<compile_context>
chip_gen: v7x
topology: tpu7x:2x2x1
jax: 0.10.0
libtpu: 0.0.40
codegen_flags: <defaults>
</compile_context>

<pallas_src>
import functools

import numpy as np
import jax
import jax.numpy as jnp
from jax.experimental import pallas as pl
from jax.experimental.pallas import tpu as pltpu

D_MODEL = 512                    # BaseCNN default d_model
ENC_CH = 960                     # 64 + 128 + 256 + 512 (resnet18 pyramid channels)
SPLITS = (64, 128, 256, 512)     # per-level channel counts in the virtual concat
VMEM_LIMIT = 32 * 1024 * 1024    # fits v7x (64 MiB physical) with headroom


# ----------------------------------------------------------------------------
# Pallas kernel 1: dense + bias + ReLU (stand-in backbone stages; each stage is
# a stride==kernel conv expressed as a patch matmul), M-tiled and pipelined.
# ----------------------------------------------------------------------------
def _dense_relu_kernel(x_ref, w_ref, b_ref, o_ref):
    y = jnp.dot(x_ref[...], w_ref[...], preferred_element_type=jnp.float32)
    y = jnp.maximum(y + b_ref[...], 0.0)       # bias + ReLU in f32 (v5e-safe VPU)
    o_ref[...] = y.astype(o_ref.dtype)


def _pick_tile_m(m, cap=1024):
    """Largest divisor of m that is a multiple of 8 and <= cap, else m."""
    for t in range(min(cap, m), 7, -1):
        if m % t == 0 and t % 8 == 0:
            return t
    return m                                    # full extent (always legal)


def dense_relu(x, w, b, *, out_dtype=jnp.bfloat16):
    m, k = x.shape
    n = w.shape[1]
    tile_m = _pick_tile_m(m)
    grid_m = m // tile_m
    return pl.pallas_call(
        _dense_relu_kernel,
        out_shape=jax.ShapeDtypeStruct((m, n), out_dtype),
        grid_spec=pltpu.PrefetchScalarGridSpec(
            num_scalar_prefetch=0,
            grid=(grid_m,),
            in_specs=[
                pl.BlockSpec((tile_m, k), lambda i: (i, 0)),
                pl.BlockSpec((k, n), lambda i: (0, 0)),
                pl.BlockSpec((1, n), lambda i: (0, 0)),
            ],
            out_specs=pl.BlockSpec((tile_m, n), lambda i: (i, 0)),
        ),
        compiler_params=pltpu.CompilerParams(
            dimension_semantics=("parallel",),
            vmem_limit_bytes=VMEM_LIMIT,
        ),
    )(x.astype(jnp.bfloat16), w.astype(jnp.bfloat16),
      b.reshape(1, -1).astype(jnp.float32))


def conv_stage(x_nhwc, w, b, stride):
    """Stride==kernel conv + ReLU, as patch-extraction (glue) + Pallas matmul."""
    n, h, wd, c = x_nhwc.shape
    s = stride
    p = x_nhwc.reshape(n, h // s, s, wd // s, s, c)
    p = p.transpose(0, 1, 3, 2, 4, 5).reshape(n * (h // s) * (wd // s), s * s * c)
    y = dense_relu(p, w, b)
    return y.reshape(n, h // s, wd // s, w.shape[1])


# ----------------------------------------------------------------------------
# Pallas kernel 2: BaseCNN head — forward_patch body after the backbone.
#
# Original:  for i in range(3): x = avg_pool2d(x, 2); pad(no-op); concat(f[i+1])
#            x = conv1x1(x); x = flatten(x, 1); x = fc(x)
#
# Rewritten using linearity of avg_pool (exact):
#   pooled_k = P_k @ f_k             (composite pool of level k straight to 7x7)
#   y        = sum_k pooled_k @ conv_w[:, block_k]^T + conv_b        # (49, 512)
#   out      = sum(y * fc_w') + fc_b        (flatten order (C,H,W) == fc_w')
# ----------------------------------------------------------------------------
def _head_kernel(f1_ref, f2_ref, f3_ref, f4_ref,
                 p1_ref, p2_ref, p3_ref,
                 cw1_ref, cw2_ref, cw3_ref, cw4_ref,
                 convb_ref, fcw_ref, fcb_ref, out_ref):
    # Composite average pooling straight to 7x7: (49, HW) @ (HW, C) -> (49, C)
    g1 = jnp.dot(p1_ref[...], f1_ref[0], preferred_element_type=jnp.float32)
    g2 = jnp.dot(p2_ref[...], f2_ref[0], preferred_element_type=jnp.float32)
    g3 = jnp.dot(p3_ref[...], f3_ref[0], preferred_element_type=jnp.float32)
    # Split-accumulate 1x1 conv over the (virtual) channel concat -> (49, 512).
    y = jnp.dot(g1.astype(jnp.bfloat16), cw1_ref[...],
                preferred_element_type=jnp.float32)
    y = y + jnp.dot(g2.astype(jnp.bfloat16), cw2_ref[...],
                    preferred_element_type=jnp.float32)
    y = y + jnp.dot(g3.astype(jnp.bfloat16), cw3_ref[...],
                    preferred_element_type=jnp.float32)
    y = y + jnp.dot(f4_ref[0], cw4_ref[...],
                    preferred_element_type=jnp.float32)
    y = y + convb_ref[...]
    # fc on torch.flatten(x, 1): flatten order (C, h, w) matches fcw laid out
    # as (hw, C) == fc_w.reshape(512, 49).T.
    val = jnp.sum(y * fcw_ref[...]) + fcb_ref[0]
    out_ref[...] = jnp.full(out_ref.shape, val, dtype=out_ref.dtype)


@functools.lru_cache(maxsize=None)
def _pool_to_7x7_T(side):
    """Host-side constant (49, side*side): P @ x_flat == avg-pool to 7x7."""
    s = side // 7
    a = np.repeat(np.eye(7, dtype=np.float32), s, axis=0)          # (side, 7)
    p = np.kron(a, a) / float(s * s)                                # (side^2, 49)
    return np.ascontiguousarray(p.T)                                # (49, side^2)


def base_cnn_head(f1, f2, f3, f4, conv_w, conv_b, fc_w, fc_b):
    n = f1.shape[0]

    def to_hw_c(f):
        b, h, w, c = f.shape
        return f.reshape(b, h * w, c).astype(jnp.bfloat16)

    f1t, f2t, f3t, f4t = map(to_hw_c, (f1, f2, f3, f4))

    p1 = jnp.asarray(_pool_to_7x7_T(56), jnp.bfloat16)   # (49, 3136)
    p2 = jnp.asarray(_pool_to_7x7_T(28), jnp.bfloat16)   # (49, 784)
    p3 = jnp.asarray(_pool_to_7x7_T(14), jnp.bfloat16)   # (49, 196)

    # Split the 1x1-conv weight along its input-channel (concat) axis.
    c0, c1, c2, _ = SPLITS
    cw = conv_w.astype(jnp.bfloat16)
    cw1 = cw[:, :c0].T                          # (64, 512)
    cw2 = cw[:, c0:c0 + c1].T                   # (128, 512)
    cw3 = cw[:, c0 + c1:c0 + c1 + c2].T         # (256, 512)
    cw4 = cw[:, c0 + c1 + c2:].T                # (512, 512)

    fcw_mat = fc_w.reshape(D_MODEL, 49).T.astype(jnp.float32)       # (49, 512)

    const = lambda i: (0, 0)

    def feat_spec(hw, c):
        return pl.BlockSpec((1, hw, c), lambda i: (i, 0, 0))

    out = pl.pallas_call(
        _head_kernel,
        out_shape=jax.ShapeDtypeStruct((n, 8, 128), jnp.float32),
        grid_spec=pltpu.PrefetchScalarGridSpec(
            num_scalar_prefetch=0,
            grid=(n,),
            in_specs=[
                feat_spec(56 * 56, 64),
                feat_spec(28 * 28, 128),
                feat_spec(14 * 14, 256),
                feat_spec(7 * 7, 512),
                pl.BlockSpec(p1.shape, const),
                pl.BlockSpec(p2.shape, const),
                pl.BlockSpec(p3.shape, const),
                pl.BlockSpec(cw1.shape, const),
                pl.BlockSpec(cw2.shape, const),
                pl.BlockSpec(cw3.shape, const),
                pl.BlockSpec(cw4.shape, const),
                pl.BlockSpec((1, D_MODEL), const),
                pl.BlockSpec((49, D_MODEL), const),
                pl.BlockSpec(memory_space=pltpu.MemorySpace.SMEM),   # fc bias scalar
            ],
            out_specs=pl.BlockSpec((1, 8, 128), lambda i: (i, 0, 0)),
        ),
        compiler_params=pltpu.CompilerParams(
            dimension_semantics=("parallel",),
            vmem_limit_bytes=VMEM_LIMIT,
        ),
    )(f1t, f2t, f3t, f4t, p1, p2, p3, cw1, cw2, cw3, cw4,
      conv_b.reshape(1, -1).astype(jnp.float32), fcw_mat,
      fc_b.astype(jnp.float32))
    return out[:, 0, :1]  # (N, 1)


# ----------------------------------------------------------------------------
# Parameters (deterministic, synthetic — shapes from BaseCNN.__init__)
# ----------------------------------------------------------------------------
def init_params(key):
    ks = jax.random.split(key, 8)

    def dense_w(k, fan_in, fan_out):
        return jax.random.normal(k, (fan_in, fan_out), jnp.float32) / jnp.sqrt(
            jnp.float32(fan_in))

    return {
        # stand-in backbone stages (stride==kernel convs)
        "w1": dense_w(ks[0], 4 * 4 * 3, 64),     "b1": jnp.zeros((64,), jnp.float32),
        "w2": dense_w(ks[1], 2 * 2 * 64, 128),   "b2": jnp.zeros((128,), jnp.float32),
        "w3": dense_w(ks[2], 2 * 2 * 128, 256),  "b3": jnp.zeros((256,), jnp.float32),
        "w4": dense_w(ks[3], 2 * 2 * 256, 512),  "b4": jnp.zeros((512,), jnp.float32),
        # nn.Conv2d(960, 512, 1)
        "conv_w": jax.random.normal(ks[4], (D_MODEL, ENC_CH), jnp.float32) * 0.02,
        "conv_b": jax.random.normal(ks[5], (D_MODEL,), jnp.float32) * 0.02,
        # nn.Linear(7*7*512, 1)
        "fc_w": jax.random.normal(ks[6], (1, 7 * 7 * D_MODEL), jnp.float32) * 0.01,
        "fc_b": jnp.zeros((1,), jnp.float32),
    }


def base_cnn_forward(params, x):
    """Training-mode forward (forward_patch). x: (N, 3, 224, 224) NCHW."""
    xh = jnp.transpose(x, (0, 2, 3, 1))                         # NCHW -> NHWC
    f1 = conv_stage(xh, params["w1"], params["b1"], 4)          # (N, 56, 56, 64)
    f2 = conv_stage(f1, params["w2"], params["b2"], 2)          # (N, 28, 28, 128)
    f3 = conv_stage(f2, params["w3"], params["b3"], 2)          # (N, 14, 14, 256)
    f4 = conv_stage(f3, params["w4"], params["b4"], 2)          # (N, 7, 7, 512)
    return base_cnn_head(f1, f2, f3, f4,
                         params["conv_w"], params["conv_b"],
                         params["fc_w"], params["fc_b"])        # (N, 1)


if __name__ == "__main__":
    key = jax.random.PRNGKey(0)
    pkey, xkey = jax.random.split(key)
    params = init_params(pkey)
    # 224x224 is what the module implies: the fc layer hard-codes 7*7*d_model.
    x = jax.random.normal(xkey, (2, 3, 224, 224), jnp.float32)

    fwd = jax.jit(base_cnn_forward)
    out = jax.block_until_ready(fwd(params, x))

    assert out.shape == (2, 1), out.shape
    assert bool(jnp.all(jnp.isfinite(out)))
    print("KERNEL_OK")
</pallas_src>

<mosaic_0001>
module attributes {stable_mosaic.version = 11 : i64} {
  func.func @_dense_relu_kernel(%arg0: i32, %arg1: memref<896x48xbf16, #tpu.memory_space<vmem>>, %arg2: memref<48x64xbf16, #tpu.memory_space<vmem>>, %arg3: memref<1x64xf32, #tpu.memory_space<vmem>>, %arg4: memref<896x64xbf16, #tpu.memory_space<vmem>>) attributes {dimension_semantics = [#tpu.dimension_semantics<parallel>], iteration_bounds = array<i64: 7>, scalar_prefetch = 0 : i64, scratch_operands = 0 : i64, tpu.core_type = #tpu.core_type<tc>, window_params = [{transform_indices = @transform_0, window_bounds = array<i64: 896, 48>}, {pipeline_mode = #tpu.pipeline_mode<synchronous>, transform_indices = @transform_1, window_bounds = array<i64: 48, 64>}, {pipeline_mode = #tpu.pipeline_mode<synchronous>, transform_indices = @transform_2, window_bounds = array<i64: 1, 64>}, {transform_indices = @transform_3, window_bounds = array<i64: 896, 64>}]} {
    %c0 = arith.constant 0 : index
    %c0_0 = arith.constant 0 : index
    %0 = vector.load %arg1[%c0, %c0_0] : memref<896x48xbf16, #tpu.memory_space<vmem>>, vector<896x48xbf16>
    %c0_1 = arith.constant 0 : index
    %c0_2 = arith.constant 0 : index
    %1 = vector.load %arg2[%c0_1, %c0_2] : memref<48x64xbf16, #tpu.memory_space<vmem>>, vector<48x64xbf16>
    %cst = arith.constant dense<0.000000e+00> : vector<896x64xf32>
    %2 = tpu.matmul %0, %1, %cst {dimension_numbers = #tpu.dot_dimension_numbers<[1], [0], [0], [1], [0, 0, 1, 1], [], []>} : vector<896x48xbf16>, vector<48x64xbf16>, vector<896x64xf32> -> vector<896x64xf32>
    %c0_3 = arith.constant 0 : index
    %c0_4 = arith.constant 0 : index
    %3 = vector.load %arg3[%c0_3, %c0_4] : memref<1x64xf32, #tpu.memory_space<vmem>>, vector<1x64xf32>
    %4 = vector.broadcast %3 : vector<1x64xf32> to vector<896x64xf32>
    %5 = arith.addf %2, %4 : vector<896x64xf32>
    %cst_5 = arith.constant 0.000000e+00 : f32
    %6 = vector.broadcast %cst_5 : f32 to vector<896x64xf32>
    %7 = arith.maximumf %5, %6 : vector<896x64xf32>
    %8 = arith.truncf %7 : vector<896x64xf32> to vector<896x64xbf16>
    %c0_6 = arith.constant 0 : index
    %c0_7 = arith.constant 0 : index
    %9 = vector.load %arg4[%c0_6, %c0_7] : memref<896x64xbf16, #tpu.memory_space<vmem>>, vector<896x64xbf16>
    tpu.vector_store %arg4[%c0_6, %c0_7], %8 {strides = array<i32>} : memref<896x64xbf16, #tpu.memory_space<vmem>>, vector<896x64xbf16>,
    return
  }
  func.func @transform_0(%arg0: i32) -> (i32, i32) {
    %c0_i32 = arith.constant 0 : i32
    %c0_i32_0 = arith.constant 0 : i32
    return %arg0, %c0_i32 : i32, i32
  }
  func.func @transform_1(%arg0: i32) -> (i32, i32) {
    %c0_i32 = arith.constant 0 : i32
    %c0_i32_0 = arith.constant 0 : i32
    %c0_i32_1 = arith.constant 0 : i32
    return %c0_i32, %c0_i32_0 : i32, i32
  }
  func.func @transform_2(%arg0: i32) -> (i32, i32) {
    %c0_i32 = arith.constant 0 : i32
    %c0_i32_0 = arith.constant 0 : i32
    %c0_i32_1 = arith.constant 0 : i32
    return %c0_i32, %c0_i32_0 : i32, i32
  }
  func.func @transform_3(%arg0: i32) -> (i32, i32) {
    %c0_i32 = arith.constant 0 : i32
    %c0_i32_0 = arith.constant 0 : i32
    return %arg0, %c0_i32 : i32, i32
  }
}

module attributes {stable_mosaic.version = 11 : i64} {
  func.func @_dense_relu_kernel(%arg0: i32, %arg1: memref<784x256xbf16, #tpu.memory_space<vmem>>, %arg2: memref<256x128xbf16, #tpu.memory_space<vmem>>, %arg3: memref<1x128xf32, #tpu.memory_space<vmem>>, %arg4: memref<784x128xbf16, #tpu.memory_space<vmem>>) attributes {dimension_semantics = [#tpu.dimension_semantics<parallel>], iteration_bounds = array<i64: 2>, scalar_prefetch = 0 : i64, scratch_operands = 0 : i64, tpu.core_type = #tpu.core_type<tc>, window_params = [{transform_indices = @transform_0, window_bounds = array<i64: 784, 256>}, {pipeline_mode = #tpu.pipeline_mode<synchronous>, transform_indices = @transform_1, window_bounds = array<i64: 256, 128>}, {pipeline_mode = #tpu.pipeline_mode<synchronous>, transform_indices = @transform_2, window_bounds = array<i64: 1, 128>}, {transform_indices = @transform_3, window_bounds = array<i64: 784, 128>}]} {
    %c0 = arith.constant 0 : index
    %c0_0 = arith.constant 0 : index
    %0 = vector.load %arg1[%c0, %c0_0] : memref<784x256xbf16, #tpu.memory_space<vmem>>, vector<784x256xbf16>
    %c0_1 = arith.constant 0 : index
    %c0_2 = arith.constant 0 : index
    %1 = vector.load %arg2[%c0_1, %c0_2] : memref<256x128xbf16, #tpu.memory_space<vmem>>, vector<256x128xbf16>
    %cst = arith.constant dense<0.000000e+00> : vector<784x128xf32>
    %2 = tpu.matmul %0, %1, %cst {dimension_numbers = #tpu.dot_dimension_numbers<[1], [0], [0], [1], [0, 0, 1, 1], [], []>} : vector<784x256xbf16>, vector<256x128xbf16>, vector<784x128xf32> -> vector<784x128xf32>
    %c0_3 = arith.constant 0 : index
    %c0_4 = arith.constant 0 : index
    %3 = vector.load %arg3[%c0_3, %c0_4] : memref<1x128xf32, #tpu.memory_space<vmem>>, vector<1x128xf32>
    %4 = vector.broadcast %3 : vector<1x128xf32> to vector<784x128xf32>
    %5 = arith.addf %2, %4 : vector<784x128xf32>
    %cst_5 = arith.constant 0.000000e+00 : f32
    %6 = vector.broadcast %cst_5 : f32 to vector<784x128xf32>
    %7 = arith.maximumf %5, %6 : vector<784x128xf32>
    %8 = arith.truncf %7 : vector<784x128xf32> to vector<784x128xbf16>
    %c0_6 = arith.constant 0 : index
    %c0_7 = arith.constant 0 : index
    %9 = vector.load %arg4[%c0_6, %c0_7] : memref<784x128xbf16, #tpu.memory_space<vmem>>, vector<784x128xbf16>
    tpu.vector_store %arg4[%c0_6, %c0_7], %8 {strides = array<i32>} : memref<784x128xbf16, #tpu.memory_space<vmem>>, vector<784x128xbf16>,
    return
  }
  func.func @transform_0(%arg0: i32) -> (i32, i32) {
    %c0_i32 = arith.constant 0 : i32
    %c0_i32_0 = arith.constant 0 : i32
    return %arg0, %c0_i32 : i32, i32
  }
  func.func @transform_1(%arg0: i32) -> (i32, i32) {
    %c0_i32 = arith.constant 0 : i32
    %c0_i32_0 = arith.constant 0 : i32
    %c0_i32_1 = arith.constant 0 : i32
    return %c0_i32, %c0_i32_0 : i32, i32
  }
  func.func @transform_2(%arg0: i32) -> (i32, i32) {
    %c0_i32 = arith.constant 0 : i32
    %c0_i32_0 = arith.constant 0 : i32
    %c0_i32_1 = arith.constant 0 : i32
    return %c0_i32, %c0_i32_0 : i32, i32
  }
  func.func @transform_3(%arg0: i32) -> (i32, i32) {
    %c0_i32 = arith.constant 0 : i32
    %c0_i32_0 = arith.constant 0 : i32
    return %arg0, %c0_i32 : i32, i32
  }
}

module attributes {stable_mosaic.version = 11 : i64} {
  func.func @_dense_relu_kernel(%arg0: i32, %arg1: memref<392x512xbf16, #tpu.memory_space<vmem>>, %arg2: memref<512x256xbf16, #tpu.memory_space<vmem>>, %arg3: memref<1x256xf32, #tpu.memory_space<vmem>>, %arg4: memref<392x256xbf16, #tpu.memory_space<vmem>>) attributes {dimension_semantics = [#tpu.dimension_semantics<parallel>], iteration_bounds = array<i64: 1>, scalar_prefetch = 0 : i64, scratch_operands = 0 : i64, tpu.core_type = #tpu.core_type<tc>, window_params = [{transform_indices = @transform_0, window_bounds = array<i64: 392, 512>}, {pipeline_mode = #tpu.pipeline_mode<synchronous>, transform_indices = @transform_1, window_bounds = array<i64: 512, 256>}, {pipeline_mode = #tpu.pipeline_mode<synchronous>, transform_indices = @transform_2, window_bounds = array<i64: 1, 256>}, {transform_indices = @transform_3, window_bounds = array<i64: 392, 256>}]} {
    %c0 = arith.constant 0 : index
    %c0_0 = arith.constant 0 : index
    %0 = vector.load %arg1[%c0, %c0_0] : memref<392x512xbf16, #tpu.memory_space<vmem>>, vector<392x512xbf16>
    %c0_1 = arith.constant 0 : index
    %c0_2 = arith.constant 0 : index
    %1 = vector.load %arg2[%c0_1, %c0_2] : memref<512x256xbf16, #tpu.memory_space<vmem>>, vector<512x256xbf16>
    %cst = arith.constant dense<0.000000e+00> : vector<392x256xf32>
    %2 = tpu.matmul %0, %1, %cst {dimension_numbers = #tpu.dot_dimension_numbers<[1], [0], [0], [1], [0, 0, 1, 1], [], []>} : vector<392x512xbf16>, vector<512x256xbf16>, vector<392x256xf32> -> vector<392x256xf32>
    %c0_3 = arith.constant 0 : index
    %c0_4 = arith.constant 0 : index
    %3 = vector.load %arg3[%c0_3, %c0_4] : memref<1x256xf32, #tpu.memory_space<vmem>>, vector<1x256xf32>
    %4 = vector.broadcast %3 : vector<1x256xf32> to vector<392x256xf32>
    %5 = arith.addf %2, %4 : vector<392x256xf32>
    %cst_5 = arith.constant 0.000000e+00 : f32
    %6 = vector.broadcast %cst_5 : f32 to vector<392x256xf32>
    %7 = arith.maximumf %5, %6 : vector<392x256xf32>
    %8 = arith.truncf %7 : vector<392x256xf32> to vector<392x256xbf16>
    %c0_6 = arith.constant 0 : index
    %c0_7 = arith.constant 0 : index
    %9 = vector.load %arg4[%c0_6, %c0_7] : memref<392x256xbf16, #tpu.memory_space<vmem>>, vector<392x256xbf16>
    tpu.vector_store %arg4[%c0_6, %c0_7], %8 {strides = array<i32>} : memref<392x256xbf16, #tpu.memory_space<vmem>>, vector<392x256xbf16>,
    return
  }
  func.func @transform_0(%arg0: i32) -> (i32, i32) {
    %c0_i32 = arith.constant 0 : i32
    %c0_i32_0 = arith.constant 0 : i32
    return %arg0, %c0_i32 : i32, i32
  }
  func.func @transform_1(%arg0: i32) -> (i32, i32) {
    %c0_i32 = arith.constant 0 : i32
    %c0_i32_0 = arith.constant 0 : i32
    %c0_i32_1 = arith.constant 0 : i32
    return %c0_i32, %c0_i32_0 : i32, i32
  }
  func.func @transform_2(%arg0: i32) -> (i32, i32) {
    %c0_i32 = arith.constant 0 : i32
    %c0_i32_0 = arith.constant 0 : i32
    %c0_i32_1 = arith.constant 0 : i32
    return %c0_i32, %c0_i32_0 : i32, i32
  }
  func.func @transform_3(%arg0: i32) -> (i32, i32) {
    %c0_i32 = arith.constant 0 : i32
    %c0_i32_0 = arith.constant 0 : i32
    return %arg0, %c0_i32 : i32, i32
  }
}

module attributes {stable_mosaic.version = 11 : i64} {
  func.func @_dense_relu_kernel(%arg0: i32, %arg1: memref<98x1024xbf16, #tpu.memory_space<vmem>>, %arg2: memref<1024x512xbf16, #tpu.memory_space<vmem>>, %arg3: memref<1x512xf32, #tpu.memory_space<vmem>>, %arg4: memref<98x512xbf16, #tpu.memory_space<vmem>>) attributes {dimension_semantics = [#tpu.dimension_semantics<parallel>], iteration_bounds = array<i64: 1>, scalar_prefetch = 0 : i64, scratch_operands = 0 : i64, tpu.core_type = #tpu.core_type<tc>, window_params = [{transform_indices = @transform_0, window_bounds = array<i64: 98, 1024>}, {pipeline_mode = #tpu.pipeline_mode<synchronous>, transform_indices = @transform_1, window_bounds = array<i64: 1024, 512>}, {pipeline_mode = #tpu.pipeline_mode<synchronous>, transform_indices = @transform_2, window_bounds = array<i64: 1, 512>}, {transform_indices = @transform_3, window_bounds = array<i64: 98, 512>}]} {
    %c0 = arith.constant 0 : index
    %c0_0 = arith.constant 0 : index
    %0 = vector.load %arg1[%c0, %c0_0] : memref<98x1024xbf16, #tpu.memory_space<vmem>>, vector<98x1024xbf16>
    %c0_1 = arith.constant 0 : index
    %c0_2 = arith.constant 0 : index
    %1 = vector.load %arg2[%c0_1, %c0_2] : memref<1024x512xbf16, #tpu.memory_space<vmem>>, vector<1024x512xbf16>
    %cst = arith.constant dense<0.000000e+00> : vector<98x512xf32>
    %2 = tpu.matmul %0, %1, %cst {dimension_numbers = #tpu.dot_dimension_numbers<[1], [0], [0], [1], [0, 0, 1, 1], [], []>} : vector<98x1024xbf16>, vector<1024x512xbf16>, vector<98x512xf32> -> vector<98x512xf32>
    %c0_3 = arith.constant 0 : index
    %c0_4 = arith.constant 0 : index
    %3 = vector.load %arg3[%c0_3, %c0_4] : memref<1x512xf32, #tpu.memory_space<vmem>>, vector<1x512xf32>
    %4 = vector.broadcast %3 : vector<1x512xf32> to vector<98x512xf32>
    %5 = arith.addf %2, %4 : vector<98x512xf32>
    %cst_5 = arith.constant 0.000000e+00 : f32
    %6 = vector.broadcast %cst_5 : f32 to vector<98x512xf32>
    %7 = arith.maximumf %5, %6 : vector<98x512xf32>
    %8 = arith.truncf %7 : vector<98x512xf32> to vector<98x512xbf16>
    %c0_6 = arith.constant 0 : index
    %c0_7 = arith.constant 0 : index
    %9 = vector.load %arg4[%c0_6, %c0_7] : memref<98x512xbf16, #tpu.memory_space<vmem>>, vector<98x512xbf16>
    tpu.vector_store %arg4[%c0_6, %c0_7], %8 {strides = array<i32>} : memref<98x512xbf16, #tpu.memory_space<vmem>>, vector<98x512xbf16>,
    return
  }
  func.func @transform_0(%arg0: i32) -> (i32, i32) {
    %c0_i32 = arith.constant 0 : i32
    %c0_i32_0 = arith.constant 0 : i32
    return %arg0, %c0_i32 : i32, i32
  }
  func.func @transform_1(%arg0: i32) -> (i32, i32) {
    %c0_i32 = arith.constant 0 : i32
    %c0_i32_0 = arith.constant 0 : i32
    %c0_i32_1 = arith.constant 0 : i32
    return %c0_i32, %c0_i32_0 : i32, i32
  }
  func.func @transform_2(%arg0: i32) -> (i32, i32) {
    %c0_i32 = arith.constant 0 : i32
    %c0_i32_0 = arith.constant 0 : i32
    %c0_i32_1 = arith.constant 0 : i32
    return %c0_i32, %c0_i32_0 : i32, i32
  }
  func.func @transform_3(%arg0: i32) -> (i32, i32) {
    %c0_i32 = arith.constant 0 : i32
    %c0_i32_0 = arith.constant 0 : i32
    return %arg0, %c0_i32 : i32, i32
  }
}

module attributes {stable_mosaic.version = 11 : i64} {
  func.func @_head_kernel(%arg0: i32, %arg1: memref<1x3136x64xbf16, #tpu.memory_space<vmem>>, %arg2: memref<1x784x128xbf16, #tpu.memory_space<vmem>>, %arg3: memref<1x196x256xbf16, #tpu.memory_space<vmem>>, %arg4: memref<1x49x512xbf16, #tpu.memory_space<vmem>>, %arg5: memref<49x3136xbf16, #tpu.memory_space<vmem>>, %arg6: memref<49x784xbf16, #tpu.memory_space<vmem>>, %arg7: memref<49x196xbf16, #tpu.memory_space<vmem>>, %arg8: memref<64x512xbf16, #tpu.memory_space<vmem>>, %arg9: memref<128x512xbf16, #tpu.memory_space<vmem>>, %arg10: memref<256x512xbf16, #tpu.memory_space<vmem>>, %arg11: memref<512x512xbf16, #tpu.memory_space<vmem>>, %arg12: memref<1x512xf32, #tpu.memory_space<vmem>>, %arg13: memref<49x512xf32, #tpu.memory_space<vmem>>, %arg14: memref<1xf32, #tpu.memory_space<smem>>, %arg15: memref<1x8x128xf32, #tpu.memory_space<vmem>>) attributes {dimension_semantics = [#tpu.dimension_semantics<parallel>], iteration_bounds = array<i64: 2>, scalar_prefetch = 0 : i64, scratch_operands = 0 : i64, tpu.core_type = #tpu.core_type<tc>, window_params = [{transform_indices = @transform_0, window_bounds = array<i64: 1, 3136, 64>}, {transform_indices = @transform_1, window_bounds = array<i64: 1, 784, 128>}, {transform_indices = @transform_2, window_bounds = array<i64: 1, 196, 256>}, {transform_indices = @transform_3, window_bounds = array<i64: 1, 49, 512>}, {pipeline_mode = #tpu.pipeline_mode<synchronous>, transform_indices = @transform_4, window_bounds = array<i64: 49, 3136>}, {pipeline_mode = #tpu.pipeline_mode<synchronous>, transform_indices = @transform_5, window_bounds = array<i64: 49, 784>}, {pipeline_mode = #tpu.pipeline_mode<synchronous>, transform_indices = @transform_6, window_bounds = array<i64: 49, 196>}, {pipeline_mode = #tpu.pipeline_mode<synchronous>, transform_indices = @transform_7, window_bounds = array<i64: 64, 512>}, {pipeline_mode = #tpu.pipeline_mode<synchronous>, transform_indices = @transform_8, window_bounds = array<i64: 128, 512>}, {pipeline_mode = #tpu.pipeline_mode<synchronous>, transform_indices = @transform_9, window_bounds = array<i64: 256, 512>}, {pipeline_mode = #tpu.pipeline_mode<synchronous>, transform_indices = @transform_10, window_bounds = array<i64: 512, 512>}, {pipeline_mode = #tpu.pipeline_mode<synchronous>, transform_indices = @transform_11, window_bounds = array<i64: 1, 512>}, {pipeline_mode = #tpu.pipeline_mode<synchronous>, transform_indices = @transform_12, window_bounds = array<i64: 49, 512>}, {transform_indices = @transform_13, window_bounds = array<i64: 1>}, {transform_indices = @transform_14, window_bounds = array<i64: 1, 8, 128>}]} {
    %c0 = arith.constant 0 : index
    %c0_0 = arith.constant 0 : index
    %0 = vector.load %arg5[%c0, %c0_0] : memref<49x3136xbf16, #tpu.memory_space<vmem>>, vector<49x3136xbf16>
    %c0_1 = arith.constant 0 : index
    %c0_2 = arith.constant 0 : index
    %c0_3 = arith.constant 0 : index
    %1 = vector.load %arg1[%c0_1, %c0_2, %c0_3] : memref<1x3136x64xbf16, #tpu.memory_space<vmem>>, vector<1x3136x64xbf16>
    %2 = vector.shape_cast %1 : vector<1x3136x64xbf16> to vector<3136x64xbf16>
    %cst = arith.constant dense<0.000000e+00> : vector<49x64xf32>
    %3 = tpu.matmul %0, %2, %cst {dimension_numbers = #tpu.dot_dimension_numbers<[1], [0], [0], [1], [0, 0, 1, 1], [], []>} : vector<49x3136xbf16>, vector<3136x64xbf16>, vector<49x64xf32> -> vector<49x64xf32>
    %c0_4 = arith.constant 0 : index
    %c0_5 = arith.constant 0 : index
    %4 = vector.load %arg6[%c0_4, %c0_5] : memref<49x784xbf16, #tpu.memory_space<vmem>>, vector<49x784xbf16>
    %c0_6 = arith.constant 0 : index
    %c0_7 = arith.constant 0 : index
    %c0_8 = arith.constant 0 : index
    %5 = vector.load %arg2[%c0_6, %c0_7, %c0_8] : memref<1x784x128xbf16, #tpu.memory_space<vmem>>, vector<1x784x128xbf16>
    %6 = vector.shape_cast %5 : vector<1x784x128xbf16> to vector<784x128xbf16>
    %cst_9 = arith.constant dense<0.000000e+00> : vector<49x128xf32>
    %7 = tpu.matmul %4, %6, %cst_9 {dimension_numbers = #tpu.dot_dimension_numbers<[1], [0], [0], [1], [0, 0, 1, 1], [], []>} : vector<49x784xbf16>, vector<784x128xbf16>, vector<49x128xf32> -> vector<49x128xf32>
    %c0_10 = arith.constant 0 : index
    %c0_11 = arith.constant 0 : index
    %8 = vector.load %arg7[%c0_10, %c0_11] : memref<49x196xbf16, #tpu.memory_space<vmem>>, vector<49x196xbf16>
    %c0_12 = arith.constant 0 : index
    %c0_13 = arith.constant 0 : index
    %c0_14 = arith.constant 0 : index
    %9 = vector.load %arg3[%c0_12, %c0_13, %c0_14] : memref<1x196x256xbf16, #tpu.memory_space<vmem>>, vector<1x196x256xbf16>
    %10 = vector.shape_cast %9 : vector<1x196x256xbf16> to vector<196x256xbf16>
    %cst_15 = arith.constant dense<0.000000e+00> : vector<49x256xf32>
    %11 = tpu.matmul %8, %10, %cst_15 {dimension_numbers = #tpu.dot_dimension_numbers<[1], [0], [0], [1], [0, 0, 1, 1], [], []>} : vector<49x196xbf16>, vector<196x256xbf16>, vector<49x256xf32> -> vector<49x256xf32>
    %12 = arith.truncf %3 : vector<49x64xf32> to vector<49x64xbf16>
    %c0_16 = arith.constant 0 : index
    %c0_17 = arith.constant 0 : index
    %13 = vector.load %arg8[%c0_16, %c0_17] : memref<64x512xbf16, #tpu.memory_space<vmem>>, vector<64x512xbf16>
    %cst_18 = arith.constant dense<0.000000e+00> : vector<49x512xf32>
    %14 = tpu.matmul %12, %13, %cst_18 {dimension_numbers = #tpu.dot_dimension_numbers<[1], [0], [0], [1], [0, 0, 1, 1], [], []>} : vector<49x64xbf16>, vector<64x512xbf16>, vector<49x512xf32> -> vector<49x512xf32>
    %15 = arith.truncf %7 : vector<49x128xf32> to vector<49x128xbf16>
    %c0_19 = arith.constant 0 : index
    %c0_20 = arith.constant 0 : index
    %16 = vector.load %arg9[%c0_19, %c0_20] : memref<128x512xbf16, #tpu.memory_space<vmem>>, vector<128x512xbf16>
    %cst_21 = arith.constant dense<0.000000e+00> : vector<49x512xf32>
    %17 = tpu.matmul %15, %16, %cst_21 {dimension_numbers = #tpu.dot_dimension_numbers<[1], [0], [0], [1], [0, 0, 1, 1], [], []>} : vector<49x128xbf16>, vector<128x512xbf16>, vector<49x512xf32> -> vector<49x512xf32>
    %18 = arith.addf %14, %17 : vector<49x512xf32>
    %19 = arith.truncf %11 : vector<49x256xf32> to vector<49x256xbf16>
    %c0_22 = arith.constant 0 : index
    %c0_23 = arith.constant 0 : index
    %20 = vector.load %arg10[%c0_22, %c0_23] : memref<256x512xbf16, #tpu.memory_space<vmem>>, vector<256x512xbf16>
    %cst_24 = arith.constant dense<0.000000e+00> : vector<49x512xf32>
    %21 = tpu.matmul %19, %20, %cst_24 {dimension_numbers = #tpu.dot_dimension_numbers<[1], [0], [0], [1], [0, 0, 1, 1], [], []>} : vector<49x256xbf16>, vector<256x512xbf16>, vector<49x512xf32> -> vector<49x512xf32>
    %22 = arith.addf %18, %21 : vector<49x512xf32>
    %c0_25 = arith.constant 0 : index
    %c0_26 = arith.constant 0 : index
    %c0_27 = arith.constant 0 : index
    %23 = vector.load %arg4[%c0_25, %c0_26, %c0_27] : memref<1x49x512xbf16, #tpu.memory_space<vmem>>, vector<1x49x512xbf16>
    %24 = vector.shape_cast %23 : vector<1x49x512xbf16> to vector<49x512xbf16>
    %c0_28 = arith.constant 0 : index
    %c0_29 = arith.constant 0 : index
    %25 = vector.load %arg11[%c0_28, %c0_29] : memref<512x512xbf16, #tpu.memory_space<vmem>>, vector<512x512xbf16>
    %cst_30 = arith.constant dense<0.000000e+00> : vector<49x512xf32>
    %26 = tpu.matmul %24, %25, %cst_30 {dimension_numbers = #tpu.dot_dimension_numbers<[1], [0], [0], [1], [0, 0, 1, 1], [], []>} : vector<49x512xbf16>, vector<512x512xbf16>, vector<49x512xf32> -> vector<49x512xf32>
    %27 = arith.addf %22, %26 : vector<49x512xf32>
    %c0_31 = arith.constant 0 : index
    %c0_32 = arith.constant 0 : index
    %28 = vector.load %arg12[%c0_31, %c0_32] : memref<1x512xf32, #tpu.memory_space<vmem>>, vector<1x512xf32>
    %29 = vector.broadcast %28 : vector<1x512xf32> to vector<49x512xf32>
    %30 = arith.addf %27, %29 : vector<49x512xf32>
    %c0_33 = arith.constant 0 : index
    %c0_34 = arith.constant 0 : index
    %31 = vector.load %arg13[%c0_33, %c0_34] : memref<49x512xf32, #tpu.memory_space<vmem>>, vector<49x512xf32>
    %32 = arith.mulf %30, %31 : vector<49x512xf32>
    %33 = vector.shape_cast %32 : vector<49x512xf32> to vector<1x49x512xf32>
    %cst_35 = arith.constant dense<0.000000e+00> : vector<1xf32>
    %34 = vector.multi_reduction <add>, %33, %cst_35 [1, 2] : vector<1x49x512xf32> to vector<1xf32>
    %35 = vector.shape_cast %34 : vector<1xf32> to vector<1x1x1xf32>
    %36 = vector.extract %35[0, 0, 0] : f32 from vector<1x1x1xf32>
    %c0_36 = arith.constant 0 : index
    %37 = memref.load %arg14[%c0_36] : memref<1xf32, #tpu.memory_space<smem>>
    %38 = arith.addf %36, %37 : f32
    %39 = vector.broadcast %38 : f32 to vector<1x8x128xf32>
    %c0_37 = arith.constant 0 : index
    %c0_38 = arith.constant 0 : index
    %c0_39 = arith.constant 0 : index
    %40 = vector.load %arg15[%c0_37, %c0_38, %c0_39] : memref<1x8x128xf32, #tpu.memory_space<vmem>>, vector<1x8x128xf32>
    tpu.vector_store %arg15[%c0_37, %c0_38, %c0_39], %39 {strides = array<i32>} : memref<1x8x128xf32, #tpu.memory_space<vmem>>, vector<1x8x128xf32>,
    return
  }
  func.func @transform_0(%arg0: i32) -> (i32, i32, i32) {
    %c0_i32 = arith.constant 0 : i32
    %c0_i32_0 = arith.constant 0 : i32
    %c0_i32_1 = arith.constant 0 : i32
    return %arg0, %c0_i32, %c0_i32_0 : i32, i32, i32
  }
  func.func @transform_1(%arg0: i32) -> (i32, i32, i32) {
    %c0_i32 = arith.constant 0 : i32
    %c0_i32_0 = arith.constant 0 : i32
    %c0_i32_1 = arith.constant 0 : i32
    return %arg0, %c0_i32, %c0_i32_0 : i32, i32, i32
  }
  func.func @transform_2(%arg0: i32) -> (i32, i32, i32) {
    %c0_i32 = arith.constant 0 : i32
    %c0_i32_0 = arith.constant 0 : i32
    %c0_i32_1 = arith.constant 0 : i32
    return %arg0, %c0_i32, %c0_i32_0 : i32, i32, i32
  }
  func.func @transform_3(%arg0: i32) -> (i32, i32, i32) {
    %c0_i32 = arith.constant 0 : i32
    %c0_i32_0 = arith.constant 0 : i32
    %c0_i32_1 = arith.constant 0 : i32
    return %arg0, %c0_i32, %c0_i32_0 : i32, i32, i32
  }
  func.func @transform_4(%arg0: i32) -> (i32, i32) {
    %c0_i32 = arith.constant 0 : i32
    %c0_i32_0 = arith.constant 0 : i32
    %c0_i32_1 = arith.constant 0 : i32
    return %c0_i32, %c0_i32_0 : i32, i32
  }
  func.func @transform_5(%arg0: i32) -> (i32, i32) {
    %c0_i32 = arith.constant 0 : i32
    %c0_i32_0 = arith.constant 0 : i32
    %c0_i32_1 = arith.constant 0 : i32
    return %c0_i32, %c0_i32_0 : i32, i32
  }
  func.func @transform_6(%arg0: i32) -> (i32, i32) {
    %c0_i32 = arith.constant 0 : i32
    %c0_i32_0 = arith.constant 0 : i32
    %c0_i32_1 = arith.constant 0 : i32
    return %c0_i32, %c0_i32_0 : i32, i32
  }
  func.func @transform_7(%arg0: i32) -> (i32, i32) {
    %c0_i32 = arith.constant 0 : i32
    %c0_i32_0 = arith.constant 0 : i32
    %c0_i32_1 = arith.constant 0 : i32
    return %c0_i32, %c0_i32_0 : i32, i32
  }
  func.func @transform_8(%arg0: i32) -> (i32, i32) {
    %c0_i32 = arith.constant 0 : i32
    %c0_i32_0 = arith.constant 0 : i32
    %c0_i32_1 = arith.constant 0 : i32
    return %c0_i32, %c0_i32_0 : i32, i32
  }
  func.func @transform_9(%arg0: i32) -> (i32, i32) {
    %c0_i32 = arith.constant 0 : i32
    %c0_i32_0 = arith.constant 0 : i32
    %c0_i32_1 = arith.constant 0 : i32
    return %c0_i32, %c0_i32_0 : i32, i32
  }
  func.func @transform_10(%arg0: i32) -> (i32, i32) {
    %c0_i32 = arith.constant 0 : i32
    %c0_i32_0 = arith.constant 0 : i32
    %c0_i32_1 = arith.constant 0 : i32
    return %c0_i32, %c0_i32_0 : i32, i32
  }
  func.func @transform_11(%arg0: i32) -> (i32, i32) {
    %c0_i32 = arith.constant 0 : i32
    %c0_i32_0 = arith.constant 0 : i32
    %c0_i32_1 = arith.constant 0 : i32
    return %c0_i32, %c0_i32_0 : i32, i32
  }
  func.func @transform_12(%arg0: i32) -> (i32, i32) {
    %c0_i32 = arith.constant 0 : i32
    %c0_i32_0 = arith.constant 0 : i32
    %c0_i32_1 = arith.constant 0 : i32
    return %c0_i32, %c0_i32_0 : i32, i32
  }
  func.func @transform_13(%arg0: i32) -> i32 {
    %c0_i32 = arith.constant 0 : i32
    %c0_i32_0 = arith.constant 0 : i32
    return %c0_i32 : i32
  }
  func.func @transform_14(%arg0: i32) -> (i32, i32, i32) {
    %c0_i32 = arith.constant 0 : i32
    %c0_i32_0 = arith.constant 0 : i32
    %c0_i32_1 = arith.constant 0 : i32
    return %arg0, %c0_i32, %c0_i32_0 : i32, i32, i32
  }
}

</mosaic_0001>

<bundles_post_ra>
// kernel: base_cnn_forward.5
= control target key start
LH: loop header
LB: loop body
LE: loop exit
PB: predicated region body
PF: predicated region fallthrough
CT: control target
= control target key end

     0   :  { %s2605_s12 = smov 0   ;;  %s3090_s0 = inlined_call_operand.vmem [shape: bf16[6272,48], index: 0, kind: input, shape index: {}]   ;;  %s3091_s1 = inlined_call_operand.vmem [shape: bf16[48,64], index: 1, kind: input, shape index: {}]   ;;  %s3092_s2 = inlined_call_operand.vmem [shape: f32[1,64], index: 2, kind: input, shape index: {}]   ;;  %s3093_s3 = inlined_call_operand.vmem [shape: bf16[6272,64], index: 3, kind: output, shape index: {}]  }
   0x1 LB: > { %s1977_s13 = sadd.s32 4294967295, %s2583_s12   ;;  %p1981_p0 = scmp.ge.s32.totalorder %s2583_s12, 1  ;;  %s2583_s12 = sphi %s2605_s12, %s13_s12  }
   0x2   : > { %p138_p1 = scmp.lt.s32.totalorder %s2583_s12, 8 }
   0x4   : > { %p139_p2 = pnand %p1981_p0, %p138_p1 }
   0x5   : > { %v2517_v0 = vld [vmem:[%s3091_s1] sm:$0xff] (!%p139_p2)   ;;  %s162_s16 = smul.u32 (!%p139_p2), 112, %s1977_s13  ;;  %v2518_v1 = vld [vmem:[%s3091_s1 + $0x8] sm:$0xff] (!%p139_p2)   ;;  %v2519_v2 = vld [vmem:[%s3091_s1 + $0x10] sm:$0xff] (!%p139_p2)   ;;  %vm598_vm0 = vcmask (!%p139_p2), 392192   ;;  %vm1808_vm1 = vcmask (!%p139_p2), 519168  }
   0x6   : > { %142 = sbr.rel (%p139_p2) target bundleno = 345 (0x159), region = 32  ;;  %2385 = vmatprep.subr.bf16.mxu0 (!%p139_p2), %v2517_v0  ;;  %2503 = vmatprep.subr.bf16.mxu1 (!%p139_p2), %v2517_v0  ;;  %v2747_v59 = vld [vmem:[%s3092_s2] ss:$0 sm:$0xff] (!%p139_p2) }
   0x7   : > { %p163_p3 = scmp.lt.s32.totalorder (!%p139_p2), %s162_s16, 783  ;;  %2386 = vmatpush3.bf16.msra.mxu0 (!%p139_p2), %v2517_v0  ;;  %2506 = vmatpush3.bf16.msra.mxu1 (!%p139_p2), %v2517_v0 }
   0x8   : > { %2387 = vmatprep.subr.bf16.mxu0 (!%p139_p2), %v2518_v1  ;;  %2504 = vmatprep.subr.bf16.mxu1 (!%p139_p2), %v2518_v1 }
   0xb   : > { %2388 = vmatpush3.bf16.msra.mxu0 (!%p139_p2), %v2518_v1  ;;  %2507 = vmatpush3.bf16.msra.mxu1 (!%p139_p2), %v2518_v1 }
   0xc   : > { %2389 = vmatprep.subr.bf16.mxu0 (!%p139_p2), %v2519_v2  ;;  %2505 = vmatprep.subr.bf16.mxu1 (!%p139_p2), %v2519_v2 }
   0xd   : > { %s3095_s16 = smov (!%p163_p3, %s162_s16), 783 }
   0xe   : > { %s1982_s21 = sshll.u32 %s3095_s16, 2 }
   0xf   : > { %s2630_s24 = scalar_lea.vmem %s3090_s0, %s1982_s21  ;;  %2390 = vmatpush3.bf16.msra.mxu0 %v2519_v2  ;;  %2508 = vmatpush3.bf16.msra.mxu1 %v2519_v2  ;;  %s2760_s29 = scalar_lea.vmem %s3093_s3, %s1982_s21 }
  0x10   : > { %v2520_v3 = vld [vmem:[%s2630_s24] sm:$0xff]   ;;  %v2522_v5 = vld [vmem:[%s2630_s24 + $0x8] sm:$0xff]   ;;  %v2524_v7 = vld [vmem:[%s2630_s24 + $0x10] sm:$0xff]  }
  0x11   : > { %v2521_v4 = vld [vmem:[%s2630_s24 + $0xe0] sm:$0xff]   ;;  %2391 = vmatprep.mubr.msk.bf16.mxu0 %vm598_vm0, %v2520_v3  ;;  %v2523_v6 = vld [vmem:[%s2630_s24 + $0xe8] sm:$0xff]   ;;  %v2525_v8 = vld [vmem:[%s2630_s24 + $0xf0] sm:$0xff]  }
  0x12   : > { %2447 = vmatprep.mubr.msk.bf16.mxu1 %vm598_vm0, %v2521_v4  ;;  %2392 = vmatmul.mubr.msk.bf16.vlgmr.msra.gmra.mrb[0].mxu0 %vm598_vm0, %v2522_v5  ;;  %v2526_v9 = vld [vmem:[%s2630_s24 + $0x18] sm:$0xff]   ;;  %v2528_v11 = vld [vmem:[%s2630_s24 + $0x20] sm:$0xff]   ;;  %v2530_v13 = vld [vmem:[%s2630_s24 + $0x28] sm:$0xff]  }
  0x13   : > { %2448 = vmatmul.mubr.msk.bf16.vlgmr.msra.gmra.mrb[0].mxu1 %vm598_vm0, %v2523_v6  ;;  %2395 = vmatprep.mubr.msk.bf16.mxu0 %vm598_vm0, %v2524_v7  ;;  %v2527_v10 = vld [vmem:[%s2630_s24 + $0xf8] sm:$0xff]   ;;  %v2529_v12 = vld [vmem:[%s2630_s24 + $0x100] sm:$0xff]   ;;  %v2531_v14 = vld [vmem:[%s2630_s24 + $0x108] sm:$0xff]  }
  0x14   : > { %2451 = vmatprep.mubr.msk.bf16.mxu1 %vm598_vm0, %v2525_v8  ;;  %v2532_v15 = vld [vmem:[%s2630_s24 + $0x30] sm:$0xff]   ;;  %v2534_v17 = vld [vmem:[%s2630_s24 + $0x38] sm:$0xff]   ;;  %v2536_v19 = vld [vmem:[%s2630_s24 + $0x40] sm:$0xff]  }
  0x15   : > { %v2533_v16 = vld [vmem:[%s2630_s24 + $0x110] sm:$0xff]   ;;  %v2535_v18 = vld [vmem:[%s2630_s24 + $0x118] sm:$0xff]   ;;  %v2537_v20 = vld [vmem:[%s2630_s24 + $0x120] sm:$0xff]  }
  0x16   : > { %v2538_v21 = vld [vmem:[%s2630_s24 + $0x48] sm:$0xff]   ;;  %v2540_v23 = vld [vmem:[%s2630_s24 + $0x50] sm:$0xff]   ;;  %v2542_v25 = vld [vmem:[%s2630_s24 + $0x58] sm:$0xff]  }
  0x17   : > { %v2539_v22 = vld [vmem:[%s2630_s24 + $0x128] sm:$0xff]   ;;  %v2541_v24 = vld [vmem:[%s2630_s24 + $0x130] sm:$0xff]   ;;  %v2543_v26 = vld [vmem:[%s2630_s24 + $0x138] sm:$0xff]  }
  0x18   : > { %v2544_v27 = vld [vmem:[%s2630_s24 + $0x60] sm:$0xff]   ;;  %v2546_v29 = vld [vmem:[%s2630_s24 + $0x68] sm:$0xff]   ;;  %v2548_v31 = vld [vmem:[%s2630_s24 + $0x70] sm:$0xff]  }
  0x19   : > { %v2545_v28 = vld [vmem:[%s2630_s24 + $0x140] sm:$0xff]   ;;  %v2547_v30 = vld [vmem:[%s2630_s24 + $0x148] sm:$0xff]   ;;  %v2549_v32 = vld [vmem:[%s2630_s24 + $0x150] sm:$0xff]  }
  0x1a   : > { %2396 = vmatmul.mubr.msk.bf16.gmra.mrb[4].mxu0 %vm598_vm0, %v2526_v9  ;;  %v2550_v33 = vld [vmem:[%s2630_s24 + $0x78] sm:$0xff]   ;;  %v2552_v35 = vld [vmem:[%s2630_s24 + $0x80] sm:$0xff]   ;;  %v2554_v37 = vld [vmem:[%s2630_s24 + $0x88] sm:$0xff]  }
  0x1b   : > { %2452 = vmatmul.mubr.msk.bf16.gmra.mrb[4].mxu1 %vm598_vm0, %v2527_v10  ;;  %2399 = vmatprep.mubr.msk.bf16.mxu0 %vm598_vm0, %v2528_v11  ;;  %v2551_v34 = vld [vmem:[%s2630_s24 + $0x158] sm:$0xff]   ;;  %v2553_v36 = vld [vmem:[%s2630_s24 + $0x160] sm:$0xff]   ;;  %v2555_v38 = vld [vmem:[%s2630_s24 + $0x168] sm:$0xff]  }
  0x1c   : > { %2455 = vmatprep.mubr.msk.bf16.mxu1 %vm598_vm0, %v2529_v12  ;;  %v2556_v39 = vld [vmem:[%s2630_s24 + $0x90] sm:$0xff]   ;;  %v2558_v41 = vld [vmem:[%s2630_s24 + $0x98] sm:$0xff]   ;;  %v2560_v43 = vld [vmem:[%s2630_s24 + $0xa0] sm:$0xff]  }
  0x1d   : > { %v2557_v40 = vld [vmem:[%s2630_s24 + $0x170] sm:$0xff]   ;;  %v2559_v42 = vld [vmem:[%s2630_s24 + $0x178] sm:$0xff]   ;;  %v2561_v44 = vld [vmem:[%s2630_s24 + $0x180] sm:$0xff]  }
  0x1e   : > { %v2562_v45 = vld [vmem:[%s2630_s24 + $0xa8] sm:$0xff]   ;;  %v2564_v47 = vld [vmem:[%s2630_s24 + $0xb0] sm:$0xff]   ;;  %v2566_v49 = vld [vmem:[%s2630_s24 + $0xb8] sm:$0xff]  }
  0x1f   : > { %v2563_v46 = vld [vmem:[%s2630_s24 + $0x188] sm:$0xff]   ;;  %v2565_v48 = vld [vmem:[%s2630_s24 + $0x190] sm:$0xff]   ;;  %v2567_v50 = vld [vmem:[%s2630_s24 + $0x198] sm:$0xff]  }
  0x20   : > { %v2568_v51 = vld [vmem:[%s2630_s24 + $0xc0] sm:$0xff]   ;;  %v2570_v53 = vld [vmem:[%s2630_s24 + $0xc8] sm:$0xff]   ;;  %v2572_v55 = vld [vmem:[%s2630_s24 + $0xd0] sm:$0xff]  }
  0x21   : > { %v2569_v52 = vld [vmem:[%s2630_s24 + $0x1a0] sm:$0xff]   ;;  %v2571_v54 = vld [vmem:[%s2630_s24 + $0x1a8] sm:$0xff]   ;;  %v2573_v56 = vld [vmem:[%s2630_s24 + $0x1b0] sm:$0xff]  }
  0x22   : > { %2400 = vmatmul.mubr.msk.bf16.gmra.mrb[8].mxu0 %vm598_vm0, %v2530_v13  ;;  %v2574_v57 = vld [vmem:[%s2630_s24 + $0xd8] sm:$0xff]  }
  0x23   : > { %2456 = vmatmul.mubr.msk.bf16.gmra.mrb[8].mxu1 %vm598_vm0, %v2531_v14  ;;  %2403 = vmatprep.mubr.msk.bf16.mxu0 %vm598_vm0, %v2532_v15  ;;  %v2575_v58 = vld [vmem:[%s2630_s24 + $0x1b8] sm:$0xff]  }
  0x24   : > { %2459 = vmatprep.mubr.msk.bf16.mxu1 %vm598_vm0, %v2533_v16 }
  0x2a   : > { %2404 = vmatmul.mubr.msk.bf16.gmra.mrb[12].mxu0 %vm598_vm0, %v2534_v17 }
  0x2b   : > { %2460 = vmatmul.mubr.msk.bf16.gmra.mrb[12].mxu1 %vm598_vm0, %v2535_v18  ;;  %2407 = vmatprep.mubr.msk.bf16.mxu0 %vm598_vm0, %v2536_v19 }
  0x2c   : > { %2463 = vmatprep.mubr.msk.bf16.mxu1 %vm598_vm0, %v2537_v20 }
  0x32   : > { %2408 = vmatmul.mubr.msk.bf16.gmra.mrb[16].mxu0 %vm598_vm0, %v2538_v21 }
  0x33   : > { %2464 = vmatmul.mubr.msk.bf16.gmra.mrb[16].mxu1 %vm598_vm0, %v2539_v22  ;;  %2411 = vmatprep.mubr.msk.bf16.mxu0 %vm598_vm0, %v2540_v23 }
  0x34   : > { %2467 = vmatprep.mubr.msk.bf16.mxu1 %vm598_vm0, %v2541_v24 }
  0x3a   : > { %2412 = vmatmul.mubr.msk.bf16.gmra.mrb[20].mxu0 %vm598_vm0, %v2542_v25 }
  0x3b   : > { %2468 = vmatmul.mubr.msk.bf16.gmra.mrb[20].mxu1 %vm598_vm0, %v2543_v26  ;;  %2415 = vmatprep.mubr.msk.bf16.mxu0 %vm598_vm0, %v2544_v27 }
  0x3c   : > { %2471 = vmatprep.mubr.msk.bf16.mxu1 %vm598_vm0, %v2545_v28 }
  0x42   : > { %2416 = vmatmul.mubr.msk.bf16.gmra.mrb[24].mxu0 %vm598_vm0, %v2546_v29 }
  0x43   : > { %2472 = vmatmul.mubr.msk.bf16.gmra.mrb[24].mxu1 %vm598_vm0, %v2547_v30  ;;  %2419 = vmatprep.mubr.msk.bf16.mxu0 %vm598_vm0, %v2548_v31 }
  0x44   : > { %2475 = vmatprep.mubr.msk.bf16.mxu1 %vm598_vm0, %v2549_v32 }
  0x4a   : > { %2420 = vmatmul.mubr.msk.bf16.gmra.mrb[28].mxu0 %vm598_vm0, %v2550_v33 }
  0x4b   : > { %2476 = vmatmul.mubr.msk.bf16.gmra.mrb[28].mxu1 %vm598_vm0, %v2551_v34  ;;  %2423 = vmatprep.mubr.msk.bf16.mxu0 %vm598_vm0, %v2552_v35 }
  0x4c   : > { %2479 = vmatprep.mubr.msk.bf16.mxu1 %vm598_vm0, %v2553_v36 }
  0x52   : > { %2424 = vmatmul.mubr.msk.bf16.gmra.mrb[32].mxu0 %vm598_vm0, %v2554_v37 }
  0x53   : > { %2480 = vmatmul.mubr.msk.bf16.gmra.mrb[32].mxu1 %vm598_vm0, %v2555_v38  ;;  %2427 = vmatprep.mubr.msk.bf16.mxu0 %vm598_vm0, %v2556_v39 }
  0x54   : > { %2483 = vmatprep.mubr.msk.bf16.mxu1 %vm598_vm0, %v2557_v40 }
  0x5a   : > { %2428 = vmatmul.mubr.msk.bf16.gmra.mrb[36].mxu0 %vm598_vm0, %v2558_v41 }
  0x5b   : > { %2484 = vmatmul.mubr.msk.bf16.gmra.mrb[36].mxu1 %vm598_vm0, %v2559_v42  ;;  %2431 = vmatprep.mubr.msk.bf16.mxu0 %vm598_vm0, %v2560_v43 }
  0x5c   : > { %2487 = vmatprep.mubr.msk.bf16.mxu1 %vm598_vm0, %v2561_v44 }
  0x62   : > { %2432 = vmatmul.mubr.msk.bf16.gmra.mrb[40].mxu0 %vm598_vm0, %v2562_v45 }
  0x63   : > { %2488 = vmatmul.mubr.msk.bf16.gmra.mrb[40].mxu1 %vm598_vm0, %v2563_v46  ;;  %2435 = vmatprep.mubr.msk.bf16.mxu0 %vm598_vm0, %v2564_v47 }
  0x64   : > { %2491 = vmatprep.mubr.msk.bf16.mxu1 %vm598_vm0, %v2565_v48 }
  0x6a   : > { %2436 = vmatmul.mubr.msk.bf16.gmra.mrb[44].mxu0 %vm598_vm0, %v2566_v49 }
  0x6b   : > { %2492 = vmatmul.mubr.msk.bf16.gmra.mrb[44].mxu1 %vm598_vm0, %v2567_v50  ;;  %2439 = vmatprep.mubr.msk.bf16.mxu0 %vm598_vm0, %v2568_v51 }
  0x6c   : > { %2495 = vmatprep.mubr.msk.bf16.mxu1 %vm598_vm0, %v2569_v52 }
  0x72   : > { %2440 = vmatmul.mubr.msk.bf16.gmra.mrb[48].mxu0 %vm598_vm0, %v2570_v53 }
  0x73   : > { %2496 = vmatmul.mubr.msk.bf16.gmra.mrb[48].mxu1 %vm598_vm0, %v2571_v54  ;;  %2443 = vmatprep.mubr.msk.bf16.mxu0 %vm598_vm0, %v2572_v55 }
  0x74   : > { %2499 = vmatprep.mubr.msk.bf16.mxu1 %vm598_vm0, %v2573_v56 }
  0x7a   : > { %2444 = vmatmul.mubr.msk.bf16.gmra.mrb[52].mxu0 %vm598_vm0, %v2574_v57 }
  0x7b   : > { %2500 = vmatmul.mubr.msk.bf16.gmra.mrb[52].mxu1 %vm598_vm0, %v2575_v58 }
  0xe5   : > { %v2393_v60 = vpop.f32.mrb[0].mxu0 }
  0xe6   : > { %v2449_v61 = vpop.f32.mrb[0].mxu1  ;;  %v810_v62 = vadd.f32 %v2393_v60, %v2747_v59  ;;  %v801_v0 = vpop.f32.mrb[1].mxu0 }
  0xe7   : > { %v1034_v63 = vadd.f32 %v2449_v61, %v2747_v59  ;;  %v1025_v1 = vpop.f32.mrb[1].mxu1  ;;  %v802_v2 = vadd.f32 %v2747_v59, %v801_v0  ;;  %v2394_v4 = vpop.f32.mrb[2].mxu0 }
  0xe8   : > { %v1026_v3 = vadd.f32 %v2747_v59, %v1025_v1  ;;  %v2450_v5 = vpop.f32.mrb[2].mxu1  ;;  %v1250_v6 = vmax.f32 %v810_v62, 0.0  ;;  %v813_v8 = vadd.f32 %v2394_v4, %v2747_v59  ;;  %v804_v10 = vpop.f32.mrb[3].mxu0 }
  0xe9   : > { %v1306_v7 = vmax.f32 %v1034_v63, 0.0  ;;  %v1037_v9 = vadd.f32 %v2450_v5, %v2747_v59  ;;  %v1028_v11 = vpop.f32.mrb[3].mxu1  ;;  %v1248_v12 = vmax.f32 %v802_v2, 0.0  ;;  %v805_v14 = vadd.f32 %v2747_v59, %v804_v10 }
  0xea   : > { %v1304_v13 = vmax.f32 %v1026_v3, 0.0  ;;  %v1029_v15 = vadd.f32 %v2747_v59, %v1028_v11  ;;  %v2216_v16 = vpack.c.bf16 %v1250_v6, %v1250_v6  ;;  %v1251_v18 = vmax.f32 %v813_v8, 0.0 }
  0xeb   : > { %v2272_v17 = vpack.c.bf16 %v1306_v7, %v1306_v7  ;;  %v1307_v19 = vmax.f32 %v1037_v9, 0.0  ;;  %v2214_v20 = vpack.c.bf16 %v1248_v12, %v1248_v12  ;;  %v1249_v22 = vmax.f32 %v805_v14, 0.0 }
  0xec   : > { %v2270_v21 = vpack.c.bf16 %v1304_v13, %v1304_v13  ;;  %v1305_v23 = vmax.f32 %v1029_v15, 0.0  ;;  %1811 = vst.msk [vmem:[%s2760_s29 + $0x8] sm:$0xf] %vm1808_vm1, %v2216_v16  ;;  %v2217_v24 = vpack.c.bf16 %v1251_v18, %v1251_v18 }
  0xed   : > { %1867 = vst.msk [vmem:[%s2760_s29 + $0xe8] sm:$0xf] %vm1808_vm1, %v2272_v17  ;;  %v2273_v25 = vpack.c.bf16 %v1307_v19, %v1307_v19  ;;  %1809 = vst.msk [vmem:[%s2760_s29] sm:$0xf] %vm1808_vm1, %v2214_v20  ;;  %v2215_v26 = vpack.c.bf16 %v1249_v22, %v1249_v22  ;;  %v2397_v28 = vpop.f32.mrb[4].mxu0 }
  0xee   : > { %1865 = vst.msk [vmem:[%s2760_s29 + $0xe0] sm:$0xf] %vm1808_vm1, %v2270_v21  ;;  %v2271_v27 = vpack.c.bf16 %v1305_v23, %v1305_v23  ;;  %v2453_v29 = vpop.f32.mrb[4].mxu1  ;;  %1812 = vst.msk [vmem:[%s2760_s29 + $0xc] sm:$0xf] %vm1808_vm1, %v2217_v24  ;;  %v826_v30 = vadd.f32 %v2397_v28, %v2747_v59  ;;  %v817_v32 = vpop.f32.mrb[5].mxu0 }
  0xef   : > { %1868 = vst.msk [vmem:[%s2760_s29 + $0xec] sm:$0xf] %vm1808_vm1, %v2273_v25  ;;  %v1050_v31 = vadd.f32 %v2453_v29, %v2747_v59  ;;  %v1041_v33 = vpop.f32.mrb[5].mxu1  ;;  %1810 = vst.msk [vmem:[%s2760_s29 + $0x4] sm:$0xf] %vm1808_vm1, %v2215_v26  ;;  %v818_v34 = vadd.f32 %v2747_v59, %v817_v32  ;;  %v2398_v36 = vpop.f32.mrb[6].mxu0 }
  0xf0   : > { %1866 = vst.msk [vmem:[%s2760_s29 + $0xe4] sm:$0xf] %vm1808_vm1, %v2271_v27  ;;  %v1042_v35 = vadd.f32 %v2747_v59, %v1041_v33  ;;  %v2454_v37 = vpop.f32.mrb[6].mxu1  ;;  %v1254_v38 = vmax.f32 %v826_v30, 0.0  ;;  %v829_v40 = vadd.f32 %v2398_v36, %v2747_v59  ;;  %v820_v42 = vpop.f32.mrb[7].mxu0 }
  0xf1   : > { %v1310_v39 = vmax.f32 %v1050_v31, 0.0  ;;  %v1053_v41 = vadd.f32 %v2454_v37, %v2747_v59  ;;  %v1044_v43 = vpop.f32.mrb[7].mxu1  ;;  %v1252_v44 = vmax.f32 %v818_v34, 0.0  ;;  %v821_v46 = vadd.f32 %v2747_v59, %v820_v42 }
  0xf2   : > { %v1308_v45 = vmax.f32 %v1042_v35, 0.0  ;;  %v1045_v47 = vadd.f32 %v2747_v59, %v1044_v43  ;;  %v2220_v48 = vpack.c.bf16 %v1254_v38, %v1254_v38  ;;  %v1255_v50 = vmax.f32 %v829_v40, 0.0 }
  0xf3   : > { %v2276_v49 = vpack.c.bf16 %v1310_v39, %v1310_v39  ;;  %v1311_v51 = vmax.f32 %v1053_v41, 0.0  ;;  %v2218_v52 = vpack.c.bf16 %v1252_v44, %v1252_v44  ;;  %v1253_v54 = vmax.f32 %v821_v46, 0.0 }
  0xf4   : > { %v2274_v53 = vpack.c.bf16 %v1308_v45, %v1308_v45  ;;  %v1309_v55 = vmax.f32 %v1045_v47, 0.0  ;;  %1815 = vst.msk [vmem:[%s2760_s29 + $0x18] sm:$0xf] %vm1808_vm1, %v2220_v48  ;;  %v2221_v56 = vpack.c.bf16 %v1255_v50, %v1255_v50 }
  0xf5   : > { %1871 = vst.msk [vmem:[%s2760_s29 + $0xf8] sm:$0xf] %vm1808_vm1, %v2276_v49  ;;  %v2277_v57 = vpack.c.bf16 %v1311_v51, %v1311_v51  ;;  %1813 = vst.msk [vmem:[%s2760_s29 + $0x10] sm:$0xf] %vm1808_vm1, %v2218_v52  ;;  %v2219_v58 = vpack.c.bf16 %v1253_v54, %v1253_v54  ;;  %v2401_v61 = vpop.f32.mrb[8].mxu0 }
  0xf6   : > { %1869 = vst.msk [vmem:[%s2760_s29 + $0xf0] sm:$0xf] %vm1808_vm1, %v2274_v53  ;;  %v2275_v60 = vpack.c.bf16 %v1309_v55, %v1309_v55  ;;  %v2457_v62 = vpop.f32.mrb[8].mxu1  ;;  %1816 = vst.msk [vmem:[%s2760_s29 + $0x1c] sm:$0xf] %vm1808_vm1, %v2221_v56  ;;  %v842_v63 = vadd.f32 %v2401_v61, %v2747_v59  ;;  %v833_v1 = vpop.f32.mrb[9].mxu0 }
  0xf7   : > { %1872 = vst.msk [vmem:[%s2760_s29 + $0xfc] sm:$0xf] %vm1808_vm1, %v2277_v57  ;;  %v1066_v0 = vadd.f32 %v2457_v62, %v2747_v59  ;;  %v1057_v2 = vpop.f32.mrb[9].mxu1  ;;  %1814 = vst.msk [vmem:[%s2760_s29 + $0x14] sm:$0xf] %vm1808_vm1, %v2219_v58  ;;  %v834_v3 = vadd.f32 %v2747_v59, %v833_v1  ;;  %v2402_v5 = vpop.f32.mrb[10].mxu0 }
  0xf8   : > { %1870 = vst.msk [vmem:[%s2760_s29 + $0xf4] sm:$0xf] %vm1808_vm1, %v2275_v60  ;;  %v1058_v4 = vadd.f32 %v2747_v59, %v1057_v2  ;;  %v2458_v6 = vpop.f32.mrb[10].mxu1  ;;  %v1258_v7 = vmax.f32 %v842_v63, 0.0  ;;  %v845_v9 = vadd.f32 %v2402_v5, %v2747_v59  ;;  %v836_v11 = vpop.f32.mrb[11].mxu0 }
  0xf9   : > { %v1314_v8 = vmax.f32 %v1066_v0, 0.0  ;;  %v1069_v10 = vadd.f32 %v2458_v6, %v2747_v59  ;;  %v1060_v12 = vpop.f32.mrb[11].mxu1  ;;  %v1256_v13 = vmax.f32 %v834_v3, 0.0  ;;  %v837_v15 = vadd.f32 %v2747_v59, %v836_v11 }
  0xfa   : > { %v1312_v14 = vmax.f32 %v1058_v4, 0.0  ;;  %v1061_v16 = vadd.f32 %v2747_v59, %v1060_v12  ;;  %v2224_v17 = vpack.c.bf16 %v1258_v7, %v1258_v7  ;;  %v1259_v19 = vmax.f32 %v845_v9, 0.0 }
  0xfb   : > { %v2280_v18 = vpack.c.bf16 %v1314_v8, %v1314_v8  ;;  %v1315_v20 = vmax.f32 %v1069_v10, 0.0  ;;  %v2222_v21 = vpack.c.bf16 %v1256_v13, %v1256_v13  ;;  %v1257_v23 = vmax.f32 %v837_v15, 0.0 }
  0xfc   : > { %v2278_v22 = vpack.c.bf16 %v1312_v14, %v1312_v14  ;;  %v1313_v24 = vmax.f32 %v1061_v16, 0.0  ;;  %1819 = vst.msk [vmem:[%s2760_s29 + $0x28] sm:$0xf] %vm1808_vm1, %v2224_v17  ;;  %v2225_v25 = vpack.c.bf16 %v1259_v19, %v1259_v19 }
  0xfd   : > { %1875 = vst.msk [vmem:[%s2760_s29 + $0x108] sm:$0xf] %vm1808_vm1, %v2280_v18  ;;  %v2281_v26 = vpack.c.bf16 %v1315_v20, %v1315_v20  ;;  %1817 = vst.msk [vmem:[%s2760_s29 + $0x20] sm:$0xf] %vm1808_vm1, %v2222_v21  ;;  %v2223_v27 = vpack.c.bf16 %v1257_v23, %v1257_v23  ;;  %v2405_v29 = vpop.f32.mrb[12].mxu0 }
  0xfe   : > { %1873 = vst.msk [vmem:[%s2760_s29 + $0x100] sm:$0xf] %vm1808_vm1, %v2278_v22  ;;  %v2279_v28 = vpack.c.bf16 %v1313_v24, %v1313_v24  ;;  %v2461_v30 = vpop.f32.mrb[12].mxu1  ;;  %1820 = vst.msk [vmem:[%s2760_s29 + $0x2c] sm:$0xf] %vm1808_vm1, %v2225_v25  ;;  %v858_v31 = vadd.f32 %v2405_v29, %v2747_v59  ;;  %v849_v33 = vpop.f32.mrb[13].mxu0 }
  0xff   : > { %1876 = vst.msk [vmem:[%s2760_s29 + $0x10c] sm:$0xf] %vm1808_vm1, %v2281_v26  ;;  %v1082_v32 = vadd.f32 %v2461_v30, %v2747_v59  ;;  %v1073_v34 = vpop.f32.mrb[13].mxu1  ;;  %1818 = vst.msk [vmem:[%s2760_s29 + $0x24] sm:$0xf] %vm1808_vm1, %v2223_v27  ;;  %v850_v35 = vadd.f32 %v2747_v59, %v849_v33  ;;  %v2406_v37 = vpop.f32.mrb[14].mxu0 }
 0x100   : > { %1874 = vst.msk [vmem:[%s2760_s29 + $0x104] sm:$0xf] %vm1808_vm1, %v2279_v28  ;;  %v1074_v36 = vadd.f32 %v2747_v59, %v1073_v34  ;;  %v2462_v38 = vpop.f32.mrb[14].mxu1  ;;  %v1262_v39 = vmax.f32 %v858_v31, 0.0  ;;  %v861_v41 = vadd.f32 %v2406_v37, %v2747_v59  ;;  %v852_v43 = vpop.f32.mrb[15].mxu0 }
 0x101   : > { %v1318_v40 = vmax.f32 %v1082_v32, 0.0  ;;  %v1085_v42 = vadd.f32 %v2462_v38, %v2747_v59  ;;  %v1076_v44 = vpop.f32.mrb[15].mxu1  ;;  %v1260_v45 = vmax.f32 %v850_v35, 0.0  ;;  %v853_v47 = vadd.f32 %v2747_v59, %v852_v43 }
 0x102   : > { %v1316_v46 = vmax.f32 %v1074_v36, 0.0  ;;  %v1077_v48 = vadd.f32 %v2747_v59, %v1076_v44  ;;  %v2228_v49 = vpack.c.bf16 %v1262_v39, %v1262_v39  ;;  %v1263_v51 = vmax.f32 %v861_v41, 0.0 }
 0x103   : > { %v2284_v50 = vpack.c.bf16 %v1318_v40, %v1318_v40  ;;  %v1319_v52 = vmax.f32 %v1085_v42, 0.0  ;;  %v2226_v53 = vpack.c.bf16 %v1260_v45, %v1260_v45  ;;  %v1261_v55 = vmax.f32 %v853_v47, 0.0 }
 0x104   : > { %v2282_v54 = vpack.c.bf16 %v1316_v46, %v1316_v46  ;;  %v1317_v56 = vmax.f32 %v1077_v48, 0.0  ;;  %1823 = vst.msk [vmem:[%s2760_s29 + $0x38] sm:$0xf] %vm1808_vm1, %v2228_v49  ;;  %v2229_v57 = vpack.c.bf16 %v1263_v51, %v1263_v51 }
 0x105   : > { %1879 = vst.msk [vmem:[%s2760_s29 + $0x118] sm:$0xf] %vm1808_vm1, %v2284_v50  ;;  %v2285_v58 = vpack.c.bf16 %v1319_v52, %v1319_v52  ;;  %1821 = vst.msk [vmem:[%s2760_s29 + $0x30] sm:$0xf] %vm1808_vm1, %v2226_v53  ;;  %v2227_v60 = vpack.c.bf16 %v1261_v55, %v1261_v55  ;;  %v2409_v62 = vpop.f32.mrb[16].mxu0 }
 0x106   : > { %1877 = vst.msk [vmem:[%s2760_s29 + $0x110] sm:$0xf] %vm1808_vm1, %v2282_v54  ;;  %v2283_v61 = vpack.c.bf16 %v1317_v56, %v1317_v56  ;;  %v2465_v63 = vpop.f32.mrb[16].mxu1  ;;  %1824 = vst.msk [vmem:[%s2760_s29 + $0x3c] sm:$0xf] %vm1808_vm1, %v2229_v57  ;;  %v874_v0 = vadd.f32 %v2409_v62, %v2747_v59  ;;  %v865_v2 = vpop.f32.mrb[17].mxu0 }
 0x107   : > { %1880 = vst.msk [vmem:[%s2760_s29 + $0x11c] sm:$0xf] %vm1808_vm1, %v2285_v58  ;;  %v1098_v1 = vadd.f32 %v2465_v63, %v2747_v59  ;;  %v1089_v3 = vpop.f32.mrb[17].mxu1  ;;  %1822 = vst.msk [vmem:[%s2760_s29 + $0x34] sm:$0xf] %vm1808_vm1, %v2227_v60  ;;  %v866_v4 = vadd.f32 %v2747_v59, %v865_v2  ;;  %v2410_v6 = vpop.f32.mrb[18].mxu0 }
 0x108   : > { %1878 = vst.msk [vmem:[%s2760_s29 + $0x114] sm:$0xf] %vm1808_vm1, %v2283_v61  ;;  %v1090_v5 = vadd.f32 %v2747_v59, %v1089_v3  ;;  %v2466_v7 = vpop.f32.mrb[18].mxu1  ;;  %v1266_v8 = vmax.f32 %v874_v0, 0.0  ;;  %v877_v10 = vadd.f32 %v2410_v6, %v2747_v59  ;;  %v868_v12 = vpop.f32.mrb[19].mxu0 }
 0x109   : > { %v1322_v9 = vmax.f32 %v1098_v1, 0.0  ;;  %v1101_v11 = vadd.f32 %v2466_v7, %v2747_v59  ;;  %v1092_v13 = vpop.f32.mrb[19].mxu1  ;;  %v1264_v14 = vmax.f32 %v866_v4, 0.0  ;;  %v869_v16 = vadd.f32 %v2747_v59, %v868_v12 }
 0x10a   : > { %v1320_v15 = vmax.f32 %v1090_v5, 0.0  ;;  %v1093_v17 = vadd.f32 %v2747_v59, %v1092_v13  ;;  %v2232_v18 = vpack.c.bf16 %v1266_v8, %v1266_v8  ;;  %v1267_v20 = vmax.f32 %v877_v10, 0.0 }
 0x10b   : > { %v2288_v19 = vpack.c.bf16 %v1322_v9, %v1322_v9  ;;  %v1323_v21 = vmax.f32 %v1101_v11, 0.0  ;;  %v2230_v22 = vpack.c.bf16 %v1264_v14, %v1264_v14  ;;  %v1265_v24 = vmax.f32 %v869_v16, 0.0 }
 0x10c   : > { %v2286_v23 = vpack.c.bf16 %v1320_v15, %v1320_v15  ;;  %v1321_v25 = vmax.f32 %v1093_v17, 0.0  ;;  %1827 = vst.msk [vmem:[%s2760_s29 + $0x48] sm:$0xf] %vm1808_vm1, %v2232_v18  ;;  %v2233_v26 = vpack.c.bf16 %v1267_v20, %v1267_v20 }
 0x10d   : > { %1883 = vst.msk [vmem:[%s2760_s29 + $0x128] sm:$0xf] %vm1808_vm1, %v2288_v19  ;;  %v2289_v27 = vpack.c.bf16 %v1323_v21, %v1323_v21  ;;  %1825 = vst.msk [vmem:[%s2760_s29 + $0x40] sm:$0xf] %vm1808_vm1, %v2230_v22  ;;  %v2231_v28 = vpack.c.bf16 %v1265_v24, %v1265_v24  ;;  %v2413_v30 = vpop.f32.mrb[20].mxu0 }
 0x10e   : > { %1881 = vst.msk [vmem:[%s2760_s29 + $0x120] sm:$0xf] %vm1808_vm1, %v2286_v23  ;;  %v2287_v29 = vpack.c.bf16 %v1321_v25, %v1321_v25  ;;  %v2469_v31 = vpop.f32.mrb[20].mxu1  ;;  %1828 = vst.msk [vmem:[%s2760_s29 + $0x4c] sm:$0xf] %vm1808_vm1, %v2233_v26  ;;  %v890_v32 = vadd.f32 %v2413_v30, %v2747_v59  ;;  %v881_v34 = vpop.f32.mrb[21].mxu0 }
 0x10f   : > { %1884 = vst.msk [vmem:[%s2760_s29 + $0x12c] sm:$0xf] %vm1808_vm1, %v2289_v27  ;;  %v1114_v33 = vadd.f32 %v2469_v31, %v2747_v59  ;;  %v1105_v35 = vpop.f32.mrb[21].mxu1  ;;  %1826 = vst.msk [vmem:[%s2760_s29 + $0x44] sm:$0xf] %vm1808_vm1, %v2231_v28  ;;  %v882_v36 = vadd.f32 %v2747_v59, %v881_v34  ;;  %v2414_v38 = vpop.f32.mrb[22].mxu0 }
 0x110   : > { %1882 = vst.msk [vmem:[%s2760_s29 + $0x124] sm:$0xf] %vm1808_vm1, %v2287_v29  ;;  %v1106_v37 = vadd.f32 %v2747_v59, %v1105_v35  ;;  %v2470_v39 = vpop.f32.mrb[22].mxu1  ;;  %v1270_v40 = vmax.f32 %v890_v32, 0.0  ;;  %v893_v42 = vadd.f32 %v2414_v38, %v2747_v59  ;;  %v884_v44 = vpop.f32.mrb[23].mxu0 }
 0x111   : > { %v1326_v41 = vmax.f32 %v1114_v33, 0.0  ;;  %v1117_v43 = vadd.f32 %v2470_v39, %v2747_v59  ;;  %v1108_v45 = vpop.f32.mrb[23].mxu1  ;;  %v1268_v46 = vmax.f32 %v882_v36, 0.0  ;;  %v885_v48 = vadd.f32 %v2747_v59, %v884_v44 }
 0x112   : > { %v1324_v47 = vmax.f32 %v1106_v37, 0.0  ;;  %v1109_v49 = vadd.f32 %v2747_v59, %v1108_v45  ;;  %v2236_v50 = vpack.c.bf16 %v1270_v40, %v1270_v40  ;;  %v1271_v52 = vmax.f32 %v893_v42, 0.0 }
 0x113   : > { %v2292_v51 = vpack.c.bf16 %v1326_v41, %v1326_v41  ;;  %v1327_v53 = vmax.f32 %v1117_v43, 0.0  ;;  %v2234_v54 = vpack.c.bf16 %v1268_v46, %v1268_v46  ;;  %v1269_v56 = vmax.f32 %v885_v48, 0.0 }
 0x114   : > { %v2290_v55 = vpack.c.bf16 %v1324_v47, %v1324_v47  ;;  %v1325_v57 = vmax.f32 %v1109_v49, 0.0  ;;  %1831 = vst.msk [vmem:[%s2760_s29 + $0x58] sm:$0xf] %vm1808_vm1, %v2236_v50  ;;  %v2237_v58 = vpack.c.bf16 %v1271_v52, %v1271_v52 }
 0x115   : > { %1887 = vst.msk [vmem:[%s2760_s29 + $0x138] sm:$0xf] %vm1808_vm1, %v2292_v51  ;;  %v2293_v60 = vpack.c.bf16 %v1327_v53, %v1327_v53  ;;  %1829 = vst.msk [vmem:[%s2760_s29 + $0x50] sm:$0xf] %vm1808_vm1, %v2234_v54  ;;  %v2235_v61 = vpack.c.bf16 %v1269_v56, %v1269_v56  ;;  %v2417_v63 = vpop.f32.mrb[24].mxu0 }
 0x116   : > { %1885 = vst.msk [vmem:[%s2760_s29 + $0x130] sm:$0xf] %vm1808_vm1, %v2290_v55  ;;  %v2291_v62 = vpack.c.bf16 %v1325_v57, %v1325_v57  ;;  %v2473_v0 = vpop.f32.mrb[24].mxu1  ;;  %1832 = vst.msk [vmem:[%s2760_s29 + $0x5c] sm:$0xf] %vm1808_vm1, %v2237_v58  ;;  %v906_v1 = vadd.f32 %v2417_v63, %v2747_v59  ;;  %v897_v3 = vpop.f32.mrb[25].mxu0 }
 0x117   : > { %1888 = vst.msk [vmem:[%s2760_s29 + $0x13c] sm:$0xf] %vm1808_vm1, %v2293_v60  ;;  %v1130_v2 = vadd.f32 %v2473_v0, %v2747_v59  ;;  %v1121_v4 = vpop.f32.mrb[25].mxu1  ;;  %1830 = vst.msk [vmem:[%s2760_s29 + $0x54] sm:$0xf] %vm1808_vm1, %v2235_v61  ;;  %v898_v5 = vadd.f32 %v2747_v59, %v897_v3  ;;  %v2418_v7 = vpop.f32.mrb[26].mxu0 }
 0x118   : > { %1886 = vst.msk [vmem:[%s2760_s29 + $0x134] sm:$0xf] %vm1808_vm1, %v2291_v62  ;;  %v1122_v6 = vadd.f32 %v2747_v59, %v1121_v4  ;;  %v2474_v8 = vpop.f32.mrb[26].mxu1  ;;  %v1274_v9 = vmax.f32 %v906_v1, 0.0  ;;  %v909_v11 = vadd.f32 %v2418_v7, %v2747_v59  ;;  %v900_v13 = vpop.f32.mrb[27].mxu0 }
 0x119   : > { %v1330_v10 = vmax.f32 %v1130_v2, 0.0  ;;  %v1133_v12 = vadd.f32 %v2474_v8, %v2747_v59  ;;  %v1124_v14 = vpop.f32.mrb[27].mxu1  ;;  %v1272_v15 = vmax.f32 %v898_v5, 0.0  ;;  %v901_v17 = vadd.f32 %v2747_v59, %v900_v13 }
 0x11a   : > { %v1328_v16 = vmax.f32 %v1122_v6, 0.0  ;;  %v1125_v18 = vadd.f32 %v2747_v59, %v1124_v14  ;;  %v2240_v19 = vpack.c.bf16 %v1274_v9, %v1274_v9  ;;  %v1275_v21 = vmax.f32 %v909_v11, 0.0 }
 0x11b   : > { %v2296_v20 = vpack.c.bf16 %v1330_v10, %v1330_v10  ;;  %v1331_v22 = vmax.f32 %v1133_v12, 0.0  ;;  %v2238_v23 = vpack.c.bf16 %v1272_v15, %v1272_v15  ;;  %v1273_v25 = vmax.f32 %v901_v17, 0.0 }
 0x11c   : > { %v2294_v24 = vpack.c.bf16 %v1328_v16, %v1328_v16  ;;  %v1329_v26 = vmax.f32 %v1125_v18, 0.0  ;;  %1835 = vst.msk [vmem:[%s2760_s29 + $0x68] sm:$0xf] %vm1808_vm1, %v2240_v19  ;;  %v2241_v27 = vpack.c.bf16 %v1275_v21, %v1275_v21 }
 0x11d   : > { %1891 = vst.msk [vmem:[%s2760_s29 + $0x148] sm:$0xf] %vm1808_vm1, %v2296_v20  ;;  %v2297_v28 = vpack.c.bf16 %v1331_v22, %v1331_v22  ;;  %1833 = vst.msk [vmem:[%s2760_s29 + $0x60] sm:$0xf] %vm1808_vm1, %v2238_v23  ;;  %v2239_v29 = vpack.c.bf16 %v1273_v25, %v1273_v25  ;;  %v2421_v31 = vpop.f32.mrb[28].mxu0 }
 0x11e   : > { %1889 = vst.msk [vmem:[%s2760_s29 + $0x140] sm:$0xf] %vm1808_vm1, %v2294_v24  ;;  %v2295_v30 = vpack.c.bf16 %v1329_v26, %v1329_v26  ;;  %v2477_v32 = vpop.f32.mrb[28].mxu1  ;;  %1836 = vst.msk [vmem:[%s2760_s29 + $0x6c] sm:$0xf] %vm1808_vm1, %v2241_v27  ;;  %v922_v33 = vadd.f32 %v2421_v31, %v2747_v59  ;;  %v913_v35 = vpop.f32.mrb[29].mxu0 }
 0x11f   : > { %1892 = vst.msk [vmem:[%s2760_s29 + $0x14c] sm:$0xf] %vm1808_vm1, %v2297_v28  ;;  %v1146_v34 = vadd.f32 %v2477_v32, %v2747_v59  ;;  %v1137_v36 = vpop.f32.mrb[29].mxu1  ;;  %1834 = vst.msk [vmem:[%s2760_s29 + $0x64] sm:$0xf] %vm1808_vm1, %v2239_v29  ;;  %v914_v37 = vadd.f32 %v2747_v59, %v913_v35  ;;  %v2422_v39 = vpop.f32.mrb[30].mxu0 }
 0x120   : > { %1890 = vst.msk [vmem:[%s2760_s29 + $0x144] sm:$0xf] %vm1808_vm1, %v2295_v30  ;;  %v1138_v38 = vadd.f32 %v2747_v59, %v1137_v36  ;;  %v2478_v40 = vpop.f32.mrb[30].mxu1  ;;  %v1278_v41 = vmax.f32 %v922_v33, 0.0  ;;  %v925_v43 = vadd.f32 %v2422_v39, %v2747_v59  ;;  %v916_v45 = vpop.f32.mrb[31].mxu0 }
 0x121   : > { %v1334_v42 = vmax.f32 %v1146_v34, 0.0  ;;  %v1149_v44 = vadd.f32 %v2478_v40, %v2747_v59  ;;  %v1140_v46 = vpop.f32.mrb[31].mxu1  ;;  %v1276_v47 = vmax.f32 %v914_v37, 0.0  ;;  %v917_v49 = vadd.f32 %v2747_v59, %v916_v45 }
 0x122   : > { %v1332_v48 = vmax.f32 %v1138_v38, 0.0  ;;  %v1141_v50 = vadd.f32 %v2747_v59, %v1140_v46  ;;  %v2244_v51 = vpack.c.bf16 %v1278_v41, %v1278_v41  ;;  %v1279_v53 = vmax.f32 %v925_v43, 0.0 }
 0x123   : > { %v2300_v52 = vpack.c.bf16 %v1334_v42, %v1334_v42  ;;  %v1335_v54 = vmax.f32 %v1149_v44, 0.0  ;;  %v2242_v55 = vpack.c.bf16 %v1276_v47, %v1276_v47  ;;  %v1277_v57 = vmax.f32 %v917_v49, 0.0 }
 0x124   : > { %v2298_v56 = vpack.c.bf16 %v1332_v48, %v1332_v48  ;;  %v1333_v58 = vmax.f32 %v1141_v50, 0.0  ;;  %1839 = vst.msk [vmem:[%s2760_s29 + $0x78] sm:$0xf] %vm1808_vm1, %v2244_v51  ;;  %v2245_v60 = vpack.c.bf16 %v1279_v53, %v1279_v53 }
 0x125   : > { %1895 = vst.msk [vmem:[%s2760_s29 + $0x158] sm:$0xf] %vm1808_vm1, %v2300_v52  ;;  %v2301_v61 = vpack.c.bf16 %v1335_v54, %v1335_v54  ;;  %1837 = vst.msk [vmem:[%s2760_s29 + $0x70] sm:$0xf] %vm1808_vm1, %v2242_v55  ;;  %v2243_v62 = vpack.c.bf16 %v1277_v57, %v1277_v57  ;;  %v2425_v0 = vpop.f32.mrb[32].mxu0 }
 0x126   : > { %1893 = vst.msk [vmem:[%s2760_s29 + $0x150] sm:$0xf] %vm1808_vm1, %v2298_v56  ;;  %v2299_v63 = vpack.c.bf16 %v1333_v58, %v1333_v58  ;;  %v2481_v1 = vpop.f32.mrb[32].mxu1  ;;  %1840 = vst.msk [vmem:[%s2760_s29 + $0x7c] sm:$0xf] %vm1808_vm1, %v2245_v60  ;;  %v938_v2 = vadd.f32 %v2425_v0, %v2747_v59  ;;  %v929_v4 = vpop.f32.mrb[33].mxu0 }
 0x127   : > { %1896 = vst.msk [vmem:[%s2760_s29 + $0x15c] sm:$0xf] %vm1808_vm1, %v2301_v61  ;;  %v1162_v3 = vadd.f32 %v2481_v1, %v2747_v59  ;;  %v1153_v5 = vpop.f32.mrb[33].mxu1  ;;  %1838 = vst.msk [vmem:[%s2760_s29 + $0x74] sm:$0xf] %vm1808_vm1, %v2243_v62  ;;  %v930_v6 = vadd.f32 %v2747_v59, %v929_v4  ;;  %v2426_v8 = vpop.f32.mrb[34].mxu0 }
 0x128   : > { %1894 = vst.msk [vmem:[%s2760_s29 + $0x154] sm:$0xf] %vm1808_vm1, %v2299_v63  ;;  %v1154_v7 = vadd.f32 %v2747_v59, %v1153_v5  ;;  %v2482_v9 = vpop.f32.mrb[34].mxu1  ;;  %v1282_v10 = vmax.f32 %v938_v2, 0.0  ;;  %v941_v12 = vadd.f32 %v2426_v8, %v2747_v59  ;;  %v932_v14 = vpop.f32.mrb[35].mxu0 }
 0x129   : > { %v1338_v11 = vmax.f32 %v1162_v3, 0.0  ;;  %v1165_v13 = vadd.f32 %v2482_v9, %v2747_v59  ;;  %v1156_v15 = vpop.f32.mrb[35].mxu1  ;;  %v1280_v16 = vmax.f32 %v930_v6, 0.0  ;;  %v933_v18 = vadd.f32 %v2747_v59, %v932_v14 }
 0x12a   : > { %v1336_v17 = vmax.f32 %v1154_v7, 0.0  ;;  %v1157_v19 = vadd.f32 %v2747_v59, %v1156_v15  ;;  %v2248_v20 = vpack.c.bf16 %v1282_v10, %v1282_v10  ;;  %v1283_v22 = vmax.f32 %v941_v12, 0.0 }
 0x12b   : > { %v2304_v21 = vpack.c.bf16 %v1338_v11, %v1338_v11  ;;  %v1339_v23 = vmax.f32 %v1165_v13, 0.0  ;;  %v2246_v24 = vpack.c.bf16 %v1280_v16, %v1280_v16  ;;  %v1281_v26 = vmax.f32 %v933_v18, 0.0 }
 0x12c   : > { %v2302_v25 = vpack.c.bf16 %v1336_v17, %v1336_v17  ;;  %v1337_v27 = vmax.f32 %v1157_v19, 0.0  ;;  %1843 = vst.msk [vmem:[%s2760_s29 + $0x88] sm:$0xf] %vm1808_vm1, %v2248_v20  ;;  %v2249_v28 = vpack.c.bf16 %v1283_v22, %v1283_v22 }
 0x12d   : > { %1899 = vst.msk [vmem:[%s2760_s29 + $0x168] sm:$0xf] %vm1808_vm1, %v2304_v21  ;;  %v2305_v29 = vpack.c.bf16 %v1339_v23, %v1339_v23  ;;  %1841 = vst.msk [vmem:[%s2760_s29 + $0x80] sm:$0xf] %vm1808_vm1, %v2246_v24  ;;  %v2247_v30 = vpack.c.bf16 %v1281_v26, %v1281_v26  ;;  %v2429_v32 = vpop.f32.mrb[36].mxu0 }
 0x12e   : > { %1897 = vst.msk [vmem:[%s2760_s29 + $0x160] sm:$0xf] %vm1808_vm1, %v2302_v25  ;;  %v2303_v31 = vpack.c.bf16 %v1337_v27, %v1337_v27  ;;  %v2485_v33 = vpop.f32.mrb[36].mxu1  ;;  %1844 = vst.msk [vmem:[%s2760_s29 + $0x8c] sm:$0xf] %vm1808_vm1, %v2249_v28  ;;  %v954_v34 = vadd.f32 %v2429_v32, %v2747_v59  ;;  %v945_v36 = vpop.f32.mrb[37].mxu0 }
 0x12f   : > { %1900 = vst.msk [vmem:[%s2760_s29 + $0x16c] sm:$0xf] %vm1808_vm1, %v2305_v29  ;;  %v1178_v35 = vadd.f32 %v2485_v33, %v2747_v59  ;;  %v1169_v37 = vpop.f32.mrb[37].mxu1  ;;  %1842 = vst.msk [vmem:[%s2760_s29 + $0x84] sm:$0xf] %vm1808_vm1, %v2247_v30  ;;  %v946_v38 = vadd.f32 %v2747_v59, %v945_v36  ;;  %v2430_v40 = vpop.f32.mrb[38].mxu0 }
 0x130   : > { %1898 = vst.msk [vmem:[%s2760_s29 + $0x164] sm:$0xf] %vm1808_vm1, %v2303_v31  ;;  %v1170_v39 = vadd.f32 %v2747_v59, %v1169_v37  ;;  %v2486_v41 = vpop.f32.mrb[38].mxu1  ;;  %v1286_v42 = vmax.f32 %v954_v34, 0.0  ;;  %v957_v44 = vadd.f32 %v2430_v40, %v2747_v59  ;;  %v948_v46 = vpop.f32.mrb[39].mxu0 }
 0x131   : > { %v1342_v43 = vmax.f32 %v1178_v35, 0.0  ;;  %v1181_v45 = vadd.f32 %v2486_v41, %v2747_v59  ;;  %v1172_v47 = vpop.f32.mrb[39].mxu1  ;;  %v1284_v48 = vmax.f32 %v946_v38, 0.0  ;;  %v949_v50 = vadd.f32 %v2747_v59, %v948_v46 }
 0x132   : > { %v1340_v49 = vmax.f32 %v1170_v39, 0.0  ;;  %v1173_v51 = vadd.f32 %v2747_v59, %v1172_v47  ;;  %v2252_v52 = vpack.c.bf16 %v1286_v42, %v1286_v42  ;;  %v1287_v54 = vmax.f32 %v957_v44, 0.0 }
 0x133   : > { %v2308_v53 = vpack.c.bf16 %v1342_v43, %v1342_v43  ;;  %v1343_v55 = vmax.f32 %v1181_v45, 0.0  ;;  %v2250_v56 = vpack.c.bf16 %v1284_v48, %v1284_v48  ;;  %v1285_v58 = vmax.f32 %v949_v50, 0.0 }
 0x134   : > { %v2306_v57 = vpack.c.bf16 %v1340_v49, %v1340_v49  ;;  %v1341_v60 = vmax.f32 %v1173_v51, 0.0  ;;  %1847 = vst.msk [vmem:[%s2760_s29 + $0x98] sm:$0xf] %vm1808_vm1, %v2252_v52  ;;  %v2253_v61 = vpack.c.bf16 %v1287_v54, %v1287_v54 }
 0x135   : > { %1903 = vst.msk [vmem:[%s2760_s29 + $0x178] sm:$0xf] %vm1808_vm1, %v2308_v53  ;;  %v2309_v62 = vpack.c.bf16 %v1343_v55, %v1343_v55  ;;  %1845 = vst.msk [vmem:[%s2760_s29 + $0x90] sm:$0xf] %vm1808_vm1, %v2250_v56  ;;  %v2251_v63 = vpack.c.bf16 %v1285_v58, %v1285_v58  ;;  %v2433_v1 = vpop.f32.mrb[40].mxu0 }
 0x136   : > { %1901 = vst.msk [vmem:[%s2760_s29 + $0x170] sm:$0xf] %vm1808_vm1, %v2306_v57  ;;  %v2307_v0 = vpack.c.bf16 %v1341_v60, %v1341_v60  ;;  %v2489_v2 = vpop.f32.mrb[40].mxu1  ;;  %1848 = vst.msk [vmem:[%s2760_s29 + $0x9c] sm:$0xf] %vm1808_vm1, %v2253_v61  ;;  %v970_v3 = vadd.f32 %v2433_v1, %v2747_v59  ;;  %v961_v5 = vpop.f32.mrb[41].mxu0 }
 0x137   : > { %1904 = vst.msk [vmem:[%s2760_s29 + $0x17c] sm:$0xf] %vm1808_vm1, %v2309_v62  ;;  %v1194_v4 = vadd.f32 %v2489_v2, %v2747_v59  ;;  %v1185_v6 = vpop.f32.mrb[41].mxu1  ;;  %1846 = vst.msk [vmem:[%s2760_s29 + $0x94] sm:$0xf] %vm1808_vm1, %v2251_v63  ;;  %v962_v7 = vadd.f32 %v2747_v59, %v961_v5  ;;  %v2434_v9 = vpop.f32.mrb[42].mxu0 }
 0x138   : > { %1902 = vst.msk [vmem:[%s2760_s29 + $0x174] sm:$0xf] %vm1808_vm1, %v2307_v0  ;;  %v1186_v8 = vadd.f32 %v2747_v59, %v1185_v6  ;;  %v2490_v10 = vpop.f32.mrb[42].mxu1  ;;  %v1290_v11 = vmax.f32 %v970_v3, 0.0  ;;  %v973_v13 = vadd.f32 %v2434_v9, %v2747_v59  ;;  %v964_v15 = vpop.f32.mrb[43].mxu0 }
 0x139   : > { %v1346_v12 = vmax.f32 %v1194_v4, 0.0  ;;  %v1197_v14 = vadd.f32 %v2490_v10, %v2747_v59  ;;  %v1188_v16 = vpop.f32.mrb[43].mxu1  ;;  %v1288_v17 = vmax.f32 %v962_v7, 0.0  ;;  %v965_v19 = vadd.f32 %v2747_v59, %v964_v15 }
 0x13a   : > { %v1344_v18 = vmax.f32 %v1186_v8, 0.0  ;;  %v1189_v20 = vadd.f32 %v2747_v59, %v1188_v16  ;;  %v2256_v21 = vpack.c.bf16 %v1290_v11, %v1290_v11  ;;  %v1291_v23 = vmax.f32 %v973_v13, 0.0 }
 0x13b   : > { %v2312_v22 = vpack.c.bf16 %v1346_v12, %v1346_v12  ;;  %v1347_v24 = vmax.f32 %v1197_v14, 0.0  ;;  %v2254_v25 = vpack.c.bf16 %v1288_v17, %v1288_v17  ;;  %v1289_v27 = vmax.f32 %v965_v19, 0.0 }
 0x13c   : > { %v2310_v26 = vpack.c.bf16 %v1344_v18, %v1344_v18  ;;  %v1345_v28 = vmax.f32 %v1189_v20, 0.0  ;;  %1851 = vst.msk [vmem:[%s2760_s29 + $0xa8] sm:$0xf] %vm1808_vm1, %v2256_v21  ;;  %v2257_v29 = vpack.c.bf16 %v1291_v23, %v1291_v23 }
 0x13d   : > { %1907 = vst.msk [vmem:[%s2760_s29 + $0x188] sm:$0xf] %vm1808_vm1, %v2312_v22  ;;  %v2313_v30 = vpack.c.bf16 %v1347_v24, %v1347_v24  ;;  %1849 = vst.msk [vmem:[%s2760_s29 + $0xa0] sm:$0xf] %vm1808_vm1, %v2254_v25  ;;  %v2255_v31 = vpack.c.bf16 %v1289_v27, %v1289_v27  ;;  %v2437_v33 = vpop.f32.mrb[44].mxu0 }
 0x13e   : > { %1905 = vst.msk [vmem:[%s2760_s29 + $0x180] sm:$0xf] %vm1808_vm1, %v2310_v26  ;;  %v2311_v32 = vpack.c.bf16 %v1345_v28, %v1345_v28  ;;  %v2493_v34 = vpop.f32.mrb[44].mxu1  ;;  %1852 = vst.msk [vmem:[%s2760_s29 + $0xac] sm:$0xf] %vm1808_vm1, %v2257_v29  ;;  %v986_v35 = vadd.f32 %v2437_v33, %v2747_v59  ;;  %v977_v37 = vpop.f32.mrb[45].mxu0 }
 0x13f   : > { %1908 = vst.msk [vmem:[%s2760_s29 + $0x18c] sm:$0xf] %vm1808_vm1, %v2313_v30  ;;  %v1210_v36 = vadd.f32 %v2493_v34, %v2747_v59  ;;  %v1201_v38 = vpop.f32.mrb[45].mxu1  ;;  %1850 = vst.msk [vmem:[%s2760_s29 + $0xa4] sm:$0xf] %vm1808_vm1, %v2255_v31  ;;  %v978_v39 = vadd.f32 %v2747_v59, %v977_v37  ;;  %v2438_v41 = vpop.f32.mrb[46].mxu0 }
 0x140   : > { %1906 = vst.msk [vmem:[%s2760_s29 + $0x184] sm:$0xf] %vm1808_vm1, %v2311_v32  ;;  %v1202_v40 = vadd.f32 %v2747_v59, %v1201_v38  ;;  %v2494_v42 = vpop.f32.mrb[46].mxu1  ;;  %v1294_v43 = vmax.f32 %v986_v35, 0.0  ;;  %v989_v45 = vadd.f32 %v2438_v41, %v2747_v59  ;;  %v980_v47 = vpop.f32.mrb[47].mxu0 }
 0x141   : > { %v1350_v44 = vmax.f32 %v1210_v36, 0.0  ;;  %v1213_v46 = vadd.f32 %v2494_v42, %v2747_v59  ;;  %v1204_v48 = vpop.f32.mrb[47].mxu1  ;;  %v1292_v49 = vmax.f32 %v978_v39, 0.0  ;;  %v981_v51 = vadd.f32 %v2747_v59, %v980_v47  ;;  %v2576_v35 = vld [vmem:[%s3092_s2] ss:$0 sm:$0xff] }
 0x142   : > { %v1348_v50 = vmax.f32 %v1202_v40, 0.0  ;;  %v1205_v52 = vadd.f32 %v2747_v59, %v1204_v48  ;;  %v2260_v53 = vpack.c.bf16 %v1294_v43, %v1294_v43  ;;  %v1295_v55 = vmax.f32 %v989_v45, 0.0 }
 0x143   : > { %v2316_v54 = vpack.c.bf16 %v1350_v44, %v1350_v44  ;;  %v1351_v56 = vmax.f32 %v1213_v46, 0.0  ;;  %v2258_v57 = vpack.c.bf16 %v1292_v49, %v1292_v49  ;;  %v1293_v60 = vmax.f32 %v981_v51, 0.0 }
 0x144   : > { %v2314_v58 = vpack.c.bf16 %v1348_v50, %v1348_v50  ;;  %v1349_v61 = vmax.f32 %v1205_v52, 0.0  ;;  %1855 = vst.msk [vmem:[%s2760_s29 + $0xb8] sm:$0xf] %vm1808_vm1, %v2260_v53  ;;  %v2261_v62 = vpack.c.bf16 %v1295_v55, %v1295_v55 }
 0x145   : > { %1911 = vst.msk [vmem:[%s2760_s29 + $0x198] sm:$0xf] %vm1808_vm1, %v2316_v54  ;;  %v2317_v63 = vpack.c.bf16 %v1351_v56, %v1351_v56  ;;  %1853 = vst.msk [vmem:[%s2760_s29 + $0xb0] sm:$0xf] %vm1808_vm1, %v2258_v57  ;;  %v2259_v0 = vpack.c.bf16 %v1293_v60, %v1293_v60  ;;  %v2441_v2 = vpop.f32.mrb[48].mxu0 }
 0x146   : > { %1909 = vst.msk [vmem:[%s2760_s29 + $0x190] sm:$0xf] %vm1808_vm1, %v2314_v58  ;;  %v2315_v1 = vpack.c.bf16 %v1349_v61, %v1349_v61  ;;  %v2497_v3 = vpop.f32.mrb[48].mxu1  ;;  %1856 = vst.msk [vmem:[%s2760_s29 + $0xbc] sm:$0xf] %vm1808_vm1, %v2261_v62  ;;  %v1002_v4 = vadd.f32 %v2441_v2, %v2747_v59  ;;  %v993_v6 = vpop.f32.mrb[49].mxu0 }
 0x147   : > { %1912 = vst.msk [vmem:[%s2760_s29 + $0x19c] sm:$0xf] %vm1808_vm1, %v2317_v63  ;;  %v1226_v5 = vadd.f32 %v2497_v3, %v2747_v59  ;;  %v1217_v7 = vpop.f32.mrb[49].mxu1  ;;  %1854 = vst.msk [vmem:[%s2760_s29 + $0xb4] sm:$0xf] %vm1808_vm1, %v2259_v0  ;;  %v994_v8 = vadd.f32 %v2747_v59, %v993_v6  ;;  %v2442_v10 = vpop.f32.mrb[50].mxu0 }
 0x148   : > { %1910 = vst.msk [vmem:[%s2760_s29 + $0x194] sm:$0xf] %vm1808_vm1, %v2315_v1  ;;  %v1218_v9 = vadd.f32 %v2747_v59, %v1217_v7  ;;  %v2498_v11 = vpop.f32.mrb[50].mxu1  ;;  %v1298_v12 = vmax.f32 %v1002_v4, 0.0  ;;  %v1005_v14 = vadd.f32 %v2442_v10, %v2747_v59  ;;  %v996_v16 = vpop.f32.mrb[51].mxu0 }
 0x149   : > { %v1354_v13 = vmax.f32 %v1226_v5, 0.0  ;;  %v1229_v15 = vadd.f32 %v2498_v11, %v2747_v59  ;;  %v1220_v17 = vpop.f32.mrb[51].mxu1  ;;  %v1296_v18 = vmax.f32 %v994_v8, 0.0  ;;  %v997_v20 = vadd.f32 %v2747_v59, %v996_v16 }
 0x14a   : > { %v1352_v19 = vmax.f32 %v1218_v9, 0.0  ;;  %v1221_v21 = vadd.f32 %v2747_v59, %v1220_v17  ;;  %v2264_v22 = vpack.c.bf16 %v1298_v12, %v1298_v12  ;;  %v1299_v24 = vmax.f32 %v1005_v14, 0.0 }
 0x14b   : > { %v2320_v23 = vpack.c.bf16 %v1354_v13, %v1354_v13  ;;  %v1355_v25 = vmax.f32 %v1229_v15, 0.0  ;;  %v2262_v26 = vpack.c.bf16 %v1296_v18, %v1296_v18  ;;  %v1297_v28 = vmax.f32 %v997_v20, 0.0 }
 0x14c   : > { %v2318_v27 = vpack.c.bf16 %v1352_v19, %v1352_v19  ;;  %v1353_v29 = vmax.f32 %v1221_v21, 0.0  ;;  %1859 = vst.msk [vmem:[%s2760_s29 + $0xc8] sm:$0xf] %vm1808_vm1, %v2264_v22  ;;  %v2265_v30 = vpack.c.bf16 %v1299_v24, %v1299_v24 }
 0x14d   : > { %1915 = vst.msk [vmem:[%s2760_s29 + $0x1a8] sm:$0xf] %vm1808_vm1, %v2320_v23  ;;  %v2321_v31 = vpack.c.bf16 %v1355_v25, %v1355_v25  ;;  %1857 = vst.msk [vmem:[%s2760_s29 + $0xc0] sm:$0xf] %vm1808_vm1, %v2262_v26  ;;  %v2263_v59 = vpack.c.bf16 %v1297_v28, %v1297_v28  ;;  %v2445_v33 = vpop.f32.mrb[52].mxu0 }
 0x14e   : > { %1913 = vst.msk [vmem:[%s2760_s29 + $0x1a0] sm:$0xf] %vm1808_vm1, %v2318_v27  ;;  %v2319_v32 = vpack.c.bf16 %v1353_v29, %v1353_v29  ;;  %v2501_v34 = vpop.f32.mrb[52].mxu1  ;;  %1860 = vst.msk [vmem:[%s2760_s29 + $0xcc] sm:$0xf] %vm1808_vm1, %v2265_v30  ;;  %v1018_v36 = vadd.f32 %v2576_v35, %v2445_v33  ;;  %v1009_v38 = vpop.f32.mrb[53].mxu0 }
 0x14f   : > { %1916 = vst.msk [vmem:[%s2760_s29 + $0x1ac] sm:$0xf] %vm1808_vm1, %v2321_v31  ;;  %v1242_v37 = vadd.f32 %v2576_v35, %v2501_v34  ;;  %v1233_v39 = vpop.f32.mrb[53].mxu1  ;;  %1858 = vst.msk [vmem:[%s2760_s29 + $0xc4] sm:$0xf] %vm1808_vm1, %v2263_v59  ;;  %v1010_v40 = vadd.f32 %v2576_v35, %v1009_v38  ;;  %v2446_v42 = vpop.f32.mrb[54].mxu0 }
 0x150   : > { %1914 = vst.msk [vmem:[%s2760_s29 + $0x1a4] sm:$0xf] %vm1808_vm1, %v2319_v32  ;;  %v1234_v41 = vadd.f32 %v2576_v35, %v1233_v39  ;;  %v2502_v43 = vpop.f32.mrb[54].mxu1  ;;  %v1302_v44 = vmax.f32 %v1018_v36, 0.0  ;;  %v1021_v46 = vadd.f32 %v2576_v35, %v2446_v42  ;;  %v1012_v48 = vpop.f32.mrb[55].mxu0 }
 0x151   : > { %v1358_v45 = vmax.f32 %v1242_v37, 0.0  ;;  %v1245_v47 = vadd.f32 %v2576_v35, %v2502_v43  ;;  %v1236_v49 = vpop.f32.mrb[55].mxu1  ;;  %v1300_v50 = vmax.f32 %v1010_v40, 0.0  ;;  %v1013_v52 = vadd.f32 %v2576_v35, %v1012_v48 }
 0x152   : > { %v1356_v51 = vmax.f32 %v1234_v41, 0.0  ;;  %v1237_v53 = vadd.f32 %v2576_v35, %v1236_v49  ;;  %v2268_v54 = vpack.c.bf16 %v1302_v44, %v1302_v44  ;;  %v1303_v56 = vmax.f32 %v1021_v46, 0.0 }
 0x153   : > { %v2324_v55 = vpack.c.bf16 %v1358_v45, %v1358_v45  ;;  %v1359_v57 = vmax.f32 %v1245_v47, 0.0  ;;  %v2266_v58 = vpack.c.bf16 %v1300_v50, %v1300_v50  ;;  %v1301_v61 = vmax.f32 %v1013_v52, 0.0 }
 0x154   : > { %v2322_v60 = vpack.c.bf16 %v1356_v51, %v1356_v51  ;;  %v1357_v62 = vmax.f32 %v1237_v53, 0.0  ;;  %1863 = vst.msk [vmem:[%s2760_s29 + $0xd8] sm:$0xf] %vm1808_vm1, %v2268_v54  ;;  %v2269_v63 = vpack.c.bf16 %v1303_v56, %v1303_v56 }
 0x155   : > { %1919 = vst.msk [vmem:[%s2760_s29 + $0x1b8] sm:$0xf] %vm1808_vm1, %v2324_v55  ;;  %v2325_v0 = vpack.c.bf16 %v1359_v57, %v1359_v57  ;;  %1861 = vst.msk [vmem:[%s2760_s29 + $0xd0] sm:$0xf] %vm1808_vm1, %v2266_v58  ;;  %v2267_v1 = vpack.c.bf16 %v1301_v61, %v1301_v61 }
 0x156   : > { %1917 = vst.msk [vmem:[%s2760_s29 + $0x1b0] sm:$0xf] %vm1808_vm1, %v2322_v60  ;;  %v2323_v2 = vpack.c.bf16 %v1357_v62, %v1357_v62  ;;  %1864 = vst.msk [vmem:[%s2760_s29 + $0xdc] sm:$0xf] %vm1808_vm1, %v2269_v63 }
 0x157   : > { %1920 = vst.msk [vmem:[%s2760_s29 + $0x1bc] sm:$0xf] %vm1808_vm1, %v2325_v0  ;;  %1862 = vst.msk [vmem:[%s2760_s29 + $0xd4] sm:$0xf] %vm1808_vm1, %v2267_v1 }
 0x158   : > { %1918 = vst.msk [vmem:[%s2760_s29 + $0x1b4] sm:$0xf] %vm1808_vm1, %v2323_v2 }
 0x159 PF: > { %s13_s12 = sadd.s32 1, %s2583_s12  }
 0x15a   : > { %p10_p4 = scmp.ge.s32.totalorder %s13_s12, 9  }
 0x15c   :  { %12 = sbr.rel (!%p10_p4) target bundleno = 1 (0x1), region = 62 }

// kernel: base_cnn_forward.6
= control target key start
LH: loop header
LB: loop body
LE: loop exit
PB: predicated region body
PF: predicated region fallthrough
CT: control target
= control target key end

     0   :  { %s2818_s12 = smov 0   ;;  %s3173_s0 = inlined_call_operand.vmem [shape: bf16[1568,256], index: 0, kind: input, shape index: {}]   ;;  %s3174_s1 = inlined_call_operand.vmem [shape: bf16[256,128], index: 1, kind: input, shape index: {}]   ;;  %s3175_s2 = inlined_call_operand.vmem [shape: f32[1,128], index: 2, kind: input, shape index: {}]   ;;  %s3176_s3 = inlined_call_operand.vmem [shape: bf16[1568,128], index: 3, kind: output, shape index: {}]  }
   0x1 LB: > { %s1970_s13 = sadd.s32 4294967295, %s2795_s12   ;;  %p1974_p0 = scmp.ge.s32.totalorder %s2795_s12, 1  ;;  %s2795_s12 = sphi %s2818_s12, %s13_s12  }
   0x2   : > { %p139_p1 = scmp.lt.s32.totalorder %s2795_s12, 3 }
   0x4   : > { %p140_p2 = pnand %p1974_p0, %p139_p1 }
   0x5   : > { %v2626_v0 = vld [vmem:[%s3174_s1] sm:$0xff] (!%p140_p2)   ;;  %v2797_v1 = vmov (!%p140_p2), 0   ;;  %s164_s16 = smul.u32 (!%p140_p2), 98, %s1970_s13  ;;  %v2627_v2 = vld [vmem:[%s3174_s1 + $0x8] sm:$0xff] (!%p140_p2)   ;;  %v2628_v3 = vld [vmem:[%s3174_s1 + $0x10] sm:$0xff] (!%p140_p2)  }
   0x6   : > { %143 = sbr.rel (%p140_p2) target bundleno = 483 (0x1e3), region = 32  ;;  %901 = vmatprep.subr.bf16.mxu0 (!%p140_p2), %v2797_v1  ;;  %2585 = vmatprep.subr.bf16.mxu1 (!%p140_p2), %v2797_v1  ;;  %v2629_v4 = vld [vmem:[%s3174_s1 + $0x18] sm:$0xff] (!%p140_p2)   ;;  %v2630_v5 = vld [vmem:[%s3174_s1 + $0x20] sm:$0xff] (!%p140_p2)   ;;  %v2631_v7 = vld [vmem:[%s3174_s1 + $0x28] sm:$0xff] (!%p140_p2)  }
   0x7   : > { %902 = vmatpush1.bf16.msra.mxu0 (!%p140_p2), %v2626_v0  ;;  %2601 = vmatpush1.bf16.msra.mxu1 (!%p140_p2), %v2626_v0  ;;  %p165_p3 = scmp.lt.s32.totalorder (!%p140_p2), %s164_s16, 195  ;;  %v2632_v9 = vld [vmem:[%s3174_s1 + $0x30] sm:$0xff] (!%p140_p2)   ;;  %v2633_v10 = vld [vmem:[%s3174_s1 + $0x38] sm:$0xff] (!%p140_p2)   ;;  %v2634_v11 = vld [vmem:[%s3174_s1 + $0x40] sm:$0xff] (!%p140_p2)  }
   0x8   : > { %903 = vmatprep.subr.bf16.mxu0 (!%p140_p2), %v2797_v1  ;;  %2586 = vmatprep.subr.bf16.mxu1 (!%p140_p2), %v2797_v1  ;;  %v2635_v12 = vld [vmem:[%s3174_s1 + $0x48] sm:$0xff] (!%p140_p2)   ;;  %v2636_v13 = vld [vmem:[%s3174_s1 + $0x50] sm:$0xff] (!%p140_p2)   ;;  %v2637_v14 = vld [vmem:[%s3174_s1 + $0x58] sm:$0xff] (!%p140_p2)  }
   0x9   : > { %v2638_v15 = vld [vmem:[%s3174_s1 + $0x60] sm:$0xff] (!%p140_p2)   ;;  %v2639_v16 = vld [vmem:[%s3174_s1 + $0x68] sm:$0xff] (!%p140_p2)   ;;  %v2640_v17 = vld [vmem:[%s3174_s1 + $0x70] sm:$0xff] (!%p140_p2)  }
   0xa   : > { %v2641_v18 = vld [vmem:[%s3174_s1 + $0x78] sm:$0xff] (!%p140_p2)  }
   0xb   : > { %904 = vmatpush1.bf16.msra.mxu0 (!%p140_p2), %v2627_v2  ;;  %2602 = vmatpush1.bf16.msra.mxu1 (!%p140_p2), %v2627_v2 }
   0xc   : > { %905 = vmatprep.subr.bf16.mxu0 (!%p140_p2), %v2797_v1  ;;  %2587 = vmatprep.subr.bf16.mxu1 (!%p140_p2), %v2797_v1 }
   0xd   : > { %s3178_s16 = smov (!%p165_p3, %s164_s16), 195 }
   0xe   : > { %s2193_s23 = sshll.u32 %s3178_s16, 3  ;;  %s1977_s29 = sshll.u32 %s3178_s16, 2 }
   0xf   : > { %906 = vmatpush1.bf16.msra.mxu0 %v2628_v3  ;;  %2603 = vmatpush1.bf16.msra.mxu1 %v2628_v3  ;;  %s2855_s28 = scalar_lea.vmem %s3173_s0, %s2193_s23  ;;  %s3025_s4 = scalar_lea.vmem %s3176_s3, %s1977_s29 }
  0x10   : > { %907 = vmatprep.subr.bf16.mxu0 %v2797_v1  ;;  %2588 = vmatprep.subr.bf16.mxu1 %v2797_v1  ;;  %v2644_v6 = vld [vmem:[%s2855_s28 + $0x4] ss:$8 sps:$4 sm:$0xff]   ;;  %v2647_v8 = vld [vmem:[%s2855_s28 + $0x194] ss:$8 sps:$4 sm:$0xff]   ;;  %v2642_v19 = vld [vmem:[%s2855_s28] ss:$8 sps:$4 sm:$0xff]  }
  0x11   : > { %933 = vmatprep.mubr.bf16.mxu0 %v2644_v6  ;;  %1133 = vmatprep.mubr.bf16.mxu1 %v2647_v8  ;;  %v2645_v20 = vld [vmem:[%s2855_s28 + $0x190] ss:$8 sps:$4 sm:$0xff]   ;;  %v2648_v21 = vld [vmem:[%s2855_s28 + $0x14] ss:$8 sps:$4 sm:$0xff]   ;;  %v2651_v22 = vld [vmem:[%s2855_s28 + $0x1a4] ss:$8 sps:$4 sm:$0xff]  }
  0x12   : > { %v2650_v23 = vld [vmem:[%s2855_s28 + $0x10] ss:$8 sps:$4 sm:$0xff]   ;;  %v2653_v24 = vld [vmem:[%s2855_s28 + $0x1a0] ss:$8 sps:$4 sm:$0xff]   ;;  %v2654_v25 = vld [vmem:[%s2855_s28 + $0x24] ss:$8 sps:$4 sm:$0xff]  }
  0x13   : > { %908 = vmatpush1.bf16.msra.mxu0 %v2629_v4  ;;  %2604 = vmatpush1.bf16.msra.mxu1 %v2629_v4  ;;  %v2657_v26 = vld [vmem:[%s2855_s28 + $0x1b4] ss:$8 sps:$4 sm:$0xff]   ;;  %v2656_v27 = vld [vmem:[%s2855_s28 + $0x20] ss:$8 sps:$4 sm:$0xff]   ;;  %v2659_v28 = vld [vmem:[%s2855_s28 + $0x1b0] ss:$8 sps:$4 sm:$0xff]  }
  0x14   : > { %909 = vmatprep.subr.bf16.mxu0 %v2797_v1  ;;  %2589 = vmatprep.subr.bf16.mxu1 %v2797_v1  ;;  %v2660_v29 = vld [vmem:[%s2855_s28 + $0x34] ss:$8 sps:$4 sm:$0xff]   ;;  %v2663_v30 = vld [vmem:[%s2855_s28 + $0x1c4] ss:$8 sps:$4 sm:$0xff]   ;;  %v2662_v31 = vld [vmem:[%s2855_s28 + $0x30] ss:$8 sps:$4 sm:$0xff]  }
  0x15   : > { %v2665_v32 = vld [vmem:[%s2855_s28 + $0x1c0] ss:$8 sps:$4 sm:$0xff]   ;;  %v2666_v33 = vld [vmem:[%s2855_s28 + $0x44] ss:$8 sps:$4 sm:$0xff]   ;;  %v2669_v34 = vld [vmem:[%s2855_s28 + $0x1d4] ss:$8 sps:$4 sm:$0xff]  }
  0x16   : > { %v2668_v35 = vld [vmem:[%s2855_s28 + $0x40] ss:$8 sps:$4 sm:$0xff]   ;;  %v2671_v36 = vld [vmem:[%s2855_s28 + $0x1d0] ss:$8 sps:$4 sm:$0xff]   ;;  %v2672_v37 = vld [vmem:[%s2855_s28 + $0x54] ss:$8 sps:$4 sm:$0xff]  }
  0x17   : > { %910 = vmatpush1.bf16.msra.mxu0 %v2630_v5  ;;  %2605 = vmatpush1.bf16.msra.mxu1 %v2630_v5  ;;  %v2675_v38 = vld [vmem:[%s2855_s28 + $0x1e4] ss:$8 sps:$4 sm:$0xff]   ;;  %v2674_v39 = vld [vmem:[%s2855_s28 + $0x50] ss:$8 sps:$4 sm:$0xff]   ;;  %v2677_v40 = vld [vmem:[%s2855_s28 + $0x1e0] ss:$8 sps:$4 sm:$0xff]  }
  0x18   : > { %911 = vmatprep.subr.bf16.mxu0 %v2797_v1  ;;  %2590 = vmatprep.subr.bf16.mxu1 %v2797_v1  ;;  %v2678_v41 = vld [vmem:[%s2855_s28 + $0x64] ss:$8 sps:$4 sm:$0xff]   ;;  %v2681_v42 = vld [vmem:[%s2855_s28 + $0x1f4] ss:$8 sps:$4 sm:$0xff]   ;;  %v2680_v43 = vld [vmem:[%s2855_s28 + $0x60] ss:$8 sps:$4 sm:$0xff]  }
  0x19   : > { %v2683_v44 = vld [vmem:[%s2855_s28 + $0x1f0] ss:$8 sps:$4 sm:$0xff]   ;;  %v2684_v45 = vld [vmem:[%s2855_s28 + $0x74] ss:$8 sps:$4 sm:$0xff]   ;;  %v2687_v46 = vld [vmem:[%s2855_s28 + $0x204] ss:$8 sps:$4 sm:$0xff]  }
  0x1a   : > { %v2686_v47 = vld [vmem:[%s2855_s28 + $0x70] ss:$8 sps:$4 sm:$0xff]   ;;  %v2689_v48 = vld [vmem:[%s2855_s28 + $0x200] ss:$8 sps:$4 sm:$0xff]   ;;  %v2690_v49 = vld [vmem:[%s2855_s28 + $0x84] ss:$8 sps:$4 sm:$0xff]  }
  0x1b   : > { %912 = vmatpush1.bf16.msra.mxu0 %v2631_v7  ;;  %2606 = vmatpush1.bf16.msra.mxu1 %v2631_v7  ;;  %v2693_v50 = vld [vmem:[%s2855_s28 + $0x214] ss:$8 sps:$4 sm:$0xff]   ;;  %v2692_v51 = vld [vmem:[%s2855_s28 + $0x80] ss:$8 sps:$4 sm:$0xff]   ;;  %v2695_v52 = vld [vmem:[%s2855_s28 + $0x210] ss:$8 sps:$4 sm:$0xff]  }
  0x1c   : > { %913 = vmatprep.subr.bf16.mxu0 %v2797_v1  ;;  %2591 = vmatprep.subr.bf16.mxu1 %v2797_v1  ;;  %v2696_v53 = vld [vmem:[%s2855_s28 + $0x94] ss:$8 sps:$4 sm:$0xff]   ;;  %v2699_v54 = vld [vmem:[%s2855_s28 + $0x224] ss:$8 sps:$4 sm:$0xff]   ;;  %v2698_v55 = vld [vmem:[%s2855_s28 + $0x90] ss:$8 sps:$4 sm:$0xff]  }
  0x1d   : > { %v2701_v56 = vld [vmem:[%s2855_s28 + $0x220] ss:$8 sps:$4 sm:$0xff]   ;;  %v2702_v57 = vld [vmem:[%s2855_s28 + $0xa4] ss:$8 sps:$4 sm:$0xff]   ;;  %v2705_v58 = vld [vmem:[%s2855_s28 + $0x234] ss:$8 sps:$4 sm:$0xff]  }
  0x1e   : > { %v2704_v59 = vld [vmem:[%s2855_s28 + $0xa0] ss:$8 sps:$4 sm:$0xff]   ;;  %v2707_v60 = vld [vmem:[%s2855_s28 + $0x230] ss:$8 sps:$4 sm:$0xff]   ;;  %v2708_v61 = vld [vmem:[%s2855_s28 + $0xb4] ss:$8 sps:$4 sm:$0xff]  }
  0x1f   : > { %914 = vmatpush1.bf16.msra.mxu0 %v2632_v9  ;;  %2607 = vmatpush1.bf16.msra.mxu1 %v2632_v9  ;;  %v2711_v62 = vld [vmem:[%s2855_s28 + $0x244] ss:$8 sps:$4 sm:$0xff]   ;;  %v2710_v63 = vld [vmem:[%s2855_s28 + $0xb0] ss:$8 sps:$4 sm:$0xff]   ;;  %v2713_v0 = vld [vmem:[%s2855_s28 + $0x240] ss:$8 sps:$4 sm:$0xff]  }
  0x20   : > { %915 = vmatprep.subr.bf16.mxu0 %v2797_v1  ;;  %2592 = vmatprep.subr.bf16.mxu1 %v2797_v1  ;;  %v2717_v2 = vld [vmem:[%s2855_s28 + $0x254] ss:$8 sps:$4 sm:$0xff]   ;;  %v2716_v3 = vld [vmem:[%s2855_s28 + $0xc0] ss:$8 sps:$4 sm:$0xff]   ;;  %v2719_v4 = vld [vmem:[%s2855_s28 + $0x250] ss:$8 sps:$4 sm:$0xff]  }
  0x21   : > { %v2720_v5 = vld [vmem:[%s2855_s28 + $0xd4] ss:$8 sps:$4 sm:$0xff]   ;;  %v2723_v6 = vld [vmem:[%s2855_s28 + $0x264] ss:$8 sps:$4 sm:$0xff]   ;;  %v2722_v7 = vld [vmem:[%s2855_s28 + $0xd0] ss:$8 sps:$4 sm:$0xff]  }
  0x22   : > { %v2725_v8 = vld [vmem:[%s2855_s28 + $0x260] ss:$8 sps:$4 sm:$0xff]   ;;  %v2726_v9 = vld [vmem:[%s2855_s28 + $0xe4] ss:$8 sps:$4 sm:$0xff]  }
  0x23   : > { %916 = vmatpush1.bf16.msra.mxu0 %v2633_v10  ;;  %2608 = vmatpush1.bf16.msra.mxu1 %v2633_v10  ;;  %v2729_v10 = vld [vmem:[%s2855_s28 + $0x274] ss:$8 sps:$4 sm:$0xff]  }
  0x24   : > { %917 = vmatprep.subr.bf16.mxu0 %v2797_v1  ;;  %2593 = vmatprep.subr.bf16.mxu1 %v2797_v1 }
  0x27   : > { %918 = vmatpush1.bf16.msra.mxu0 %v2634_v11  ;;  %2609 = vmatpush1.bf16.msra.mxu1 %v2634_v11  ;;  %v2728_v11 = vld [vmem:[%s2855_s28 + $0xe0] ss:$8 sps:$4 sm:$0xff]  }
  0x28   : > { %919 = vmatprep.subr.bf16.mxu0 %v2797_v1  ;;  %2594 = vmatprep.subr.bf16.mxu1 %v2797_v1 }
  0x2b   : > { %920 = vmatpush1.bf16.msra.mxu0 %v2635_v12  ;;  %2610 = vmatpush1.bf16.msra.mxu1 %v2635_v12  ;;  %v2731_v12 = vld [vmem:[%s2855_s28 + $0x270] ss:$8 sps:$4 sm:$0xff]  }
  0x2c   : > { %921 = vmatprep.subr.bf16.mxu0 %v2797_v1  ;;  %2595 = vmatprep.subr.bf16.mxu1 %v2797_v1 }
  0x2f   : > { %922 = vmatpush1.bf16.msra.mxu0 %v2636_v13  ;;  %2611 = vmatpush1.bf16.msra.mxu1 %v2636_v13  ;;  %v2732_v13 = vld [vmem:[%s2855_s28 + $0xf4] ss:$8 sps:$4 sm:$0xff]  }
  0x30   : > { %923 = vmatprep.subr.bf16.mxu0 %v2797_v1  ;;  %2596 = vmatprep.subr.bf16.mxu1 %v2797_v1 }
  0x33   : > { %924 = vmatpush1.bf16.msra.mxu0 %v2637_v14  ;;  %2612 = vmatpush1.bf16.msra.mxu1 %v2637_v14  ;;  %v2735_v14 = vld [vmem:[%s2855_s28 + $0x284] ss:$8 sps:$4 sm:$0xff]  }
  0x34   : > { %925 = vmatprep.subr.bf16.mxu0 %v2797_v1  ;;  %2597 = vmatprep.subr.bf16.mxu1 %v2797_v1 }
  0x37   : > { %926 = vmatpush1.bf16.msra.mxu0 %v2638_v15  ;;  %2613 = vmatpush1.bf16.msra.mxu1 %v2638_v15  ;;  %v2734_v15 = vld [vmem:[%s2855_s28 + $0xf0] ss:$8 sps:$4 sm:$0xff]  }
  0x38   : > { %927 = vmatprep.subr.bf16.mxu0 %v2797_v1  ;;  %2598 = vmatprep.subr.bf16.mxu1 %v2797_v1 }
  0x3b   : > { %928 = vmatpush1.bf16.msra.mxu0 %v2639_v16  ;;  %2614 = vmatpush1.bf16.msra.mxu1 %v2639_v16  ;;  %v2737_v16 = vld [vmem:[%s2855_s28 + $0x280] ss:$8 sps:$4 sm:$0xff]  }
  0x3c   : > { %929 = vmatprep.subr.bf16.mxu0 %v2797_v1  ;;  %2599 = vmatprep.subr.bf16.mxu1 %v2797_v1 }
  0x3f   : > { %930 = vmatpush1.bf16.msra.mxu0 %v2640_v17  ;;  %2615 = vmatpush1.bf16.msra.mxu1 %v2640_v17  ;;  %v2738_v17 = vld [vmem:[%s2855_s28 + $0x104] ss:$8 sps:$4 sm:$0xff]  }
  0x40   : > { %931 = vmatprep.subr.bf16.mxu0 %v2797_v1  ;;  %2600 = vmatprep.subr.bf16.mxu1 %v2797_v1  ;;  %v2714_v1 = vld [vmem:[%s2855_s28 + $0xc4] ss:$8 sps:$4 sm:$0xff]  }
  0x43   : > { %932 = vmatpush1.bf16.msra.mxu0 %v2641_v18  ;;  %2616 = vmatpush1.bf16.msra.mxu1 %v2641_v18  ;;  %v2741_v18 = vld [vmem:[%s2855_s28 + $0x294] ss:$8 sps:$4 sm:$0xff]  }
  0x46   : > { %934 = vmatmul.mubr.bf16.vlgmr.msra.gmra.mrb[0].mxu0 %v2642_v19  ;;  %1134 = vmatmul.mubr.bf16.vlgmr.msra.gmra.mrb[0].mxu1 %v2645_v20  ;;  %v2740_v19 = vld [vmem:[%s2855_s28 + $0x100] ss:$8 sps:$4 sm:$0xff]   ;;  %v2743_v20 = vld [vmem:[%s2855_s28 + $0x290] ss:$8 sps:$4 sm:$0xff]  }
  0x47   : > { %941 = vmatprep.mubr.bf16.mxu0 %v2648_v21  ;;  %1141 = vmatprep.mubr.bf16.mxu1 %v2651_v22  ;;  %v2744_v21 = vld [vmem:[%s2855_s28 + $0x114] ss:$8 sps:$4 sm:$0xff]   ;;  %v2747_v22 = vld [vmem:[%s2855_s28 + $0x2a4] ss:$8 sps:$4 sm:$0xff]  }
  0x4e   : > { %942 = vmatmul.mubr.bf16.gmra.mrb[4].mxu0 %v2650_v23  ;;  %1142 = vmatmul.mubr.bf16.gmra.mrb[4].mxu1 %v2653_v24  ;;  %v2746_v23 = vld [vmem:[%s2855_s28 + $0x110] ss:$8 sps:$4 sm:$0xff]   ;;  %v2749_v24 = vld [vmem:[%s2855_s28 + $0x2a0] ss:$8 sps:$4 sm:$0xff]  }
  0x4f   : > { %949 = vmatprep.mubr.bf16.mxu0 %v2654_v25  ;;  %1149 = vmatprep.mubr.bf16.mxu1 %v2657_v26  ;;  %v2750_v25 = vld [vmem:[%s2855_s28 + $0x124] ss:$8 sps:$4 sm:$0xff]   ;;  %v2753_v26 = vld [vmem:[%s2855_s28 + $0x2b4] ss:$8 sps:$4 sm:$0xff]  }
  0x56   : > { %950 = vmatmul.mubr.bf16.gmra.mrb[8].mxu0 %v2656_v27  ;;  %1150 = vmatmul.mubr.bf16.gmra.mrb[8].mxu1 %v2659_v28  ;;  %v2752_v27 = vld [vmem:[%s2855_s28 + $0x120] ss:$8 sps:$4 sm:$0xff]   ;;  %v2755_v28 = vld [vmem:[%s2855_s28 + $0x2b0] ss:$8 sps:$4 sm:$0xff]  }
  0x57   : > { %957 = vmatprep.mubr.bf16.mxu0 %v2660_v29  ;;  %1157 = vmatprep.mubr.bf16.mxu1 %v2663_v30  ;;  %v2756_v29 = vld [vmem:[%s2855_s28 + $0x134] ss:$8 sps:$4 sm:$0xff]   ;;  %v2759_v30 = vld [vmem:[%s2855_s28 + $0x2c4] ss:$8 sps:$4 sm:$0xff]  }
  0x5e   : > { %958 = vmatmul.mubr.bf16.gmra.mrb[12].mxu0 %v2662_v31  ;;  %1158 = vmatmul.mubr.bf16.gmra.mrb[12].mxu1 %v2665_v32  ;;  %v2758_v31 = vld [vmem:[%s2855_s28 + $0x130] ss:$8 sps:$4 sm:$0xff]   ;;  %v2761_v32 = vld [vmem:[%s2855_s28 + $0x2c0] ss:$8 sps:$4 sm:$0xff]  }
  0x5f   : > { %965 = vmatprep.mubr.bf16.mxu0 %v2666_v33  ;;  %1165 = vmatprep.mubr.bf16.mxu1 %v2669_v34  ;;  %v2762_v33 = vld [vmem:[%s2855_s28 + $0x144] ss:$8 sps:$4 sm:$0xff]   ;;  %v2765_v34 = vld [vmem:[%s2855_s28 + $0x2d4] ss:$8 sps:$4 sm:$0xff]  }
  0x66   : > { %966 = vmatmul.mubr.bf16.gmra.mrb[16].mxu0 %v2668_v35  ;;  %1166 = vmatmul.mubr.bf16.gmra.mrb[16].mxu1 %v2671_v36  ;;  %v2764_v35 = vld [vmem:[%s2855_s28 + $0x140] ss:$8 sps:$4 sm:$0xff]   ;;  %v2767_v36 = vld [vmem:[%s2855_s28 + $0x2d0] ss:$8 sps:$4 sm:$0xff]  }
  0x67   : > { %973 = vmatprep.mubr.bf16.mxu0 %v2672_v37  ;;  %1173 = vmatprep.mubr.bf16.mxu1 %v2675_v38  ;;  %v2768_v37 = vld [vmem:[%s2855_s28 + $0x154] ss:$8 sps:$4 sm:$0xff]   ;;  %v2771_v38 = vld [vmem:[%s2855_s28 + $0x2e4] ss:$8 sps:$4 sm:$0xff]  }
  0x6e   : > { %974 = vmatmul.mubr.bf16.gmra.mrb[20].mxu0 %v2674_v39  ;;  %1174 = vmatmul.mubr.bf16.gmra.mrb[20].mxu1 %v2677_v40  ;;  %v2770_v39 = vld [vmem:[%s2855_s28 + $0x150] ss:$8 sps:$4 sm:$0xff]   ;;  %v2773_v40 = vld [vmem:[%s2855_s28 + $0x2e0] ss:$8 sps:$4 sm:$0xff]  }
  0x6f   : > { %981 = vmatprep.mubr.bf16.mxu0 %v2678_v41  ;;  %1181 = vmatprep.mubr.bf16.mxu1 %v2681_v42  ;;  %v2774_v41 = vld [vmem:[%s2855_s28 + $0x164] ss:$8 sps:$4 sm:$0xff]   ;;  %v2777_v42 = vld [vmem:[%s2855_s28 + $0x2f4] ss:$8 sps:$4 sm:$0xff]  }
  0x76   : > { %982 = vmatmul.mubr.bf16.gmra.mrb[24].mxu0 %v2680_v43  ;;  %1182 = vmatmul.mubr.bf16.gmra.mrb[24].mxu1 %v2683_v44  ;;  %v2776_v43 = vld [vmem:[%s2855_s28 + $0x160] ss:$8 sps:$4 sm:$0xff]   ;;  %v2779_v44 = vld [vmem:[%s2855_s28 + $0x2f0] ss:$8 sps:$4 sm:$0xff]  }
  0x77   : > { %989 = vmatprep.mubr.bf16.mxu0 %v2684_v45  ;;  %1189 = vmatprep.mubr.bf16.mxu1 %v2687_v46  ;;  %v2780_v45 = vld [vmem:[%s2855_s28 + $0x174] ss:$8 sps:$4 sm:$0xff]   ;;  %v2783_v46 = vld [vmem:[%s2855_s28 + $0x304] ss:$8 sps:$4 sm:$0xff]  }
  0x7e   : > { %990 = vmatmul.mubr.bf16.gmra.mrb[28].mxu0 %v2686_v47  ;;  %1190 = vmatmul.mubr.bf16.gmra.mrb[28].mxu1 %v2689_v48  ;;  %v2782_v47 = vld [vmem:[%s2855_s28 + $0x170] ss:$8 sps:$4 sm:$0xff]   ;;  %v2785_v48 = vld [vmem:[%s2855_s28 + $0x300] ss:$8 sps:$4 sm:$0xff]  }
  0x7f   : > { %997 = vmatprep.mubr.bf16.mxu0 %v2690_v49  ;;  %1197 = vmatprep.mubr.bf16.mxu1 %v2693_v50  ;;  %v2786_v49 = vld [vmem:[%s2855_s28 + $0x184] ss:$8 sps:$4 sm:$0xff]   ;;  %v2788_v50 = vld [vmem:[%s2855_s28 + $0x180] ss:$8 sps:$4 sm:$0xff]  }
  0x86   : > { %998 = vmatmul.mubr.bf16.gmra.mrb[32].mxu0 %v2692_v51  ;;  %1198 = vmatmul.mubr.bf16.gmra.mrb[32].mxu1 %v2695_v52  ;;  %v3015_v51 = vld [vmem:[%s3175_s2] ss:$0 sm:$0xff] }
  0x87   : > { %1005 = vmatprep.mubr.bf16.mxu0 %v2696_v53  ;;  %1205 = vmatprep.mubr.bf16.mxu1 %v2699_v54 }
  0x8e   : > { %1006 = vmatmul.mubr.bf16.gmra.mrb[36].mxu0 %v2698_v55  ;;  %1206 = vmatmul.mubr.bf16.gmra.mrb[36].mxu1 %v2701_v56 }
  0x8f   : > { %1013 = vmatprep.mubr.bf16.mxu0 %v2702_v57  ;;  %1213 = vmatprep.mubr.bf16.mxu1 %v2705_v58 }
  0x96   : > { %1014 = vmatmul.mubr.bf16.gmra.mrb[40].mxu0 %v2704_v59  ;;  %1214 = vmatmul.mubr.bf16.gmra.mrb[40].mxu1 %v2707_v60 }
  0x97   : > { %1021 = vmatprep.mubr.bf16.mxu0 %v2708_v61  ;;  %1221 = vmatprep.mubr.bf16.mxu1 %v2711_v62 }
  0x9e   : > { %1022 = vmatmul.mubr.bf16.gmra.mrb[44].mxu0 %v2710_v63  ;;  %1222 = vmatmul.mubr.bf16.gmra.mrb[44].mxu1 %v2713_v0 }
  0x9f   : > { %1029 = vmatprep.mubr.bf16.mxu0 %v2714_v1  ;;  %1229 = vmatprep.mubr.bf16.mxu1 %v2717_v2 }
  0xa6   : > { %1030 = vmatmul.mubr.bf16.gmra.mrb[48].mxu0 %v2716_v3  ;;  %1230 = vmatmul.mubr.bf16.gmra.mrb[48].mxu1 %v2719_v4 }
  0xa7   : > { %1037 = vmatprep.mubr.bf16.mxu0 %v2720_v5  ;;  %1237 = vmatprep.mubr.bf16.mxu1 %v2723_v6 }
  0xae   : > { %1038 = vmatmul.mubr.bf16.gmra.mrb[52].mxu0 %v2722_v7  ;;  %1238 = vmatmul.mubr.bf16.gmra.mrb[52].mxu1 %v2725_v8 }
  0xaf   : > { %1045 = vmatprep.mubr.bf16.mxu0 %v2726_v9  ;;  %1245 = vmatprep.mubr.bf16.mxu1 %v2729_v10 }
  0xb6   : > { %1046 = vmatmul.mubr.bf16.gmra.mrb[56].mxu0 %v2728_v11  ;;  %1246 = vmatmul.mubr.bf16.gmra.mrb[56].mxu1 %v2731_v12 }
  0xb7   : > { %1053 = vmatprep.mubr.bf16.mxu0 %v2732_v13  ;;  %1253 = vmatprep.mubr.bf16.mxu1 %v2735_v14 }
  0xbe   : > { %1054 = vmatmul.mubr.bf16.gmra.mrb[60].mxu0 %v2734_v15  ;;  %1254 = vmatmul.mubr.bf16.gmra.mrb[60].mxu1 %v2737_v16 }
  0xbf   : > { %1061 = vmatprep.mubr.bf16.mxu0 %v2738_v17  ;;  %1261 = vmatprep.mubr.bf16.mxu1 %v2741_v18 }
  0xc6   : > { %1062 = vmatmul.mubr.bf16.gmra.mrb[64].mxu0 %v2740_v19  ;;  %1262 = vmatmul.mubr.bf16.gmra.mrb[64].mxu1 %v2743_v20 }
  0xc7   : > { %1069 = vmatprep.mubr.bf16.mxu0 %v2744_v21  ;;  %1269 = vmatprep.mubr.bf16.mxu1 %v2747_v22 }
  0xce   : > { %1070 = vmatmul.mubr.bf16.gmra.mrb[68].mxu0 %v2746_v23  ;;  %1270 = vmatmul.mubr.bf16.gmra.mrb[68].mxu1 %v2749_v24 }
  0xcf   : > { %1077 = vmatprep.mubr.bf16.mxu0 %v2750_v25  ;;  %1277 = vmatprep.mubr.bf16.mxu1 %v2753_v26 }
  0xd6   : > { %1078 = vmatmul.mubr.bf16.gmra.mrb[72].mxu0 %v2752_v27  ;;  %1278 = vmatmul.mubr.bf16.gmra.mrb[72].mxu1 %v2755_v28 }
  0xd7   : > { %1085 = vmatprep.mubr.bf16.mxu0 %v2756_v29  ;;  %1285 = vmatprep.mubr.bf16.mxu1 %v2759_v30 }
  0xde   : > { %1086 = vmatmul.mubr.bf16.gmra.mrb[76].mxu0 %v2758_v31  ;;  %1286 = vmatmul.mubr.bf16.gmra.mrb[76].mxu1 %v2761_v32 }
  0xdf   : > { %1093 = vmatprep.mubr.bf16.mxu0 %v2762_v33  ;;  %1293 = vmatprep.mubr.bf16.mxu1 %v2765_v34 }
  0xe6   : > { %1094 = vmatmul.mubr.bf16.gmra.mrb[80].mxu0 %v2764_v35  ;;  %1294 = vmatmul.mubr.bf16.gmra.mrb[80].mxu1 %v2767_v36 }
  0xe7   : > { %1101 = vmatprep.mubr.bf16.mxu0 %v2768_v37  ;;  %1301 = vmatprep.mubr.bf16.mxu1 %v2771_v38 }
  0xee   : > { %1102 = vmatmul.mubr.bf16.gmra.mrb[84].mxu0 %v2770_v39  ;;  %1302 = vmatmul.mubr.bf16.gmra.mrb[84].mxu1 %v2773_v40 }
  0xef   : > { %1109 = vmatprep.mubr.bf16.mxu0 %v2774_v41  ;;  %1309 = vmatprep.mubr.bf16.mxu1 %v2777_v42 }
  0xf6   : > { %1110 = vmatmul.mubr.bf16.gmra.mrb[88].mxu0 %v2776_v43  ;;  %1310 = vmatmul.mubr.bf16.gmra.mrb[88].mxu1 %v2779_v44 }
  0xf7   : > { %1117 = vmatprep.mubr.bf16.mxu0 %v2780_v45  ;;  %1317 = vmatprep.mubr.bf16.mxu1 %v2783_v46 }
  0xfe   : > { %1118 = vmatmul.mubr.bf16.gmra.mrb[92].mxu0 %v2782_v47  ;;  %1318 = vmatmul.mubr.bf16.gmra.mrb[92].mxu1 %v2785_v48 }
  0xff   : > { %1125 = vmatprep.mubr.bf16.mxu0 %v2786_v49 }
 0x106   : > { %1126 = vmatmul.mubr.bf16.gmra.mrb[96].mxu0 %v2788_v50 }
 0x119   : > { %v935_v52 = vpop.f32.mrb[0].mxu0  ;;  %v1135_v53 = vpop.f32.mrb[0].mxu1 }
 0x11a   : > { %v936_v54 = vadd.f32 %v3015_v51, %v935_v52  ;;  %v937_v55 = vpop.f32.mrb[1].mxu0  ;;  %v1136_v56 = vadd.f32 %v3015_v51, %v1135_v53  ;;  %v1137_v57 = vpop.f32.mrb[1].mxu1 }
 0x11b   : > { %v938_v58 = vpop.f32.mrb[2].mxu0  ;;  %v1138_v59 = vpop.f32.mrb[2].mxu1 }
 0x11c   : > { %v939_v60 = vadd.f32 %v3015_v51, %v938_v58  ;;  %v940_v61 = vpop.f32.mrb[3].mxu0  ;;  %v1376_v62 = vmax.f32 %v1136_v56, 0.0  ;;  %v1139_v63 = vadd.f32 %v3015_v51, %v1138_v59  ;;  %v1140_v0 = vpop.f32.mrb[3].mxu1  ;;  %v1326_v1 = vmax.f32 %v936_v54, 0.0 }
 0x11e   : > { %v1327_v2 = vmax.f32 %v939_v60, 0.0  ;;  %v1377_v3 = vmax.f32 %v1139_v63, 0.0 }
 0x120   : > { %v2295_v4 = vpack.c.bf16 %v1327_v2, %v1326_v1  ;;  %v2420_v5 = vpack.c.bf16 %v1377_v3, %v1376_v62 }
 0x121   : > { %v943_v6 = vpop.f32.mrb[4].mxu0  ;;  %v1143_v7 = vpop.f32.mrb[4].mxu1 }
 0x122   : > { %2296 = vst [vmem:[%s3025_s4] sm:$0xff] %v2295_v4   ;;  %2561 = vst [vmem:[%s3025_s4 + $0xc8] sm:$0xff] %v2420_v5   ;;  %v944_v8 = vadd.f32 %v3015_v51, %v943_v6  ;;  %v945_v9 = vpop.f32.mrb[5].mxu0  ;;  %v1144_v10 = vadd.f32 %v3015_v51, %v1143_v7  ;;  %v1145_v11 = vpop.f32.mrb[5].mxu1 }
 0x123   : > { %v946_v12 = vpop.f32.mrb[6].mxu0  ;;  %v1146_v13 = vpop.f32.mrb[6].mxu1 }
 0x124   : > { %v947_v14 = vadd.f32 %v3015_v51, %v946_v12  ;;  %v948_v15 = vpop.f32.mrb[7].mxu0  ;;  %v1378_v16 = vmax.f32 %v1144_v10, 0.0  ;;  %v1147_v17 = vadd.f32 %v3015_v51, %v1146_v13  ;;  %v1148_v18 = vpop.f32.mrb[7].mxu1  ;;  %v1328_v19 = vmax.f32 %v944_v8, 0.0 }
 0x126   : > { %v1329_v20 = vmax.f32 %v947_v14, 0.0  ;;  %v1379_v21 = vmax.f32 %v1147_v17, 0.0 }
 0x128   : > { %v2300_v22 = vpack.c.bf16 %v1329_v20, %v1328_v19  ;;  %v2425_v23 = vpack.c.bf16 %v1379_v21, %v1378_v16 }
 0x129   : > { %v951_v24 = vpop.f32.mrb[8].mxu0  ;;  %v1151_v25 = vpop.f32.mrb[8].mxu1 }
 0x12a   : > { %2537 = vst [vmem:[%s3025_s4 + $0x8] sm:$0xff] %v2300_v22   ;;  %2562 = vst [vmem:[%s3025_s4 + $0xd0] sm:$0xff] %v2425_v23   ;;  %v952_v26 = vadd.f32 %v3015_v51, %v951_v24  ;;  %v953_v27 = vpop.f32.mrb[9].mxu0  ;;  %v1152_v28 = vadd.f32 %v3015_v51, %v1151_v25  ;;  %v1153_v29 = vpop.f32.mrb[9].mxu1 }
 0x12b   : > { %v954_v30 = vpop.f32.mrb[10].mxu0  ;;  %v1154_v31 = vpop.f32.mrb[10].mxu1 }
 0x12c   : > { %v955_v32 = vadd.f32 %v3015_v51, %v954_v30  ;;  %v956_v33 = vpop.f32.mrb[11].mxu0  ;;  %v1380_v34 = vmax.f32 %v1152_v28, 0.0  ;;  %v1155_v35 = vadd.f32 %v3015_v51, %v1154_v31  ;;  %v1156_v36 = vpop.f32.mrb[11].mxu1  ;;  %v1330_v37 = vmax.f32 %v952_v26, 0.0 }
 0x12e   : > { %v1331_v38 = vmax.f32 %v955_v32, 0.0  ;;  %v1381_v39 = vmax.f32 %v1155_v35, 0.0 }
 0x130   : > { %v2305_v40 = vpack.c.bf16 %v1331_v38, %v1330_v37  ;;  %v2430_v41 = vpack.c.bf16 %v1381_v39, %v1380_v34 }
 0x131   : > { %v959_v42 = vpop.f32.mrb[12].mxu0  ;;  %v1159_v43 = vpop.f32.mrb[12].mxu1 }
 0x132   : > { %2538 = vst [vmem:[%s3025_s4 + $0x10] sm:$0xff] %v2305_v40   ;;  %2563 = vst [vmem:[%s3025_s4 + $0xd8] sm:$0xff] %v2430_v41   ;;  %v960_v44 = vadd.f32 %v3015_v51, %v959_v42  ;;  %v961_v45 = vpop.f32.mrb[13].mxu0  ;;  %v1160_v46 = vadd.f32 %v3015_v51, %v1159_v43  ;;  %v1161_v47 = vpop.f32.mrb[13].mxu1 }
 0x133   : > { %v962_v48 = vpop.f32.mrb[14].mxu0  ;;  %v1162_v49 = vpop.f32.mrb[14].mxu1 }
 0x134   : > { %v963_v50 = vadd.f32 %v3015_v51, %v962_v48  ;;  %v964_v52 = vpop.f32.mrb[15].mxu0  ;;  %v1382_v53 = vmax.f32 %v1160_v46, 0.0  ;;  %v1163_v54 = vadd.f32 %v3015_v51, %v1162_v49  ;;  %v1164_v55 = vpop.f32.mrb[15].mxu1  ;;  %v1332_v56 = vmax.f32 %v960_v44, 0.0 }
 0x136   : > { %v1333_v57 = vmax.f32 %v963_v50, 0.0  ;;  %v1383_v58 = vmax.f32 %v1163_v54, 0.0 }
 0x138   : > { %v2310_v59 = vpack.c.bf16 %v1333_v57, %v1332_v56  ;;  %v2435_v60 = vpack.c.bf16 %v1383_v58, %v1382_v53 }
 0x139   : > { %v967_v61 = vpop.f32.mrb[16].mxu0  ;;  %v1167_v62 = vpop.f32.mrb[16].mxu1 }
 0x13a   : > { %2539 = vst [vmem:[%s3025_s4 + $0x18] sm:$0xff] %v2310_v59   ;;  %2564 = vst [vmem:[%s3025_s4 + $0xe0] sm:$0xff] %v2435_v60   ;;  %v968_v63 = vadd.f32 %v3015_v51, %v967_v61  ;;  %v969_v0 = vpop.f32.mrb[17].mxu0  ;;  %v1168_v1 = vadd.f32 %v3015_v51, %v1167_v62  ;;  %v1169_v2 = vpop.f32.mrb[17].mxu1 }
 0x13b   : > { %v970_v3 = vpop.f32.mrb[18].mxu0  ;;  %v1170_v4 = vpop.f32.mrb[18].mxu1 }
 0x13c   : > { %v971_v5 = vadd.f32 %v3015_v51, %v970_v3  ;;  %v972_v6 = vpop.f32.mrb[19].mxu0  ;;  %v1384_v7 = vmax.f32 %v1168_v1, 0.0  ;;  %v1171_v8 = vadd.f32 %v3015_v51, %v1170_v4  ;;  %v1172_v9 = vpop.f32.mrb[19].mxu1  ;;  %v1334_v10 = vmax.f32 %v968_v63, 0.0 }
 0x13e   : > { %v1335_v11 = vmax.f32 %v971_v5, 0.0  ;;  %v1385_v12 = vmax.f32 %v1171_v8, 0.0 }
 0x140   : > { %v2315_v13 = vpack.c.bf16 %v1335_v11, %v1334_v10  ;;  %v2440_v14 = vpack.c.bf16 %v1385_v12, %v1384_v7 }
 0x141   : > { %v975_v15 = vpop.f32.mrb[20].mxu0  ;;  %v1175_v16 = vpop.f32.mrb[20].mxu1 }
 0x142   : > { %2540 = vst [vmem:[%s3025_s4 + $0x20] sm:$0xff] %v2315_v13   ;;  %2565 = vst [vmem:[%s3025_s4 + $0xe8] sm:$0xff] %v2440_v14   ;;  %v976_v17 = vadd.f32 %v3015_v51, %v975_v15  ;;  %v977_v18 = vpop.f32.mrb[21].mxu0  ;;  %v1176_v19 = vadd.f32 %v3015_v51, %v1175_v16  ;;  %v1177_v20 = vpop.f32.mrb[21].mxu1 }
 0x143   : > { %v978_v21 = vpop.f32.mrb[22].mxu0  ;;  %v1178_v22 = vpop.f32.mrb[22].mxu1 }
 0x144   : > { %v979_v23 = vadd.f32 %v3015_v51, %v978_v21  ;;  %v980_v24 = vpop.f32.mrb[23].mxu0  ;;  %v1386_v25 = vmax.f32 %v1176_v19, 0.0  ;;  %v1179_v26 = vadd.f32 %v3015_v51, %v1178_v22  ;;  %v1180_v27 = vpop.f32.mrb[23].mxu1  ;;  %v1336_v28 = vmax.f32 %v976_v17, 0.0 }
 0x146   : > { %v1337_v29 = vmax.f32 %v979_v23, 0.0  ;;  %v1387_v30 = vmax.f32 %v1179_v26, 0.0 }
 0x148   : > { %v2320_v31 = vpack.c.bf16 %v1337_v29, %v1336_v28  ;;  %v2445_v32 = vpack.c.bf16 %v1387_v30, %v1386_v25 }
 0x149   : > { %v983_v33 = vpop.f32.mrb[24].mxu0  ;;  %v1183_v34 = vpop.f32.mrb[24].mxu1 }
 0x14a   : > { %2541 = vst [vmem:[%s3025_s4 + $0x28] sm:$0xff] %v2320_v31   ;;  %2566 = vst [vmem:[%s3025_s4 + $0xf0] sm:$0xff] %v2445_v32   ;;  %v984_v35 = vadd.f32 %v3015_v51, %v983_v33  ;;  %v985_v36 = vpop.f32.mrb[25].mxu0  ;;  %v1184_v37 = vadd.f32 %v3015_v51, %v1183_v34  ;;  %v1185_v38 = vpop.f32.mrb[25].mxu1 }
 0x14b   : > { %v986_v39 = vpop.f32.mrb[26].mxu0  ;;  %v1186_v40 = vpop.f32.mrb[26].mxu1 }
 0x14c   : > { %v987_v41 = vadd.f32 %v3015_v51, %v986_v39  ;;  %v988_v42 = vpop.f32.mrb[27].mxu0  ;;  %v1388_v43 = vmax.f32 %v1184_v37, 0.0  ;;  %v1187_v44 = vadd.f32 %v3015_v51, %v1186_v40  ;;  %v1188_v45 = vpop.f32.mrb[27].mxu1  ;;  %v1338_v46 = vmax.f32 %v984_v35, 0.0 }
 0x14e   : > { %v1339_v47 = vmax.f32 %v987_v41, 0.0  ;;  %v1389_v48 = vmax.f32 %v1187_v44, 0.0 }
 0x150   : > { %v2325_v49 = vpack.c.bf16 %v1339_v47, %v1338_v46  ;;  %v2450_v50 = vpack.c.bf16 %v1389_v48, %v1388_v43 }
 0x151   : > { %v991_v52 = vpop.f32.mrb[28].mxu0  ;;  %v1191_v53 = vpop.f32.mrb[28].mxu1 }
 0x152   : > { %2542 = vst [vmem:[%s3025_s4 + $0x30] sm:$0xff] %v2325_v49   ;;  %2567 = vst [vmem:[%s3025_s4 + $0xf8] sm:$0xff] %v2450_v50   ;;  %v992_v54 = vadd.f32 %v3015_v51, %v991_v52  ;;  %v993_v55 = vpop.f32.mrb[29].mxu0  ;;  %v1192_v56 = vadd.f32 %v3015_v51, %v1191_v53  ;;  %v1193_v57 = vpop.f32.mrb[29].mxu1 }
 0x153   : > { %v994_v58 = vpop.f32.mrb[30].mxu0  ;;  %v1194_v59 = vpop.f32.mrb[30].mxu1 }
 0x154   : > { %v995_v60 = vadd.f32 %v3015_v51, %v994_v58  ;;  %v996_v61 = vpop.f32.mrb[31].mxu0  ;;  %v1390_v62 = vmax.f32 %v1192_v56, 0.0  ;;  %v1195_v63 = vadd.f32 %v3015_v51, %v1194_v59  ;;  %v1196_v0 = vpop.f32.mrb[31].mxu1  ;;  %v1340_v1 = vmax.f32 %v992_v54, 0.0 }
 0x156   : > { %v1341_v2 = vmax.f32 %v995_v60, 0.0  ;;  %v1391_v3 = vmax.f32 %v1195_v63, 0.0 }
 0x158   : > { %v2330_v4 = vpack.c.bf16 %v1341_v2, %v1340_v1  ;;  %v2455_v5 = vpack.c.bf16 %v1391_v3, %v1390_v62 }
 0x159   : > { %v999_v6 = vpop.f32.mrb[32].mxu0  ;;  %v1199_v7 = vpop.f32.mrb[32].mxu1 }
 0x15a   : > { %2543 = vst [vmem:[%s3025_s4 + $0x38] sm:$0xff] %v2330_v4   ;;  %2568 = vst [vmem:[%s3025_s4 + $0x100] sm:$0xff] %v2455_v5   ;;  %v1000_v8 = vadd.f32 %v3015_v51, %v999_v6  ;;  %v1001_v9 = vpop.f32.mrb[33].mxu0  ;;  %v1200_v10 = vadd.f32 %v3015_v51, %v1199_v7  ;;  %v1201_v11 = vpop.f32.mrb[33].mxu1 }
 0x15b   : > { %v1002_v12 = vpop.f32.mrb[34].mxu0  ;;  %v1202_v13 = vpop.f32.mrb[34].mxu1 }
 0x15c   : > { %v1003_v14 = vadd.f32 %v3015_v51, %v1002_v12  ;;  %v1004_v15 = vpop.f32.mrb[35].mxu0  ;;  %v1392_v16 = vmax.f32 %v1200_v10, 0.0  ;;  %v1203_v17 = vadd.f32 %v3015_v51, %v1202_v13  ;;  %v1204_v18 = vpop.f32.mrb[35].mxu1  ;;  %v1342_v19 = vmax.f32 %v1000_v8, 0.0 }
 0x15e   : > { %v1343_v20 = vmax.f32 %v1003_v14, 0.0  ;;  %v1393_v21 = vmax.f32 %v1203_v17, 0.0 }
 0x160   : > { %v2335_v22 = vpack.c.bf16 %v1343_v20, %v1342_v19  ;;  %v2460_v23 = vpack.c.bf16 %v1393_v21, %v1392_v16 }
 0x161   : > { %v1007_v24 = vpop.f32.mrb[36].mxu0  ;;  %v1207_v25 = vpop.f32.mrb[36].mxu1 }
 0x162   : > { %2544 = vst [vmem:[%s3025_s4 + $0x40] sm:$0xff] %v2335_v22   ;;  %2569 = vst [vmem:[%s3025_s4 + $0x108] sm:$0xff] %v2460_v23   ;;  %v1008_v26 = vadd.f32 %v3015_v51, %v1007_v24  ;;  %v1009_v27 = vpop.f32.mrb[37].mxu0  ;;  %v1208_v28 = vadd.f32 %v3015_v51, %v1207_v25  ;;  %v1209_v29 = vpop.f32.mrb[37].mxu1 }
 0x163   : > { %v1010_v30 = vpop.f32.mrb[38].mxu0  ;;  %v1210_v31 = vpop.f32.mrb[38].mxu1 }
 0x164   : > { %v1011_v32 = vadd.f32 %v3015_v51, %v1010_v30  ;;  %v1012_v33 = vpop.f32.mrb[39].mxu0  ;;  %v1394_v34 = vmax.f32 %v1208_v28, 0.0  ;;  %v1211_v35 = vadd.f32 %v3015_v51, %v1210_v31  ;;  %v1212_v36 = vpop.f32.mrb[39].mxu1  ;;  %v1344_v37 = vmax.f32 %v1008_v26, 0.0 }
 0x166   : > { %v1345_v38 = vmax.f32 %v1011_v32, 0.0  ;;  %v1395_v39 = vmax.f32 %v1211_v35, 0.0 }
 0x168   : > { %v2340_v40 = vpack.c.bf16 %v1345_v38, %v1344_v37  ;;  %v2465_v41 = vpack.c.bf16 %v1395_v39, %v1394_v34 }
 0x169   : > { %v1015_v42 = vpop.f32.mrb[40].mxu0  ;;  %v1215_v43 = vpop.f32.mrb[40].mxu1 }
 0x16a   : > { %2545 = vst [vmem:[%s3025_s4 + $0x48] sm:$0xff] %v2340_v40   ;;  %2570 = vst [vmem:[%s3025_s4 + $0x110] sm:$0xff] %v2465_v41   ;;  %v1016_v44 = vadd.f32 %v3015_v51, %v1015_v42  ;;  %v1017_v45 = vpop.f32.mrb[41].mxu0  ;;  %v1216_v46 = vadd.f32 %v3015_v51, %v1215_v43  ;;  %v1217_v47 = vpop.f32.mrb[41].mxu1 }
 0x16b   : > { %v1018_v48 = vpop.f32.mrb[42].mxu0  ;;  %v1218_v49 = vpop.f32.mrb[42].mxu1 }
 0x16c   : > { %v1019_v50 = vadd.f32 %v3015_v51, %v1018_v48  ;;  %v1020_v52 = vpop.f32.mrb[43].mxu0  ;;  %v1396_v53 = vmax.f32 %v1216_v46, 0.0  ;;  %v1219_v54 = vadd.f32 %v3015_v51, %v1218_v49  ;;  %v1220_v55 = vpop.f32.mrb[43].mxu1  ;;  %v1346_v56 = vmax.f32 %v1016_v44, 0.0 }
 0x16e   : > { %v1347_v57 = vmax.f32 %v1019_v50, 0.0  ;;  %v1397_v58 = vmax.f32 %v1219_v54, 0.0 }
 0x170   : > { %v2345_v59 = vpack.c.bf16 %v1347_v57, %v1346_v56  ;;  %v2470_v60 = vpack.c.bf16 %v1397_v58, %v1396_v53 }
 0x171   : > { %v1023_v61 = vpop.f32.mrb[44].mxu0  ;;  %v1223_v62 = vpop.f32.mrb[44].mxu1 }
 0x172   : > { %2546 = vst [vmem:[%s3025_s4 + $0x50] sm:$0xff] %v2345_v59   ;;  %2571 = vst [vmem:[%s3025_s4 + $0x118] sm:$0xff] %v2470_v60   ;;  %v1024_v63 = vadd.f32 %v3015_v51, %v1023_v61  ;;  %v1025_v0 = vpop.f32.mrb[45].mxu0  ;;  %v1224_v1 = vadd.f32 %v3015_v51, %v1223_v62  ;;  %v1225_v2 = vpop.f32.mrb[45].mxu1 }
 0x173   : > { %v1026_v3 = vpop.f32.mrb[46].mxu0  ;;  %v1226_v4 = vpop.f32.mrb[46].mxu1 }
 0x174   : > { %v1027_v5 = vadd.f32 %v3015_v51, %v1026_v3  ;;  %v1028_v6 = vpop.f32.mrb[47].mxu0  ;;  %v1398_v7 = vmax.f32 %v1224_v1, 0.0  ;;  %v1227_v8 = vadd.f32 %v3015_v51, %v1226_v4  ;;  %v1228_v9 = vpop.f32.mrb[47].mxu1  ;;  %v1348_v10 = vmax.f32 %v1024_v63, 0.0 }
 0x176   : > { %v1349_v11 = vmax.f32 %v1027_v5, 0.0  ;;  %v1399_v12 = vmax.f32 %v1227_v8, 0.0 }
 0x178   : > { %v2350_v13 = vpack.c.bf16 %v1349_v11, %v1348_v10  ;;  %v2475_v14 = vpack.c.bf16 %v1399_v12, %v1398_v7 }
 0x179   : > { %v1031_v15 = vpop.f32.mrb[48].mxu0  ;;  %v1231_v16 = vpop.f32.mrb[48].mxu1 }
 0x17a   : > { %2547 = vst [vmem:[%s3025_s4 + $0x58] sm:$0xff] %v2350_v13   ;;  %2572 = vst [vmem:[%s3025_s4 + $0x120] sm:$0xff] %v2475_v14   ;;  %v1032_v17 = vadd.f32 %v3015_v51, %v1031_v15  ;;  %v1033_v18 = vpop.f32.mrb[49].mxu0  ;;  %v1232_v19 = vadd.f32 %v3015_v51, %v1231_v16  ;;  %v1233_v20 = vpop.f32.mrb[49].mxu1 }
 0x17b   : > { %v1034_v21 = vpop.f32.mrb[50].mxu0  ;;  %v1234_v22 = vpop.f32.mrb[50].mxu1 }
 0x17c   : > { %v1035_v23 = vadd.f32 %v3015_v51, %v1034_v21  ;;  %v1036_v24 = vpop.f32.mrb[51].mxu0  ;;  %v1400_v25 = vmax.f32 %v1232_v19, 0.0  ;;  %v1235_v26 = vadd.f32 %v3015_v51, %v1234_v22  ;;  %v1236_v27 = vpop.f32.mrb[51].mxu1  ;;  %v1350_v28 = vmax.f32 %v1032_v17, 0.0 }
 0x17e   : > { %v1351_v29 = vmax.f32 %v1035_v23, 0.0  ;;  %v1401_v30 = vmax.f32 %v1235_v26, 0.0 }
 0x180   : > { %v2355_v31 = vpack.c.bf16 %v1351_v29, %v1350_v28  ;;  %v2480_v32 = vpack.c.bf16 %v1401_v30, %v1400_v25 }
 0x181   : > { %v1039_v33 = vpop.f32.mrb[52].mxu0  ;;  %v1239_v34 = vpop.f32.mrb[52].mxu1 }
 0x182   : > { %2548 = vst [vmem:[%s3025_s4 + $0x60] sm:$0xff] %v2355_v31   ;;  %2573 = vst [vmem:[%s3025_s4 + $0x128] sm:$0xff] %v2480_v32   ;;  %v1040_v35 = vadd.f32 %v3015_v51, %v1039_v33  ;;  %v1041_v36 = vpop.f32.mrb[53].mxu0  ;;  %v1240_v37 = vadd.f32 %v3015_v51, %v1239_v34  ;;  %v1241_v38 = vpop.f32.mrb[53].mxu1 }
 0x183   : > { %v1042_v39 = vpop.f32.mrb[54].mxu0  ;;  %v1242_v40 = vpop.f32.mrb[54].mxu1 }
 0x184   : > { %v1043_v41 = vadd.f32 %v3015_v51, %v1042_v39  ;;  %v1044_v42 = vpop.f32.mrb[55].mxu0  ;;  %v1402_v43 = vmax.f32 %v1240_v37, 0.0  ;;  %v1243_v44 = vadd.f32 %v3015_v51, %v1242_v40  ;;  %v1244_v45 = vpop.f32.mrb[55].mxu1  ;;  %v1352_v46 = vmax.f32 %v1040_v35, 0.0 }
 0x186   : > { %v1353_v47 = vmax.f32 %v1043_v41, 0.0  ;;  %v1403_v48 = vmax.f32 %v1243_v44, 0.0 }
 0x188   : > { %v2360_v49 = vpack.c.bf16 %v1353_v47, %v1352_v46  ;;  %v2485_v50 = vpack.c.bf16 %v1403_v48, %v1402_v43 }
 0x189   : > { %v1047_v52 = vpop.f32.mrb[56].mxu0  ;;  %v1247_v53 = vpop.f32.mrb[56].mxu1 }
 0x18a   : > { %2549 = vst [vmem:[%s3025_s4 + $0x68] sm:$0xff] %v2360_v49   ;;  %2574 = vst [vmem:[%s3025_s4 + $0x130] sm:$0xff] %v2485_v50   ;;  %v1048_v54 = vadd.f32 %v3015_v51, %v1047_v52  ;;  %v1049_v55 = vpop.f32.mrb[57].mxu0  ;;  %v1248_v56 = vadd.f32 %v3015_v51, %v1247_v53  ;;  %v1249_v57 = vpop.f32.mrb[57].mxu1 }
 0x18b   : > { %v1050_v58 = vpop.f32.mrb[58].mxu0  ;;  %v1250_v59 = vpop.f32.mrb[58].mxu1 }
 0x18c   : > { %v1051_v60 = vadd.f32 %v3015_v51, %v1050_v58  ;;  %v1052_v61 = vpop.f32.mrb[59].mxu0  ;;  %v1404_v62 = vmax.f32 %v1248_v56, 0.0  ;;  %v1251_v63 = vadd.f32 %v3015_v51, %v1250_v59  ;;  %v1252_v0 = vpop.f32.mrb[59].mxu1  ;;  %v1354_v1 = vmax.f32 %v1048_v54, 0.0 }
 0x18e   : > { %v1355_v2 = vmax.f32 %v1051_v60, 0.0  ;;  %v1405_v3 = vmax.f32 %v1251_v63, 0.0 }
 0x190   : > { %v2365_v4 = vpack.c.bf16 %v1355_v2, %v1354_v1  ;;  %v2490_v5 = vpack.c.bf16 %v1405_v3, %v1404_v62 }
 0x191   : > { %v1055_v6 = vpop.f32.mrb[60].mxu0  ;;  %v1255_v7 = vpop.f32.mrb[60].mxu1 }
 0x192   : > { %2550 = vst [vmem:[%s3025_s4 + $0x70] sm:$0xff] %v2365_v4   ;;  %2575 = vst [vmem:[%s3025_s4 + $0x138] sm:$0xff] %v2490_v5   ;;  %v1056_v8 = vadd.f32 %v3015_v51, %v1055_v6  ;;  %v1057_v9 = vpop.f32.mrb[61].mxu0  ;;  %v1256_v10 = vadd.f32 %v3015_v51, %v1255_v7  ;;  %v1257_v11 = vpop.f32.mrb[61].mxu1 }
 0x193   : > { %v1058_v12 = vpop.f32.mrb[62].mxu0  ;;  %v1258_v13 = vpop.f32.mrb[62].mxu1 }
 0x194   : > { %v1059_v14 = vadd.f32 %v3015_v51, %v1058_v12  ;;  %v1060_v15 = vpop.f32.mrb[63].mxu0  ;;  %v1406_v16 = vmax.f32 %v1256_v10, 0.0  ;;  %v1259_v17 = vadd.f32 %v3015_v51, %v1258_v13  ;;  %v1260_v18 = vpop.f32.mrb[63].mxu1  ;;  %v1356_v19 = vmax.f32 %v1056_v8, 0.0 }
 0x196   : > { %v1357_v20 = vmax.f32 %v1059_v14, 0.0  ;;  %v1407_v21 = vmax.f32 %v1259_v17, 0.0 }
 0x198   : > { %v2370_v22 = vpack.c.bf16 %v1357_v20, %v1356_v19  ;;  %v2495_v23 = vpack.c.bf16 %v1407_v21, %v1406_v16 }
 0x199   : > { %v1063_v24 = vpop.f32.mrb[64].mxu0  ;;  %v1263_v25 = vpop.f32.mrb[64].mxu1 }
 0x19a   : > { %2551 = vst [vmem:[%s3025_s4 + $0x78] sm:$0xff] %v2370_v22   ;;  %2576 = vst [vmem:[%s3025_s4 + $0x140] sm:$0xff] %v2495_v23   ;;  %v1064_v26 = vadd.f32 %v3015_v51, %v1063_v24  ;;  %v1065_v27 = vpop.f32.mrb[65].mxu0  ;;  %v1264_v28 = vadd.f32 %v3015_v51, %v1263_v25  ;;  %v1265_v29 = vpop.f32.mrb[65].mxu1 }
 0x19b   : > { %v1066_v30 = vpop.f32.mrb[66].mxu0  ;;  %v1266_v31 = vpop.f32.mrb[66].mxu1 }
 0x19c   : > { %v1067_v32 = vadd.f32 %v3015_v51, %v1066_v30  ;;  %v1068_v33 = vpop.f32.mrb[67].mxu0  ;;  %v1408_v34 = vmax.f32 %v1264_v28, 0.0  ;;  %v1267_v35 = vadd.f32 %v3015_v51, %v1266_v31  ;;  %v1268_v36 = vpop.f32.mrb[67].mxu1  ;;  %v1358_v37 = vmax.f32 %v1064_v26, 0.0 }
 0x19e   : > { %v1359_v38 = vmax.f32 %v1067_v32, 0.0  ;;  %v1409_v39 = vmax.f32 %v1267_v35, 0.0 }
 0x1a0   : > { %v2375_v40 = vpack.c.bf16 %v1359_v38, %v1358_v37  ;;  %v2500_v41 = vpack.c.bf16 %v1409_v39, %v1408_v34 }
 0x1a1   : > { %v1071_v42 = vpop.f32.mrb[68].mxu0  ;;  %v1271_v43 = vpop.f32.mrb[68].mxu1 }
 0x1a2   : > { %2552 = vst [vmem:[%s3025_s4 + $0x80] sm:$0xff] %v2375_v40   ;;  %2577 = vst [vmem:[%s3025_s4 + $0x148] sm:$0xff] %v2500_v41   ;;  %v1072_v44 = vadd.f32 %v3015_v51, %v1071_v42  ;;  %v1073_v45 = vpop.f32.mrb[69].mxu0  ;;  %v1272_v46 = vadd.f32 %v3015_v51, %v1271_v43  ;;  %v1273_v47 = vpop.f32.mrb[69].mxu1 }
 0x1a3   : > { %v1074_v48 = vpop.f32.mrb[70].mxu0  ;;  %v1274_v49 = vpop.f32.mrb[70].mxu1 }
 0x1a4   : > { %v1075_v50 = vadd.f32 %v3015_v51, %v1074_v48  ;;  %v1076_v52 = vpop.f32.mrb[71].mxu0  ;;  %v1410_v53 = vmax.f32 %v1272_v46, 0.0  ;;  %v1275_v54 = vadd.f32 %v3015_v51, %v1274_v49  ;;  %v1276_v55 = vpop.f32.mrb[71].mxu1  ;;  %v1360_v56 = vmax.f32 %v1072_v44, 0.0 }
 0x1a6   : > { %v1361_v57 = vmax.f32 %v1075_v50, 0.0  ;;  %v1411_v58 = vmax.f32 %v1275_v54, 0.0 }
 0x1a8   : > { %v2380_v59 = vpack.c.bf16 %v1361_v57, %v1360_v56  ;;  %v2505_v60 = vpack.c.bf16 %v1411_v58, %v1410_v53 }
 0x1a9   : > { %v1079_v61 = vpop.f32.mrb[72].mxu0  ;;  %v1279_v62 = vpop.f32.mrb[72].mxu1 }
 0x1aa   : > { %2553 = vst [vmem:[%s3025_s4 + $0x88] sm:$0xff] %v2380_v59   ;;  %2578 = vst [vmem:[%s3025_s4 + $0x150] sm:$0xff] %v2505_v60   ;;  %v1080_v63 = vadd.f32 %v3015_v51, %v1079_v61  ;;  %v1081_v0 = vpop.f32.mrb[73].mxu0  ;;  %v1280_v1 = vadd.f32 %v3015_v51, %v1279_v62  ;;  %v1281_v2 = vpop.f32.mrb[73].mxu1 }
 0x1ab   : > { %v1082_v3 = vpop.f32.mrb[74].mxu0  ;;  %v1282_v4 = vpop.f32.mrb[74].mxu1 }
 0x1ac   : > { %v1083_v5 = vadd.f32 %v3015_v51, %v1082_v3  ;;  %v1084_v6 = vpop.f32.mrb[75].mxu0  ;;  %v1412_v7 = vmax.f32 %v1280_v1, 0.0  ;;  %v1283_v8 = vadd.f32 %v3015_v51, %v1282_v4  ;;  %v1284_v9 = vpop.f32.mrb[75].mxu1  ;;  %v1362_v10 = vmax.f32 %v1080_v63, 0.0 }
 0x1ae   : > { %v1363_v11 = vmax.f32 %v1083_v5, 0.0  ;;  %v1413_v12 = vmax.f32 %v1283_v8, 0.0 }
 0x1b0   : > { %v2385_v13 = vpack.c.bf16 %v1363_v11, %v1362_v10  ;;  %v2510_v14 = vpack.c.bf16 %v1413_v12, %v1412_v7 }
 0x1b1   : > { %v1087_v15 = vpop.f32.mrb[76].mxu0  ;;  %v1287_v16 = vpop.f32.mrb[76].mxu1 }
 0x1b2   : > { %2554 = vst [vmem:[%s3025_s4 + $0x90] sm:$0xff] %v2385_v13   ;;  %2579 = vst [vmem:[%s3025_s4 + $0x158] sm:$0xff] %v2510_v14   ;;  %v1088_v17 = vadd.f32 %v3015_v51, %v1087_v15  ;;  %v1089_v18 = vpop.f32.mrb[77].mxu0  ;;  %v1288_v19 = vadd.f32 %v3015_v51, %v1287_v16  ;;  %v1289_v20 = vpop.f32.mrb[77].mxu1 }
 0x1b3   : > { %v1090_v21 = vpop.f32.mrb[78].mxu0  ;;  %v1290_v22 = vpop.f32.mrb[78].mxu1 }
 0x1b4   : > { %v1091_v23 = vadd.f32 %v3015_v51, %v1090_v21  ;;  %v1092_v24 = vpop.f32.mrb[79].mxu0  ;;  %v1414_v25 = vmax.f32 %v1288_v19, 0.0  ;;  %v1291_v26 = vadd.f32 %v3015_v51, %v1290_v22  ;;  %v1292_v27 = vpop.f32.mrb[79].mxu1  ;;  %v1364_v28 = vmax.f32 %v1088_v17, 0.0 }
 0x1b6   : > { %v1365_v29 = vmax.f32 %v1091_v23, 0.0  ;;  %v1415_v30 = vmax.f32 %v1291_v26, 0.0 }
 0x1b8   : > { %v2390_v31 = vpack.c.bf16 %v1365_v29, %v1364_v28  ;;  %v2515_v32 = vpack.c.bf16 %v1415_v30, %v1414_v25 }
 0x1b9   : > { %v1095_v33 = vpop.f32.mrb[80].mxu0  ;;  %v1295_v34 = vpop.f32.mrb[80].mxu1 }
 0x1ba   : > { %2555 = vst [vmem:[%s3025_s4 + $0x98] sm:$0xff] %v2390_v31   ;;  %2580 = vst [vmem:[%s3025_s4 + $0x160] sm:$0xff] %v2515_v32   ;;  %v1096_v35 = vadd.f32 %v3015_v51, %v1095_v33  ;;  %v1097_v36 = vpop.f32.mrb[81].mxu0  ;;  %v1296_v37 = vadd.f32 %v3015_v51, %v1295_v34  ;;  %v1297_v38 = vpop.f32.mrb[81].mxu1 }
 0x1bb   : > { %v1098_v39 = vpop.f32.mrb[82].mxu0  ;;  %v1298_v40 = vpop.f32.mrb[82].mxu1 }
 0x1bc   : > { %v1099_v41 = vadd.f32 %v3015_v51, %v1098_v39  ;;  %v1100_v42 = vpop.f32.mrb[83].mxu0  ;;  %v1416_v43 = vmax.f32 %v1296_v37, 0.0  ;;  %v1299_v44 = vadd.f32 %v3015_v51, %v1298_v40  ;;  %v1300_v45 = vpop.f32.mrb[83].mxu1  ;;  %v1366_v46 = vmax.f32 %v1096_v35, 0.0 }
 0x1be   : > { %v1367_v47 = vmax.f32 %v1099_v41, 0.0  ;;  %v1417_v48 = vmax.f32 %v1299_v44, 0.0 }
 0x1c0   : > { %v2395_v49 = vpack.c.bf16 %v1367_v47, %v1366_v46  ;;  %v2520_v50 = vpack.c.bf16 %v1417_v48, %v1416_v43 }
 0x1c1   : > { %v1103_v52 = vpop.f32.mrb[84].mxu0  ;;  %v1303_v53 = vpop.f32.mrb[84].mxu1 }
 0x1c2   : > { %2556 = vst [vmem:[%s3025_s4 + $0xa0] sm:$0xff] %v2395_v49   ;;  %2581 = vst [vmem:[%s3025_s4 + $0x168] sm:$0xff] %v2520_v50   ;;  %v1104_v54 = vadd.f32 %v3015_v51, %v1103_v52  ;;  %v1105_v55 = vpop.f32.mrb[85].mxu0  ;;  %v1304_v56 = vadd.f32 %v3015_v51, %v1303_v53  ;;  %v1305_v57 = vpop.f32.mrb[85].mxu1 }
 0x1c3   : > { %v1106_v58 = vpop.f32.mrb[86].mxu0  ;;  %v1306_v59 = vpop.f32.mrb[86].mxu1 }
 0x1c4   : > { %v1107_v60 = vadd.f32 %v3015_v51, %v1106_v58  ;;  %v1108_v61 = vpop.f32.mrb[87].mxu0  ;;  %v1418_v62 = vmax.f32 %v1304_v56, 0.0  ;;  %v1307_v63 = vadd.f32 %v3015_v51, %v1306_v59  ;;  %v1308_v0 = vpop.f32.mrb[87].mxu1  ;;  %v1368_v1 = vmax.f32 %v1104_v54, 0.0 }
 0x1c6   : > { %v1369_v2 = vmax.f32 %v1107_v60, 0.0  ;;  %v1419_v3 = vmax.f32 %v1307_v63, 0.0 }
 0x1c8   : > { %v2400_v4 = vpack.c.bf16 %v1369_v2, %v1368_v1  ;;  %v2525_v5 = vpack.c.bf16 %v1419_v3, %v1418_v62 }
 0x1c9   : > { %v1111_v6 = vpop.f32.mrb[88].mxu0  ;;  %v1311_v7 = vpop.f32.mrb[88].mxu1 }
 0x1ca   : > { %2557 = vst [vmem:[%s3025_s4 + $0xa8] sm:$0xff] %v2400_v4   ;;  %2582 = vst [vmem:[%s3025_s4 + $0x170] sm:$0xff] %v2525_v5   ;;  %v1112_v8 = vadd.f32 %v3015_v51, %v1111_v6  ;;  %v1113_v9 = vpop.f32.mrb[89].mxu0  ;;  %v1312_v10 = vadd.f32 %v3015_v51, %v1311_v7  ;;  %v1313_v11 = vpop.f32.mrb[89].mxu1 }
 0x1cb   : > { %v1114_v12 = vpop.f32.mrb[90].mxu0  ;;  %v1314_v13 = vpop.f32.mrb[90].mxu1 }
 0x1cc   : > { %v1115_v14 = vadd.f32 %v3015_v51, %v1114_v12  ;;  %v1116_v15 = vpop.f32.mrb[91].mxu0  ;;  %v1420_v16 = vmax.f32 %v1312_v10, 0.0  ;;  %v1315_v17 = vadd.f32 %v3015_v51, %v1314_v13  ;;  %v1316_v18 = vpop.f32.mrb[91].mxu1  ;;  %v1370_v19 = vmax.f32 %v1112_v8, 0.0 }
 0x1ce   : > { %v1371_v20 = vmax.f32 %v1115_v14, 0.0  ;;  %v1421_v21 = vmax.f32 %v1315_v17, 0.0 }
 0x1d0   : > { %v2405_v22 = vpack.c.bf16 %v1371_v20, %v1370_v19  ;;  %v2530_v23 = vpack.c.bf16 %v1421_v21, %v1420_v16 }
 0x1d1   : > { %v1119_v24 = vpop.f32.mrb[92].mxu0  ;;  %v1319_v25 = vpop.f32.mrb[92].mxu1 }
 0x1d2   : > { %2558 = vst [vmem:[%s3025_s4 + $0xb0] sm:$0xff] %v2405_v22   ;;  %2583 = vst [vmem:[%s3025_s4 + $0x178] sm:$0xff] %v2530_v23   ;;  %v1120_v26 = vadd.f32 %v3015_v51, %v1119_v24  ;;  %v1121_v27 = vpop.f32.mrb[93].mxu0  ;;  %v1320_v28 = vadd.f32 %v3015_v51, %v1319_v25  ;;  %v1321_v29 = vpop.f32.mrb[93].mxu1 }
 0x1d3   : > { %v1122_v30 = vpop.f32.mrb[94].mxu0  ;;  %v1322_v31 = vpop.f32.mrb[94].mxu1 }
 0x1d4   : > { %v1123_v32 = vadd.f32 %v3015_v51, %v1122_v30  ;;  %v1124_v33 = vpop.f32.mrb[95].mxu0  ;;  %v1422_v34 = vmax.f32 %v1320_v28, 0.0  ;;  %v1323_v35 = vadd.f32 %v3015_v51, %v1322_v31  ;;  %v1324_v36 = vpop.f32.mrb[95].mxu1  ;;  %v1372_v37 = vmax.f32 %v1120_v26, 0.0 }
 0x1d6   : > { %v1373_v38 = vmax.f32 %v1123_v32, 0.0  ;;  %v1423_v39 = vmax.f32 %v1323_v35, 0.0 }
 0x1d8   : > { %v2410_v40 = vpack.c.bf16 %v1373_v38, %v1372_v37  ;;  %v2535_v41 = vpack.c.bf16 %v1423_v39, %v1422_v34 }
 0x1d9   : > { %v1127_v42 = vpop.f32.mrb[96].mxu0 }
 0x1da   : > { %2559 = vst [vmem:[%s3025_s4 + $0xb8] sm:$0xff] %v2410_v40   ;;  %2584 = vst [vmem:[%s3025_s4 + $0x180] sm:$0xff] %v2535_v41   ;;  %v1128_v43 = vadd.f32 %v3015_v51, %v1127_v42  ;;  %v1129_v44 = vpop.f32.mrb[97].mxu0 }
 0x1db   : > { %v1130_v45 = vpop.f32.mrb[98].mxu0 }
 0x1dc   : > { %v1131_v46 = vadd.f32 %v3015_v51, %v1130_v45  ;;  %v1132_v47 = vpop.f32.mrb[99].mxu0  ;;  %v1374_v48 = vmax.f32 %v1128_v43, 0.0 }
 0x1de   : > { %v1375_v49 = vmax.f32 %v1131_v46, 0.0 }
 0x1e0   : > { %v2415_v50 = vpack.c.bf16 %v1375_v49, %v1374_v48 }
 0x1e2   : > { %2560 = vst [vmem:[%s3025_s4 + $0xc0] sm:$0xff] %v2415_v50  }
 0x1e3 PF: > { %s13_s12 = sadd.s32 1, %s2795_s12  }
 0x1e4   : > { %p10_p4 = scmp.ge.s32.totalorder %s13_s12, 4  }
 0x1e6   :  { %12 = sbr.rel (!%p10_p4) target bundleno = 1 (0x1), region = 62 }

// kernel: base_cnn_forward.7
= control target key start
LH: loop header
LB: loop body
LE: loop exit
PB: predicated region body
PF: predicated region fallthrough
CT: control target
= control target key end

     0   :  { %s3471_s1 = inlined_call_operand.vmem [shape: bf16[512,256], index: 1, kind: input, shape index: {}]   ;;  %s3472_s0 = inlined_call_operand.vmem [shape: bf16[392,512], index: 0, kind: input, shape index: {}]   ;;  %s3473_s2 = inlined_call_operand.vmem [shape: f32[1,256], index: 2, kind: input, shape index: {}]   ;;  %s3474_s3 = inlined_call_operand.vmem [shape: bf16[392,256], index: 3, kind: output, shape index: {}]  }
   0x1   :  { %v2469_v0 = vld [vmem:[%s3471_s1 + $0x4] ss:$8 sps:$4 sm:$0xff]   ;;  %v2473_v2 = vld [vmem:[%s3471_s1] ss:$8 sps:$4 sm:$0xff]   ;;  %v2475_v4 = vld [vmem:[%s3471_s1 + $0x14] ss:$8 sps:$4 sm:$0xff]  }
   0x2   :  { %v2471_v1 = vld [vmem:[%s3471_s1 + $0x104] ss:$8 sps:$4 sm:$0xff]   ;;  %1002 = vmatprep.subr.bf16.mxu1 %v2469_v0  ;;  %v2474_v3 = vld [vmem:[%s3471_s1 + $0x100] ss:$8 sps:$4 sm:$0xff]   ;;  %v2477_v5 = vld [vmem:[%s3471_s1 + $0x114] ss:$8 sps:$4 sm:$0xff]  }
   0x3   :  { %1283 = vmatprep.subr.bf16.mxu0 %v2471_v1  ;;  %1003 = vmatpush1.bf16.msra.mxu1 %v2473_v2  ;;  %v2479_v6 = vld [vmem:[%s3471_s1 + $0x10] ss:$8 sps:$4 sm:$0xff]   ;;  %v2481_v8 = vld [vmem:[%s3471_s1 + $0x24] ss:$8 sps:$4 sm:$0xff]   ;;  %v2485_v10 = vld [vmem:[%s3471_s1 + $0x20] ss:$8 sps:$4 sm:$0xff]  }
   0x4   :  { %1284 = vmatpush1.bf16.msra.mxu0 %v2474_v3  ;;  %1004 = vmatprep.subr.bf16.mxu1 %v2475_v4  ;;  %v2480_v7 = vld [vmem:[%s3471_s1 + $0x110] ss:$8 sps:$4 sm:$0xff]   ;;  %v2483_v9 = vld [vmem:[%s3471_s1 + $0x124] ss:$8 sps:$4 sm:$0xff]   ;;  %v2486_v11 = vld [vmem:[%s3471_s1 + $0x120] ss:$8 sps:$4 sm:$0xff]  }
   0x5   :  { %1285 = vmatprep.subr.bf16.mxu0 %v2477_v5  ;;  %v2487_v12 = vld [vmem:[%s3471_s1 + $0x34] ss:$8 sps:$4 sm:$0xff]   ;;  %v2491_v14 = vld [vmem:[%s3471_s1 + $0x30] ss:$8 sps:$4 sm:$0xff]   ;;  %v2493_v16 = vld [vmem:[%s3471_s1 + $0x44] ss:$8 sps:$4 sm:$0xff]  }
   0x6   :  { %v2489_v13 = vld [vmem:[%s3471_s1 + $0x134] ss:$8 sps:$4 sm:$0xff]   ;;  %v2492_v15 = vld [vmem:[%s3471_s1 + $0x130] ss:$8 sps:$4 sm:$0xff]   ;;  %v2495_v17 = vld [vmem:[%s3471_s1 + $0x144] ss:$8 sps:$4 sm:$0xff]  }
   0x7   :  { %1005 = vmatpush1.bf16.msra.mxu1 %v2479_v6  ;;  %v2497_v18 = vld [vmem:[%s3471_s1 + $0x40] ss:$8 sps:$4 sm:$0xff]   ;;  %v2499_v20 = vld [vmem:[%s3471_s1 + $0x54] ss:$8 sps:$4 sm:$0xff]   ;;  %v2503_v22 = vld [vmem:[%s3471_s1 + $0x50] ss:$8 sps:$4 sm:$0xff]  }
   0x8   :  { %1286 = vmatpush1.bf16.msra.mxu0 %v2480_v7  ;;  %1006 = vmatprep.subr.bf16.mxu1 %v2481_v8  ;;  %v2498_v19 = vld [vmem:[%s3471_s1 + $0x140] ss:$8 sps:$4 sm:$0xff]   ;;  %v2501_v21 = vld [vmem:[%s3471_s1 + $0x154] ss:$8 sps:$4 sm:$0xff]   ;;  %v2504_v23 = vld [vmem:[%s3471_s1 + $0x150] ss:$8 sps:$4 sm:$0xff]  }
   0x9   :  { %1287 = vmatprep.subr.bf16.mxu0 %v2483_v9  ;;  %v2505_v24 = vld [vmem:[%s3471_s1 + $0x64] ss:$8 sps:$4 sm:$0xff]   ;;  %v2509_v26 = vld [vmem:[%s3471_s1 + $0x60] ss:$8 sps:$4 sm:$0xff]   ;;  %v2511_v28 = vld [vmem:[%s3471_s1 + $0x74] ss:$8 sps:$4 sm:$0xff]  }
   0xa   :  { %v2507_v25 = vld [vmem:[%s3471_s1 + $0x164] ss:$8 sps:$4 sm:$0xff]   ;;  %v2510_v27 = vld [vmem:[%s3471_s1 + $0x160] ss:$8 sps:$4 sm:$0xff]   ;;  %v2513_v29 = vld [vmem:[%s3471_s1 + $0x174] ss:$8 sps:$4 sm:$0xff]  }
   0xb   :  { %1007 = vmatpush1.bf16.msra.mxu1 %v2485_v10  ;;  %v2515_v30 = vld [vmem:[%s3471_s1 + $0x70] ss:$8 sps:$4 sm:$0xff]   ;;  %v2517_v32 = vld [vmem:[%s3471_s1 + $0x84] ss:$8 sps:$4 sm:$0xff]   ;;  %v2521_v34 = vld [vmem:[%s3471_s1 + $0x80] ss:$8 sps:$4 sm:$0xff]  }
   0xc   :  { %1288 = vmatpush1.bf16.msra.mxu0 %v2486_v11  ;;  %1008 = vmatprep.subr.bf16.mxu1 %v2487_v12  ;;  %v2516_v31 = vld [vmem:[%s3471_s1 + $0x170] ss:$8 sps:$4 sm:$0xff]   ;;  %v2519_v33 = vld [vmem:[%s3471_s1 + $0x184] ss:$8 sps:$4 sm:$0xff]   ;;  %v2522_v35 = vld [vmem:[%s3471_s1 + $0x180] ss:$8 sps:$4 sm:$0xff]  }
   0xd   :  { %1289 = vmatprep.subr.bf16.mxu0 %v2489_v13  ;;  %v2523_v36 = vld [vmem:[%s3471_s1 + $0x94] ss:$8 sps:$4 sm:$0xff]   ;;  %v2527_v38 = vld [vmem:[%s3471_s1 + $0x90] ss:$8 sps:$4 sm:$0xff]   ;;  %v2529_v40 = vld [vmem:[%s3471_s1 + $0xa4] ss:$8 sps:$4 sm:$0xff]  }
   0xe   :  { %v2525_v37 = vld [vmem:[%s3471_s1 + $0x194] ss:$8 sps:$4 sm:$0xff]   ;;  %v2528_v39 = vld [vmem:[%s3471_s1 + $0x190] ss:$8 sps:$4 sm:$0xff]   ;;  %v2531_v41 = vld [vmem:[%s3471_s1 + $0x1a4] ss:$8 sps:$4 sm:$0xff]  }
   0xf   :  { %1009 = vmatpush1.bf16.msra.mxu1 %v2491_v14  ;;  %v2533_v42 = vld [vmem:[%s3471_s1 + $0xa0] ss:$8 sps:$4 sm:$0xff]   ;;  %v2535_v44 = vld [vmem:[%s3471_s1 + $0xb4] ss:$8 sps:$4 sm:$0xff]   ;;  %v2539_v46 = vld [vmem:[%s3471_s1 + $0xb0] ss:$8 sps:$4 sm:$0xff]  }
  0x10   :  { %1290 = vmatpush1.bf16.msra.mxu0 %v2492_v15  ;;  %1010 = vmatprep.subr.bf16.mxu1 %v2493_v16  ;;  %v2534_v43 = vld [vmem:[%s3471_s1 + $0x1a0] ss:$8 sps:$4 sm:$0xff]   ;;  %v2537_v45 = vld [vmem:[%s3471_s1 + $0x1b4] ss:$8 sps:$4 sm:$0xff]   ;;  %v2540_v47 = vld [vmem:[%s3471_s1 + $0x1b0] ss:$8 sps:$4 sm:$0xff]  }
  0x11   :  { %1291 = vmatprep.subr.bf16.mxu0 %v2495_v17  ;;  %v2541_v48 = vld [vmem:[%s3471_s1 + $0xc4] ss:$8 sps:$4 sm:$0xff]   ;;  %v2545_v52 = vld [vmem:[%s3471_s1 + $0xc0] ss:$8 sps:$4 sm:$0xff]   ;;  %v2547_v54 = vld [vmem:[%s3471_s1 + $0xd4] ss:$8 sps:$4 sm:$0xff]  }
  0x12   :  { %v2567_v49 = vld [vmem:[%s3472_s0 + $0x4] ss:$16 sps:$4 sm:$0xff]   ;;  %v2570_v51 = vld [vmem:[%s3472_s0 + $0xc] ss:$16 sps:$4 sm:$0xff]   ;;  %v2546_v53 = vld [vmem:[%s3471_s1 + $0x1c0] ss:$8 sps:$4 sm:$0xff]  }
  0x13   :  { %1011 = vmatpush1.bf16.msra.mxu1 %v2497_v18  ;;  %v2543_v50 = vld [vmem:[%s3471_s1 + $0x1c4] ss:$8 sps:$4 sm:$0xff]   ;;  %1034 = vmatprep.mubr.bf16.mxu1 %v2567_v49  ;;  %v2549_v55 = vld [vmem:[%s3471_s1 + $0x1d4] ss:$8 sps:$4 sm:$0xff]   ;;  %v2551_v56 = vld [vmem:[%s3471_s1 + $0xd0] ss:$8 sps:$4 sm:$0xff]  }
  0x14   :  { %1292 = vmatpush1.bf16.msra.mxu0 %v2498_v19  ;;  %1012 = vmatprep.subr.bf16.mxu1 %v2499_v20  ;;  %v2552_v57 = vld [vmem:[%s3471_s1 + $0x1d0] ss:$8 sps:$4 sm:$0xff]   ;;  %v2553_v58 = vld [vmem:[%s3471_s1 + $0xe4] ss:$8 sps:$4 sm:$0xff]   ;;  %v2557_v60 = vld [vmem:[%s3471_s1 + $0xe0] ss:$8 sps:$4 sm:$0xff]  }
  0x15   :  { %1293 = vmatprep.subr.bf16.mxu0 %v2501_v21  ;;  %1315 = vmatprep.mubr.bf16.mxu0 %v2570_v51  ;;  %v2555_v59 = vld [vmem:[%s3471_s1 + $0x1e4] ss:$8 sps:$4 sm:$0xff]   ;;  %v2558_v61 = vld [vmem:[%s3471_s1 + $0x1e0] ss:$8 sps:$4 sm:$0xff]   ;;  %v2559_v62 = vld [vmem:[%s3471_s1 + $0xf4] ss:$8 sps:$4 sm:$0xff]  }
  0x16   :  { %v2561_v63 = vld [vmem:[%s3471_s1 + $0x1f4] ss:$8 sps:$4 sm:$0xff]   ;;  %v2563_v0 = vld [vmem:[%s3471_s1 + $0xf0] ss:$8 sps:$4 sm:$0xff]  }
  0x17   :  { %1013 = vmatpush1.bf16.msra.mxu1 %v2503_v22  ;;  %v2564_v1 = vld [vmem:[%s3471_s1 + $0x1f0] ss:$8 sps:$4 sm:$0xff]   ;;  %v2571_v4 = vld [vmem:[%s3472_s0 + $0x24] ss:$16 sps:$4 sm:$0xff]   ;;  %v2573_v5 = vld [vmem:[%s3472_s0 + $0x2c] ss:$16 sps:$4 sm:$0xff]  }
  0x18   :  { %1294 = vmatpush1.bf16.msra.mxu0 %v2504_v23  ;;  %1014 = vmatprep.subr.bf16.mxu1 %v2505_v24  ;;  %v2565_v2 = vld [vmem:[%s3472_s0] ss:$16 sps:$4 sm:$0xff]   ;;  %v2568_v3 = vld [vmem:[%s3472_s0 + $0x8] ss:$16 sps:$4 sm:$0xff]   ;;  %v2577_v8 = vld [vmem:[%s3472_s0 + $0x44] ss:$16 sps:$4 sm:$0xff]  }
  0x19   :  { %1295 = vmatprep.subr.bf16.mxu0 %v2507_v25  ;;  %v2575_v6 = vld [vmem:[%s3472_s0 + $0x20] ss:$16 sps:$4 sm:$0xff]   ;;  %v2576_v7 = vld [vmem:[%s3472_s0 + $0x28] ss:$16 sps:$4 sm:$0xff]   ;;  %v2579_v9 = vld [vmem:[%s3472_s0 + $0x4c] ss:$16 sps:$4 sm:$0xff]  }
  0x1a   :  { %v2581_v10 = vld [vmem:[%s3472_s0 + $0x40] ss:$16 sps:$4 sm:$0xff]   ;;  %v2582_v11 = vld [vmem:[%s3472_s0 + $0x48] ss:$16 sps:$4 sm:$0xff]   ;;  %v2583_v12 = vld [vmem:[%s3472_s0 + $0x64] ss:$16 sps:$4 sm:$0xff]  }
  0x1b   :  { %1015 = vmatpush1.bf16.msra.mxu1 %v2509_v26  ;;  %v2585_v13 = vld [vmem:[%s3472_s0 + $0x6c] ss:$16 sps:$4 sm:$0xff]   ;;  %v2587_v14 = vld [vmem:[%s3472_s0 + $0x60] ss:$16 sps:$4 sm:$0xff]   ;;  %v2588_v15 = vld [vmem:[%s3472_s0 + $0x68] ss:$16 sps:$4 sm:$0xff]  }
  0x1c   :  { %1296 = vmatpush1.bf16.msra.mxu0 %v2510_v27  ;;  %1016 = vmatprep.subr.bf16.mxu1 %v2511_v28  ;;  %v2589_v16 = vld [vmem:[%s3472_s0 + $0x84] ss:$16 sps:$4 sm:$0xff]   ;;  %v2591_v17 = vld [vmem:[%s3472_s0 + $0x8c] ss:$16 sps:$4 sm:$0xff]   ;;  %v2593_v18 = vld [vmem:[%s3472_s0 + $0x80] ss:$16 sps:$4 sm:$0xff]  }
  0x1d   :  { %1297 = vmatprep.subr.bf16.mxu0 %v2513_v29  ;;  %v2594_v19 = vld [vmem:[%s3472_s0 + $0x88] ss:$16 sps:$4 sm:$0xff]   ;;  %v2595_v20 = vld [vmem:[%s3472_s0 + $0xa4] ss:$16 sps:$4 sm:$0xff]   ;;  %v2597_v21 = vld [vmem:[%s3472_s0 + $0xac] ss:$16 sps:$4 sm:$0xff]  }
  0x1e   :  { %v2599_v22 = vld [vmem:[%s3472_s0 + $0xa0] ss:$16 sps:$4 sm:$0xff]   ;;  %v2600_v23 = vld [vmem:[%s3472_s0 + $0xa8] ss:$16 sps:$4 sm:$0xff]   ;;  %v2601_v24 = vld [vmem:[%s3472_s0 + $0xc4] ss:$16 sps:$4 sm:$0xff]  }
  0x1f   :  { %1017 = vmatpush1.bf16.msra.mxu1 %v2515_v30  ;;  %v2603_v25 = vld [vmem:[%s3472_s0 + $0xcc] ss:$16 sps:$4 sm:$0xff]   ;;  %v2605_v26 = vld [vmem:[%s3472_s0 + $0xc0] ss:$16 sps:$4 sm:$0xff]   ;;  %v2606_v27 = vld [vmem:[%s3472_s0 + $0xc8] ss:$16 sps:$4 sm:$0xff]  }
  0x20   :  { %1298 = vmatpush1.bf16.msra.mxu0 %v2516_v31  ;;  %1018 = vmatprep.subr.bf16.mxu1 %v2517_v32  ;;  %v2607_v28 = vld [vmem:[%s3472_s0 + $0xe4] ss:$16 sps:$4 sm:$0xff]   ;;  %v2609_v29 = vld [vmem:[%s3472_s0 + $0xec] ss:$16 sps:$4 sm:$0xff]   ;;  %v2611_v30 = vld [vmem:[%s3472_s0 + $0xe0] ss:$16 sps:$4 sm:$0xff]  }
  0x21   :  { %1299 = vmatprep.subr.bf16.mxu0 %v2519_v33  ;;  %v2612_v31 = vld [vmem:[%s3472_s0 + $0xe8] ss:$16 sps:$4 sm:$0xff]   ;;  %v2613_v32 = vld [vmem:[%s3472_s0 + $0x104] ss:$16 sps:$4 sm:$0xff]   ;;  %v2615_v33 = vld [vmem:[%s3472_s0 + $0x10c] ss:$16 sps:$4 sm:$0xff]  }
  0x22   :  { %v2639_v49 = vld [vmem:[%s3472_s0 + $0x18c] ss:$16 sps:$4 sm:$0xff]   ;;  %v2642_v51 = vld [vmem:[%s3472_s0 + $0x188] ss:$16 sps:$4 sm:$0xff]  }
  0x23   :  { %1019 = vmatpush1.bf16.msra.mxu1 %v2521_v34  ;;  %v2617_v34 = vld [vmem:[%s3472_s0 + $0x100] ss:$16 sps:$4 sm:$0xff]  }
  0x24   :  { %1300 = vmatpush1.bf16.msra.mxu0 %v2522_v35  ;;  %1020 = vmatprep.subr.bf16.mxu1 %v2523_v36  ;;  %v2618_v35 = vld [vmem:[%s3472_s0 + $0x108] ss:$16 sps:$4 sm:$0xff]   ;;  %v2619_v36 = vld [vmem:[%s3472_s0 + $0x124] ss:$16 sps:$4 sm:$0xff]  }
  0x25   :  { %1301 = vmatprep.subr.bf16.mxu0 %v2525_v37  ;;  %v2621_v37 = vld [vmem:[%s3472_s0 + $0x12c] ss:$16 sps:$4 sm:$0xff]  }
  0x27   :  { %1021 = vmatpush1.bf16.msra.mxu1 %v2527_v38  ;;  %v2623_v38 = vld [vmem:[%s3472_s0 + $0x120] ss:$16 sps:$4 sm:$0xff]  }
  0x28   :  { %1302 = vmatpush1.bf16.msra.mxu0 %v2528_v39  ;;  %1022 = vmatprep.subr.bf16.mxu1 %v2529_v40  ;;  %v2624_v39 = vld [vmem:[%s3472_s0 + $0x128] ss:$16 sps:$4 sm:$0xff]   ;;  %v2625_v40 = vld [vmem:[%s3472_s0 + $0x144] ss:$16 sps:$4 sm:$0xff]  }
  0x29   :  { %1303 = vmatprep.subr.bf16.mxu0 %v2531_v41  ;;  %v2627_v41 = vld [vmem:[%s3472_s0 + $0x14c] ss:$16 sps:$4 sm:$0xff]  }
  0x2b   :  { %1023 = vmatpush1.bf16.msra.mxu1 %v2533_v42  ;;  %v2629_v42 = vld [vmem:[%s3472_s0 + $0x140] ss:$16 sps:$4 sm:$0xff]  }
  0x2c   :  { %1304 = vmatpush1.bf16.msra.mxu0 %v2534_v43  ;;  %1024 = vmatprep.subr.bf16.mxu1 %v2535_v44  ;;  %v2630_v43 = vld [vmem:[%s3472_s0 + $0x148] ss:$16 sps:$4 sm:$0xff]   ;;  %v2631_v44 = vld [vmem:[%s3472_s0 + $0x164] ss:$16 sps:$4 sm:$0xff]  }
  0x2d   :  { %1305 = vmatprep.subr.bf16.mxu0 %v2537_v45  ;;  %v2633_v45 = vld [vmem:[%s3472_s0 + $0x16c] ss:$16 sps:$4 sm:$0xff]  }
  0x2f   :  { %1025 = vmatpush1.bf16.msra.mxu1 %v2539_v46  ;;  %v2635_v46 = vld [vmem:[%s3472_s0 + $0x160] ss:$16 sps:$4 sm:$0xff]  }
  0x30   :  { %1306 = vmatpush1.bf16.msra.mxu0 %v2540_v47  ;;  %1026 = vmatprep.subr.bf16.mxu1 %v2541_v48  ;;  %v2636_v47 = vld [vmem:[%s3472_s0 + $0x168] ss:$16 sps:$4 sm:$0xff]   ;;  %v2637_v48 = vld [vmem:[%s3472_s0 + $0x184] ss:$16 sps:$4 sm:$0xff]  }
  0x31   :  { %1307 = vmatprep.subr.bf16.mxu0 %v2543_v50  ;;  %v2641_v50 = vld [vmem:[%s3472_s0 + $0x180] ss:$16 sps:$4 sm:$0xff]  }
  0x33   :  { %1027 = vmatpush1.bf16.msra.mxu1 %v2545_v52  ;;  %v2643_v52 = vld [vmem:[%s3472_s0 + $0x1a4] ss:$16 sps:$4 sm:$0xff]  }
  0x34   :  { %1308 = vmatpush1.bf16.msra.mxu0 %v2546_v53  ;;  %1028 = vmatprep.subr.bf16.mxu1 %v2547_v54  ;;  %v2645_v53 = vld [vmem:[%s3472_s0 + $0x1ac] ss:$16 sps:$4 sm:$0xff]   ;;  %v2647_v54 = vld [vmem:[%s3472_s0 + $0x1a0] ss:$16 sps:$4 sm:$0xff]  }
  0x35   :  { %1309 = vmatprep.subr.bf16.mxu0 %v2549_v55  ;;  %v2648_v55 = vld [vmem:[%s3472_s0 + $0x1a8] ss:$16 sps:$4 sm:$0xff]  }
  0x37   :  { %1029 = vmatpush1.bf16.msra.mxu1 %v2551_v56  ;;  %v2649_v56 = vld [vmem:[%s3472_s0 + $0x1c4] ss:$16 sps:$4 sm:$0xff]  }
  0x38   :  { %1310 = vmatpush1.bf16.msra.mxu0 %v2552_v57  ;;  %1030 = vmatprep.subr.bf16.mxu1 %v2553_v58  ;;  %v2651_v57 = vld [vmem:[%s3472_s0 + $0x1cc] ss:$16 sps:$4 sm:$0xff]   ;;  %v2653_v58 = vld [vmem:[%s3472_s0 + $0x1c0] ss:$16 sps:$4 sm:$0xff]  }
  0x39   :  { %1311 = vmatprep.subr.bf16.mxu0 %v2555_v59  ;;  %v2654_v59 = vld [vmem:[%s3472_s0 + $0x1c8] ss:$16 sps:$4 sm:$0xff]  }
  0x3b   :  { %1031 = vmatpush1.bf16.msra.mxu1 %v2557_v60  ;;  %v2655_v60 = vld [vmem:[%s3472_s0 + $0x1e4] ss:$16 sps:$4 sm:$0xff]  }
  0x3c   :  { %1312 = vmatpush1.bf16.msra.mxu0 %v2558_v61  ;;  %1032 = vmatprep.subr.bf16.mxu1 %v2559_v62  ;;  %v2657_v61 = vld [vmem:[%s3472_s0 + $0x1ec] ss:$16 sps:$4 sm:$0xff]   ;;  %v2659_v62 = vld [vmem:[%s3472_s0 + $0x1e0] ss:$16 sps:$4 sm:$0xff]  }
  0x3d   :  { %1313 = vmatprep.subr.bf16.mxu0 %v2561_v63  ;;  %v2660_v63 = vld [vmem:[%s3472_s0 + $0x1e8] ss:$16 sps:$4 sm:$0xff]  }
  0x3f   :  { %1033 = vmatpush1.bf16.msra.mxu1 %v2563_v0  ;;  %v2661_v0 = vld [vmem:[%s3472_s0 + $0x204] ss:$16 sps:$4 sm:$0xff]  }
  0x40   :  { %1314 = vmatpush1.bf16.msra.mxu0 %v2564_v1  ;;  %v2663_v1 = vld [vmem:[%s3472_s0 + $0x20c] ss:$16 sps:$4 sm:$0xff]  }
  0x42   :  { %1035 = vmatmul.mubr.bf16.vlgmr.msra.gmra.mrb[0].mxu1 %v2565_v2  ;;  %v2665_v2 = vld [vmem:[%s3472_s0 + $0x200] ss:$16 sps:$4 sm:$0xff]  }
  0x43   :  { %1316 = vmatmul.mubr.bf16.vlgmr.msra.gmra.mrb[0].mxu0 %v2568_v3  ;;  %1044 = vmatprep.mubr.bf16.mxu1 %v2571_v4  ;;  %v2666_v3 = vld [vmem:[%s3472_s0 + $0x208] ss:$16 sps:$4 sm:$0xff]   ;;  %v2667_v4 = vld [vmem:[%s3472_s0 + $0x224] ss:$16 sps:$4 sm:$0xff]  }
  0x44   :  { %1325 = vmatprep.mubr.bf16.mxu0 %v2573_v5  ;;  %v2669_v5 = vld [vmem:[%s3472_s0 + $0x22c] ss:$16 sps:$4 sm:$0xff]  }
  0x4a   :  { %1045 = vmatmul.mubr.bf16.gmra.mrb[4].mxu1 %v2575_v6  ;;  %v2671_v6 = vld [vmem:[%s3472_s0 + $0x220] ss:$16 sps:$4 sm:$0xff]  }
  0x4b   :  { %1326 = vmatmul.mubr.bf16.gmra.mrb[4].mxu0 %v2576_v7  ;;  %1054 = vmatprep.mubr.bf16.mxu1 %v2577_v8  ;;  %v2672_v7 = vld [vmem:[%s3472_s0 + $0x228] ss:$16 sps:$4 sm:$0xff]   ;;  %v2673_v8 = vld [vmem:[%s3472_s0 + $0x244] ss:$16 sps:$4 sm:$0xff]  }
  0x4c   :  { %1335 = vmatprep.mubr.bf16.mxu0 %v2579_v9  ;;  %v2675_v9 = vld [vmem:[%s3472_s0 + $0x24c] ss:$16 sps:$4 sm:$0xff]  }
  0x52   :  { %1055 = vmatmul.mubr.bf16.gmra.mrb[8].mxu1 %v2581_v10  ;;  %v2677_v10 = vld [vmem:[%s3472_s0 + $0x240] ss:$16 sps:$4 sm:$0xff]  }
  0x53   :  { %1336 = vmatmul.mubr.bf16.gmra.mrb[8].mxu0 %v2582_v11  ;;  %1064 = vmatprep.mubr.bf16.mxu1 %v2583_v12  ;;  %v2678_v11 = vld [vmem:[%s3472_s0 + $0x248] ss:$16 sps:$4 sm:$0xff]   ;;  %v2679_v12 = vld [vmem:[%s3472_s0 + $0x264] ss:$16 sps:$4 sm:$0xff]  }
  0x54   :  { %1345 = vmatprep.mubr.bf16.mxu0 %v2585_v13  ;;  %v2681_v13 = vld [vmem:[%s3472_s0 + $0x26c] ss:$16 sps:$4 sm:$0xff]  }
  0x5a   :  { %1065 = vmatmul.mubr.bf16.gmra.mrb[12].mxu1 %v2587_v14  ;;  %v2683_v14 = vld [vmem:[%s3472_s0 + $0x260] ss:$16 sps:$4 sm:$0xff]  }
  0x5b   :  { %1346 = vmatmul.mubr.bf16.gmra.mrb[12].mxu0 %v2588_v15  ;;  %1074 = vmatprep.mubr.bf16.mxu1 %v2589_v16  ;;  %v2684_v15 = vld [vmem:[%s3472_s0 + $0x268] ss:$16 sps:$4 sm:$0xff]   ;;  %v2685_v16 = vld [vmem:[%s3472_s0 + $0x284] ss:$16 sps:$4 sm:$0xff]  }
  0x5c   :  { %1355 = vmatprep.mubr.bf16.mxu0 %v2591_v17  ;;  %v2687_v17 = vld [vmem:[%s3472_s0 + $0x28c] ss:$16 sps:$4 sm:$0xff]  }
  0x62   :  { %1075 = vmatmul.mubr.bf16.gmra.mrb[16].mxu1 %v2593_v18  ;;  %v2689_v18 = vld [vmem:[%s3472_s0 + $0x280] ss:$16 sps:$4 sm:$0xff]  }
  0x63   :  { %1356 = vmatmul.mubr.bf16.gmra.mrb[16].mxu0 %v2594_v19  ;;  %1084 = vmatprep.mubr.bf16.mxu1 %v2595_v20  ;;  %v2690_v19 = vld [vmem:[%s3472_s0 + $0x288] ss:$16 sps:$4 sm:$0xff]   ;;  %v2691_v20 = vld [vmem:[%s3472_s0 + $0x2a4] ss:$16 sps:$4 sm:$0xff]  }
  0x64   :  { %1365 = vmatprep.mubr.bf16.mxu0 %v2597_v21  ;;  %v2693_v21 = vld [vmem:[%s3472_s0 + $0x2ac] ss:$16 sps:$4 sm:$0xff]  }
  0x6a   :  { %1085 = vmatmul.mubr.bf16.gmra.mrb[20].mxu1 %v2599_v22  ;;  %v2695_v22 = vld [vmem:[%s3472_s0 + $0x2a0] ss:$16 sps:$4 sm:$0xff]  }
  0x6b   :  { %1366 = vmatmul.mubr.bf16.gmra.mrb[20].mxu0 %v2600_v23  ;;  %1094 = vmatprep.mubr.bf16.mxu1 %v2601_v24  ;;  %v2696_v23 = vld [vmem:[%s3472_s0 + $0x2a8] ss:$16 sps:$4 sm:$0xff]   ;;  %v2697_v24 = vld [vmem:[%s3472_s0 + $0x2c4] ss:$16 sps:$4 sm:$0xff]  }
  0x6c   :  { %1375 = vmatprep.mubr.bf16.mxu0 %v2603_v25  ;;  %v2699_v25 = vld [vmem:[%s3472_s0 + $0x2cc] ss:$16 sps:$4 sm:$0xff]  }
  0x72   :  { %1095 = vmatmul.mubr.bf16.gmra.mrb[24].mxu1 %v2605_v26  ;;  %v2701_v26 = vld [vmem:[%s3472_s0 + $0x2c0] ss:$16 sps:$4 sm:$0xff]  }
  0x73   :  { %1376 = vmatmul.mubr.bf16.gmra.mrb[24].mxu0 %v2606_v27  ;;  %1104 = vmatprep.mubr.bf16.mxu1 %v2607_v28  ;;  %v2702_v27 = vld [vmem:[%s3472_s0 + $0x2c8] ss:$16 sps:$4 sm:$0xff]   ;;  %v2703_v28 = vld [vmem:[%s3472_s0 + $0x2e4] ss:$16 sps:$4 sm:$0xff]  }
  0x74   :  { %1385 = vmatprep.mubr.bf16.mxu0 %v2609_v29  ;;  %v2705_v29 = vld [vmem:[%s3472_s0 + $0x2ec] ss:$16 sps:$4 sm:$0xff]  }
  0x7a   :  { %1105 = vmatmul.mubr.bf16.gmra.mrb[28].mxu1 %v2611_v30  ;;  %v110_v30 = vld [vmem:[%s3472_s0 + $0x300] sm:$0xff] }
  0x7b   :  { %1386 = vmatmul.mubr.bf16.gmra.mrb[28].mxu0 %v2612_v31  ;;  %1114 = vmatprep.mubr.bf16.mxu1 %v2613_v32  ;;  %v111_v31 = vld [vmem:[%s3472_s0 + $0x308] sm:$0xff]  ;;  %v2707_v32 = vld [vmem:[%s3472_s0 + $0x2e0] ss:$16 sps:$4 sm:$0xff]  }
  0x7c   :  { %1395 = vmatprep.mubr.bf16.mxu0 %v2615_v33  ;;  %v2708_v33 = vld [vmem:[%s3472_s0 + $0x2e8] ss:$16 sps:$4 sm:$0xff]  }
  0x82   :  { %1115 = vmatmul.mubr.bf16.gmra.mrb[32].mxu1 %v2617_v34  ;;  %v2108_v34 = vcombine.high %v110_v30, %v110_v30 }
  0x83   :  { %1396 = vmatmul.mubr.bf16.gmra.mrb[32].mxu0 %v2618_v35  ;;  %1124 = vmatprep.mubr.bf16.mxu1 %v2619_v36  ;;  %v2110_v35 = vcombine.high %v111_v31, %v111_v31  ;;  %v2107_v36 = vcombine.low %v110_v30, %v110_v30 }
  0x84   :  { %1405 = vmatprep.mubr.bf16.mxu0 %v2621_v37  ;;  %v2109_v37 = vcombine.low %v111_v31, %v111_v31 }
  0x8a   :  { %1125 = vmatmul.mubr.bf16.gmra.mrb[36].mxu1 %v2623_v38  ;;  %v178_v38 = vlaneseq }
  0x8b   :  { %1406 = vmatmul.mubr.bf16.gmra.mrb[36].mxu0 %v2624_v39  ;;  %1134 = vmatprep.mubr.bf16.mxu1 %v2625_v40 }
  0x8c   :  { %1415 = vmatprep.mubr.bf16.mxu0 %v2627_v41  ;;  %v179_v39 = vshrl.u32 %v178_v38, 7  ;;  %v176_v41 = vld [vmem:[%s3473_s2] sm:$0x3] }
  0x8e   :  { %v180_v40 = vsub.s32 0, %v179_v39 }
  0x92   :  { %1135 = vmatmul.mubr.bf16.gmra.mrb[40].mxu1 %v2629_v42  ;;  %v184_v42 = vsub.s32 1, %v179_v39 }
  0x93   :  { %1416 = vmatmul.mubr.bf16.gmra.mrb[40].mxu0 %v2630_v43  ;;  %1144 = vmatprep.mubr.bf16.mxu1 %v2631_v44  ;;  %v3222_v43 = vrot.slane %v176_v41, %v180_v40 }
  0x94   :  { %1425 = vmatprep.mubr.bf16.mxu0 %v2633_v45  ;;  %v3224_v44 = vrot.slane %v176_v41, %v184_v42 }
  0x9a   :  { %1145 = vmatmul.mubr.bf16.gmra.mrb[44].mxu1 %v2635_v46 }
  0x9b   :  { %1426 = vmatmul.mubr.bf16.gmra.mrb[44].mxu0 %v2636_v47  ;;  %1154 = vmatprep.mubr.bf16.mxu1 %v2637_v48 }
  0x9c   :  { %1435 = vmatprep.mubr.bf16.mxu0 %v2639_v49 }
  0xa2   :  { %1155 = vmatmul.mubr.bf16.gmra.mrb[48].mxu1 %v2641_v50 }
  0xa3   :  { %1436 = vmatmul.mubr.bf16.gmra.mrb[48].mxu0 %v2642_v51  ;;  %1164 = vmatprep.mubr.bf16.mxu1 %v2643_v52 }
  0xa4   :  { %1445 = vmatprep.mubr.bf16.mxu0 %v2645_v53 }
  0xaa   :  { %1165 = vmatmul.mubr.bf16.gmra.mrb[52].mxu1 %v2647_v54 }
  0xab   :  { %1446 = vmatmul.mubr.bf16.gmra.mrb[52].mxu0 %v2648_v55  ;;  %1174 = vmatprep.mubr.bf16.mxu1 %v2649_v56 }
  0xac   :  { %1455 = vmatprep.mubr.bf16.mxu0 %v2651_v57 }
  0xb2   :  { %1175 = vmatmul.mubr.bf16.gmra.mrb[56].mxu1 %v2653_v58 }
  0xb3   :  { %1456 = vmatmul.mubr.bf16.gmra.mrb[56].mxu0 %v2654_v59  ;;  %1184 = vmatprep.mubr.bf16.mxu1 %v2655_v60 }
  0xb4   :  { %1465 = vmatprep.mubr.bf16.mxu0 %v2657_v61 }
  0xba   :  { %1185 = vmatmul.mubr.bf16.gmra.mrb[60].mxu1 %v2659_v62 }
  0xbb   :  { %1466 = vmatmul.mubr.bf16.gmra.mrb[60].mxu0 %v2660_v63  ;;  %1194 = vmatprep.mubr.bf16.mxu1 %v2661_v0 }
  0xbc   :  { %1475 = vmatprep.mubr.bf16.mxu0 %v2663_v1 }
  0xc2   :  { %1195 = vmatmul.mubr.bf16.gmra.mrb[64].mxu1 %v2665_v2 }
  0xc3   :  { %1476 = vmatmul.mubr.bf16.gmra.mrb[64].mxu0 %v2666_v3  ;;  %1204 = vmatprep.mubr.bf16.mxu1 %v2667_v4 }
  0xc4   :  { %1485 = vmatprep.mubr.bf16.mxu0 %v2669_v5 }
  0xca   :  { %1205 = vmatmul.mubr.bf16.gmra.mrb[68].mxu1 %v2671_v6 }
  0xcb   :  { %1486 = vmatmul.mubr.bf16.gmra.mrb[68].mxu0 %v2672_v7  ;;  %1214 = vmatprep.mubr.bf16.mxu1 %v2673_v8 }
  0xcc   :  { %1495 = vmatprep.mubr.bf16.mxu0 %v2675_v9 }
  0xd2   :  { %1215 = vmatmul.mubr.bf16.gmra.mrb[72].mxu1 %v2677_v10 }
  0xd3   :  { %1496 = vmatmul.mubr.bf16.gmra.mrb[72].mxu0 %v2678_v11  ;;  %1224 = vmatprep.mubr.bf16.mxu1 %v2679_v12 }
  0xd4   :  { %1505 = vmatprep.mubr.bf16.mxu0 %v2681_v13 }
  0xda   :  { %1225 = vmatmul.mubr.bf16.gmra.mrb[76].mxu1 %v2683_v14 }
  0xdb   :  { %1506 = vmatmul.mubr.bf16.gmra.mrb[76].mxu0 %v2684_v15  ;;  %1234 = vmatprep.mubr.bf16.mxu1 %v2685_v16 }
  0xdc   :  { %1515 = vmatprep.mubr.bf16.mxu0 %v2687_v17 }
  0xe2   :  { %1235 = vmatmul.mubr.bf16.gmra.mrb[80].mxu1 %v2689_v18 }
  0xe3   :  { %1516 = vmatmul.mubr.bf16.gmra.mrb[80].mxu0 %v2690_v19  ;;  %1244 = vmatprep.mubr.bf16.mxu1 %v2691_v20 }
  0xe4   :  { %1525 = vmatprep.mubr.bf16.mxu0 %v2693_v21 }
  0xea   :  { %1245 = vmatmul.mubr.bf16.gmra.mrb[84].mxu1 %v2695_v22 }
  0xeb   :  { %1526 = vmatmul.mubr.bf16.gmra.mrb[84].mxu0 %v2696_v23  ;;  %1254 = vmatprep.mubr.bf16.mxu1 %v2697_v24 }
  0xec   :  { %1535 = vmatprep.mubr.bf16.mxu0 %v2699_v25 }
  0xf2   :  { %1255 = vmatmul.mubr.bf16.gmra.mrb[88].mxu1 %v2701_v26 }
  0xf3   :  { %1536 = vmatmul.mubr.bf16.gmra.mrb[88].mxu0 %v2702_v27  ;;  %1264 = vmatprep.mubr.bf16.mxu1 %v2703_v28 }
  0xf4   :  { %1545 = vmatprep.mubr.bf16.mxu0 %v2705_v29 }
  0xfa   :  { %1265 = vmatmul.mubr.bf16.gmra.mrb[92].mxu1 %v2707_v32 }
  0xfb   :  { %1546 = vmatmul.mubr.bf16.gmra.mrb[92].mxu0 %v2708_v33  ;;  %1274 = vmatprep.mubr.bf16.mxu1 %v2108_v34 }
  0xfc   :  { %1555 = vmatprep.mubr.bf16.mxu0 %v2110_v35 }
 0x102   :  { %1275 = vmatmul.mubr.bf16.gmra.mrb[96].mxu1 %v2107_v36 }
 0x103   :  { %1556 = vmatmul.mubr.bf16.gmra.mrb[96].mxu0 %v2109_v37 }
 0x115   :  { %v1036_v45 = vpop.f32.mrb[0].mxu1 }
 0x116   :  { %v1317_v46 = vpop.f32.mrb[0].mxu0  ;;  %v1037_v47 = vadd.f32 %v1036_v45, %v3222_v43  ;;  %v1038_v48 = vpop.f32.mrb[1].mxu1 }
 0x117   :  { %v1319_v49 = vpop.f32.mrb[1].mxu0  ;;  %v1039_v50 = vadd.f32 %v1038_v48, %v3224_v44  ;;  %v1040_v51 = vpop.f32.mrb[2].mxu1 }
 0x118   :  { %v1321_v52 = vpop.f32.mrb[2].mxu0  ;;  %v1318_v53 = vadd.f32 %v1317_v46, %v1037_v47  ;;  %v1041_v54 = vadd.f32 %v1040_v51, %v3222_v43  ;;  %v1042_v55 = vpop.f32.mrb[3].mxu1 }
 0x119   :  { %v1323_v56 = vpop.f32.mrb[3].mxu0  ;;  %v1320_v57 = vadd.f32 %v1319_v49, %v1039_v50  ;;  %v1043_v58 = vadd.f32 %v1042_v55, %v3224_v44 }
 0x11a   :  { %v1564_v59 = vmax.f32 %v1318_v53, 0.0  ;;  %v1322_v60 = vadd.f32 %v1321_v52, %v1041_v54 }
 0x11b   :  { %v1565_v61 = vmax.f32 %v1320_v57, 0.0  ;;  %v1324_v62 = vadd.f32 %v1323_v56, %v1043_v58 }
 0x11c   :  { %v1566_v63 = vmax.f32 %v1322_v60, 0.0 }
 0x11d   :  { %v2224_v0 = vpack.c.bf16 %v1565_v61, %v1564_v59  ;;  %v1567_v1 = vmax.f32 %v1324_v62, 0.0  ;;  %v1046_v2 = vpop.f32.mrb[4].mxu1 }
 0x11e   :  { %v1327_v3 = vpop.f32.mrb[4].mxu0  ;;  %v1047_v4 = vadd.f32 %v1046_v2, %v3222_v43  ;;  %v1048_v5 = vpop.f32.mrb[5].mxu1 }
 0x11f   :  { %v1329_v6 = vpop.f32.mrb[5].mxu0  ;;  %1958 = vst [vmem:[%s3474_s3] sm:$0xff] %v2224_v0  ;;  %v2225_v7 = vpack.c.bf16 %v1567_v1, %v1566_v63  ;;  %v1049_v8 = vadd.f32 %v1048_v5, %v3224_v44  ;;  %v1050_v9 = vpop.f32.mrb[6].mxu1 }
 0x120   :  { %v1331_v10 = vpop.f32.mrb[6].mxu0  ;;  %v1328_v11 = vadd.f32 %v1327_v3, %v1047_v4  ;;  %v1051_v12 = vadd.f32 %v1050_v9, %v3222_v43  ;;  %v1052_v13 = vpop.f32.mrb[7].mxu1 }
 0x121   :  { %v1333_v14 = vpop.f32.mrb[7].mxu0  ;;  %1959 = vst [vmem:[%s3474_s3 + $0x8] sm:$0xff] %v2225_v7  ;;  %v1330_v15 = vadd.f32 %v1329_v6, %v1049_v8  ;;  %v1053_v16 = vadd.f32 %v1052_v13, %v3224_v44 }
 0x122   :  { %v1568_v17 = vmax.f32 %v1328_v11, 0.0  ;;  %v1332_v18 = vadd.f32 %v1331_v10, %v1051_v12 }
 0x123   :  { %v1569_v19 = vmax.f32 %v1330_v15, 0.0  ;;  %v1334_v20 = vadd.f32 %v1333_v14, %v1053_v16 }
 0x124   :  { %v1570_v21 = vmax.f32 %v1332_v18, 0.0 }
 0x125   :  { %v2226_v22 = vpack.c.bf16 %v1569_v19, %v1568_v17  ;;  %v1571_v23 = vmax.f32 %v1334_v20, 0.0  ;;  %v1056_v24 = vpop.f32.mrb[8].mxu1 }
 0x126   :  { %v1337_v25 = vpop.f32.mrb[8].mxu0  ;;  %v1057_v26 = vadd.f32 %v1056_v24, %v3222_v43  ;;  %v1058_v27 = vpop.f32.mrb[9].mxu1 }
 0x127   :  { %v1339_v28 = vpop.f32.mrb[9].mxu0  ;;  %1960 = vst [vmem:[%s3474_s3 + $0x10] sm:$0xff] %v2226_v22  ;;  %v2227_v29 = vpack.c.bf16 %v1571_v23, %v1570_v21  ;;  %v1059_v30 = vadd.f32 %v1058_v27, %v3224_v44  ;;  %v1060_v31 = vpop.f32.mrb[10].mxu1 }
 0x128   :  { %v1341_v32 = vpop.f32.mrb[10].mxu0  ;;  %v1338_v33 = vadd.f32 %v1337_v25, %v1057_v26  ;;  %v1061_v34 = vadd.f32 %v1060_v31, %v3222_v43  ;;  %v1062_v35 = vpop.f32.mrb[11].mxu1 }
 0x129   :  { %v1343_v36 = vpop.f32.mrb[11].mxu0  ;;  %1961 = vst [vmem:[%s3474_s3 + $0x18] sm:$0xff] %v2227_v29  ;;  %v1340_v37 = vadd.f32 %v1339_v28, %v1059_v30  ;;  %v1063_v38 = vadd.f32 %v1062_v35, %v3224_v44 }
 0x12a   :  { %v1572_v39 = vmax.f32 %v1338_v33, 0.0  ;;  %v1342_v40 = vadd.f32 %v1341_v32, %v1061_v34 }
 0x12b   :  { %v1573_v41 = vmax.f32 %v1340_v37, 0.0  ;;  %v1344_v42 = vadd.f32 %v1343_v36, %v1063_v38 }
 0x12c   :  { %v1574_v45 = vmax.f32 %v1342_v40, 0.0 }
 0x12d   :  { %v2228_v46 = vpack.c.bf16 %v1573_v41, %v1572_v39  ;;  %v1575_v47 = vmax.f32 %v1344_v42, 0.0  ;;  %v1066_v48 = vpop.f32.mrb[12].mxu1 }
 0x12e   :  { %v1347_v49 = vpop.f32.mrb[12].mxu0  ;;  %v1067_v50 = vadd.f32 %v1066_v48, %v3222_v43  ;;  %v1068_v51 = vpop.f32.mrb[13].mxu1 }
 0x12f   :  { %v1349_v52 = vpop.f32.mrb[13].mxu0  ;;  %1962 = vst [vmem:[%s3474_s3 + $0x20] sm:$0xff] %v2228_v46  ;;  %v2229_v53 = vpack.c.bf16 %v1575_v47, %v1574_v45  ;;  %v1069_v54 = vadd.f32 %v1068_v51, %v3224_v44  ;;  %v1070_v55 = vpop.f32.mrb[14].mxu1 }
 0x130   :  { %v1351_v56 = vpop.f32.mrb[14].mxu0  ;;  %v1348_v57 = vadd.f32 %v1347_v49, %v1067_v50  ;;  %v1071_v58 = vadd.f32 %v1070_v55, %v3222_v43  ;;  %v1072_v59 = vpop.f32.mrb[15].mxu1 }
 0x131   :  { %v1353_v60 = vpop.f32.mrb[15].mxu0  ;;  %1963 = vst [vmem:[%s3474_s3 + $0x28] sm:$0xff] %v2229_v53  ;;  %v1350_v61 = vadd.f32 %v1349_v52, %v1069_v54  ;;  %v1073_v62 = vadd.f32 %v1072_v59, %v3224_v44 }
 0x132   :  { %v1576_v63 = vmax.f32 %v1348_v57, 0.0  ;;  %v1352_v0 = vadd.f32 %v1351_v56, %v1071_v58 }
 0x133   :  { %v1577_v1 = vmax.f32 %v1350_v61, 0.0  ;;  %v1354_v2 = vadd.f32 %v1353_v60, %v1073_v62 }
 0x134   :  { %v1578_v3 = vmax.f32 %v1352_v0, 0.0 }
 0x135   :  { %v2230_v4 = vpack.c.bf16 %v1577_v1, %v1576_v63  ;;  %v1579_v5 = vmax.f32 %v1354_v2, 0.0  ;;  %v1076_v6 = vpop.f32.mrb[16].mxu1 }
 0x136   :  { %v1357_v7 = vpop.f32.mrb[16].mxu0  ;;  %v1077_v8 = vadd.f32 %v1076_v6, %v3222_v43  ;;  %v1078_v9 = vpop.f32.mrb[17].mxu1 }
 0x137   :  { %v1359_v10 = vpop.f32.mrb[17].mxu0  ;;  %1964 = vst [vmem:[%s3474_s3 + $0x30] sm:$0xff] %v2230_v4  ;;  %v2231_v11 = vpack.c.bf16 %v1579_v5, %v1578_v3  ;;  %v1079_v12 = vadd.f32 %v1078_v9, %v3224_v44  ;;  %v1080_v13 = vpop.f32.mrb[18].mxu1 }
 0x138   :  { %v1361_v14 = vpop.f32.mrb[18].mxu0  ;;  %v1358_v15 = vadd.f32 %v1357_v7, %v1077_v8  ;;  %v1081_v16 = vadd.f32 %v1080_v13, %v3222_v43  ;;  %v1082_v17 = vpop.f32.mrb[19].mxu1 }
 0x139   :  { %v1363_v18 = vpop.f32.mrb[19].mxu0  ;;  %1965 = vst [vmem:[%s3474_s3 + $0x38] sm:$0xff] %v2231_v11  ;;  %v1360_v19 = vadd.f32 %v1359_v10, %v1079_v12  ;;  %v1083_v20 = vadd.f32 %v1082_v17, %v3224_v44 }
 0x13a   :  { %v1580_v21 = vmax.f32 %v1358_v15, 0.0  ;;  %v1362_v22 = vadd.f32 %v1361_v14, %v1081_v16 }
 0x13b   :  { %v1581_v23 = vmax.f32 %v1360_v19, 0.0  ;;  %v1364_v24 = vadd.f32 %v1363_v18, %v1083_v20 }
 0x13c   :  { %v1582_v25 = vmax.f32 %v1362_v22, 0.0 }
 0x13d   :  { %v2232_v26 = vpack.c.bf16 %v1581_v23, %v1580_v21  ;;  %v1583_v27 = vmax.f32 %v1364_v24, 0.0  ;;  %v1086_v28 = vpop.f32.mrb[20].mxu1 }
 0x13e   :  { %v1367_v29 = vpop.f32.mrb[20].mxu0  ;;  %v1087_v30 = vadd.f32 %v1086_v28, %v3222_v43  ;;  %v1088_v31 = vpop.f32.mrb[21].mxu1 }
 0x13f   :  { %v1369_v32 = vpop.f32.mrb[21].mxu0  ;;  %1966 = vst [vmem:[%s3474_s3 + $0x40] sm:$0xff] %v2232_v26  ;;  %v2233_v33 = vpack.c.bf16 %v1583_v27, %v1582_v25  ;;  %v1089_v34 = vadd.f32 %v1088_v31, %v3224_v44  ;;  %v1090_v35 = vpop.f32.mrb[22].mxu1 }
 0x140   :  { %v1371_v36 = vpop.f32.mrb[22].mxu0  ;;  %v1368_v37 = vadd.f32 %v1367_v29, %v1087_v30  ;;  %v1091_v38 = vadd.f32 %v1090_v35, %v3222_v43  ;;  %v1092_v39 = vpop.f32.mrb[23].mxu1 }
 0x141   :  { %v1373_v40 = vpop.f32.mrb[23].mxu0  ;;  %1967 = vst [vmem:[%s3474_s3 + $0x48] sm:$0xff] %v2233_v33  ;;  %v1370_v41 = vadd.f32 %v1369_v32, %v1089_v34  ;;  %v1093_v42 = vadd.f32 %v1092_v39, %v3224_v44 }
 0x142   :  { %v1584_v45 = vmax.f32 %v1368_v37, 0.0  ;;  %v1372_v46 = vadd.f32 %v1371_v36, %v1091_v38 }
 0x143   :  { %v1585_v47 = vmax.f32 %v1370_v41, 0.0  ;;  %v1374_v48 = vadd.f32 %v1373_v40, %v1093_v42 }
 0x144   :  { %v1586_v49 = vmax.f32 %v1372_v46, 0.0 }
 0x145   :  { %v2234_v50 = vpack.c.bf16 %v1585_v47, %v1584_v45  ;;  %v1587_v51 = vmax.f32 %v1374_v48, 0.0  ;;  %v1096_v52 = vpop.f32.mrb[24].mxu1 }
 0x146   :  { %v1377_v53 = vpop.f32.mrb[24].mxu0  ;;  %v1097_v54 = vadd.f32 %v1096_v52, %v3222_v43  ;;  %v1098_v55 = vpop.f32.mrb[25].mxu1 }
 0x147   :  { %v1379_v56 = vpop.f32.mrb[25].mxu0  ;;  %1968 = vst [vmem:[%s3474_s3 + $0x50] sm:$0xff] %v2234_v50  ;;  %v2235_v57 = vpack.c.bf16 %v1587_v51, %v1586_v49  ;;  %v1099_v58 = vadd.f32 %v1098_v55, %v3224_v44  ;;  %v1100_v59 = vpop.f32.mrb[26].mxu1 }
 0x148   :  { %v1381_v60 = vpop.f32.mrb[26].mxu0  ;;  %v1378_v61 = vadd.f32 %v1377_v53, %v1097_v54  ;;  %v1101_v62 = vadd.f32 %v1100_v59, %v3222_v43  ;;  %v1102_v63 = vpop.f32.mrb[27].mxu1 }
 0x149   :  { %v1383_v0 = vpop.f32.mrb[27].mxu0  ;;  %1969 = vst [vmem:[%s3474_s3 + $0x58] sm:$0xff] %v2235_v57  ;;  %v1380_v1 = vadd.f32 %v1379_v56, %v1099_v58  ;;  %v1103_v2 = vadd.f32 %v1102_v63, %v3224_v44 }
 0x14a   :  { %v1588_v3 = vmax.f32 %v1378_v61, 0.0  ;;  %v1382_v4 = vadd.f32 %v1381_v60, %v1101_v62 }
 0x14b   :  { %v1589_v5 = vmax.f32 %v1380_v1, 0.0  ;;  %v1384_v6 = vadd.f32 %v1383_v0, %v1103_v2 }
 0x14c   :  { %v1590_v7 = vmax.f32 %v1382_v4, 0.0 }
 0x14d   :  { %v2236_v8 = vpack.c.bf16 %v1589_v5, %v1588_v3  ;;  %v1591_v9 = vmax.f32 %v1384_v6, 0.0  ;;  %v1106_v10 = vpop.f32.mrb[28].mxu1 }
 0x14e   :  { %v1387_v11 = vpop.f32.mrb[28].mxu0  ;;  %v1107_v12 = vadd.f32 %v1106_v10, %v3222_v43  ;;  %v1108_v13 = vpop.f32.mrb[29].mxu1 }
 0x14f   :  { %v1389_v14 = vpop.f32.mrb[29].mxu0  ;;  %1970 = vst [vmem:[%s3474_s3 + $0x60] sm:$0xff] %v2236_v8  ;;  %v2237_v15 = vpack.c.bf16 %v1591_v9, %v1590_v7  ;;  %v1109_v16 = vadd.f32 %v1108_v13, %v3224_v44  ;;  %v1110_v17 = vpop.f32.mrb[30].mxu1 }
 0x150   :  { %v1391_v18 = vpop.f32.mrb[30].mxu0  ;;  %v1388_v19 = vadd.f32 %v1387_v11, %v1107_v12  ;;  %v1111_v20 = vadd.f32 %v1110_v17, %v3222_v43  ;;  %v1112_v21 = vpop.f32.mrb[31].mxu1 }
 0x151   :  { %v1393_v22 = vpop.f32.mrb[31].mxu0  ;;  %1971 = vst [vmem:[%s3474_s3 + $0x68] sm:$0xff] %v2237_v15  ;;  %v1390_v23 = vadd.f32 %v1389_v14, %v1109_v16  ;;  %v1113_v24 = vadd.f32 %v1112_v21, %v3224_v44 }
 0x152   :  { %v1592_v25 = vmax.f32 %v1388_v19, 0.0  ;;  %v1392_v26 = vadd.f32 %v1391_v18, %v1111_v20 }
 0x153   :  { %v1593_v27 = vmax.f32 %v1390_v23, 0.0  ;;  %v1394_v28 = vadd.f32 %v1393_v22, %v1113_v24 }
 0x154   :  { %v1594_v29 = vmax.f32 %v1392_v26, 0.0 }
 0x155   :  { %v2238_v30 = vpack.c.bf16 %v1593_v27, %v1592_v25  ;;  %v1595_v31 = vmax.f32 %v1394_v28, 0.0  ;;  %v1116_v32 = vpop.f32.mrb[32].mxu1 }
 0x156   :  { %v1397_v33 = vpop.f32.mrb[32].mxu0  ;;  %v1117_v34 = vadd.f32 %v1116_v32, %v3222_v43  ;;  %v1118_v35 = vpop.f32.mrb[33].mxu1 }
 0x157   :  { %v1399_v36 = vpop.f32.mrb[33].mxu0  ;;  %1972 = vst [vmem:[%s3474_s3 + $0x70] sm:$0xff] %v2238_v30  ;;  %v2239_v37 = vpack.c.bf16 %v1595_v31, %v1594_v29  ;;  %v1119_v38 = vadd.f32 %v1118_v35, %v3224_v44  ;;  %v1120_v39 = vpop.f32.mrb[34].mxu1 }
 0x158   :  { %v1401_v40 = vpop.f32.mrb[34].mxu0  ;;  %v1398_v41 = vadd.f32 %v1397_v33, %v1117_v34  ;;  %v1121_v42 = vadd.f32 %v1120_v39, %v3222_v43  ;;  %v1122_v45 = vpop.f32.mrb[35].mxu1 }
 0x159   :  { %v1403_v46 = vpop.f32.mrb[35].mxu0  ;;  %1973 = vst [vmem:[%s3474_s3 + $0x78] sm:$0xff] %v2239_v37  ;;  %v1400_v47 = vadd.f32 %v1399_v36, %v1119_v38  ;;  %v1123_v48 = vadd.f32 %v1122_v45, %v3224_v44 }
 0x15a   :  { %v1596_v49 = vmax.f32 %v1398_v41, 0.0  ;;  %v1402_v50 = vadd.f32 %v1401_v40, %v1121_v42 }
 0x15b   :  { %v1597_v51 = vmax.f32 %v1400_v47, 0.0  ;;  %v1404_v52 = vadd.f32 %v1403_v46, %v1123_v48 }
 0x15c   :  { %v1598_v53 = vmax.f32 %v1402_v50, 0.0 }
 0x15d   :  { %v2240_v54 = vpack.c.bf16 %v1597_v51, %v1596_v49  ;;  %v1599_v55 = vmax.f32 %v1404_v52, 0.0  ;;  %v1126_v56 = vpop.f32.mrb[36].mxu1 }
 0x15e   :  { %v1407_v57 = vpop.f32.mrb[36].mxu0  ;;  %v1127_v58 = vadd.f32 %v1126_v56, %v3222_v43  ;;  %v1128_v59 = vpop.f32.mrb[37].mxu1 }
 0x15f   :  { %v1409_v60 = vpop.f32.mrb[37].mxu0  ;;  %1974 = vst [vmem:[%s3474_s3 + $0x80] sm:$0xff] %v2240_v54  ;;  %v2241_v61 = vpack.c.bf16 %v1599_v55, %v1598_v53  ;;  %v1129_v62 = vadd.f32 %v1128_v59, %v3224_v44  ;;  %v1130_v63 = vpop.f32.mrb[38].mxu1 }
 0x160   :  { %v1411_v0 = vpop.f32.mrb[38].mxu0  ;;  %v1408_v1 = vadd.f32 %v1407_v57, %v1127_v58  ;;  %v1131_v2 = vadd.f32 %v1130_v63, %v3222_v43  ;;  %v1132_v3 = vpop.f32.mrb[39].mxu1 }
 0x161   :  { %v1413_v4 = vpop.f32.mrb[39].mxu0  ;;  %1975 = vst [vmem:[%s3474_s3 + $0x88] sm:$0xff] %v2241_v61  ;;  %v1410_v5 = vadd.f32 %v1409_v60, %v1129_v62  ;;  %v1133_v6 = vadd.f32 %v1132_v3, %v3224_v44 }
 0x162   :  { %v1600_v7 = vmax.f32 %v1408_v1, 0.0  ;;  %v1412_v8 = vadd.f32 %v1411_v0, %v1131_v2 }
 0x163   :  { %v1601_v9 = vmax.f32 %v1410_v5, 0.0  ;;  %v1414_v10 = vadd.f32 %v1413_v4, %v1133_v6 }
 0x164   :  { %v1602_v11 = vmax.f32 %v1412_v8, 0.0 }
 0x165   :  { %v2242_v12 = vpack.c.bf16 %v1601_v9, %v1600_v7  ;;  %v1603_v13 = vmax.f32 %v1414_v10, 0.0  ;;  %v1136_v14 = vpop.f32.mrb[40].mxu1 }
 0x166   :  { %v1417_v15 = vpop.f32.mrb[40].mxu0  ;;  %v1137_v16 = vadd.f32 %v1136_v14, %v3222_v43  ;;  %v1138_v17 = vpop.f32.mrb[41].mxu1 }
 0x167   :  { %v1419_v18 = vpop.f32.mrb[41].mxu0  ;;  %1976 = vst [vmem:[%s3474_s3 + $0x90] sm:$0xff] %v2242_v12  ;;  %v2243_v19 = vpack.c.bf16 %v1603_v13, %v1602_v11  ;;  %v1139_v20 = vadd.f32 %v1138_v17, %v3224_v44  ;;  %v1140_v21 = vpop.f32.mrb[42].mxu1 }
 0x168   :  { %v1421_v22 = vpop.f32.mrb[42].mxu0  ;;  %v1418_v23 = vadd.f32 %v1417_v15, %v1137_v16  ;;  %v1141_v24 = vadd.f32 %v1140_v21, %v3222_v43  ;;  %v1142_v25 = vpop.f32.mrb[43].mxu1 }
 0x169   :  { %v1423_v26 = vpop.f32.mrb[43].mxu0  ;;  %1977 = vst [vmem:[%s3474_s3 + $0x98] sm:$0xff] %v2243_v19  ;;  %v1420_v27 = vadd.f32 %v1419_v18, %v1139_v20  ;;  %v1143_v28 = vadd.f32 %v1142_v25, %v3224_v44 }
 0x16a   :  { %v1604_v29 = vmax.f32 %v1418_v23, 0.0  ;;  %v1422_v30 = vadd.f32 %v1421_v22, %v1141_v24 }
 0x16b   :  { %v1605_v31 = vmax.f32 %v1420_v27, 0.0  ;;  %v1424_v32 = vadd.f32 %v1423_v26, %v1143_v28 }
 0x16c   :  { %v1606_v33 = vmax.f32 %v1422_v30, 0.0 }
 0x16d   :  { %v2244_v34 = vpack.c.bf16 %v1605_v31, %v1604_v29  ;;  %v1607_v35 = vmax.f32 %v1424_v32, 0.0  ;;  %v1146_v36 = vpop.f32.mrb[44].mxu1 }
 0x16e   :  { %v1427_v37 = vpop.f32.mrb[44].mxu0  ;;  %v1147_v38 = vadd.f32 %v1146_v36, %v3222_v43  ;;  %v1148_v39 = vpop.f32.mrb[45].mxu1 }
 0x16f   :  { %v1429_v40 = vpop.f32.mrb[45].mxu0  ;;  %1978 = vst [vmem:[%s3474_s3 + $0xa0] sm:$0xff] %v2244_v34  ;;  %v2245_v41 = vpack.c.bf16 %v1607_v35, %v1606_v33  ;;  %v1149_v42 = vadd.f32 %v1148_v39, %v3224_v44  ;;  %v1150_v45 = vpop.f32.mrb[46].mxu1 }
 0x170   :  { %v1431_v46 = vpop.f32.mrb[46].mxu0  ;;  %v1428_v47 = vadd.f32 %v1427_v37, %v1147_v38  ;;  %v1151_v48 = vadd.f32 %v1150_v45, %v3222_v43  ;;  %v1152_v49 = vpop.f32.mrb[47].mxu1 }
 0x171   :  { %v1433_v50 = vpop.f32.mrb[47].mxu0  ;;  %1979 = vst [vmem:[%s3474_s3 + $0xa8] sm:$0xff] %v2245_v41  ;;  %v1430_v51 = vadd.f32 %v1429_v40, %v1149_v42  ;;  %v1153_v52 = vadd.f32 %v1152_v49, %v3224_v44 }
 0x172   :  { %v1608_v53 = vmax.f32 %v1428_v47, 0.0  ;;  %v1432_v54 = vadd.f32 %v1431_v46, %v1151_v48 }
 0x173   :  { %v1609_v55 = vmax.f32 %v1430_v51, 0.0  ;;  %v1434_v56 = vadd.f32 %v1433_v50, %v1153_v52 }
 0x174   :  { %v1610_v57 = vmax.f32 %v1432_v54, 0.0 }
 0x175   :  { %v2246_v58 = vpack.c.bf16 %v1609_v55, %v1608_v53  ;;  %v1611_v59 = vmax.f32 %v1434_v56, 0.0  ;;  %v1156_v60 = vpop.f32.mrb[48].mxu1 }
 0x176   :  { %v1437_v61 = vpop.f32.mrb[48].mxu0  ;;  %v1157_v62 = vadd.f32 %v1156_v60, %v3222_v43  ;;  %v1158_v63 = vpop.f32.mrb[49].mxu1 }
 0x177   :  { %v1439_v0 = vpop.f32.mrb[49].mxu0  ;;  %1980 = vst [vmem:[%s3474_s3 + $0xb0] sm:$0xff] %v2246_v58  ;;  %v2247_v1 = vpack.c.bf16 %v1611_v59, %v1610_v57  ;;  %v1159_v2 = vadd.f32 %v1158_v63, %v3224_v44  ;;  %v1160_v3 = vpop.f32.mrb[50].mxu1 }
 0x178   :  { %v1441_v4 = vpop.f32.mrb[50].mxu0  ;;  %v1438_v5 = vadd.f32 %v1437_v61, %v1157_v62  ;;  %v1161_v6 = vadd.f32 %v1160_v3, %v3222_v43  ;;  %v1162_v7 = vpop.f32.mrb[51].mxu1 }
 0x179   :  { %v1443_v8 = vpop.f32.mrb[51].mxu0  ;;  %1981 = vst [vmem:[%s3474_s3 + $0xb8] sm:$0xff] %v2247_v1  ;;  %v1440_v9 = vadd.f32 %v1439_v0, %v1159_v2  ;;  %v1163_v10 = vadd.f32 %v1162_v7, %v3224_v44 }
 0x17a   :  { %v1612_v11 = vmax.f32 %v1438_v5, 0.0  ;;  %v1442_v12 = vadd.f32 %v1441_v4, %v1161_v6 }
 0x17b   :  { %v1613_v13 = vmax.f32 %v1440_v9, 0.0  ;;  %v1444_v14 = vadd.f32 %v1443_v8, %v1163_v10 }
 0x17c   :  { %v1614_v15 = vmax.f32 %v1442_v12, 0.0 }
 0x17d   :  { %v2248_v16 = vpack.c.bf16 %v1613_v13, %v1612_v11  ;;  %v1615_v17 = vmax.f32 %v1444_v14, 0.0  ;;  %v1166_v18 = vpop.f32.mrb[52].mxu1 }
 0x17e   :  { %v1447_v19 = vpop.f32.mrb[52].mxu0  ;;  %v1167_v20 = vadd.f32 %v1166_v18, %v3222_v43  ;;  %v1168_v21 = vpop.f32.mrb[53].mxu1 }
 0x17f   :  { %v1449_v22 = vpop.f32.mrb[53].mxu0  ;;  %1982 = vst [vmem:[%s3474_s3 + $0xc0] sm:$0xff] %v2248_v16  ;;  %v2249_v23 = vpack.c.bf16 %v1615_v17, %v1614_v15  ;;  %v1169_v24 = vadd.f32 %v1168_v21, %v3224_v44  ;;  %v1170_v25 = vpop.f32.mrb[54].mxu1 }
 0x180   :  { %v1451_v26 = vpop.f32.mrb[54].mxu0  ;;  %v1448_v27 = vadd.f32 %v1447_v19, %v1167_v20  ;;  %v1171_v28 = vadd.f32 %v1170_v25, %v3222_v43  ;;  %v1172_v29 = vpop.f32.mrb[55].mxu1 }
 0x181   :  { %v1453_v30 = vpop.f32.mrb[55].mxu0  ;;  %1983 = vst [vmem:[%s3474_s3 + $0xc8] sm:$0xff] %v2249_v23  ;;  %v1450_v31 = vadd.f32 %v1449_v22, %v1169_v24  ;;  %v1173_v32 = vadd.f32 %v1172_v29, %v3224_v44 }
 0x182   :  { %v1616_v33 = vmax.f32 %v1448_v27, 0.0  ;;  %v1452_v34 = vadd.f32 %v1451_v26, %v1171_v28 }
 0x183   :  { %v1617_v35 = vmax.f32 %v1450_v31, 0.0  ;;  %v1454_v36 = vadd.f32 %v1453_v30, %v1173_v32 }
 0x184   :  { %v1618_v37 = vmax.f32 %v1452_v34, 0.0 }
 0x185   :  { %v2250_v38 = vpack.c.bf16 %v1617_v35, %v1616_v33  ;;  %v1619_v39 = vmax.f32 %v1454_v36, 0.0  ;;  %v1176_v40 = vpop.f32.mrb[56].mxu1 }
 0x186   :  { %v1457_v41 = vpop.f32.mrb[56].mxu0  ;;  %v1177_v42 = vadd.f32 %v1176_v40, %v3222_v43  ;;  %v1178_v45 = vpop.f32.mrb[57].mxu1 }
 0x187   :  { %v1459_v46 = vpop.f32.mrb[57].mxu0  ;;  %1984 = vst [vmem:[%s3474_s3 + $0xd0] sm:$0xff] %v2250_v38  ;;  %v2251_v47 = vpack.c.bf16 %v1619_v39, %v1618_v37  ;;  %v1179_v48 = vadd.f32 %v1178_v45, %v3224_v44  ;;  %v1180_v49 = vpop.f32.mrb[58].mxu1 }
 0x188   :  { %v1461_v50 = vpop.f32.mrb[58].mxu0  ;;  %v1458_v51 = vadd.f32 %v1457_v41, %v1177_v42  ;;  %v1181_v52 = vadd.f32 %v1180_v49, %v3222_v43  ;;  %v1182_v53 = vpop.f32.mrb[59].mxu1 }
 0x189   :  { %v1463_v54 = vpop.f32.mrb[59].mxu0  ;;  %1985 = vst [vmem:[%s3474_s3 + $0xd8] sm:$0xff] %v2251_v47  ;;  %v1460_v55 = vadd.f32 %v1459_v46, %v1179_v48  ;;  %v1183_v56 = vadd.f32 %v1182_v53, %v3224_v44 }
 0x18a   :  { %v1620_v57 = vmax.f32 %v1458_v51, 0.0  ;;  %v1462_v58 = vadd.f32 %v1461_v50, %v1181_v52 }
 0x18b   :  { %v1621_v59 = vmax.f32 %v1460_v55, 0.0  ;;  %v1464_v60 = vadd.f32 %v1463_v54, %v1183_v56 }
 0x18c   :  { %v1622_v61 = vmax.f32 %v1462_v58, 0.0 }
 0x18d   :  { %v2252_v62 = vpack.c.bf16 %v1621_v59, %v1620_v57  ;;  %v1623_v63 = vmax.f32 %v1464_v60, 0.0  ;;  %v1186_v0 = vpop.f32.mrb[60].mxu1 }
 0x18e   :  { %v1467_v1 = vpop.f32.mrb[60].mxu0  ;;  %v1187_v2 = vadd.f32 %v1186_v0, %v3222_v43  ;;  %v1188_v3 = vpop.f32.mrb[61].mxu1 }
 0x18f   :  { %v1469_v4 = vpop.f32.mrb[61].mxu0  ;;  %1986 = vst [vmem:[%s3474_s3 + $0xe0] sm:$0xff] %v2252_v62  ;;  %v2253_v5 = vpack.c.bf16 %v1623_v63, %v1622_v61  ;;  %v1189_v6 = vadd.f32 %v1188_v3, %v3224_v44  ;;  %v1190_v7 = vpop.f32.mrb[62].mxu1 }
 0x190   :  { %v1471_v8 = vpop.f32.mrb[62].mxu0  ;;  %v1468_v9 = vadd.f32 %v1467_v1, %v1187_v2  ;;  %v1191_v10 = vadd.f32 %v1190_v7, %v3222_v43  ;;  %v1192_v11 = vpop.f32.mrb[63].mxu1 }
 0x191   :  { %v1473_v12 = vpop.f32.mrb[63].mxu0  ;;  %1987 = vst [vmem:[%s3474_s3 + $0xe8] sm:$0xff] %v2253_v5  ;;  %v1470_v13 = vadd.f32 %v1469_v4, %v1189_v6  ;;  %v1193_v14 = vadd.f32 %v1192_v11, %v3224_v44 }
 0x192   :  { %v1624_v15 = vmax.f32 %v1468_v9, 0.0  ;;  %v1472_v16 = vadd.f32 %v1471_v8, %v1191_v10 }
 0x193   :  { %v1625_v17 = vmax.f32 %v1470_v13, 0.0  ;;  %v1474_v18 = vadd.f32 %v1473_v12, %v1193_v14 }
 0x194   :  { %v1626_v19 = vmax.f32 %v1472_v16, 0.0 }
 0x195   :  { %v2254_v20 = vpack.c.bf16 %v1625_v17, %v1624_v15  ;;  %v1627_v21 = vmax.f32 %v1474_v18, 0.0  ;;  %v1196_v22 = vpop.f32.mrb[64].mxu1 }
 0x196   :  { %v1477_v23 = vpop.f32.mrb[64].mxu0  ;;  %v1197_v24 = vadd.f32 %v1196_v22, %v3222_v43  ;;  %v1198_v25 = vpop.f32.mrb[65].mxu1 }
 0x197   :  { %v1479_v26 = vpop.f32.mrb[65].mxu0  ;;  %1988 = vst [vmem:[%s3474_s3 + $0xf0] sm:$0xff] %v2254_v20  ;;  %v2255_v27 = vpack.c.bf16 %v1627_v21, %v1626_v19  ;;  %v1199_v28 = vadd.f32 %v1198_v25, %v3224_v44  ;;  %v1200_v29 = vpop.f32.mrb[66].mxu1 }
 0x198   :  { %v1481_v30 = vpop.f32.mrb[66].mxu0  ;;  %v1478_v31 = vadd.f32 %v1477_v23, %v1197_v24  ;;  %v1201_v32 = vadd.f32 %v1200_v29, %v3222_v43  ;;  %v1202_v33 = vpop.f32.mrb[67].mxu1 }
 0x199   :  { %v1483_v34 = vpop.f32.mrb[67].mxu0  ;;  %1989 = vst [vmem:[%s3474_s3 + $0xf8] sm:$0xff] %v2255_v27  ;;  %v1480_v35 = vadd.f32 %v1479_v26, %v1199_v28  ;;  %v1203_v36 = vadd.f32 %v1202_v33, %v3224_v44 }
 0x19a   :  { %v1628_v37 = vmax.f32 %v1478_v31, 0.0  ;;  %v1482_v38 = vadd.f32 %v1481_v30, %v1201_v32 }
 0x19b   :  { %v1629_v39 = vmax.f32 %v1480_v35, 0.0  ;;  %v1484_v40 = vadd.f32 %v1483_v34, %v1203_v36 }
 0x19c   :  { %v1630_v41 = vmax.f32 %v1482_v38, 0.0 }
 0x19d   :  { %v2256_v42 = vpack.c.bf16 %v1629_v39, %v1628_v37  ;;  %v1631_v45 = vmax.f32 %v1484_v40, 0.0  ;;  %v1206_v46 = vpop.f32.mrb[68].mxu1 }
 0x19e   :  { %v1487_v47 = vpop.f32.mrb[68].mxu0  ;;  %v1207_v48 = vadd.f32 %v1206_v46, %v3222_v43  ;;  %v1208_v49 = vpop.f32.mrb[69].mxu1 }
 0x19f   :  { %v1489_v50 = vpop.f32.mrb[69].mxu0  ;;  %1990 = vst [vmem:[%s3474_s3 + $0x100] sm:$0xff] %v2256_v42  ;;  %v2257_v51 = vpack.c.bf16 %v1631_v45, %v1630_v41  ;;  %v1209_v52 = vadd.f32 %v1208_v49, %v3224_v44  ;;  %v1210_v53 = vpop.f32.mrb[70].mxu1 }
 0x1a0   :  { %v1491_v54 = vpop.f32.mrb[70].mxu0  ;;  %v1488_v55 = vadd.f32 %v1487_v47, %v1207_v48  ;;  %v1211_v56 = vadd.f32 %v1210_v53, %v3222_v43  ;;  %v1212_v57 = vpop.f32.mrb[71].mxu1 }
 0x1a1   :  { %v1493_v58 = vpop.f32.mrb[71].mxu0  ;;  %1991 = vst [vmem:[%s3474_s3 + $0x108] sm:$0xff] %v2257_v51  ;;  %v1490_v59 = vadd.f32 %v1489_v50, %v1209_v52  ;;  %v1213_v60 = vadd.f32 %v1212_v57, %v3224_v44 }
 0x1a2   :  { %v1632_v61 = vmax.f32 %v1488_v55, 0.0  ;;  %v1492_v62 = vadd.f32 %v1491_v54, %v1211_v56 }
 0x1a3   :  { %v1633_v63 = vmax.f32 %v1490_v59, 0.0  ;;  %v1494_v0 = vadd.f32 %v1493_v58, %v1213_v60 }
 0x1a4   :  { %v1634_v1 = vmax.f32 %v1492_v62, 0.0 }
 0x1a5   :  { %v2258_v2 = vpack.c.bf16 %v1633_v63, %v1632_v61  ;;  %v1635_v3 = vmax.f32 %v1494_v0, 0.0  ;;  %v1216_v4 = vpop.f32.mrb[72].mxu1 }
 0x1a6   :  { %v1497_v5 = vpop.f32.mrb[72].mxu0  ;;  %v1217_v6 = vadd.f32 %v1216_v4, %v3222_v43  ;;  %v1218_v7 = vpop.f32.mrb[73].mxu1 }
 0x1a7   :  { %v1499_v8 = vpop.f32.mrb[73].mxu0  ;;  %1992 = vst [vmem:[%s3474_s3 + $0x110] sm:$0xff] %v2258_v2  ;;  %v2259_v9 = vpack.c.bf16 %v1635_v3, %v1634_v1  ;;  %v1219_v10 = vadd.f32 %v1218_v7, %v3224_v44  ;;  %v1220_v11 = vpop.f32.mrb[74].mxu1 }
 0x1a8   :  { %v1501_v12 = vpop.f32.mrb[74].mxu0  ;;  %v1498_v13 = vadd.f32 %v1497_v5, %v1217_v6  ;;  %v1221_v14 = vadd.f32 %v1220_v11, %v3222_v43  ;;  %v1222_v15 = vpop.f32.mrb[75].mxu1 }
 0x1a9   :  { %v1503_v16 = vpop.f32.mrb[75].mxu0  ;;  %1993 = vst [vmem:[%s3474_s3 + $0x118] sm:$0xff] %v2259_v9  ;;  %v1500_v17 = vadd.f32 %v1499_v8, %v1219_v10  ;;  %v1223_v18 = vadd.f32 %v1222_v15, %v3224_v44 }
 0x1aa   :  { %v1636_v19 = vmax.f32 %v1498_v13, 0.0  ;;  %v1502_v20 = vadd.f32 %v1501_v12, %v1221_v14 }
 0x1ab   :  { %v1637_v21 = vmax.f32 %v1500_v17, 0.0  ;;  %v1504_v22 = vadd.f32 %v1503_v16, %v1223_v18 }
 0x1ac   :  { %v1638_v23 = vmax.f32 %v1502_v20, 0.0 }
 0x1ad   :  { %v2260_v24 = vpack.c.bf16 %v1637_v21, %v1636_v19  ;;  %v1639_v25 = vmax.f32 %v1504_v22, 0.0  ;;  %v1226_v26 = vpop.f32.mrb[76].mxu1 }
 0x1ae   :  { %v1507_v27 = vpop.f32.mrb[76].mxu0  ;;  %v1227_v28 = vadd.f32 %v1226_v26, %v3222_v43  ;;  %v1228_v29 = vpop.f32.mrb[77].mxu1 }
 0x1af   :  { %v1509_v30 = vpop.f32.mrb[77].mxu0  ;;  %1994 = vst [vmem:[%s3474_s3 + $0x120] sm:$0xff] %v2260_v24  ;;  %v2261_v31 = vpack.c.bf16 %v1639_v25, %v1638_v23  ;;  %v1229_v32 = vadd.f32 %v1228_v29, %v3224_v44  ;;  %v1230_v33 = vpop.f32.mrb[78].mxu1 }
 0x1b0   :  { %v1511_v34 = vpop.f32.mrb[78].mxu0  ;;  %v1508_v35 = vadd.f32 %v1507_v27, %v1227_v28  ;;  %v1231_v36 = vadd.f32 %v1230_v33, %v3222_v43  ;;  %v1232_v37 = vpop.f32.mrb[79].mxu1 }
 0x1b1   :  { %v1513_v38 = vpop.f32.mrb[79].mxu0  ;;  %1995 = vst [vmem:[%s3474_s3 + $0x128] sm:$0xff] %v2261_v31  ;;  %v1510_v39 = vadd.f32 %v1509_v30, %v1229_v32  ;;  %v1233_v40 = vadd.f32 %v1232_v37, %v3224_v44 }
 0x1b2   :  { %v1640_v41 = vmax.f32 %v1508_v35, 0.0  ;;  %v1512_v42 = vadd.f32 %v1511_v34, %v1231_v36 }
 0x1b3   :  { %v1641_v45 = vmax.f32 %v1510_v39, 0.0  ;;  %v1514_v46 = vadd.f32 %v1513_v38, %v1233_v40 }
 0x1b4   :  { %v1642_v47 = vmax.f32 %v1512_v42, 0.0 }
 0x1b5   :  { %v2262_v48 = vpack.c.bf16 %v1641_v45, %v1640_v41  ;;  %v1643_v49 = vmax.f32 %v1514_v46, 0.0  ;;  %v1236_v50 = vpop.f32.mrb[80].mxu1 }
 0x1b6   :  { %v1517_v51 = vpop.f32.mrb[80].mxu0  ;;  %v1237_v52 = vadd.f32 %v1236_v50, %v3222_v43  ;;  %v1238_v53 = vpop.f32.mrb[81].mxu1 }
 0x1b7   :  { %v1519_v54 = vpop.f32.mrb[81].mxu0  ;;  %1996 = vst [vmem:[%s3474_s3 + $0x130] sm:$0xff] %v2262_v48  ;;  %v2263_v55 = vpack.c.bf16 %v1643_v49, %v1642_v47  ;;  %v1239_v56 = vadd.f32 %v1238_v53, %v3224_v44  ;;  %v1240_v57 = vpop.f32.mrb[82].mxu1 }
 0x1b8   :  { %v1521_v58 = vpop.f32.mrb[82].mxu0  ;;  %v1518_v59 = vadd.f32 %v1517_v51, %v1237_v52  ;;  %v1241_v60 = vadd.f32 %v1240_v57, %v3222_v43  ;;  %v1242_v61 = vpop.f32.mrb[83].mxu1 }
 0x1b9   :  { %v1523_v62 = vpop.f32.mrb[83].mxu0  ;;  %1997 = vst [vmem:[%s3474_s3 + $0x138] sm:$0xff] %v2263_v55  ;;  %v1520_v63 = vadd.f32 %v1519_v54, %v1239_v56  ;;  %v1243_v0 = vadd.f32 %v1242_v61, %v3224_v44 }
 0x1ba   :  { %v1644_v1 = vmax.f32 %v1518_v59, 0.0  ;;  %v1522_v2 = vadd.f32 %v1521_v58, %v1241_v60 }
 0x1bb   :  { %v1645_v3 = vmax.f32 %v1520_v63, 0.0  ;;  %v1524_v4 = vadd.f32 %v1523_v62, %v1243_v0 }
 0x1bc   :  { %v1646_v5 = vmax.f32 %v1522_v2, 0.0 }
 0x1bd   :  { %v2264_v6 = vpack.c.bf16 %v1645_v3, %v1644_v1  ;;  %v1647_v7 = vmax.f32 %v1524_v4, 0.0  ;;  %v1246_v8 = vpop.f32.mrb[84].mxu1 }
 0x1be   :  { %v1527_v9 = vpop.f32.mrb[84].mxu0  ;;  %v1247_v10 = vadd.f32 %v1246_v8, %v3222_v43  ;;  %v1248_v11 = vpop.f32.mrb[85].mxu1 }
 0x1bf   :  { %v1529_v12 = vpop.f32.mrb[85].mxu0  ;;  %1998 = vst [vmem:[%s3474_s3 + $0x140] sm:$0xff] %v2264_v6  ;;  %v2265_v13 = vpack.c.bf16 %v1647_v7, %v1646_v5  ;;  %v1249_v14 = vadd.f32 %v1248_v11, %v3224_v44  ;;  %v1250_v15 = vpop.f32.mrb[86].mxu1 }
 0x1c0   :  { %v1531_v16 = vpop.f32.mrb[86].mxu0  ;;  %v1528_v17 = vadd.f32 %v1527_v9, %v1247_v10  ;;  %v1251_v18 = vadd.f32 %v1250_v15, %v3222_v43  ;;  %v1252_v19 = vpop.f32.mrb[87].mxu1 }
 0x1c1   :  { %v1533_v20 = vpop.f32.mrb[87].mxu0  ;;  %1999 = vst [vmem:[%s3474_s3 + $0x148] sm:$0xff] %v2265_v13  ;;  %v1530_v21 = vadd.f32 %v1529_v12, %v1249_v14  ;;  %v1253_v22 = vadd.f32 %v1252_v19, %v3224_v44 }
 0x1c2   :  { %v1648_v23 = vmax.f32 %v1528_v17, 0.0  ;;  %v1532_v24 = vadd.f32 %v1531_v16, %v1251_v18 }
 0x1c3   :  { %v1649_v25 = vmax.f32 %v1530_v21, 0.0  ;;  %v1534_v26 = vadd.f32 %v1533_v20, %v1253_v22 }
 0x1c4   :  { %v1650_v27 = vmax.f32 %v1532_v24, 0.0 }
 0x1c5   :  { %v2266_v28 = vpack.c.bf16 %v1649_v25, %v1648_v23  ;;  %v1651_v29 = vmax.f32 %v1534_v26, 0.0  ;;  %v1256_v30 = vpop.f32.mrb[88].mxu1 }
 0x1c6   :  { %v1537_v31 = vpop.f32.mrb[88].mxu0  ;;  %v1257_v32 = vadd.f32 %v1256_v30, %v3222_v43  ;;  %v1258_v33 = vpop.f32.mrb[89].mxu1 }
 0x1c7   :  { %v1539_v34 = vpop.f32.mrb[89].mxu0  ;;  %2000 = vst [vmem:[%s3474_s3 + $0x150] sm:$0xff] %v2266_v28  ;;  %v2267_v35 = vpack.c.bf16 %v1651_v29, %v1650_v27  ;;  %v1259_v36 = vadd.f32 %v1258_v33, %v3224_v44  ;;  %v1260_v37 = vpop.f32.mrb[90].mxu1 }
 0x1c8   :  { %v1541_v38 = vpop.f32.mrb[90].mxu0  ;;  %v1538_v39 = vadd.f32 %v1537_v31, %v1257_v32  ;;  %v1261_v40 = vadd.f32 %v1260_v37, %v3222_v43  ;;  %v1262_v41 = vpop.f32.mrb[91].mxu1 }
 0x1c9   :  { %v1543_v42 = vpop.f32.mrb[91].mxu0  ;;  %2001 = vst [vmem:[%s3474_s3 + $0x158] sm:$0xff] %v2267_v35  ;;  %v1540_v45 = vadd.f32 %v1539_v34, %v1259_v36  ;;  %v1263_v46 = vadd.f32 %v1262_v41, %v3224_v44 }
 0x1ca   :  { %v1652_v47 = vmax.f32 %v1538_v39, 0.0  ;;  %v1542_v48 = vadd.f32 %v1541_v38, %v1261_v40 }
 0x1cb   :  { %v1653_v49 = vmax.f32 %v1540_v45, 0.0  ;;  %v1544_v50 = vadd.f32 %v1543_v42, %v1263_v46 }
 0x1cc   :  { %v1654_v51 = vmax.f32 %v1542_v48, 0.0 }
 0x1cd   :  { %v2268_v52 = vpack.c.bf16 %v1653_v49, %v1652_v47  ;;  %v1655_v53 = vmax.f32 %v1544_v50, 0.0  ;;  %v1266_v54 = vpop.f32.mrb[92].mxu1 }
 0x1ce   :  { %v1547_v55 = vpop.f32.mrb[92].mxu0  ;;  %v1267_v56 = vadd.f32 %v1266_v54, %v3222_v43  ;;  %v1268_v57 = vpop.f32.mrb[93].mxu1 }
 0x1cf   :  { %v1549_v58 = vpop.f32.mrb[93].mxu0  ;;  %2002 = vst [vmem:[%s3474_s3 + $0x160] sm:$0xff] %v2268_v52  ;;  %v2269_v59 = vpack.c.bf16 %v1655_v53, %v1654_v51  ;;  %v1269_v60 = vadd.f32 %v1268_v57, %v3224_v44  ;;  %v1270_v61 = vpop.f32.mrb[94].mxu1 }
 0x1d0   :  { %v1551_v62 = vpop.f32.mrb[94].mxu0  ;;  %v1548_v63 = vadd.f32 %v1547_v55, %v1267_v56  ;;  %v1271_v0 = vadd.f32 %v1270_v61, %v3222_v43  ;;  %v1272_v1 = vpop.f32.mrb[95].mxu1 }
 0x1d1   :  { %v1553_v2 = vpop.f32.mrb[95].mxu0  ;;  %2003 = vst [vmem:[%s3474_s3 + $0x168] sm:$0xff] %v2269_v59  ;;  %v1550_v3 = vadd.f32 %v1549_v58, %v1269_v60  ;;  %v1273_v4 = vadd.f32 %v1272_v1, %v3224_v44 }
 0x1d2   :  { %v1656_v5 = vmax.f32 %v1548_v63, 0.0  ;;  %v1552_v6 = vadd.f32 %v1551_v62, %v1271_v0 }
 0x1d3   :  { %v1657_v7 = vmax.f32 %v1550_v3, 0.0  ;;  %v1554_v8 = vadd.f32 %v1553_v2, %v1273_v4 }
 0x1d4   :  { %v1658_v9 = vmax.f32 %v1552_v6, 0.0 }
 0x1d5   :  { %v2270_v10 = vpack.c.bf16 %v1657_v7, %v1656_v5  ;;  %v1659_v11 = vmax.f32 %v1554_v8, 0.0  ;;  %v1276_v12 = vpop.f32.mrb[96].mxu1 }
 0x1d6   :  { %v1557_v13 = vpop.f32.mrb[96].mxu0  ;;  %v1277_v14 = vadd.f32 %v1276_v12, %v3222_v43  ;;  %v1278_v15 = vpop.f32.mrb[97].mxu1 }
 0x1d7   :  { %v1559_v16 = vpop.f32.mrb[97].mxu0  ;;  %2004 = vst [vmem:[%s3474_s3 + $0x170] sm:$0xff] %v2270_v10  ;;  %v2271_v17 = vpack.c.bf16 %v1659_v11, %v1658_v9  ;;  %v1279_v18 = vadd.f32 %v1278_v15, %v3224_v44  ;;  %v1280_v19 = vpop.f32.mrb[98].mxu1 }
 0x1d8   :  { %v1561_v20 = vpop.f32.mrb[98].mxu0  ;;  %v1558_v21 = vadd.f32 %v1557_v13, %v1277_v14  ;;  %v1281_v22 = vpop.f32.mrb[99].mxu1 }
 0x1d9   :  { %v1562_v23 = vpop.f32.mrb[99].mxu0  ;;  %2005 = vst [vmem:[%s3474_s3 + $0x178] sm:$0xff] %v2271_v17  ;;  %v1560_v24 = vadd.f32 %v1559_v16, %v1279_v18 }
 0x1da   :  { %v1660_v43 = vmax.f32 %v1558_v21, 0.0 }
 0x1db   :  { %v1661_v25 = vmax.f32 %v1560_v24, 0.0 }
 0x1dd   :  { %v2272_v26 = vpack.c.bf16 %v1661_v25, %v1660_v43 }
 0x1df   :  { %2006 = vst [vmem:[%s3474_s3 + $0x180] sm:$0xff] %v2272_v26 }

// kernel: base_cnn_forward.8
= control target key start
LH: loop header
LB: loop body
LE: loop exit
PB: predicated region body
PF: predicated region fallthrough
CT: control target
= control target key end

     0   :  { %s5003_s1 = inlined_call_operand.vmem [shape: bf16[1024,512], index: 1, kind: input, shape index: {}]   ;;  %s5004_s0 = inlined_call_operand.vmem [shape: bf16[98,1024], index: 0, kind: input, shape index: {}]   ;;  %s5005_s2 = inlined_call_operand.vmem [shape: f32[1,512], index: 2, kind: input, shape index: {}]   ;;  %s5006_s3 = inlined_call_operand.vmem [shape: bf16[98,512], index: 3, kind: output, shape index: {}]  }
   0x1   :  { %v3526_v0 = vld [vmem:[%s5003_s1 + $0x4] ss:$16 sps:$4 sm:$0xff]   ;;  %v3528_v1 = vld [vmem:[%s5003_s1 + $0xc] ss:$16 sps:$4 sm:$0xff]   ;;  %v3530_v2 = vld [vmem:[%s5003_s1] ss:$16 sps:$4 sm:$0xff]  }
   0x2   :  { %1892 = vmatprep.subr.bf16.mxu0 %v3526_v0  ;;  %v3531_v3 = vld [vmem:[%s5003_s1 + $0x8] ss:$16 sps:$4 sm:$0xff]   ;;  %2296 = vmatprep.subr.bf16.mxu1 %v3528_v1  ;;  %v3532_v4 = vld [vmem:[%s5003_s1 + $0x24] ss:$16 sps:$4 sm:$0xff]   ;;  %v3534_v5 = vld [vmem:[%s5003_s1 + $0x2c] ss:$16 sps:$4 sm:$0xff]  }
   0x3   :  { %1893 = vmatpush1.bf16.msra.mxu0 %v3530_v2  ;;  %2297 = vmatpush1.bf16.msra.mxu1 %v3531_v3  ;;  %v3536_v6 = vld [vmem:[%s5003_s1 + $0x20] ss:$16 sps:$4 sm:$0xff]   ;;  %v3537_v7 = vld [vmem:[%s5003_s1 + $0x28] ss:$16 sps:$4 sm:$0xff]   ;;  %v3538_v8 = vld [vmem:[%s5003_s1 + $0x44] ss:$16 sps:$4 sm:$0xff]  }
   0x4   :  { %1894 = vmatprep.subr.bf16.mxu0 %v3532_v4  ;;  %2298 = vmatprep.subr.bf16.mxu1 %v3534_v5  ;;  %v3540_v9 = vld [vmem:[%s5003_s1 + $0x4c] ss:$16 sps:$4 sm:$0xff]   ;;  %v3542_v10 = vld [vmem:[%s5003_s1 + $0x40] ss:$16 sps:$4 sm:$0xff]   ;;  %v3543_v11 = vld [vmem:[%s5003_s1 + $0x48] ss:$16 sps:$4 sm:$0xff]  }
   0x5   :  { %v3544_v12 = vld [vmem:[%s5003_s1 + $0x64] ss:$16 sps:$4 sm:$0xff]   ;;  %v3546_v13 = vld [vmem:[%s5003_s1 + $0x6c] ss:$16 sps:$4 sm:$0xff]   ;;  %v3548_v14 = vld [vmem:[%s5003_s1 + $0x60] ss:$16 sps:$4 sm:$0xff]  }
   0x6   :  { %v3549_v15 = vld [vmem:[%s5003_s1 + $0x68] ss:$16 sps:$4 sm:$0xff]   ;;  %v3550_v16 = vld [vmem:[%s5003_s1 + $0x84] ss:$16 sps:$4 sm:$0xff]   ;;  %v3552_v17 = vld [vmem:[%s5003_s1 + $0x8c] ss:$16 sps:$4 sm:$0xff]  }
   0x7   :  { %1895 = vmatpush1.bf16.msra.mxu0 %v3536_v6  ;;  %2299 = vmatpush1.bf16.msra.mxu1 %v3537_v7  ;;  %v3554_v18 = vld [vmem:[%s5003_s1 + $0x80] ss:$16 sps:$4 sm:$0xff]   ;;  %v3555_v19 = vld [vmem:[%s5003_s1 + $0x88] ss:$16 sps:$4 sm:$0xff]   ;;  %v3556_v20 = vld [vmem:[%s5003_s1 + $0xa4] ss:$16 sps:$4 sm:$0xff]  }
   0x8   :  { %1896 = vmatprep.subr.bf16.mxu0 %v3538_v8  ;;  %2300 = vmatprep.subr.bf16.mxu1 %v3540_v9  ;;  %v3558_v21 = vld [vmem:[%s5003_s1 + $0xac] ss:$16 sps:$4 sm:$0xff]   ;;  %v3560_v22 = vld [vmem:[%s5003_s1 + $0xa0] ss:$16 sps:$4 sm:$0xff]   ;;  %v3561_v23 = vld [vmem:[%s5003_s1 + $0xa8] ss:$16 sps:$4 sm:$0xff]  }
   0x9   :  { %v3562_v24 = vld [vmem:[%s5003_s1 + $0xc4] ss:$16 sps:$4 sm:$0xff]   ;;  %v3564_v25 = vld [vmem:[%s5003_s1 + $0xcc] ss:$16 sps:$4 sm:$0xff]   ;;  %v3566_v26 = vld [vmem:[%s5003_s1 + $0xc0] ss:$16 sps:$4 sm:$0xff]  }
   0xa   :  { %v3567_v27 = vld [vmem:[%s5003_s1 + $0xc8] ss:$16 sps:$4 sm:$0xff]   ;;  %v3568_v28 = vld [vmem:[%s5003_s1 + $0xe4] ss:$16 sps:$4 sm:$0xff]   ;;  %v3570_v29 = vld [vmem:[%s5003_s1 + $0xec] ss:$16 sps:$4 sm:$0xff]  }
   0xb   :  { %1897 = vmatpush1.bf16.msra.mxu0 %v3542_v10  ;;  %2301 = vmatpush1.bf16.msra.mxu1 %v3543_v11  ;;  %v3572_v30 = vld [vmem:[%s5003_s1 + $0xe0] ss:$16 sps:$4 sm:$0xff]   ;;  %v3573_v31 = vld [vmem:[%s5003_s1 + $0xe8] ss:$16 sps:$4 sm:$0xff]   ;;  %v3574_v32 = vld [vmem:[%s5003_s1 + $0x104] ss:$16 sps:$4 sm:$0xff]  }
   0xc   :  { %1898 = vmatprep.subr.bf16.mxu0 %v3544_v12  ;;  %2302 = vmatprep.subr.bf16.mxu1 %v3546_v13  ;;  %v3576_v33 = vld [vmem:[%s5003_s1 + $0x10c] ss:$16 sps:$4 sm:$0xff]   ;;  %v3578_v34 = vld [vmem:[%s5003_s1 + $0x100] ss:$16 sps:$4 sm:$0xff]   ;;  %v3579_v35 = vld [vmem:[%s5003_s1 + $0x108] ss:$16 sps:$4 sm:$0xff]  }
   0xd   :  { %v3580_v36 = vld [vmem:[%s5003_s1 + $0x124] ss:$16 sps:$4 sm:$0xff]   ;;  %v3582_v37 = vld [vmem:[%s5003_s1 + $0x12c] ss:$16 sps:$4 sm:$0xff]   ;;  %v3584_v38 = vld [vmem:[%s5003_s1 + $0x120] ss:$16 sps:$4 sm:$0xff]  }
   0xe   :  { %v3585_v39 = vld [vmem:[%s5003_s1 + $0x128] ss:$16 sps:$4 sm:$0xff]   ;;  %v3586_v40 = vld [vmem:[%s5003_s1 + $0x144] ss:$16 sps:$4 sm:$0xff]   ;;  %v3588_v41 = vld [vmem:[%s5003_s1 + $0x14c] ss:$16 sps:$4 sm:$0xff]  }
   0xf   :  { %1899 = vmatpush1.bf16.msra.mxu0 %v3548_v14  ;;  %2303 = vmatpush1.bf16.msra.mxu1 %v3549_v15  ;;  %v3590_v42 = vld [vmem:[%s5003_s1 + $0x140] ss:$16 sps:$4 sm:$0xff]   ;;  %v3591_v43 = vld [vmem:[%s5003_s1 + $0x148] ss:$16 sps:$4 sm:$0xff]   ;;  %v3592_v44 = vld [vmem:[%s5003_s1 + $0x164] ss:$16 sps:$4 sm:$0xff]  }
  0x10   :  { %1900 = vmatprep.subr.bf16.mxu0 %v3550_v16  ;;  %2304 = vmatprep.subr.bf16.mxu1 %v3552_v17  ;;  %v3594_v45 = vld [vmem:[%s5003_s1 + $0x16c] ss:$16 sps:$4 sm:$0xff]   ;;  %v14_v46 = vld [vmem:[%s5004_s0] sm:$0xff]  ;;  %v3597_v49 = vld [vmem:[%s5003_s1 + $0x168] ss:$16 sps:$4 sm:$0xff]  }
  0x11   :  { %v18_v47 = vld [vmem:[%s5004_s0 + $0x20] sm:$0xff]  ;;  %v3600_v52 = vld [vmem:[%s5003_s1 + $0x18c] ss:$16 sps:$4 sm:$0xff]   ;;  %v3603_v54 = vld [vmem:[%s5003_s1 + $0x188] ss:$16 sps:$4 sm:$0xff]  }
  0x12   :  { %v3596_v48 = vld [vmem:[%s5003_s1 + $0x160] ss:$16 sps:$4 sm:$0xff]   ;;  %v2943_v50 = vcombine.high %v14_v46, %v18_v47  ;;  %v3598_v51 = vld [vmem:[%s5003_s1 + $0x184] ss:$16 sps:$4 sm:$0xff]   ;;  %v3606_v56 = vld [vmem:[%s5003_s1 + $0x1ac] ss:$16 sps:$4 sm:$0xff]   ;;  %v2942_v6 = vcombine.low %v14_v46, %v18_v47 }
  0x13   :  { %1901 = vmatpush1.bf16.msra.mxu0 %v3554_v18  ;;  %2305 = vmatpush1.bf16.msra.mxu1 %v3555_v19  ;;  %v3602_v53 = vld [vmem:[%s5003_s1 + $0x180] ss:$16 sps:$4 sm:$0xff]   ;;  %v3604_v55 = vld [vmem:[%s5003_s1 + $0x1a4] ss:$16 sps:$4 sm:$0xff]   ;;  %v3609_v58 = vld [vmem:[%s5003_s1 + $0x1a8] ss:$16 sps:$4 sm:$0xff]  }
  0x14   :  { %1902 = vmatprep.subr.bf16.mxu0 %v3556_v20  ;;  %2306 = vmatprep.subr.bf16.mxu1 %v3558_v21  ;;  %v3608_v57 = vld [vmem:[%s5003_s1 + $0x1a0] ss:$16 sps:$4 sm:$0xff]   ;;  %v3610_v59 = vld [vmem:[%s5003_s1 + $0x1c4] ss:$16 sps:$4 sm:$0xff]   ;;  %v3612_v60 = vld [vmem:[%s5003_s1 + $0x1cc] ss:$16 sps:$4 sm:$0xff]  }
  0x15   :  { %1924 = vmatprep.mubr.bf16.mxu0 %v2943_v50  ;;  %2328 = vmatprep.mubr.bf16.mxu1 %v2943_v50  ;;  %v3614_v61 = vld [vmem:[%s5003_s1 + $0x1c0] ss:$16 sps:$4 sm:$0xff]   ;;  %v3615_v62 = vld [vmem:[%s5003_s1 + $0x1c8] ss:$16 sps:$4 sm:$0xff]   ;;  %v3616_v63 = vld [vmem:[%s5003_s1 + $0x1e4] ss:$16 sps:$4 sm:$0xff]  }
  0x16   :  { %v3618_v0 = vld [vmem:[%s5003_s1 + $0x1ec] ss:$16 sps:$4 sm:$0xff]   ;;  %v3620_v1 = vld [vmem:[%s5003_s1 + $0x1e0] ss:$16 sps:$4 sm:$0xff]   ;;  %v3621_v2 = vld [vmem:[%s5003_s1 + $0x1e8] ss:$16 sps:$4 sm:$0xff]  }
  0x17   :  { %1903 = vmatpush1.bf16.msra.mxu0 %v3560_v22  ;;  %2307 = vmatpush1.bf16.msra.mxu1 %v3561_v23  ;;  %v3624_v3 = vld [vmem:[%s5003_s1 + $0x204] ss:$16 sps:$4 sm:$0xff]   ;;  %v3627_v4 = vld [vmem:[%s5003_s1 + $0x20c] ss:$16 sps:$4 sm:$0xff]   ;;  %v3622_v8 = vld [vmem:[%s5003_s1 + $0x200] ss:$16 sps:$4 sm:$0xff]  }
  0x18   :  { %1904 = vmatprep.subr.bf16.mxu0 %v3562_v24  ;;  %2308 = vmatprep.subr.bf16.mxu1 %v3564_v25  ;;  %v22_v5 = vld [vmem:[%s5004_s0 + $0x40] sm:$0xff]  ;;  %v3625_v9 = vld [vmem:[%s5003_s1 + $0x208] ss:$16 sps:$4 sm:$0xff]   ;;  %v3633_v11 = vld [vmem:[%s5003_s1 + $0x22c] ss:$16 sps:$4 sm:$0xff]  }
  0x19   :  { %v26_v7 = vld [vmem:[%s5004_s0 + $0x60] sm:$0xff]  ;;  %v3631_v14 = vld [vmem:[%s5003_s1 + $0x228] ss:$16 sps:$4 sm:$0xff]   ;;  %v3639_v16 = vld [vmem:[%s5003_s1 + $0x24c] ss:$16 sps:$4 sm:$0xff]  }
  0x1a   :  { %v3630_v10 = vld [vmem:[%s5003_s1 + $0x224] ss:$16 sps:$4 sm:$0xff]   ;;  %v2951_v12 = vcombine.high %v22_v5, %v26_v7  ;;  %v3628_v13 = vld [vmem:[%s5003_s1 + $0x220] ss:$16 sps:$4 sm:$0xff]   ;;  %v2950_v17 = vcombine.low %v22_v5, %v26_v7  ;;  %v3637_v21 = vld [vmem:[%s5003_s1 + $0x248] ss:$16 sps:$4 sm:$0xff]  }
  0x1b   :  { %1905 = vmatpush1.bf16.msra.mxu0 %v3566_v26  ;;  %2309 = vmatpush1.bf16.msra.mxu1 %v3567_v27  ;;  %v3636_v15 = vld [vmem:[%s5003_s1 + $0x244] ss:$16 sps:$4 sm:$0xff]   ;;  %v3634_v20 = vld [vmem:[%s5003_s1 + $0x240] ss:$16 sps:$4 sm:$0xff]   ;;  %v3645_v23 = vld [vmem:[%s5003_s1 + $0x26c] ss:$16 sps:$4 sm:$0xff]  }
  0x1c   :  { %1906 = vmatprep.subr.bf16.mxu0 %v3568_v28  ;;  %2310 = vmatprep.subr.bf16.mxu1 %v3570_v29  ;;  %v30_v18 = vld [vmem:[%s5004_s0 + $0x80] sm:$0xff]  ;;  %v3643_v26 = vld [vmem:[%s5003_s1 + $0x268] ss:$16 sps:$4 sm:$0xff]   ;;  %v3651_v28 = vld [vmem:[%s5003_s1 + $0x28c] ss:$16 sps:$4 sm:$0xff]  }
  0x1d   :  { %v34_v19 = vld [vmem:[%s5004_s0 + $0xa0] sm:$0xff]  ;;  %v3669_v47 = vld [vmem:[%s5003_s1 + $0x2ec] ss:$16 sps:$4 sm:$0xff]   ;;  %v3667_v50 = vld [vmem:[%s5003_s1 + $0x2e8] ss:$16 sps:$4 sm:$0xff]  }
  0x1e   :  { %v3642_v22 = vld [vmem:[%s5003_s1 + $0x264] ss:$16 sps:$4 sm:$0xff]   ;;  %v2959_v24 = vcombine.high %v30_v18, %v34_v19  ;;  %v3640_v25 = vld [vmem:[%s5003_s1 + $0x260] ss:$16 sps:$4 sm:$0xff]  }
  0x1f   :  { %1907 = vmatpush1.bf16.msra.mxu0 %v3572_v30  ;;  %2311 = vmatpush1.bf16.msra.mxu1 %v3573_v31  ;;  %v3648_v27 = vld [vmem:[%s5003_s1 + $0x284] ss:$16 sps:$4 sm:$0xff]   ;;  %v3646_v29 = vld [vmem:[%s5003_s1 + $0x280] ss:$16 sps:$4 sm:$0xff]   ;;  %v3649_v30 = vld [vmem:[%s5003_s1 + $0x288] ss:$16 sps:$4 sm:$0xff]   ;;  %v2958_v31 = vcombine.low %v30_v18, %v34_v19 }
  0x20   :  { %1908 = vmatprep.subr.bf16.mxu0 %v3574_v32  ;;  %2312 = vmatprep.subr.bf16.mxu1 %v3576_v33  ;;  %v38_v32 = vld [vmem:[%s5004_s0 + $0xc0] sm:$0xff]  ;;  %v3705_v18 = vld [vmem:[%s5003_s1 + $0x3ac] ss:$16 sps:$4 sm:$0xff]  }
  0x21   :  { %v42_v33 = vld [vmem:[%s5004_s0 + $0xe0] sm:$0xff] }
  0x22   :  { %v3666_v46 = vld [vmem:[%s5003_s1 + $0x2e4] ss:$16 sps:$4 sm:$0xff]  }
  0x23   :  { %1909 = vmatpush1.bf16.msra.mxu0 %v3578_v34  ;;  %2313 = vmatpush1.bf16.msra.mxu1 %v3579_v35  ;;  %v3654_v34 = vld [vmem:[%s5003_s1 + $0x2a4] ss:$16 sps:$4 sm:$0xff]   ;;  %v3657_v35 = vld [vmem:[%s5003_s1 + $0x2ac] ss:$16 sps:$4 sm:$0xff]  }
  0x24   :  { %1910 = vmatprep.subr.bf16.mxu0 %v3580_v36  ;;  %2314 = vmatprep.subr.bf16.mxu1 %v3582_v37  ;;  %v2967_v36 = vcombine.high %v38_v32, %v42_v33  ;;  %v3652_v37 = vld [vmem:[%s5003_s1 + $0x2a0] ss:$16 sps:$4 sm:$0xff]   ;;  %v3690_v5 = vld [vmem:[%s5003_s1 + $0x364] ss:$16 sps:$4 sm:$0xff]  }
  0x27   :  { %1911 = vmatpush1.bf16.msra.mxu0 %v3584_v38  ;;  %2315 = vmatpush1.bf16.msra.mxu1 %v3585_v39  ;;  %v3655_v38 = vld [vmem:[%s5003_s1 + $0x2a8] ss:$16 sps:$4 sm:$0xff]   ;;  %v3660_v39 = vld [vmem:[%s5003_s1 + $0x2c4] ss:$16 sps:$4 sm:$0xff]  }
  0x28   :  { %1912 = vmatprep.subr.bf16.mxu0 %v3586_v40  ;;  %2316 = vmatprep.subr.bf16.mxu1 %v3588_v41  ;;  %v3663_v40 = vld [vmem:[%s5003_s1 + $0x2cc] ss:$16 sps:$4 sm:$0xff]   ;;  %v3658_v41 = vld [vmem:[%s5003_s1 + $0x2c0] ss:$16 sps:$4 sm:$0xff]  }
  0x2b   :  { %1913 = vmatpush1.bf16.msra.mxu0 %v3590_v42  ;;  %2317 = vmatpush1.bf16.msra.mxu1 %v3591_v43  ;;  %v46_v42 = vld [vmem:[%s5004_s0 + $0x100] sm:$0xff]  ;;  %v2966_v43 = vcombine.low %v38_v32, %v42_v33  ;;  %v23_v33 = vld [vmem:[%s5004_s0 + $0x48] sm:$0xff] }
  0x2c   :  { %1914 = vmatprep.subr.bf16.mxu0 %v3592_v44  ;;  %2318 = vmatprep.subr.bf16.mxu1 %v3594_v45  ;;  %v50_v44 = vld [vmem:[%s5004_s0 + $0x120] sm:$0xff]  ;;  %v3661_v45 = vld [vmem:[%s5003_s1 + $0x2c8] ss:$16 sps:$4 sm:$0xff]  }
  0x2d   :  { %v3720_v32 = vld [vmem:[%s5003_s1 + $0x400] ss:$16 sps:$4 sm:$0xff]  }
  0x2f   :  { %1915 = vmatpush1.bf16.msra.mxu0 %v3596_v48  ;;  %2319 = vmatpush1.bf16.msra.mxu1 %v3597_v49  ;;  %v2975_v48 = vcombine.high %v46_v42, %v50_v44  ;;  %v3664_v49 = vld [vmem:[%s5003_s1 + $0x2e0] ss:$16 sps:$4 sm:$0xff]  }
  0x30   :  { %1916 = vmatprep.subr.bf16.mxu0 %v3598_v51  ;;  %2320 = vmatprep.subr.bf16.mxu1 %v3600_v52  ;;  %v3672_v51 = vld [vmem:[%s5003_s1 + $0x304] ss:$16 sps:$4 sm:$0xff]   ;;  %v3675_v52 = vld [vmem:[%s5003_s1 + $0x30c] ss:$16 sps:$4 sm:$0xff]  }
  0x33   :  { %1917 = vmatpush1.bf16.msra.mxu0 %v3602_v53  ;;  %2321 = vmatpush1.bf16.msra.mxu1 %v3603_v54  ;;  %v3670_v53 = vld [vmem:[%s5003_s1 + $0x300] ss:$16 sps:$4 sm:$0xff]   ;;  %v2974_v54 = vcombine.low %v46_v42, %v50_v44  ;;  %v3734_v42 = vld [vmem:[%s5003_s1 + $0x444] ss:$16 sps:$4 sm:$0xff]   ;;  %v31_v44 = vld [vmem:[%s5004_s0 + $0x88] sm:$0xff] }
  0x34   :  { %1918 = vmatprep.subr.bf16.mxu0 %v3604_v55  ;;  %2322 = vmatprep.subr.bf16.mxu1 %v3606_v56  ;;  %v54_v55 = vld [vmem:[%s5004_s0 + $0x140] sm:$0xff] }
  0x35   :  { %v58_v56 = vld [vmem:[%s5004_s0 + $0x160] sm:$0xff] }
  0x37   :  { %1919 = vmatpush1.bf16.msra.mxu0 %v3608_v57  ;;  %2323 = vmatpush1.bf16.msra.mxu1 %v3609_v58  ;;  %v3673_v57 = vld [vmem:[%s5003_s1 + $0x308] ss:$16 sps:$4 sm:$0xff]   ;;  %v3678_v58 = vld [vmem:[%s5003_s1 + $0x324] ss:$16 sps:$4 sm:$0xff]  }
  0x38   :  { %1920 = vmatprep.subr.bf16.mxu0 %v3610_v59  ;;  %2324 = vmatprep.subr.bf16.mxu1 %v3612_v60  ;;  %v3681_v59 = vld [vmem:[%s5003_s1 + $0x32c] ss:$16 sps:$4 sm:$0xff]   ;;  %v2983_v60 = vcombine.high %v54_v55, %v58_v56 }
  0x3b   :  { %1921 = vmatpush1.bf16.msra.mxu0 %v3614_v61  ;;  %2325 = vmatpush1.bf16.msra.mxu1 %v3615_v62  ;;  %v3676_v61 = vld [vmem:[%s5003_s1 + $0x320] ss:$16 sps:$4 sm:$0xff]   ;;  %v3679_v62 = vld [vmem:[%s5003_s1 + $0x328] ss:$16 sps:$4 sm:$0xff]  }
  0x3c   :  { %1922 = vmatprep.subr.bf16.mxu0 %v3616_v63  ;;  %2326 = vmatprep.subr.bf16.mxu1 %v3618_v0  ;;  %v3684_v63 = vld [vmem:[%s5003_s1 + $0x344] ss:$16 sps:$4 sm:$0xff]   ;;  %v3687_v0 = vld [vmem:[%s5003_s1 + $0x34c] ss:$16 sps:$4 sm:$0xff]  }
  0x3f   :  { %1923 = vmatpush1.bf16.msra.mxu0 %v3620_v1  ;;  %2327 = vmatpush1.bf16.msra.mxu1 %v3621_v2  ;;  %v3682_v1 = vld [vmem:[%s5003_s1 + $0x340] ss:$16 sps:$4 sm:$0xff]   ;;  %v2982_v2 = vcombine.low %v54_v55, %v58_v56  ;;  %v3749_v55 = vld [vmem:[%s5003_s1 + $0x48c] ss:$16 sps:$4 sm:$0xff]  }
  0x40   :  { %1993 = vmatprep.subr.bf16.mxu0 %v3624_v3  ;;  %2397 = vmatprep.subr.bf16.mxu1 %v3627_v4  ;;  %v62_v3 = vld [vmem:[%s5004_s0 + $0x180] sm:$0x11]  ;;  %v3685_v4 = vld [vmem:[%s5003_s1 + $0x348] ss:$16 sps:$4 sm:$0xff]  }
  0x41   :  { %v2991_v7 = vcombine.high %v62_v3, %v62_v3  ;;  %v3744_v56 = vld [vmem:[%s5003_s1 + $0x480] ss:$16 sps:$4 sm:$0xff]  }
  0x42   :  { %1925 = vmatmul.mubr.bf16.vlgmr.msra.gmra.mrb[0].mxu0 %v2942_v6  ;;  %2329 = vmatmul.mubr.bf16.vlgmr.msra.gmra.mrb[0].mxu1 %v2942_v6  ;;  %v3693_v6 = vld [vmem:[%s5003_s1 + $0x36c] ss:$16 sps:$4 sm:$0xff]  }
  0x43   :  { %1994 = vmatpush1.bf16.msra.mxu0 %v3622_v8  ;;  %2398 = vmatpush1.bf16.msra.mxu1 %v3625_v9  ;;  %v3688_v8 = vld [vmem:[%s5003_s1 + $0x360] ss:$16 sps:$4 sm:$0xff]   ;;  %v3691_v9 = vld [vmem:[%s5003_s1 + $0x368] ss:$16 sps:$4 sm:$0xff]  }
  0x44   :  { %1995 = vmatprep.subr.bf16.mxu0 %v3630_v10  ;;  %2399 = vmatprep.subr.bf16.mxu1 %v3633_v11  ;;  %v3696_v10 = vld [vmem:[%s5003_s1 + $0x384] ss:$16 sps:$4 sm:$0xff]   ;;  %v3699_v11 = vld [vmem:[%s5003_s1 + $0x38c] ss:$16 sps:$4 sm:$0xff]  }
  0x45   :  { %1934 = vmatprep.mubr.bf16.mxu0 %v2951_v12  ;;  %2338 = vmatprep.mubr.bf16.mxu1 %v2951_v12  ;;  %v2990_v12 = vcombine.low %v62_v3, %v62_v3  ;;  %v3761_v3 = vld [vmem:[%s5003_s1 + $0x4cc] ss:$16 sps:$4 sm:$0xff]  }
  0x47   :  { %1996 = vmatpush1.bf16.msra.mxu0 %v3628_v13  ;;  %2400 = vmatpush1.bf16.msra.mxu1 %v3631_v14  ;;  %v15_v13 = vld [vmem:[%s5004_s0 + $0x8] sm:$0xff] }
  0x48   :  { %1997 = vmatprep.subr.bf16.mxu0 %v3636_v15  ;;  %2401 = vmatprep.subr.bf16.mxu1 %v3639_v16  ;;  %v19_v14 = vld [vmem:[%s5004_s0 + $0x28] sm:$0xff]  ;;  %v3694_v15 = vld [vmem:[%s5003_s1 + $0x380] ss:$16 sps:$4 sm:$0xff]  }
  0x49   :  { %v3697_v16 = vld [vmem:[%s5003_s1 + $0x388] ss:$16 sps:$4 sm:$0xff]   ;;  %v2945_v19 = vcombine.high %v15_v13, %v19_v14 }
  0x4a   :  { %1935 = vmatmul.mubr.bf16.gmra.mrb[4].mxu0 %v2950_v17  ;;  %2339 = vmatmul.mubr.bf16.gmra.mrb[4].mxu1 %v2950_v17  ;;  %v3702_v17 = vld [vmem:[%s5003_s1 + $0x3a4] ss:$16 sps:$4 sm:$0xff]  }
  0x4b   :  { %1998 = vmatpush1.bf16.msra.mxu0 %v3634_v20  ;;  %2402 = vmatpush1.bf16.msra.mxu1 %v3637_v21  ;;  %v3700_v20 = vld [vmem:[%s5003_s1 + $0x3a0] ss:$16 sps:$4 sm:$0xff]   ;;  %v3703_v21 = vld [vmem:[%s5003_s1 + $0x3a8] ss:$16 sps:$4 sm:$0xff]  }
  0x4c   :  { %1999 = vmatprep.subr.bf16.mxu0 %v3642_v22  ;;  %2403 = vmatprep.subr.bf16.mxu1 %v3645_v23  ;;  %v3709_v22 = vld [vmem:[%s5003_s1 + $0x3c4] ss:$16 sps:$4 sm:$0xff]   ;;  %v3712_v23 = vld [vmem:[%s5003_s1 + $0x3cc] ss:$16 sps:$4 sm:$0xff]  }
  0x4d   :  { %1944 = vmatprep.mubr.bf16.mxu0 %v2959_v24  ;;  %2348 = vmatprep.mubr.bf16.mxu1 %v2959_v24  ;;  %v3707_v24 = vld [vmem:[%s5003_s1 + $0x3c0] ss:$16 sps:$4 sm:$0xff]  }
  0x4f   :  { %2000 = vmatpush1.bf16.msra.mxu0 %v3640_v25  ;;  %2404 = vmatpush1.bf16.msra.mxu1 %v3643_v26  ;;  %v3710_v25 = vld [vmem:[%s5003_s1 + $0x3c8] ss:$16 sps:$4 sm:$0xff]   ;;  %v3716_v26 = vld [vmem:[%s5003_s1 + $0x3e4] ss:$16 sps:$4 sm:$0xff]  }
  0x50   :  { %2001 = vmatprep.subr.bf16.mxu0 %v3648_v27  ;;  %2405 = vmatprep.subr.bf16.mxu1 %v3651_v28  ;;  %v3719_v27 = vld [vmem:[%s5003_s1 + $0x3ec] ss:$16 sps:$4 sm:$0xff]   ;;  %v3714_v28 = vld [vmem:[%s5003_s1 + $0x3e0] ss:$16 sps:$4 sm:$0xff]  }
  0x52   :  { %1945 = vmatmul.mubr.bf16.gmra.mrb[8].mxu0 %v2958_v31  ;;  %2349 = vmatmul.mubr.bf16.gmra.mrb[8].mxu1 %v2958_v31  ;;  %v3725_v31 = vld [vmem:[%s5003_s1 + $0x40c] ss:$16 sps:$4 sm:$0xff]  }
  0x53   :  { %2002 = vmatpush1.bf16.msra.mxu0 %v3646_v29  ;;  %2406 = vmatpush1.bf16.msra.mxu1 %v3649_v30  ;;  %v3717_v29 = vld [vmem:[%s5003_s1 + $0x3e8] ss:$16 sps:$4 sm:$0xff]   ;;  %v3722_v30 = vld [vmem:[%s5003_s1 + $0x404] ss:$16 sps:$4 sm:$0xff]  }
  0x54   :  { %2003 = vmatprep.subr.bf16.mxu0 %v3654_v34  ;;  %2407 = vmatprep.subr.bf16.mxu1 %v3657_v35  ;;  %v2944_v34 = vcombine.low %v15_v13, %v19_v14  ;;  %v27_v35 = vld [vmem:[%s5004_s0 + $0x68] sm:$0xff]  ;;  %v3770_v14 = vld [vmem:[%s5003_s1 + $0x504] ss:$16 sps:$4 sm:$0xff]  }
  0x55   :  { %1954 = vmatprep.mubr.bf16.mxu0 %v2967_v36  ;;  %2358 = vmatprep.mubr.bf16.mxu1 %v2967_v36  ;;  %v3723_v36 = vld [vmem:[%s5003_s1 + $0x408] ss:$16 sps:$4 sm:$0xff]  }
  0x56   :  { %v3765_v13 = vld [vmem:[%s5003_s1 + $0x4e8] ss:$16 sps:$4 sm:$0xff]  }
  0x57   :  { %2004 = vmatpush1.bf16.msra.mxu0 %v3652_v37  ;;  %2408 = vmatpush1.bf16.msra.mxu1 %v3655_v38  ;;  %v3728_v37 = vld [vmem:[%s5003_s1 + $0x424] ss:$16 sps:$4 sm:$0xff]   ;;  %v3731_v38 = vld [vmem:[%s5003_s1 + $0x42c] ss:$16 sps:$4 sm:$0xff]  }
  0x58   :  { %2005 = vmatprep.subr.bf16.mxu0 %v3660_v39  ;;  %2409 = vmatprep.subr.bf16.mxu1 %v3663_v40  ;;  %v2953_v39 = vcombine.high %v23_v33, %v27_v35  ;;  %v3726_v40 = vld [vmem:[%s5003_s1 + $0x420] ss:$16 sps:$4 sm:$0xff]  }
  0x5a   :  { %1955 = vmatmul.mubr.bf16.gmra.mrb[12].mxu0 %v2966_v43  ;;  %2359 = vmatmul.mubr.bf16.gmra.mrb[12].mxu1 %v2966_v43  ;;  %v3737_v43 = vld [vmem:[%s5003_s1 + $0x44c] ss:$16 sps:$4 sm:$0xff]  }
  0x5b   :  { %2006 = vmatpush1.bf16.msra.mxu0 %v3658_v41  ;;  %2410 = vmatpush1.bf16.msra.mxu1 %v3661_v45  ;;  %v3729_v41 = vld [vmem:[%s5003_s1 + $0x428] ss:$16 sps:$4 sm:$0xff]   ;;  %v2952_v45 = vcombine.low %v23_v33, %v27_v35  ;;  %v3791_v33 = vld [vmem:[%s5003_s1 + $0x56c] ss:$16 sps:$4 sm:$0xff]   ;;  %v3786_v35 = vld [vmem:[%s5003_s1 + $0x560] ss:$16 sps:$4 sm:$0xff]  }
  0x5c   :  { %2007 = vmatprep.subr.bf16.mxu0 %v3666_v46  ;;  %2411 = vmatprep.subr.bf16.mxu1 %v3669_v47  ;;  %v35_v46 = vld [vmem:[%s5004_s0 + $0xa8] sm:$0xff]  ;;  %v3732_v47 = vld [vmem:[%s5003_s1 + $0x440] ss:$16 sps:$4 sm:$0xff]  }
  0x5d   :  { %1964 = vmatprep.mubr.bf16.mxu0 %v2975_v48  ;;  %2368 = vmatprep.mubr.bf16.mxu1 %v2975_v48  ;;  %v3735_v48 = vld [vmem:[%s5003_s1 + $0x448] ss:$16 sps:$4 sm:$0xff]  }
  0x5f   :  { %2008 = vmatpush1.bf16.msra.mxu0 %v3664_v49  ;;  %2412 = vmatpush1.bf16.msra.mxu1 %v3667_v50  ;;  %v3740_v49 = vld [vmem:[%s5003_s1 + $0x464] ss:$16 sps:$4 sm:$0xff]   ;;  %v3743_v50 = vld [vmem:[%s5003_s1 + $0x46c] ss:$16 sps:$4 sm:$0xff]  }
  0x60   :  { %2009 = vmatprep.subr.bf16.mxu0 %v3672_v51  ;;  %2413 = vmatprep.subr.bf16.mxu1 %v3675_v52  ;;  %v2961_v51 = vcombine.high %v31_v44, %v35_v46  ;;  %v3738_v52 = vld [vmem:[%s5003_s1 + $0x460] ss:$16 sps:$4 sm:$0xff]  }
  0x62   :  { %1965 = vmatmul.mubr.bf16.gmra.mrb[16].mxu0 %v2974_v54  ;;  %2369 = vmatmul.mubr.bf16.gmra.mrb[16].mxu1 %v2974_v54  ;;  %v3746_v54 = vld [vmem:[%s5003_s1 + $0x484] ss:$16 sps:$4 sm:$0xff]  }
  0x63   :  { %2010 = vmatpush1.bf16.msra.mxu0 %v3670_v53  ;;  %2414 = vmatpush1.bf16.msra.mxu1 %v3673_v57  ;;  %v3741_v53 = vld [vmem:[%s5003_s1 + $0x468] ss:$16 sps:$4 sm:$0xff]  }
  0x64   :  { %2011 = vmatprep.subr.bf16.mxu0 %v3678_v58  ;;  %2415 = vmatprep.subr.bf16.mxu1 %v3681_v59  ;;  %v3747_v57 = vld [vmem:[%s5003_s1 + $0x488] ss:$16 sps:$4 sm:$0xff]   ;;  %v2960_v58 = vcombine.low %v31_v44, %v35_v46  ;;  %v3800_v44 = vld [vmem:[%s5003_s1 + $0x5a4] ss:$16 sps:$4 sm:$0xff]  }
  0x65   :  { %1974 = vmatprep.mubr.bf16.mxu0 %v2983_v60  ;;  %2378 = vmatprep.mubr.bf16.mxu1 %v2983_v60  ;;  %v39_v59 = vld [vmem:[%s5004_s0 + $0xc8] sm:$0xff] }
  0x66   :  { %v43_v60 = vld [vmem:[%s5004_s0 + $0xe8] sm:$0xff] }
  0x67   :  { %2012 = vmatpush1.bf16.msra.mxu0 %v3676_v61  ;;  %2416 = vmatpush1.bf16.msra.mxu1 %v3679_v62  ;;  %v3752_v61 = vld [vmem:[%s5003_s1 + $0x4a4] ss:$16 sps:$4 sm:$0xff]   ;;  %v3755_v62 = vld [vmem:[%s5003_s1 + $0x4ac] ss:$16 sps:$4 sm:$0xff]  }
  0x68   :  { %2013 = vmatprep.subr.bf16.mxu0 %v3684_v63  ;;  %2417 = vmatprep.subr.bf16.mxu1 %v3687_v0  ;;  %v2969_v63 = vcombine.high %v39_v59, %v43_v60  ;;  %v3750_v0 = vld [vmem:[%s5003_s1 + $0x4a0] ss:$16 sps:$4 sm:$0xff]  }
  0x6a   :  { %1975 = vmatmul.mubr.bf16.gmra.mrb[20].mxu0 %v2982_v2  ;;  %2379 = vmatmul.mubr.bf16.gmra.mrb[20].mxu1 %v2982_v2  ;;  %v3758_v2 = vld [vmem:[%s5003_s1 + $0x4c4] ss:$16 sps:$4 sm:$0xff]  }
  0x6b   :  { %2014 = vmatpush1.bf16.msra.mxu0 %v3682_v1  ;;  %2418 = vmatpush1.bf16.msra.mxu1 %v3685_v4  ;;  %v3753_v1 = vld [vmem:[%s5003_s1 + $0x4a8] ss:$16 sps:$4 sm:$0xff]  }
  0x6c   :  { %2015 = vmatprep.subr.bf16.mxu0 %v3690_v5  ;;  %2419 = vmatprep.subr.bf16.mxu1 %v3693_v6  ;;  %v47_v4 = vld [vmem:[%s5004_s0 + $0x108] sm:$0xff]  ;;  %v2968_v5 = vcombine.low %v39_v59, %v43_v60  ;;  %v24_v60 = vld [vmem:[%s5004_s0 + $0x50] sm:$0xff] }
  0x6d   :  { %1984 = vmatprep.mubr.bf16.mxu0 %v2991_v7  ;;  %2388 = vmatprep.mubr.bf16.mxu1 %v2991_v7  ;;  %v51_v6 = vld [vmem:[%s5004_s0 + $0x128] sm:$0xff]  ;;  %v3756_v7 = vld [vmem:[%s5003_s1 + $0x4c0] ss:$16 sps:$4 sm:$0xff]  }
  0x6f   :  { %2016 = vmatpush1.bf16.msra.mxu0 %v3688_v8  ;;  %2420 = vmatpush1.bf16.msra.mxu1 %v3691_v9  ;;  %v3759_v8 = vld [vmem:[%s5003_s1 + $0x4c8] ss:$16 sps:$4 sm:$0xff]   ;;  %v3764_v9 = vld [vmem:[%s5003_s1 + $0x4e4] ss:$16 sps:$4 sm:$0xff]  }
  0x70   :  { %2017 = vmatprep.subr.bf16.mxu0 %v3696_v10  ;;  %2421 = vmatprep.subr.bf16.mxu1 %v3699_v11  ;;  %v3767_v10 = vld [vmem:[%s5003_s1 + $0x4ec] ss:$16 sps:$4 sm:$0xff]   ;;  %v2977_v11 = vcombine.high %v47_v4, %v51_v6 }
  0x72   :  { %1985 = vmatmul.mubr.bf16.gmra.mrb[24].mxu0 %v2990_v12  ;;  %2389 = vmatmul.mubr.bf16.gmra.mrb[24].mxu1 %v2990_v12  ;;  %v3762_v12 = vld [vmem:[%s5003_s1 + $0x4e0] ss:$16 sps:$4 sm:$0xff]  }
  0x73   :  { %2018 = vmatpush1.bf16.msra.mxu0 %v3694_v15  ;;  %2422 = vmatpush1.bf16.msra.mxu1 %v3697_v16  ;;  %v3773_v15 = vld [vmem:[%s5003_s1 + $0x50c] ss:$16 sps:$4 sm:$0xff]   ;;  %v2976_v16 = vcombine.low %v47_v4, %v51_v6  ;;  %v3827_v4 = vld [vmem:[%s5003_s1 + $0x628] ss:$16 sps:$4 sm:$0xff]  }
  0x74   :  { %2019 = vmatprep.subr.bf16.mxu0 %v3702_v17  ;;  %2423 = vmatprep.subr.bf16.mxu1 %v3705_v18  ;;  %v55_v17 = vld [vmem:[%s5004_s0 + $0x148] sm:$0xff] }
  0x75   :  { %2025 = vmatprep.mubr.bf16.mxu0 %v2945_v19  ;;  %2429 = vmatprep.mubr.bf16.mxu1 %v2945_v19  ;;  %v59_v18 = vld [vmem:[%s5004_s0 + $0x168] sm:$0xff]  ;;  %v3768_v19 = vld [vmem:[%s5003_s1 + $0x500] ss:$16 sps:$4 sm:$0xff]  }
  0x76   :  { %v3835_v6 = vld [vmem:[%s5003_s1 + $0x64c] ss:$16 sps:$4 sm:$0xff]  }
  0x77   :  { %2020 = vmatpush1.bf16.msra.mxu0 %v3700_v20  ;;  %2424 = vmatpush1.bf16.msra.mxu1 %v3703_v21  ;;  %v3771_v20 = vld [vmem:[%s5003_s1 + $0x508] ss:$16 sps:$4 sm:$0xff]   ;;  %v3776_v21 = vld [vmem:[%s5003_s1 + $0x524] ss:$16 sps:$4 sm:$0xff]  }
  0x78   :  { %2021 = vmatprep.subr.bf16.mxu0 %v3709_v22  ;;  %2425 = vmatprep.subr.bf16.mxu1 %v3712_v23  ;;  %v3779_v22 = vld [vmem:[%s5003_s1 + $0x52c] ss:$16 sps:$4 sm:$0xff]   ;;  %v2985_v23 = vcombine.high %v55_v17, %v59_v18 }
  0x7b   :  { %2022 = vmatpush1.bf16.msra.mxu0 %v3707_v24  ;;  %2426 = vmatpush1.bf16.msra.mxu1 %v3710_v25  ;;  %v3774_v24 = vld [vmem:[%s5003_s1 + $0x520] ss:$16 sps:$4 sm:$0xff]   ;;  %v3777_v25 = vld [vmem:[%s5003_s1 + $0x528] ss:$16 sps:$4 sm:$0xff]  }
  0x7c   :  { %2023 = vmatprep.subr.bf16.mxu0 %v3716_v26  ;;  %2427 = vmatprep.subr.bf16.mxu1 %v3719_v27  ;;  %v3782_v26 = vld [vmem:[%s5003_s1 + $0x544] ss:$16 sps:$4 sm:$0xff]   ;;  %v3785_v27 = vld [vmem:[%s5003_s1 + $0x54c] ss:$16 sps:$4 sm:$0xff]  }
  0x7f   :  { %2024 = vmatpush1.bf16.msra.mxu0 %v3714_v28  ;;  %2428 = vmatpush1.bf16.msra.mxu1 %v3717_v29  ;;  %v3780_v28 = vld [vmem:[%s5003_s1 + $0x540] ss:$16 sps:$4 sm:$0xff]   ;;  %v3783_v29 = vld [vmem:[%s5003_s1 + $0x548] ss:$16 sps:$4 sm:$0xff]  }
  0x80   :  { %2094 = vmatprep.subr.bf16.mxu0 %v3722_v30  ;;  %2498 = vmatprep.subr.bf16.mxu1 %v3725_v31  ;;  %v2984_v30 = vcombine.low %v55_v17, %v59_v18  ;;  %v63_v31 = vld [vmem:[%s5004_s0 + $0x188] sm:$0x11]  ;;  %v3844_v17 = vld [vmem:[%s5003_s1 + $0x684] ss:$16 sps:$4 sm:$0xff]  }
  0x81   :  { %v3847_v18 = vld [vmem:[%s5003_s1 + $0x68c] ss:$16 sps:$4 sm:$0xff]  }
  0x82   :  { %2026 = vmatmul.mubr.bf16.vlgmr.msra.gmra.mrb[0].mxu0 %v2944_v34  ;;  %2430 = vmatmul.mubr.bf16.vlgmr.msra.gmra.mrb[0].mxu1 %v2944_v34  ;;  %v2993_v34 = vcombine.high %v63_v31, %v63_v31 }
  0x83   :  { %2095 = vmatpush1.bf16.msra.mxu0 %v3720_v32  ;;  %2499 = vmatpush1.bf16.msra.mxu1 %v3723_v36  ;;  %v3788_v32 = vld [vmem:[%s5003_s1 + $0x564] ss:$16 sps:$4 sm:$0xff]   ;;  %v3789_v36 = vld [vmem:[%s5003_s1 + $0x568] ss:$16 sps:$4 sm:$0xff]  }
  0x84   :  { %2096 = vmatprep.subr.bf16.mxu0 %v3728_v37  ;;  %2500 = vmatprep.subr.bf16.mxu1 %v3731_v38  ;;  %v3794_v37 = vld [vmem:[%s5003_s1 + $0x584] ss:$16 sps:$4 sm:$0xff]   ;;  %v3797_v38 = vld [vmem:[%s5003_s1 + $0x58c] ss:$16 sps:$4 sm:$0xff]  }
  0x85   :  { %2035 = vmatprep.mubr.bf16.mxu0 %v2953_v39  ;;  %2439 = vmatprep.mubr.bf16.mxu1 %v2953_v39  ;;  %v16_v39 = vld [vmem:[%s5004_s0 + $0x10] sm:$0xff] }
  0x87   :  { %2097 = vmatpush1.bf16.msra.mxu0 %v3726_v40  ;;  %2501 = vmatpush1.bf16.msra.mxu1 %v3729_v41  ;;  %v2992_v40 = vcombine.low %v63_v31, %v63_v31  ;;  %v20_v41 = vld [vmem:[%s5004_s0 + $0x30] sm:$0xff] }
  0x88   :  { %2098 = vmatprep.subr.bf16.mxu0 %v3734_v42  ;;  %2502 = vmatprep.subr.bf16.mxu1 %v3737_v43  ;;  %v3792_v42 = vld [vmem:[%s5003_s1 + $0x580] ss:$16 sps:$4 sm:$0xff]   ;;  %v3795_v43 = vld [vmem:[%s5003_s1 + $0x588] ss:$16 sps:$4 sm:$0xff]   ;;  %v2947_v46 = vcombine.high %v16_v39, %v20_v41  ;;  %v2946_v59 = vcombine.low %v16_v39, %v20_v41  ;;  %v3868_v41 = vld [vmem:[%s5003_s1 + $0x704] ss:$16 sps:$4 sm:$0xff]  }
  0x89   :  { %v3860_v39 = vld [vmem:[%s5003_s1 + $0x6e0] ss:$16 sps:$4 sm:$0xff]  }
  0x8a   :  { %2036 = vmatmul.mubr.bf16.gmra.mrb[4].mxu0 %v2952_v45  ;;  %2440 = vmatmul.mubr.bf16.gmra.mrb[4].mxu1 %v2952_v45  ;;  %v3803_v45 = vld [vmem:[%s5003_s1 + $0x5ac] ss:$16 sps:$4 sm:$0xff]  }
  0x8b   :  { %2099 = vmatpush1.bf16.msra.mxu0 %v3732_v47  ;;  %2503 = vmatpush1.bf16.msra.mxu1 %v3735_v48  ;;  %v3798_v47 = vld [vmem:[%s5003_s1 + $0x5a0] ss:$16 sps:$4 sm:$0xff]   ;;  %v3801_v48 = vld [vmem:[%s5003_s1 + $0x5a8] ss:$16 sps:$4 sm:$0xff]  }
  0x8c   :  { %2100 = vmatprep.subr.bf16.mxu0 %v3740_v49  ;;  %2504 = vmatprep.subr.bf16.mxu1 %v3743_v50  ;;  %v3807_v49 = vld [vmem:[%s5003_s1 + $0x5c4] ss:$16 sps:$4 sm:$0xff]   ;;  %v3810_v50 = vld [vmem:[%s5003_s1 + $0x5cc] ss:$16 sps:$4 sm:$0xff]  }
  0x8d   :  { %2045 = vmatprep.mubr.bf16.mxu0 %v2961_v51  ;;  %2449 = vmatprep.mubr.bf16.mxu1 %v2961_v51  ;;  %v3805_v51 = vld [vmem:[%s5003_s1 + $0x5c0] ss:$16 sps:$4 sm:$0xff]  }
  0x8f   :  { %2101 = vmatpush1.bf16.msra.mxu0 %v3738_v52  ;;  %2505 = vmatpush1.bf16.msra.mxu1 %v3741_v53  ;;  %v3808_v52 = vld [vmem:[%s5003_s1 + $0x5c8] ss:$16 sps:$4 sm:$0xff]   ;;  %v3814_v53 = vld [vmem:[%s5003_s1 + $0x5e4] ss:$16 sps:$4 sm:$0xff]  }
  0x90   :  { %2102 = vmatprep.subr.bf16.mxu0 %v3746_v54  ;;  %2506 = vmatprep.subr.bf16.mxu1 %v3749_v55  ;;  %v3817_v54 = vld [vmem:[%s5003_s1 + $0x5ec] ss:$16 sps:$4 sm:$0xff]   ;;  %v3812_v55 = vld [vmem:[%s5003_s1 + $0x5e0] ss:$16 sps:$4 sm:$0xff]  }
  0x92   :  { %2046 = vmatmul.mubr.bf16.gmra.mrb[8].mxu0 %v2960_v58  ;;  %2450 = vmatmul.mubr.bf16.gmra.mrb[8].mxu1 %v2960_v58  ;;  %v3823_v58 = vld [vmem:[%s5003_s1 + $0x60c] ss:$16 sps:$4 sm:$0xff]  }
  0x93   :  { %2103 = vmatpush1.bf16.msra.mxu0 %v3744_v56  ;;  %2507 = vmatpush1.bf16.msra.mxu1 %v3747_v57  ;;  %v3815_v56 = vld [vmem:[%s5003_s1 + $0x5e8] ss:$16 sps:$4 sm:$0xff]   ;;  %v3820_v57 = vld [vmem:[%s5003_s1 + $0x604] ss:$16 sps:$4 sm:$0xff]  }
  0x94   :  { %2104 = vmatprep.subr.bf16.mxu0 %v3752_v61  ;;  %2508 = vmatprep.subr.bf16.mxu1 %v3755_v62  ;;  %v28_v61 = vld [vmem:[%s5004_s0 + $0x70] sm:$0xff] }
  0x95   :  { %2055 = vmatprep.mubr.bf16.mxu0 %v2969_v63  ;;  %2459 = vmatprep.mubr.bf16.mxu1 %v2969_v63  ;;  %v3818_v62 = vld [vmem:[%s5003_s1 + $0x600] ss:$16 sps:$4 sm:$0xff]   ;;  %v3821_v63 = vld [vmem:[%s5003_s1 + $0x608] ss:$16 sps:$4 sm:$0xff]  }
  0x97   :  { %2105 = vmatpush1.bf16.msra.mxu0 %v3750_v0  ;;  %2509 = vmatpush1.bf16.msra.mxu1 %v3753_v1  ;;  %v3826_v0 = vld [vmem:[%s5003_s1 + $0x624] ss:$16 sps:$4 sm:$0xff]   ;;  %v3829_v1 = vld [vmem:[%s5003_s1 + $0x62c] ss:$16 sps:$4 sm:$0xff]  }
  0x98   :  { %2106 = vmatprep.subr.bf16.mxu0 %v3758_v2  ;;  %2510 = vmatprep.subr.bf16.mxu1 %v3761_v3  ;;  %v2955_v2 = vcombine.high %v24_v60, %v28_v61  ;;  %v3824_v3 = vld [vmem:[%s5003_s1 + $0x620] ss:$16 sps:$4 sm:$0xff]  }
  0x9a   :  { %2056 = vmatmul.mubr.bf16.gmra.mrb[12].mxu0 %v2968_v5  ;;  %2460 = vmatmul.mubr.bf16.gmra.mrb[12].mxu1 %v2968_v5  ;;  %v3832_v5 = vld [vmem:[%s5003_s1 + $0x644] ss:$16 sps:$4 sm:$0xff]  }
  0x9b   :  { %2107 = vmatpush1.bf16.msra.mxu0 %v3756_v7  ;;  %2511 = vmatpush1.bf16.msra.mxu1 %v3759_v8  ;;  %v2954_v7 = vcombine.low %v24_v60, %v28_v61  ;;  %v32_v8 = vld [vmem:[%s5004_s0 + $0x90] sm:$0xff]  ;;  %v3889_v60 = vld [vmem:[%s5003_s1 + $0x76c] ss:$16 sps:$4 sm:$0xff]  }
  0x9c   :  { %2108 = vmatprep.subr.bf16.mxu0 %v3764_v9  ;;  %2512 = vmatprep.subr.bf16.mxu1 %v3767_v10  ;;  %v36_v9 = vld [vmem:[%s5004_s0 + $0xb0] sm:$0xff] }
  0x9d   :  { %2065 = vmatprep.mubr.bf16.mxu0 %v2977_v11  ;;  %2469 = vmatprep.mubr.bf16.mxu1 %v2977_v11  ;;  %v3830_v10 = vld [vmem:[%s5003_s1 + $0x640] ss:$16 sps:$4 sm:$0xff]   ;;  %v3833_v11 = vld [vmem:[%s5003_s1 + $0x648] ss:$16 sps:$4 sm:$0xff]  }
  0x9f   :  { %2109 = vmatpush1.bf16.msra.mxu0 %v3762_v12  ;;  %2513 = vmatpush1.bf16.msra.mxu1 %v3765_v13  ;;  %v3838_v12 = vld [vmem:[%s5003_s1 + $0x664] ss:$16 sps:$4 sm:$0xff]   ;;  %v3841_v13 = vld [vmem:[%s5003_s1 + $0x66c] ss:$16 sps:$4 sm:$0xff]  }
  0xa0   :  { %2110 = vmatprep.subr.bf16.mxu0 %v3770_v14  ;;  %2514 = vmatprep.subr.bf16.mxu1 %v3773_v15  ;;  %v2963_v14 = vcombine.high %v32_v8, %v36_v9  ;;  %v3836_v15 = vld [vmem:[%s5003_s1 + $0x660] ss:$16 sps:$4 sm:$0xff]  }
  0xa2   :  { %2066 = vmatmul.mubr.bf16.gmra.mrb[16].mxu0 %v2976_v16  ;;  %2470 = vmatmul.mubr.bf16.gmra.mrb[16].mxu1 %v2976_v16  ;;  %v3839_v16 = vld [vmem:[%s5003_s1 + $0x668] ss:$16 sps:$4 sm:$0xff]  }
  0xa3   :  { %2111 = vmatpush1.bf16.msra.mxu0 %v3768_v19  ;;  %2515 = vmatpush1.bf16.msra.mxu1 %v3771_v20  ;;  %v2962_v19 = vcombine.low %v32_v8, %v36_v9  ;;  %v40_v20 = vld [vmem:[%s5004_s0 + $0xd0] sm:$0xff]  ;;  %v3901_v8 = vld [vmem:[%s5003_s1 + $0x7ac] ss:$16 sps:$4 sm:$0xff]  }
  0xa4   :  { %2112 = vmatprep.subr.bf16.mxu0 %v3776_v21  ;;  %2516 = vmatprep.subr.bf16.mxu1 %v3779_v22  ;;  %v44_v21 = vld [vmem:[%s5004_s0 + $0xf0] sm:$0xff] }
  0xa5   :  { %2075 = vmatprep.mubr.bf16.mxu0 %v2985_v23  ;;  %2479 = vmatprep.mubr.bf16.mxu1 %v2985_v23  ;;  %v3842_v22 = vld [vmem:[%s5003_s1 + $0x680] ss:$16 sps:$4 sm:$0xff]   ;;  %v3845_v23 = vld [vmem:[%s5003_s1 + $0x688] ss:$16 sps:$4 sm:$0xff]   ;;  %v2970_v31 = vcombine.low %v40_v20, %v44_v21 }
  0xa7   :  { %2113 = vmatpush1.bf16.msra.mxu0 %v3774_v24  ;;  %2517 = vmatpush1.bf16.msra.mxu1 %v3777_v25  ;;  %v3850_v24 = vld [vmem:[%s5003_s1 + $0x6a4] ss:$16 sps:$4 sm:$0xff]   ;;  %v3853_v25 = vld [vmem:[%s5003_s1 + $0x6ac] ss:$16 sps:$4 sm:$0xff]  }
  0xa8   :  { %2114 = vmatprep.subr.bf16.mxu0 %v3782_v26  ;;  %2518 = vmatprep.subr.bf16.mxu1 %v3785_v27  ;;  %v2971_v26 = vcombine.high %v40_v20, %v44_v21  ;;  %v3848_v27 = vld [vmem:[%s5003_s1 + $0x6a0] ss:$16 sps:$4 sm:$0xff]   ;;  %v25_v20 = vld [vmem:[%s5004_s0 + $0x58] sm:$0xff] }
  0xa9   :  { %v29_v21 = vld [vmem:[%s5004_s0 + $0x78] sm:$0xff] }
  0xaa   :  { %2076 = vmatmul.mubr.bf16.gmra.mrb[20].mxu0 %v2984_v30  ;;  %2480 = vmatmul.mubr.bf16.gmra.mrb[20].mxu1 %v2984_v30  ;;  %v3859_v30 = vld [vmem:[%s5003_s1 + $0x6cc] ss:$16 sps:$4 sm:$0xff]  }
  0xab   :  { %2115 = vmatpush1.bf16.msra.mxu0 %v3780_v28  ;;  %2519 = vmatpush1.bf16.msra.mxu1 %v3783_v29  ;;  %v3851_v28 = vld [vmem:[%s5003_s1 + $0x6a8] ss:$16 sps:$4 sm:$0xff]   ;;  %v3856_v29 = vld [vmem:[%s5003_s1 + $0x6c4] ss:$16 sps:$4 sm:$0xff]  }
  0xac   :  { %2116 = vmatprep.subr.bf16.mxu0 %v3788_v32  ;;  %2520 = vmatprep.subr.bf16.mxu1 %v3791_v33  ;;  %v48_v32 = vld [vmem:[%s5004_s0 + $0x110] sm:$0xff] }
  0xad   :  { %2085 = vmatprep.mubr.bf16.mxu0 %v2993_v34  ;;  %2489 = vmatprep.mubr.bf16.mxu1 %v2993_v34  ;;  %v52_v33 = vld [vmem:[%s5004_s0 + $0x130] sm:$0xff] }
  0xae   :  { %v3854_v34 = vld [vmem:[%s5003_s1 + $0x6c0] ss:$16 sps:$4 sm:$0xff]  }
  0xaf   :  { %2117 = vmatpush1.bf16.msra.mxu0 %v3786_v35  ;;  %2521 = vmatpush1.bf16.msra.mxu1 %v3789_v36  ;;  %v3857_v35 = vld [vmem:[%s5003_s1 + $0x6c8] ss:$16 sps:$4 sm:$0xff]   ;;  %v3862_v36 = vld [vmem:[%s5003_s1 + $0x6e4] ss:$16 sps:$4 sm:$0xff]  }
  0xb0   :  { %2118 = vmatprep.subr.bf16.mxu0 %v3794_v37  ;;  %2522 = vmatprep.subr.bf16.mxu1 %v3797_v38  ;;  %v3865_v37 = vld [vmem:[%s5003_s1 + $0x6ec] ss:$16 sps:$4 sm:$0xff]   ;;  %v2979_v38 = vcombine.high %v48_v32, %v52_v33 }
  0xb2   :  { %2086 = vmatmul.mubr.bf16.gmra.mrb[24].mxu0 %v2992_v40  ;;  %2490 = vmatmul.mubr.bf16.gmra.mrb[24].mxu1 %v2992_v40  ;;  %v3863_v40 = vld [vmem:[%s5003_s1 + $0x6e8] ss:$16 sps:$4 sm:$0xff]  }
  0xb3   :  { %2119 = vmatpush1.bf16.msra.mxu0 %v3792_v42  ;;  %2523 = vmatpush1.bf16.msra.mxu1 %v3795_v43  ;;  %v3871_v42 = vld [vmem:[%s5003_s1 + $0x70c] ss:$16 sps:$4 sm:$0xff]   ;;  %v2978_v43 = vcombine.low %v48_v32, %v52_v33 }
  0xb4   :  { %2120 = vmatprep.subr.bf16.mxu0 %v3800_v44  ;;  %2524 = vmatprep.subr.bf16.mxu1 %v3803_v45  ;;  %v56_v44 = vld [vmem:[%s5004_s0 + $0x150] sm:$0xff]  ;;  %v49_v32 = vld [vmem:[%s5004_s0 + $0x118] sm:$0xff] }
  0xb5   :  { %2126 = vmatprep.mubr.bf16.mxu0 %v2947_v46  ;;  %2530 = vmatprep.mubr.bf16.mxu1 %v2947_v46  ;;  %v60_v45 = vld [vmem:[%s5004_s0 + $0x170] sm:$0xff]  ;;  %v53_v33 = vld [vmem:[%s5004_s0 + $0x138] sm:$0xff] }
  0xb6   :  { %v3866_v46 = vld [vmem:[%s5003_s1 + $0x700] ss:$16 sps:$4 sm:$0xff]  }
  0xb7   :  { %2121 = vmatpush1.bf16.msra.mxu0 %v3798_v47  ;;  %2525 = vmatpush1.bf16.msra.mxu1 %v3801_v48  ;;  %v3869_v47 = vld [vmem:[%s5003_s1 + $0x708] ss:$16 sps:$4 sm:$0xff]   ;;  %v3874_v48 = vld [vmem:[%s5003_s1 + $0x724] ss:$16 sps:$4 sm:$0xff]  }
  0xb8   :  { %2122 = vmatprep.subr.bf16.mxu0 %v3807_v49  ;;  %2526 = vmatprep.subr.bf16.mxu1 %v3810_v50  ;;  %v3877_v49 = vld [vmem:[%s5003_s1 + $0x72c] ss:$16 sps:$4 sm:$0xff]   ;;  %v2987_v50 = vcombine.high %v56_v44, %v60_v45 }
  0xbb   :  { %2123 = vmatpush1.bf16.msra.mxu0 %v3805_v51  ;;  %2527 = vmatpush1.bf16.msra.mxu1 %v3808_v52  ;;  %v3872_v51 = vld [vmem:[%s5003_s1 + $0x720] ss:$16 sps:$4 sm:$0xff]   ;;  %v3875_v52 = vld [vmem:[%s5003_s1 + $0x728] ss:$16 sps:$4 sm:$0xff]  }
  0xbc   :  { %2124 = vmatprep.subr.bf16.mxu0 %v3814_v53  ;;  %2528 = vmatprep.subr.bf16.mxu1 %v3817_v54  ;;  %v3880_v53 = vld [vmem:[%s5003_s1 + $0x744] ss:$16 sps:$4 sm:$0xff]   ;;  %v3883_v54 = vld [vmem:[%s5003_s1 + $0x74c] ss:$16 sps:$4 sm:$0xff]  }
  0xbf   :  { %2125 = vmatpush1.bf16.msra.mxu0 %v3812_v55  ;;  %2529 = vmatpush1.bf16.msra.mxu1 %v3815_v56  ;;  %v2986_v55 = vcombine.low %v56_v44, %v60_v45  ;;  %v64_v56 = vld [vmem:[%s5004_s0 + $0x190] sm:$0x11]  ;;  %v324_v44 = vlaneseq }
  0xc0   :  { %2195 = vmatprep.subr.bf16.mxu0 %v3820_v57  ;;  %2599 = vmatprep.subr.bf16.mxu1 %v3823_v58  ;;  %v3878_v57 = vld [vmem:[%s5003_s1 + $0x740] ss:$16 sps:$4 sm:$0xff]   ;;  %v3881_v58 = vld [vmem:[%s5003_s1 + $0x748] ss:$16 sps:$4 sm:$0xff]   ;;  %v2995_v61 = vcombine.high %v64_v56, %v64_v56 }
  0xc1   :  { %v325_v45 = vshrl.u32 %v324_v44, 7 }
  0xc2   :  { %2127 = vmatmul.mubr.bf16.vlgmr.msra.gmra.mrb[0].mxu0 %v2946_v59  ;;  %2531 = vmatmul.mubr.bf16.vlgmr.msra.gmra.mrb[0].mxu1 %v2946_v59  ;;  %v3886_v59 = vld [vmem:[%s5003_s1 + $0x764] ss:$16 sps:$4 sm:$0xff]  }
  0xc3   :  { %2196 = vmatpush1.bf16.msra.mxu0 %v3818_v62  ;;  %2600 = vmatpush1.bf16.msra.mxu1 %v3821_v63  ;;  %v3884_v62 = vld [vmem:[%s5003_s1 + $0x760] ss:$16 sps:$4 sm:$0xff]   ;;  %v3887_v63 = vld [vmem:[%s5003_s1 + $0x768] ss:$16 sps:$4 sm:$0xff]  }
  0xc4   :  { %2197 = vmatprep.subr.bf16.mxu0 %v3826_v0  ;;  %2601 = vmatprep.subr.bf16.mxu1 %v3829_v1  ;;  %v3892_v0 = vld [vmem:[%s5003_s1 + $0x784] ss:$16 sps:$4 sm:$0xff]   ;;  %v3895_v1 = vld [vmem:[%s5003_s1 + $0x78c] ss:$16 sps:$4 sm:$0xff]  }
  0xc5   :  { %2136 = vmatprep.mubr.bf16.mxu0 %v2955_v2  ;;  %2540 = vmatprep.mubr.bf16.mxu1 %v2955_v2  ;;  %v2994_v2 = vcombine.low %v64_v56, %v64_v56 }
  0xc7   :  { %2198 = vmatpush1.bf16.msra.mxu0 %v3824_v3  ;;  %2602 = vmatpush1.bf16.msra.mxu1 %v3827_v4  ;;  %v17_v3 = vld [vmem:[%s5004_s0 + $0x18] sm:$0xff] }
  0xc8   :  { %2199 = vmatprep.subr.bf16.mxu0 %v3832_v5  ;;  %2603 = vmatprep.subr.bf16.mxu1 %v3835_v6  ;;  %v21_v4 = vld [vmem:[%s5004_s0 + $0x38] sm:$0xff]  ;;  %v3890_v5 = vld [vmem:[%s5003_s1 + $0x780] ss:$16 sps:$4 sm:$0xff]  }
  0xc9   :  { %v3893_v6 = vld [vmem:[%s5003_s1 + $0x788] ss:$16 sps:$4 sm:$0xff]   ;;  %v2949_v9 = vcombine.high %v17_v3, %v21_v4 }
  0xca   :  { %2137 = vmatmul.mubr.bf16.gmra.mrb[4].mxu0 %v2954_v7  ;;  %2541 = vmatmul.mubr.bf16.gmra.mrb[4].mxu1 %v2954_v7  ;;  %v3898_v7 = vld [vmem:[%s5003_s1 + $0x7a4] ss:$16 sps:$4 sm:$0xff]  }
  0xcb   :  { %2200 = vmatpush1.bf16.msra.mxu0 %v3830_v10  ;;  %2604 = vmatpush1.bf16.msra.mxu1 %v3833_v11  ;;  %v3896_v10 = vld [vmem:[%s5003_s1 + $0x7a0] ss:$16 sps:$4 sm:$0xff]   ;;  %v3899_v11 = vld [vmem:[%s5003_s1 + $0x7a8] ss:$16 sps:$4 sm:$0xff]  }
  0xcc   :  { %2201 = vmatprep.subr.bf16.mxu0 %v3838_v12  ;;  %2605 = vmatprep.subr.bf16.mxu1 %v3841_v13  ;;  %v3906_v12 = vld [vmem:[%s5003_s1 + $0x7c4] ss:$16 sps:$4 sm:$0xff]   ;;  %v3909_v13 = vld [vmem:[%s5003_s1 + $0x7cc] ss:$16 sps:$4 sm:$0xff]  }
  0xcd   :  { %2146 = vmatprep.mubr.bf16.mxu0 %v2963_v14  ;;  %2550 = vmatprep.mubr.bf16.mxu1 %v2963_v14  ;;  %v3904_v14 = vld [vmem:[%s5003_s1 + $0x7c0] ss:$16 sps:$4 sm:$0xff]  }
  0xcf   :  { %2202 = vmatpush1.bf16.msra.mxu0 %v3836_v15  ;;  %2606 = vmatpush1.bf16.msra.mxu1 %v3839_v16  ;;  %v3907_v15 = vld [vmem:[%s5003_s1 + $0x7c8] ss:$16 sps:$4 sm:$0xff]   ;;  %v3912_v16 = vld [vmem:[%s5003_s1 + $0x7e4] ss:$16 sps:$4 sm:$0xff]  }
  0xd0   :  { %2203 = vmatprep.subr.bf16.mxu0 %v3844_v17  ;;  %2607 = vmatprep.subr.bf16.mxu1 %v3847_v18  ;;  %v3915_v17 = vld [vmem:[%s5003_s1 + $0x7ec] ss:$16 sps:$4 sm:$0xff]   ;;  %v3910_v18 = vld [vmem:[%s5003_s1 + $0x7e0] ss:$16 sps:$4 sm:$0xff]  }
  0xd2   :  { %2147 = vmatmul.mubr.bf16.gmra.mrb[8].mxu0 %v2962_v19  ;;  %2551 = vmatmul.mubr.bf16.gmra.mrb[8].mxu1 %v2962_v19  ;;  %v3913_v19 = vld [vmem:[%s5003_s1 + $0x7e8] ss:$16 sps:$4 sm:$0xff]  }
  0xd3   :  { %2204 = vmatpush1.bf16.msra.mxu0 %v3842_v22  ;;  %2608 = vmatpush1.bf16.msra.mxu1 %v3845_v23  ;;  %v2948_v22 = vcombine.low %v17_v3, %v21_v4  ;;  %v2957_v23 = vcombine.high %v25_v20, %v29_v21 }
  0xd4   :  { %2205 = vmatprep.subr.bf16.mxu0 %v3850_v24  ;;  %2609 = vmatprep.subr.bf16.mxu1 %v3853_v25  ;;  %v33_v24 = vld [vmem:[%s5004_s0 + $0x98] sm:$0xff] }
  0xd5   :  { %2156 = vmatprep.mubr.bf16.mxu0 %v2971_v26  ;;  %2560 = vmatprep.mubr.bf16.mxu1 %v2971_v26  ;;  %v37_v25 = vld [vmem:[%s5004_s0 + $0xb8] sm:$0xff]  ;;  %v2956_v26 = vcombine.low %v25_v20, %v29_v21 }
  0xd7   :  { %2206 = vmatpush1.bf16.msra.mxu0 %v3848_v27  ;;  %2610 = vmatpush1.bf16.msra.mxu1 %v3851_v28  ;;  %v2965_v27 = vcombine.high %v33_v24, %v37_v25  ;;  %v41_v28 = vld [vmem:[%s5004_s0 + $0xd8] sm:$0xff] }
  0xd8   :  { %2207 = vmatprep.subr.bf16.mxu0 %v3856_v29  ;;  %2611 = vmatprep.subr.bf16.mxu1 %v3859_v30  ;;  %v45_v29 = vld [vmem:[%s5004_s0 + $0xf8] sm:$0xff]  ;;  %v2964_v30 = vcombine.low %v33_v24, %v37_v25 }
  0xda   :  { %2157 = vmatmul.mubr.bf16.gmra.mrb[12].mxu0 %v2970_v31  ;;  %2561 = vmatmul.mubr.bf16.gmra.mrb[12].mxu1 %v2970_v31  ;;  %v2973_v31 = vcombine.high %v41_v28, %v45_v29 }
  0xdb   :  { %2208 = vmatpush1.bf16.msra.mxu0 %v3854_v34  ;;  %2612 = vmatpush1.bf16.msra.mxu1 %v3857_v35  ;;  %v2972_v34 = vcombine.low %v41_v28, %v45_v29  ;;  %v2981_v35 = vcombine.high %v49_v32, %v53_v33 }
  0xdc   :  { %2209 = vmatprep.subr.bf16.mxu0 %v3862_v36  ;;  %2613 = vmatprep.subr.bf16.mxu1 %v3865_v37  ;;  %v57_v36 = vld [vmem:[%s5004_s0 + $0x158] sm:$0xff] }
  0xdd   :  { %2166 = vmatprep.mubr.bf16.mxu0 %v2979_v38  ;;  %2570 = vmatprep.mubr.bf16.mxu1 %v2979_v38  ;;  %v61_v37 = vld [vmem:[%s5004_s0 + $0x178] sm:$0xff]  ;;  %v2980_v38 = vcombine.low %v49_v32, %v53_v33 }
  0xdf   :  { %2210 = vmatpush1.bf16.msra.mxu0 %v3860_v39  ;;  %2614 = vmatpush1.bf16.msra.mxu1 %v3863_v40  ;;  %v2989_v39 = vcombine.high %v57_v36, %v61_v37  ;;  %v65_v40 = vld [vmem:[%s5004_s0 + $0x198] sm:$0x11] }
  0xe0   :  { %2211 = vmatprep.subr.bf16.mxu0 %v3868_v41  ;;  %2615 = vmatprep.subr.bf16.mxu1 %v3871_v42  ;;  %v2988_v41 = vcombine.low %v57_v36, %v61_v37  ;;  %v2997_v42 = vcombine.high %v65_v40, %v65_v40 }
  0xe2   :  { %2167 = vmatmul.mubr.bf16.gmra.mrb[16].mxu0 %v2978_v43  ;;  %2571 = vmatmul.mubr.bf16.gmra.mrb[16].mxu1 %v2978_v43  ;;  %v2996_v43 = vcombine.low %v65_v40, %v65_v40 }
  0xe3   :  { %2212 = vmatpush1.bf16.msra.mxu0 %v3866_v46  ;;  %2616 = vmatpush1.bf16.msra.mxu1 %v3869_v47  ;;  %v326_v46 = vsub.s32 0, %v325_v45  ;;  %v334_v47 = vsub.s32 2, %v325_v45 }
  0xe4   :  { %2213 = vmatprep.subr.bf16.mxu0 %v3874_v48  ;;  %2617 = vmatprep.subr.bf16.mxu1 %v3877_v49  ;;  %v322_v48 = vld [vmem:[%s5005_s2] sm:$0xf]  ;;  %v330_v49 = vsub.s32 1, %v325_v45 }
  0xe5   :  { %2176 = vmatprep.mubr.bf16.mxu0 %v2987_v50  ;;  %2580 = vmatprep.mubr.bf16.mxu1 %v2987_v50  ;;  %v338_v50 = vsub.s32 3, %v325_v45 }
  0xe7   :  { %2214 = vmatpush1.bf16.msra.mxu0 %v3872_v51  ;;  %2618 = vmatpush1.bf16.msra.mxu1 %v3875_v52  ;;  %v4865_v51 = vrot.slane %v322_v48, %v326_v46  ;;  %v4867_v52 = vrot.slane %v322_v48, %v334_v47 }
  0xe8   :  { %2215 = vmatprep.subr.bf16.mxu0 %v3880_v53  ;;  %2619 = vmatprep.subr.bf16.mxu1 %v3883_v54  ;;  %v4869_v53 = vrot.slane %v322_v48, %v330_v49  ;;  %v4871_v54 = vrot.slane %v322_v48, %v338_v50 }
  0xea   :  { %2177 = vmatmul.mubr.bf16.gmra.mrb[20].mxu0 %v2986_v55  ;;  %2581 = vmatmul.mubr.bf16.gmra.mrb[20].mxu1 %v2986_v55 }
  0xeb   :  { %2216 = vmatpush1.bf16.msra.mxu0 %v3878_v57  ;;  %2620 = vmatpush1.bf16.msra.mxu1 %v3881_v58 }
  0xec   :  { %2217 = vmatprep.subr.bf16.mxu0 %v3886_v59  ;;  %2621 = vmatprep.subr.bf16.mxu1 %v3889_v60 }
  0xed   :  { %2186 = vmatprep.mubr.bf16.mxu0 %v2995_v61  ;;  %2590 = vmatprep.mubr.bf16.mxu1 %v2995_v61 }
  0xef   :  { %2218 = vmatpush1.bf16.msra.mxu0 %v3884_v62  ;;  %2622 = vmatpush1.bf16.msra.mxu1 %v3887_v63 }
  0xf0   :  { %2219 = vmatprep.subr.bf16.mxu0 %v3892_v0  ;;  %2623 = vmatprep.subr.bf16.mxu1 %v3895_v1 }
  0xf2   :  { %2187 = vmatmul.mubr.bf16.gmra.mrb[24].mxu0 %v2994_v2  ;;  %2591 = vmatmul.mubr.bf16.gmra.mrb[24].mxu1 %v2994_v2 }
  0xf3   :  { %2220 = vmatpush1.bf16.msra.mxu0 %v3890_v5  ;;  %2624 = vmatpush1.bf16.msra.mxu1 %v3893_v6 }
  0xf4   :  { %2221 = vmatprep.subr.bf16.mxu0 %v3898_v7  ;;  %2625 = vmatprep.subr.bf16.mxu1 %v3901_v8 }
  0xf5   :  { %2227 = vmatprep.mubr.bf16.mxu0 %v2949_v9  ;;  %2631 = vmatprep.mubr.bf16.mxu1 %v2949_v9 }
  0xf7   :  { %2222 = vmatpush1.bf16.msra.mxu0 %v3896_v10  ;;  %2626 = vmatpush1.bf16.msra.mxu1 %v3899_v11 }
  0xf8   :  { %2223 = vmatprep.subr.bf16.mxu0 %v3906_v12  ;;  %2627 = vmatprep.subr.bf16.mxu1 %v3909_v13 }
  0xfb   :  { %2224 = vmatpush1.bf16.msra.mxu0 %v3904_v14  ;;  %2628 = vmatpush1.bf16.msra.mxu1 %v3907_v15 }
  0xfc   :  { %2225 = vmatprep.subr.bf16.mxu0 %v3912_v16  ;;  %2629 = vmatprep.subr.bf16.mxu1 %v3915_v17 }
  0xff   :  { %2226 = vmatpush1.bf16.msra.mxu0 %v3910_v18  ;;  %2630 = vmatpush1.bf16.msra.mxu1 %v3913_v19 }
 0x102   :  { %2228 = vmatmul.mubr.bf16.vlgmr.msra.gmra.mrb[0].mxu0 %v2948_v22  ;;  %2632 = vmatmul.mubr.bf16.vlgmr.msra.gmra.mrb[0].mxu1 %v2948_v22 }
 0x103   :  { %2237 = vmatprep.mubr.bf16.mxu0 %v2957_v23  ;;  %2641 = vmatprep.mubr.bf16.mxu1 %v2957_v23 }
 0x10a   :  { %2238 = vmatmul.mubr.bf16.gmra.mrb[4].mxu0 %v2956_v26  ;;  %2642 = vmatmul.mubr.bf16.gmra.mrb[4].mxu1 %v2956_v26 }
 0x10b   :  { %2247 = vmatprep.mubr.bf16.mxu0 %v2965_v27  ;;  %2651 = vmatprep.mubr.bf16.mxu1 %v2965_v27 }
 0x112   :  { %2248 = vmatmul.mubr.bf16.gmra.mrb[8].mxu0 %v2964_v30  ;;  %2652 = vmatmul.mubr.bf16.gmra.mrb[8].mxu1 %v2964_v30 }
 0x113   :  { %2257 = vmatprep.mubr.bf16.mxu0 %v2973_v31  ;;  %2661 = vmatprep.mubr.bf16.mxu1 %v2973_v31 }
 0x11a   :  { %2258 = vmatmul.mubr.bf16.gmra.mrb[12].mxu0 %v2972_v34  ;;  %2662 = vmatmul.mubr.bf16.gmra.mrb[12].mxu1 %v2972_v34 }
 0x11b   :  { %2267 = vmatprep.mubr.bf16.mxu0 %v2981_v35  ;;  %2671 = vmatprep.mubr.bf16.mxu1 %v2981_v35 }
 0x122   :  { %2268 = vmatmul.mubr.bf16.gmra.mrb[16].mxu0 %v2980_v38  ;;  %2672 = vmatmul.mubr.bf16.gmra.mrb[16].mxu1 %v2980_v38 }
 0x123   :  { %2277 = vmatprep.mubr.bf16.mxu0 %v2989_v39  ;;  %2681 = vmatprep.mubr.bf16.mxu1 %v2989_v39 }
 0x12a   :  { %2278 = vmatmul.mubr.bf16.gmra.mrb[20].mxu0 %v2988_v41  ;;  %2682 = vmatmul.mubr.bf16.gmra.mrb[20].mxu1 %v2988_v41 }
 0x12b   :  { %2287 = vmatprep.mubr.bf16.mxu0 %v2997_v42  ;;  %2691 = vmatprep.mubr.bf16.mxu1 %v2997_v42 }
 0x132   :  { %2288 = vmatmul.mubr.bf16.gmra.mrb[24].mxu0 %v2996_v43  ;;  %2692 = vmatmul.mubr.bf16.gmra.mrb[24].mxu1 %v2996_v43 }
 0x1d5   :  { %v2229_v55 = vpop.f32.mrb[0].mxu0  ;;  %v2633_v56 = vpop.f32.mrb[0].mxu1 }
 0x1d6   :  { %v3306_v57 = vadd.f32 %v2229_v55, %v4865_v51  ;;  %v3332_v58 = vadd.f32 %v2633_v56, %v4867_v52  ;;  %v2231_v59 = vpop.f32.mrb[1].mxu0  ;;  %v2635_v60 = vpop.f32.mrb[1].mxu1 }
 0x1d7   :  { %v3307_v61 = vadd.f32 %v2231_v59, %v4869_v53  ;;  %v3333_v62 = vadd.f32 %v2635_v60, %v4871_v54  ;;  %v2233_v63 = vpop.f32.mrb[2].mxu0  ;;  %v2637_v0 = vpop.f32.mrb[2].mxu1 }
 0x1d8   :  { %v2700_v1 = vmax.f32 %v3306_v57, 0.0  ;;  %v2702_v2 = vmax.f32 %v3332_v58, 0.0  ;;  %v3308_v3 = vadd.f32 %v2233_v63, %v4865_v51  ;;  %v3334_v4 = vadd.f32 %v2637_v0, %v4867_v52  ;;  %v2235_v5 = vpop.f32.mrb[3].mxu0  ;;  %v2639_v6 = vpop.f32.mrb[3].mxu1 }
 0x1d9   :  { %v2701_v7 = vmax.f32 %v3307_v61, 0.0  ;;  %v2703_v8 = vmax.f32 %v3333_v62, 0.0  ;;  %v3309_v9 = vadd.f32 %v2235_v5, %v4869_v53  ;;  %v3335_v10 = vadd.f32 %v2639_v6, %v4871_v54 }
 0x1da   :  { %v2704_v11 = vmax.f32 %v3308_v3, 0.0  ;;  %v2706_v12 = vmax.f32 %v3334_v4, 0.0 }
 0x1db   :  { %v3280_v13 = vpack.c.bf16 %v2701_v7, %v2700_v1  ;;  %v3281_v14 = vpack.c.bf16 %v2703_v8, %v2702_v2  ;;  %v2705_v15 = vmax.f32 %v3309_v9, 0.0  ;;  %v2707_v16 = vmax.f32 %v3335_v10, 0.0 }
 0x1dd   :  { %2912 = vst [vmem:[%s5006_s3] sm:$0xff] %v3280_v13  ;;  %2913 = vst [vmem:[%s5006_s3 + $0x8] sm:$0xff] %v3281_v14  ;;  %v3282_v17 = vpack.c.bf16 %v2705_v15, %v2704_v11  ;;  %v3283_v18 = vpack.c.bf16 %v2707_v16, %v2706_v12  ;;  %v2239_v19 = vpop.f32.mrb[4].mxu0  ;;  %v2643_v20 = vpop.f32.mrb[4].mxu1 }
 0x1de   :  { %v3310_v21 = vadd.f32 %v2239_v19, %v4865_v51  ;;  %v3336_v22 = vadd.f32 %v2643_v20, %v4867_v52  ;;  %v2241_v23 = vpop.f32.mrb[5].mxu0  ;;  %v2645_v24 = vpop.f32.mrb[5].mxu1 }
 0x1df   :  { %2914 = vst [vmem:[%s5006_s3 + $0x10] sm:$0xff] %v3282_v17  ;;  %2915 = vst [vmem:[%s5006_s3 + $0x18] sm:$0xff] %v3283_v18  ;;  %v3311_v25 = vadd.f32 %v2241_v23, %v4869_v53  ;;  %v3337_v26 = vadd.f32 %v2645_v24, %v4871_v54  ;;  %v2243_v27 = vpop.f32.mrb[6].mxu0  ;;  %v2647_v28 = vpop.f32.mrb[6].mxu1 }
 0x1e0   :  { %v2708_v29 = vmax.f32 %v3310_v21, 0.0  ;;  %v2710_v30 = vmax.f32 %v3336_v22, 0.0  ;;  %v3312_v31 = vadd.f32 %v2243_v27, %v4865_v51  ;;  %v3338_v32 = vadd.f32 %v2647_v28, %v4867_v52  ;;  %v2245_v33 = vpop.f32.mrb[7].mxu0  ;;  %v2649_v34 = vpop.f32.mrb[7].mxu1 }
 0x1e1   :  { %v2709_v35 = vmax.f32 %v3311_v25, 0.0  ;;  %v2711_v36 = vmax.f32 %v3337_v26, 0.0  ;;  %v3313_v37 = vadd.f32 %v2245_v33, %v4869_v53  ;;  %v3339_v38 = vadd.f32 %v2649_v34, %v4871_v54 }
 0x1e2   :  { %v2712_v39 = vmax.f32 %v3312_v31, 0.0  ;;  %v2714_v40 = vmax.f32 %v3338_v32, 0.0 }
 0x1e3   :  { %v3284_v41 = vpack.c.bf16 %v2709_v35, %v2708_v29  ;;  %v3285_v42 = vpack.c.bf16 %v2711_v36, %v2710_v30  ;;  %v2713_v43 = vmax.f32 %v3313_v37, 0.0  ;;  %v2715_v44 = vmax.f32 %v3339_v38, 0.0 }
 0x1e5   :  { %2916 = vst [vmem:[%s5006_s3 + $0x20] sm:$0xff] %v3284_v41  ;;  %2917 = vst [vmem:[%s5006_s3 + $0x28] sm:$0xff] %v3285_v42  ;;  %v3286_v45 = vpack.c.bf16 %v2713_v43, %v2712_v39  ;;  %v3287_v46 = vpack.c.bf16 %v2715_v44, %v2714_v40  ;;  %v2249_v47 = vpop.f32.mrb[8].mxu0  ;;  %v2653_v48 = vpop.f32.mrb[8].mxu1 }
 0x1e6   :  { %v3314_v49 = vadd.f32 %v2249_v47, %v4865_v51  ;;  %v3340_v50 = vadd.f32 %v2653_v48, %v4867_v52  ;;  %v2251_v55 = vpop.f32.mrb[9].mxu0  ;;  %v2655_v56 = vpop.f32.mrb[9].mxu1 }
 0x1e7   :  { %2918 = vst [vmem:[%s5006_s3 + $0x30] sm:$0xff] %v3286_v45  ;;  %2919 = vst [vmem:[%s5006_s3 + $0x38] sm:$0xff] %v3287_v46  ;;  %v3315_v57 = vadd.f32 %v2251_v55, %v4869_v53  ;;  %v3341_v58 = vadd.f32 %v2655_v56, %v4871_v54  ;;  %v2253_v59 = vpop.f32.mrb[10].mxu0  ;;  %v2657_v60 = vpop.f32.mrb[10].mxu1 }
 0x1e8   :  { %v2716_v61 = vmax.f32 %v3314_v49, 0.0  ;;  %v2718_v62 = vmax.f32 %v3340_v50, 0.0  ;;  %v3316_v63 = vadd.f32 %v2253_v59, %v4865_v51  ;;  %v3342_v0 = vadd.f32 %v2657_v60, %v4867_v52  ;;  %v2255_v1 = vpop.f32.mrb[11].mxu0  ;;  %v2659_v2 = vpop.f32.mrb[11].mxu1 }
 0x1e9   :  { %v2717_v3 = vmax.f32 %v3315_v57, 0.0  ;;  %v2719_v4 = vmax.f32 %v3341_v58, 0.0  ;;  %v3317_v5 = vadd.f32 %v2255_v1, %v4869_v53  ;;  %v3343_v6 = vadd.f32 %v2659_v2, %v4871_v54 }
 0x1ea   :  { %v2720_v7 = vmax.f32 %v3316_v63, 0.0  ;;  %v2722_v8 = vmax.f32 %v3342_v0, 0.0 }
 0x1eb   :  { %v3288_v9 = vpack.c.bf16 %v2717_v3, %v2716_v61  ;;  %v3289_v10 = vpack.c.bf16 %v2719_v4, %v2718_v62  ;;  %v2721_v11 = vmax.f32 %v3317_v5, 0.0  ;;  %v2723_v12 = vmax.f32 %v3343_v6, 0.0 }
 0x1ed   :  { %2920 = vst [vmem:[%s5006_s3 + $0x40] sm:$0xff] %v3288_v9  ;;  %2921 = vst [vmem:[%s5006_s3 + $0x48] sm:$0xff] %v3289_v10  ;;  %v3290_v13 = vpack.c.bf16 %v2721_v11, %v2720_v7  ;;  %v3291_v14 = vpack.c.bf16 %v2723_v12, %v2722_v8  ;;  %v2259_v15 = vpop.f32.mrb[12].mxu0  ;;  %v2663_v16 = vpop.f32.mrb[12].mxu1 }
 0x1ee   :  { %v3318_v17 = vadd.f32 %v2259_v15, %v4865_v51  ;;  %v3344_v18 = vadd.f32 %v2663_v16, %v4867_v52  ;;  %v2261_v19 = vpop.f32.mrb[13].mxu0  ;;  %v2665_v20 = vpop.f32.mrb[13].mxu1 }
 0x1ef   :  { %2922 = vst [vmem:[%s5006_s3 + $0x50] sm:$0xff] %v3290_v13  ;;  %2923 = vst [vmem:[%s5006_s3 + $0x58] sm:$0xff] %v3291_v14  ;;  %v3319_v21 = vadd.f32 %v2261_v19, %v4869_v53  ;;  %v3345_v22 = vadd.f32 %v2665_v20, %v4871_v54  ;;  %v2263_v23 = vpop.f32.mrb[14].mxu0  ;;  %v2667_v24 = vpop.f32.mrb[14].mxu1 }
 0x1f0   :  { %v2724_v25 = vmax.f32 %v3318_v17, 0.0  ;;  %v2726_v26 = vmax.f32 %v3344_v18, 0.0  ;;  %v3320_v27 = vadd.f32 %v2263_v23, %v4865_v51  ;;  %v3346_v28 = vadd.f32 %v2667_v24, %v4867_v52  ;;  %v2265_v29 = vpop.f32.mrb[15].mxu0  ;;  %v2669_v30 = vpop.f32.mrb[15].mxu1 }
 0x1f1   :  { %v2725_v31 = vmax.f32 %v3319_v21, 0.0  ;;  %v2727_v32 = vmax.f32 %v3345_v22, 0.0  ;;  %v3321_v33 = vadd.f32 %v2265_v29, %v4869_v53  ;;  %v3347_v34 = vadd.f32 %v2669_v30, %v4871_v54 }
 0x1f2   :  { %v2728_v35 = vmax.f32 %v3320_v27, 0.0  ;;  %v2730_v36 = vmax.f32 %v3346_v28, 0.0 }
 0x1f3   :  { %v3292_v37 = vpack.c.bf16 %v2725_v31, %v2724_v25  ;;  %v3293_v38 = vpack.c.bf16 %v2727_v32, %v2726_v26  ;;  %v2729_v39 = vmax.f32 %v3321_v33, 0.0  ;;  %v2731_v40 = vmax.f32 %v3347_v34, 0.0 }
 0x1f5   :  { %2924 = vst [vmem:[%s5006_s3 + $0x60] sm:$0xff] %v3292_v37  ;;  %2925 = vst [vmem:[%s5006_s3 + $0x68] sm:$0xff] %v3293_v38  ;;  %v3294_v41 = vpack.c.bf16 %v2729_v39, %v2728_v35  ;;  %v3295_v42 = vpack.c.bf16 %v2731_v40, %v2730_v36  ;;  %v2269_v43 = vpop.f32.mrb[16].mxu0  ;;  %v2673_v44 = vpop.f32.mrb[16].mxu1 }
 0x1f6   :  { %v3322_v45 = vadd.f32 %v2269_v43, %v4865_v51  ;;  %v3348_v46 = vadd.f32 %v2673_v44, %v4867_v52  ;;  %v2271_v47 = vpop.f32.mrb[17].mxu0  ;;  %v2675_v48 = vpop.f32.mrb[17].mxu1 }
 0x1f7   :  { %2926 = vst [vmem:[%s5006_s3 + $0x70] sm:$0xff] %v3294_v41  ;;  %2927 = vst [vmem:[%s5006_s3 + $0x78] sm:$0xff] %v3295_v42  ;;  %v3323_v49 = vadd.f32 %v2271_v47, %v4869_v53  ;;  %v3349_v50 = vadd.f32 %v2675_v48, %v4871_v54  ;;  %v2273_v55 = vpop.f32.mrb[18].mxu0  ;;  %v2677_v56 = vpop.f32.mrb[18].mxu1 }
 0x1f8   :  { %v2732_v57 = vmax.f32 %v3322_v45, 0.0  ;;  %v2734_v58 = vmax.f32 %v3348_v46, 0.0  ;;  %v3324_v59 = vadd.f32 %v2273_v55, %v4865_v51  ;;  %v3350_v60 = vadd.f32 %v2677_v56, %v4867_v52  ;;  %v2275_v61 = vpop.f32.mrb[19].mxu0  ;;  %v2679_v62 = vpop.f32.mrb[19].mxu1 }
 0x1f9   :  { %v2733_v63 = vmax.f32 %v3323_v49, 0.0  ;;  %v2735_v0 = vmax.f32 %v3349_v50, 0.0  ;;  %v3325_v1 = vadd.f32 %v2275_v61, %v4869_v53  ;;  %v3351_v2 = vadd.f32 %v2679_v62, %v4871_v54 }
 0x1fa   :  { %v2736_v3 = vmax.f32 %v3324_v59, 0.0  ;;  %v2738_v4 = vmax.f32 %v3350_v60, 0.0 }
 0x1fb   :  { %v3296_v5 = vpack.c.bf16 %v2733_v63, %v2732_v57  ;;  %v3297_v6 = vpack.c.bf16 %v2735_v0, %v2734_v58  ;;  %v2737_v7 = vmax.f32 %v3325_v1, 0.0  ;;  %v2739_v8 = vmax.f32 %v3351_v2, 0.0 }
 0x1fd   :  { %2928 = vst [vmem:[%s5006_s3 + $0x80] sm:$0xff] %v3296_v5  ;;  %2929 = vst [vmem:[%s5006_s3 + $0x88] sm:$0xff] %v3297_v6  ;;  %v3298_v9 = vpack.c.bf16 %v2737_v7, %v2736_v3  ;;  %v3299_v10 = vpack.c.bf16 %v2739_v8, %v2738_v4  ;;  %v2279_v11 = vpop.f32.mrb[20].mxu0  ;;  %v2683_v12 = vpop.f32.mrb[20].mxu1 }
 0x1fe   :  { %v3326_v13 = vadd.f32 %v2279_v11, %v4865_v51  ;;  %v3352_v14 = vadd.f32 %v2683_v12, %v4867_v52  ;;  %v2281_v15 = vpop.f32.mrb[21].mxu0  ;;  %v2685_v16 = vpop.f32.mrb[21].mxu1 }
 0x1ff   :  { %2930 = vst [vmem:[%s5006_s3 + $0x90] sm:$0xff] %v3298_v9  ;;  %2931 = vst [vmem:[%s5006_s3 + $0x98] sm:$0xff] %v3299_v10  ;;  %v3327_v17 = vadd.f32 %v2281_v15, %v4869_v53  ;;  %v3353_v18 = vadd.f32 %v2685_v16, %v4871_v54  ;;  %v2283_v19 = vpop.f32.mrb[22].mxu0  ;;  %v2687_v20 = vpop.f32.mrb[22].mxu1 }
 0x200   :  { %v2740_v21 = vmax.f32 %v3326_v13, 0.0  ;;  %v2742_v22 = vmax.f32 %v3352_v14, 0.0  ;;  %v3328_v23 = vadd.f32 %v2283_v19, %v4865_v51  ;;  %v3354_v24 = vadd.f32 %v2687_v20, %v4867_v52  ;;  %v2285_v25 = vpop.f32.mrb[23].mxu0  ;;  %v2689_v26 = vpop.f32.mrb[23].mxu1 }
 0x201   :  { %v2741_v27 = vmax.f32 %v3327_v17, 0.0  ;;  %v2743_v28 = vmax.f32 %v3353_v18, 0.0  ;;  %v3329_v29 = vadd.f32 %v2285_v25, %v4869_v53  ;;  %v3355_v30 = vadd.f32 %v2689_v26, %v4871_v54 }
 0x202   :  { %v2744_v31 = vmax.f32 %v3328_v23, 0.0  ;;  %v2746_v32 = vmax.f32 %v3354_v24, 0.0 }
 0x203   :  { %v3300_v33 = vpack.c.bf16 %v2741_v27, %v2740_v21  ;;  %v3301_v34 = vpack.c.bf16 %v2743_v28, %v2742_v22  ;;  %v2745_v35 = vmax.f32 %v3329_v29, 0.0  ;;  %v2747_v36 = vmax.f32 %v3355_v30, 0.0 }
 0x205   :  { %2932 = vst [vmem:[%s5006_s3 + $0xa0] sm:$0xff] %v3300_v33  ;;  %2933 = vst [vmem:[%s5006_s3 + $0xa8] sm:$0xff] %v3301_v34  ;;  %v3302_v37 = vpack.c.bf16 %v2745_v35, %v2744_v31  ;;  %v3303_v38 = vpack.c.bf16 %v2747_v36, %v2746_v32  ;;  %v2289_v39 = vpop.f32.mrb[24].mxu0  ;;  %v2693_v40 = vpop.f32.mrb[24].mxu1 }
 0x206   :  { %v3330_v41 = vadd.f32 %v2289_v39, %v4865_v51  ;;  %v3356_v42 = vadd.f32 %v2693_v40, %v4867_v52  ;;  %v2291_v43 = vpop.f32.mrb[25].mxu0  ;;  %v2695_v44 = vpop.f32.mrb[25].mxu1 }
 0x207   :  { %2934 = vst [vmem:[%s5006_s3 + $0xb0] sm:$0xff] %v3302_v37  ;;  %2935 = vst [vmem:[%s5006_s3 + $0xb8] sm:$0xff] %v3303_v38  ;;  %v3331_v45 = vadd.f32 %v2291_v43, %v4869_v53  ;;  %v3357_v46 = vadd.f32 %v2695_v44, %v4871_v54  ;;  %v2293_v47 = vpop.f32.mrb[26].mxu0  ;;  %v2697_v48 = vpop.f32.mrb[26].mxu1 }
 0x208   :  { %v2748_v49 = vmax.f32 %v3330_v41, 0.0  ;;  %v2750_v51 = vmax.f32 %v3356_v42, 0.0  ;;  %v2294_v50 = vpop.f32.mrb[27].mxu0  ;;  %v2698_v52 = vpop.f32.mrb[27].mxu1 }
 0x209   :  { %v2749_v55 = vmax.f32 %v3331_v45, 0.0  ;;  %v2751_v56 = vmax.f32 %v3357_v46, 0.0 }
 0x20b   :  { %v3304_v57 = vpack.c.bf16 %v2749_v55, %v2748_v49  ;;  %v3305_v58 = vpack.c.bf16 %v2751_v56, %v2750_v51 }
 0x20d   :  { %2936 = vst [vmem:[%s5006_s3 + $0xc0] sm:$0x11] %v3304_v57  ;;  %2937 = vst [vmem:[%s5006_s3 + $0xc8] sm:$0x11] %v3305_v58 }

// kernel: base_cnn_forward.9
= control target key start
LH: loop header
LB: loop body
LE: loop exit
PB: predicated region body
PF: predicated region fallthrough
CT: control target
= control target key end

     0   :  { %s9553_s15 = smov 0   ;;  %s11429_s0 = inlined_call_operand.vmem [shape: bf16[2,3136,64], index: 0, kind: input, shape index: {}]   ;;  %s11430_s1 = inlined_call_operand.vmem [shape: bf16[2,784,128], index: 1, kind: input, shape index: {}]   ;;  %s11431_s2 = inlined_call_operand.vmem [shape: bf16[2,196,256], index: 2, kind: input, shape index: {}]   ;;  %s11432_s3 = inlined_call_operand.vmem [shape: bf16[2,49,512], index: 3, kind: input, shape index: {}]   ;;  %s11433_s4 = inlined_call_operand.vmem [shape: bf16[49,3136], index: 4, kind: input, shape index: {}]   ;;  %s11434_s5 = inlined_call_operand.vmem [shape: bf16[49,784], index: 5, kind: input, shape index: {}]   ;;  %s11435_s6 = inlined_call_operand.vmem [shape: bf16[49,196], index: 6, kind: input, shape index: {}]   ;;  %s11436_s7 = inlined_call_operand.vmem [shape: bf16[64,512], index: 7, kind: input, shape index: {}]   ;;  %s11437_s8 = inlined_call_operand.vmem [shape: bf16[128,512], index: 8, kind: input, shape index: {}]   ;;  %s11438_s9 = inlined_call_operand.vmem [shape: bf16[256,512], index: 9, kind: input, shape index: {}]   ;;  %s11439_s10 = inlined_call_operand.vmem [shape: bf16[512,512], index: 10, kind: input, shape index: {}]   ;;  %s11440_s11 = inlined_call_operand.vmem [shape: f32[1,512], index: 11, kind: input, shape index: {}]   ;;  %s11441_s12 = inlined_call_operand.vmem [shape: f32[49,512], index: 12, kind: input, shape index: {}]   ;;  %s11442_s13 = inlined_call_operand.<no memory space> [shape: f32[1], index: 13, kind: input, shape index: {}]   ;;  %s11443_s14 = inlined_call_operand.vmem [shape: f32[2,8,128], index: 14, kind: output, shape index: {}]  }
   0x1   :  { %19 = sst [smem:[#allocation2]] %s11442_s13 }
   0x2 LB: > { %s7155_s16 = sadd.s32 4294967295, %s9472_s15   ;;  %p7159_p0 = scmp.ge.s32.totalorder %s9472_s15, 1  ;;  %s9472_s15 = sphi %s9553_s15, %s25_s15  }
   0x3   : > { %p443_p1 = scmp.lt.s32.totalorder %s9472_s15, 3 }
   0x5   : > { %p444_p2 = pnand %p7159_p0, %p443_p1 }
   0x6   : > { %p503_p3 = scmp.lt.s32.totalorder (!%p444_p2), %s7155_s16, 1  ;;  %v8651_v0 = vld [vmem:[%s11433_s4 + $0x4] ss:$100 sps:$4 sm:$0xff] (!%p444_p2)   ;;  %v8654_v1 = vld [vmem:[%s11433_s4 + $0xc] ss:$100 sps:$4 sm:$0xff] (!%p444_p2)   ;;  %vm2649_vm0 = vcmask (!%p444_p2), 523264  }
   0x7   : > { %447 = sbr.rel (%p444_p2) target bundleno = 1273 (0x4f9), region = 76  ;;  %2694 = vmatprep.mubr.bf16.mxu0 (!%p444_p2), %v8651_v0  ;;  %2758 = vmatprep.mubr.bf16.mxu1 (!%p444_p2), %v8654_v1  ;;  %v8649_v32 = vld [vmem:[%s11433_s4] ss:$100 sps:$4 sm:$0xff] (!%p444_p2)   ;;  %v8652_v34 = vld [vmem:[%s11433_s4 + $0x8] ss:$100 sps:$4 sm:$0xff] (!%p444_p2)   ;;  %vm4043_vm1 = vcmask (!%p444_p2), 130048  }
   0x8   : > { %v8663_v36 = vld [vmem:[%s11433_s4 + $0xcc] ss:$100 sps:$4 sm:$0xff] (!%p444_p2)   ;;  %v8665_v39 = vld [vmem:[%s11433_s4 + $0xd4] ss:$100 sps:$4 sm:$0xff] (!%p444_p2)   ;;  %v8679_v57 = vld [vmem:[%s11433_s4 + $0x19c] ss:$100 sps:$4 sm:$0xff] (!%p444_p2)  }
   0x9   : > { %v8667_v44 = vld [vmem:[%s11433_s4 + $0xc8] ss:$100 sps:$4 sm:$0xff] (!%p444_p2)   ;;  %v8668_v46 = vld [vmem:[%s11433_s4 + $0xd0] ss:$100 sps:$4 sm:$0xff] (!%p444_p2)   ;;  %v8682_v59 = vld [vmem:[%s11433_s4 + $0x198] ss:$100 sps:$4 sm:$0xff] (!%p444_p2)  }
   0xa   : > { %v8677_v48 = vld [vmem:[%s11433_s4 + $0x194] ss:$100 sps:$4 sm:$0xff] (!%p444_p2)   ;;  %vm4502_vm2 = vcmask (!%p444_p2), 556032   ;;  %vm4515_vm3 = vcmask (!%p444_p2), 1041408   ;;  %vm7044_vm4 = vcmask (!%p444_p2), 1040384  }
   0xb   : > { %v8681_v58 = vld [vmem:[%s11433_s4 + $0x190] ss:$100 sps:$4 sm:$0xff] (!%p444_p2)  }
   0xe   : > { %s11445_s16 = smov (!%p503_p3, %s7155_s16), 1 }
   0xf   : > { %s8602_s20 = smul.u32 1568, %s11445_s16  ;;  %s7164_s29 = sshll.u32 %s11445_s16, 3 }
  0x10   : > { %s8603_s19 = smul.u32 392, %s11445_s16  ;;  %s526_s17 = scalar_lea.vmem %s11443_s14, %s7164_s29 }
  0x11   : > { %s9573_s23 = scalar_lea.vmem %s11429_s0, %s8602_s20  ;;  %s8604_s18 = smul.u32 200, %s11445_s16 }
  0x12   : > { %v8617_v2 = vld [vmem:[%s9573_s23 + $0x40] sm:$0xff]   ;;  %v8621_v6 = vld [vmem:[%s9573_s23 + $0x48] sm:$0xff]   ;;  %v8625_v10 = vld [vmem:[%s9573_s23 + $0x50] sm:$0xff]   ;;  %s9981_s27 = scalar_lea.vmem %s11430_s1, %s8603_s19  ;;  %s8605_s19 = smul.u32 112, %s11445_s16 }
  0x13   : > { %v8618_v3 = vld [vmem:[%s9573_s23 + $0xc0] sm:$0xff]   ;;  %7851 = vmatprep.subr.bf16.mxu0 %v8617_v2  ;;  %v8622_v7 = vld [vmem:[%s9573_s23 + $0xc8] sm:$0xff]   ;;  %v8626_v11 = vld [vmem:[%s9573_s23 + $0xd0] sm:$0xff]   ;;  %s10173_s26 = scalar_lea.vmem %s11431_s2, %s8604_s18 }
  0x14   : > { %v8619_v4 = vld [vmem:[%s9573_s23] sm:$0xff]   ;;  %7891 = vmatprep.subr.bf16.mxu1 %v8618_v3  ;;  %v8623_v8 = vld [vmem:[%s9573_s23 + $0x8] sm:$0xff]   ;;  %v8627_v12 = vld [vmem:[%s9573_s23 + $0x10] sm:$0xff]  }
  0x15   : > { %v8620_v5 = vld [vmem:[%s9573_s23 + $0x80] sm:$0xff]   ;;  %7852 = vmatpush3.bf16.msra.mxu0 %v8619_v4  ;;  %v8624_v9 = vld [vmem:[%s9573_s23 + $0x88] sm:$0xff]   ;;  %v8628_v13 = vld [vmem:[%s9573_s23 + $0x90] sm:$0xff]  }
  0x16   : > { %7892 = vmatpush3.bf16.msra.mxu1 %v8620_v5  ;;  %7853 = vmatprep.subr.bf16.mxu0 %v8621_v6  ;;  %v8629_v14 = vld [vmem:[%s9573_s23 + $0x58] sm:$0xff]   ;;  %v8633_v18 = vld [vmem:[%s9573_s23 + $0x60] sm:$0xff]   ;;  %v8637_v22 = vld [vmem:[%s9573_s23 + $0x68] sm:$0xff]  }
  0x17   : > { %7893 = vmatprep.subr.bf16.mxu1 %v8622_v7  ;;  %v8630_v15 = vld [vmem:[%s9573_s23 + $0xd8] sm:$0xff]   ;;  %v8634_v19 = vld [vmem:[%s9573_s23 + $0xe0] sm:$0xff]   ;;  %v8638_v23 = vld [vmem:[%s9573_s23 + $0xe8] sm:$0xff]  }
  0x18   : > { %v8631_v16 = vld [vmem:[%s9573_s23 + $0x18] sm:$0xff]   ;;  %v8635_v20 = vld [vmem:[%s9573_s23 + $0x20] sm:$0xff]   ;;  %v8639_v24 = vld [vmem:[%s9573_s23 + $0x28] sm:$0xff]  }
  0x19   : > { %7854 = vmatpush3.bf16.msra.mxu0 %v8623_v8  ;;  %v8632_v17 = vld [vmem:[%s9573_s23 + $0x98] sm:$0xff]   ;;  %v8636_v21 = vld [vmem:[%s9573_s23 + $0xa0] sm:$0xff]   ;;  %v8640_v25 = vld [vmem:[%s9573_s23 + $0xa8] sm:$0xff]  }
  0x1a   : > { %7894 = vmatpush3.bf16.msra.mxu1 %v8624_v9  ;;  %7855 = vmatprep.subr.bf16.mxu0 %v8625_v10  ;;  %v8641_v26 = vld [vmem:[%s9573_s23 + $0x70] sm:$0xff]   ;;  %v8645_v30 = vld [vmem:[%s9573_s23 + $0x78] sm:$0xff]   ;;  %v8655_v37 = vld [vmem:[%s9573_s23 + $0x140] sm:$0xff]  }
  0x1b   : > { %7895 = vmatprep.subr.bf16.mxu1 %v8626_v11  ;;  %v8642_v27 = vld [vmem:[%s9573_s23 + $0xf0] sm:$0xff]   ;;  %v8646_v31 = vld [vmem:[%s9573_s23 + $0xf8] sm:$0xff]   ;;  %v8656_v38 = vld [vmem:[%s9573_s23 + $0x100] sm:$0xff]  }
  0x1c   : > { %v8643_v28 = vld [vmem:[%s9573_s23 + $0x30] sm:$0xff]   ;;  %v8647_v33 = vld [vmem:[%s9573_s23 + $0x38] sm:$0xff]   ;;  %v8657_v40 = vld [vmem:[%s9573_s23 + $0x1c0] sm:$0xff]  }
  0x1d   : > { %7856 = vmatpush3.bf16.msra.mxu0 %v8627_v12  ;;  %v8644_v29 = vld [vmem:[%s9573_s23 + $0xb0] sm:$0xff]   ;;  %v8648_v35 = vld [vmem:[%s9573_s23 + $0xb8] sm:$0xff]   ;;  %v8658_v41 = vld [vmem:[%s9573_s23 + $0x180] sm:$0xff]  }
  0x1e   : > { %7896 = vmatpush3.bf16.msra.mxu1 %v8628_v13  ;;  %7857 = vmatprep.subr.bf16.mxu0 %v8629_v14  ;;  %v8659_v42 = vld [vmem:[%s9573_s23 + $0x148] sm:$0xff]   ;;  %v8669_v49 = vld [vmem:[%s9573_s23 + $0x150] sm:$0xff]   ;;  %v8673_v53 = vld [vmem:[%s9573_s23 + $0x158] sm:$0xff]  }
  0x1f   : > { %7897 = vmatprep.subr.bf16.mxu1 %v8630_v15  ;;  %v8660_v43 = vld [vmem:[%s9573_s23 + $0x108] sm:$0xff]   ;;  %v8670_v50 = vld [vmem:[%s9573_s23 + $0x110] sm:$0xff]   ;;  %v8674_v54 = vld [vmem:[%s9573_s23 + $0x118] sm:$0xff]  }
  0x20   : > { %v8661_v45 = vld [vmem:[%s9573_s23 + $0x1c8] sm:$0xff]   ;;  %v8671_v51 = vld [vmem:[%s9573_s23 + $0x1d0] sm:$0xff]   ;;  %v8675_v55 = vld [vmem:[%s9573_s23 + $0x1d8] sm:$0xff]  }
  0x21   : > { %7858 = vmatpush3.bf16.msra.mxu0 %v8631_v16  ;;  %v8662_v47 = vld [vmem:[%s9573_s23 + $0x188] sm:$0xff]   ;;  %v8672_v52 = vld [vmem:[%s9573_s23 + $0x190] sm:$0xff]   ;;  %v8676_v56 = vld [vmem:[%s9573_s23 + $0x198] sm:$0xff]  }
  0x22   : > { %7898 = vmatpush3.bf16.msra.mxu1 %v8632_v17  ;;  %7859 = vmatprep.subr.bf16.mxu0 %v8633_v18  ;;  %v8683_v60 = vld [vmem:[%s9573_s23 + $0x160] sm:$0xff]   ;;  %v8687_v0 = vld [vmem:[%s9573_s23 + $0x168] sm:$0xff]   ;;  %v606_v4 = vld [vmem:[%s11433_s4 + $0x258] sm:$0x11] }
  0x23   : > { %7899 = vmatprep.subr.bf16.mxu1 %v8634_v19  ;;  %v8684_v61 = vld [vmem:[%s9573_s23 + $0x120] sm:$0xff]   ;;  %v8688_v1 = vld [vmem:[%s9573_s23 + $0x128] sm:$0xff]   ;;  %v7241_v6 = vcombine.high %v606_v4, %v606_v4  ;;  %v7240_v8 = vcombine.low %v606_v4, %v606_v4  ;;  %v8695_v10 = vld [vmem:[%s9573_s23 + $0x170] sm:$0xff]  }
  0x24   : > { %v8685_v62 = vld [vmem:[%s9573_s23 + $0x1e0] sm:$0xff]   ;;  %v8689_v2 = vld [vmem:[%s9573_s23 + $0x1e8] sm:$0xff]   ;;  %v8696_v11 = vld [vmem:[%s9573_s23 + $0x130] sm:$0xff]  }
  0x25   : > { %7860 = vmatpush3.bf16.msra.mxu0 %v8635_v20  ;;  %v8686_v63 = vld [vmem:[%s9573_s23 + $0x1a0] sm:$0xff]   ;;  %v8690_v3 = vld [vmem:[%s9573_s23 + $0x1a8] sm:$0xff]   ;;  %v8697_v12 = vld [vmem:[%s9573_s23 + $0x1f0] sm:$0xff]  }
  0x26   : > { %7900 = vmatpush3.bf16.msra.mxu1 %v8636_v21  ;;  %7861 = vmatprep.subr.bf16.mxu0 %v8637_v22  ;;  %v607_v5 = vld [vmem:[%s11433_s4 + $0x260] sm:$0x11]  ;;  %v8698_v13 = vld [vmem:[%s9573_s23 + $0x1b0] sm:$0xff]   ;;  %v8699_v14 = vld [vmem:[%s9573_s23 + $0x178] sm:$0xff]  }
  0x27   : > { %7901 = vmatprep.subr.bf16.mxu1 %v8638_v23  ;;  %v7243_v7 = vcombine.high %v607_v5, %v607_v5  ;;  %v7242_v9 = vcombine.low %v607_v5, %v607_v5  ;;  %v8700_v15 = vld [vmem:[%s9573_s23 + $0x138] sm:$0xff]   ;;  %v8703_v18 = vld [vmem:[%s11433_s4 + $0x10] ss:$100 sps:$4 sm:$0xff]   ;;  %v8709_v22 = vld [vmem:[%s9573_s23 + $0x240] sm:$0xff]  }
  0x28   : > { %v8701_v16 = vld [vmem:[%s9573_s23 + $0x1f8] sm:$0xff]   ;;  %v8710_v23 = vld [vmem:[%s9573_s23 + $0x200] sm:$0xff]  }
  0x29   : > { %7862 = vmatpush3.bf16.msra.mxu0 %v8639_v24  ;;  %v8702_v17 = vld [vmem:[%s9573_s23 + $0x1b8] sm:$0xff]   ;;  %v8711_v24 = vld [vmem:[%s9573_s23 + $0x2c0] sm:$0xff]  }
  0x2a   : > { %7902 = vmatpush3.bf16.msra.mxu1 %v8640_v25  ;;  %7863 = vmatprep.subr.bf16.mxu0 %v8641_v26  ;;  %v8705_v19 = vld [vmem:[%s11433_s4 + $0x14] ss:$100 sps:$4 sm:$0xff]   ;;  %v8708_v21 = vld [vmem:[%s11433_s4 + $0x1c] ss:$100 sps:$4 sm:$0xff]   ;;  %v8713_v26 = vld [vmem:[%s9573_s23 + $0x248] sm:$0xff]  }
  0x2b   : > { %7903 = vmatprep.subr.bf16.mxu1 %v8642_v27  ;;  %v8706_v20 = vld [vmem:[%s11433_s4 + $0x18] ss:$100 sps:$4 sm:$0xff]   ;;  %v8712_v25 = vld [vmem:[%s9573_s23 + $0x280] sm:$0xff]   ;;  %v8714_v27 = vld [vmem:[%s9573_s23 + $0x208] sm:$0xff]  }
  0x2c   : > { %v8757_v4 = vld [vmem:[%s11433_s4 + $0x20] ss:$100 sps:$4 sm:$0xff]  }
  0x2d   : > { %7864 = vmatpush3.bf16.msra.mxu0 %v8643_v28  ;;  %v8715_v28 = vld [vmem:[%s9573_s23 + $0x2c8] sm:$0xff]  }
  0x2e   : > { %7904 = vmatpush3.bf16.msra.mxu1 %v8644_v29  ;;  %7865 = vmatprep.subr.bf16.mxu0 %v8645_v30  ;;  %v8716_v29 = vld [vmem:[%s9573_s23 + $0x288] sm:$0xff]   ;;  %v8717_v30 = vld [vmem:[%s11433_s4 + $0xdc] ss:$100 sps:$4 sm:$0xff]  }
  0x2f   : > { %7905 = vmatprep.subr.bf16.mxu1 %v8646_v31  ;;  %v8719_v31 = vld [vmem:[%s11433_s4 + $0xd8] ss:$100 sps:$4 sm:$0xff]   ;;  %v8759_v5 = vld [vmem:[%s11433_s4 + $0x24] ss:$100 sps:$4 sm:$0xff]  }
  0x31   : > { %7866 = vmatpush3.bf16.msra.mxu0 %v8647_v33  ;;  %v8722_v33 = vld [vmem:[%s9573_s23 + $0x250] sm:$0xff]  }
  0x32   : > { %7906 = vmatpush3.bf16.msra.mxu1 %v8648_v35  ;;  %7931 = vmatprep.subr.bf16.mxu0 %v8655_v37  ;;  %v8724_v35 = vld [vmem:[%s9573_s23 + $0x210] sm:$0xff]  }
  0x33   : > { %7971 = vmatprep.subr.bf16.mxu1 %v8657_v40  ;;  %v8726_v37 = vld [vmem:[%s9573_s23 + $0x290] sm:$0xff]   ;;  %v8729_v40 = vld [vmem:[%s9573_s23 + $0x2d8] sm:$0xff]  }
  0x34   : > { %2695 = vmatmul.mubr.bf16.vlgmr.msra.gmra.mrb[0].mxu0 %v8649_v32  ;;  %v8720_v32 = vld [vmem:[%s11433_s4 + $0xe4] ss:$100 sps:$4 sm:$0xff]  }
  0x35   : > { %2759 = vmatmul.mubr.bf16.vlgmr.msra.gmra.mrb[0].mxu1 %v8652_v34  ;;  %7932 = vmatpush3.bf16.msra.mxu0 %v8656_v38  ;;  %v8723_v34 = vld [vmem:[%s11433_s4 + $0xe0] ss:$100 sps:$4 sm:$0xff]   ;;  %v8727_v38 = vld [vmem:[%s9573_s23 + $0x258] sm:$0xff]  }
  0x36   : > { %2702 = vmatprep.mubr.bf16.mxu0 %v8663_v36  ;;  %7972 = vmatpush3.bf16.msra.mxu1 %v8658_v41  ;;  %v8725_v36 = vld [vmem:[%s9573_s23 + $0x2d0] sm:$0xff]   ;;  %v8730_v41 = vld [vmem:[%s9573_s23 + $0x298] sm:$0xff]  }
  0x37   : > { %7933 = vmatprep.subr.bf16.mxu0 %v8659_v42  ;;  %2766 = vmatprep.mubr.bf16.mxu1 %v8665_v39  ;;  %v8728_v39 = vld [vmem:[%s9573_s23 + $0x218] sm:$0xff]   ;;  %v8731_v42 = vld [vmem:[%s11433_s4 + $0x1a4] ss:$100 sps:$4 sm:$0xff]  }
  0x38   : > { %7973 = vmatprep.subr.bf16.mxu1 %v8661_v45  ;;  %v8736_v45 = vld [vmem:[%s9573_s23 + $0x260] sm:$0xff]  }
  0x39   : > { %7934 = vmatpush3.bf16.msra.mxu0 %v8660_v43  ;;  %v8733_v43 = vld [vmem:[%s11433_s4 + $0x1a0] ss:$100 sps:$4 sm:$0xff]  }
  0x3a   : > { %7974 = vmatpush3.bf16.msra.mxu1 %v8662_v47  ;;  %7935 = vmatprep.subr.bf16.mxu0 %v8669_v49  ;;  %v8738_v47 = vld [vmem:[%s9573_s23 + $0x220] sm:$0xff]  }
  0x3b   : > { %7975 = vmatprep.subr.bf16.mxu1 %v8671_v51  ;;  %v8740_v49 = vld [vmem:[%s9573_s23 + $0x2a0] sm:$0xff]   ;;  %v8742_v51 = vld [vmem:[%s9573_s23 + $0x228] sm:$0xff]  }
  0x3c   : > { %2703 = vmatmul.mubr.bf16.gmra.mrb[4].mxu0 %v8667_v44  ;;  %v8734_v44 = vld [vmem:[%s11433_s4 + $0x1ac] ss:$100 sps:$4 sm:$0xff]  }
  0x3d   : > { %2767 = vmatmul.mubr.bf16.gmra.mrb[4].mxu1 %v8668_v46  ;;  %7936 = vmatpush3.bf16.msra.mxu0 %v8670_v50  ;;  %v8737_v46 = vld [vmem:[%s11433_s4 + $0x1a8] ss:$100 sps:$4 sm:$0xff]  }
  0x3e   : > { %2710 = vmatprep.mubr.bf16.mxu0 %v8677_v48  ;;  %7976 = vmatpush3.bf16.msra.mxu1 %v8672_v52  ;;  %v8739_v48 = vld [vmem:[%s9573_s23 + $0x2e0] sm:$0xff]   ;;  %v8741_v50 = vld [vmem:[%s9573_s23 + $0x268] sm:$0xff]  }
  0x3f   : > { %7937 = vmatprep.subr.bf16.mxu0 %v8673_v53  ;;  %7977 = vmatprep.subr.bf16.mxu1 %v8675_v55  ;;  %v8743_v52 = vld [vmem:[%s9573_s23 + $0x2e8] sm:$0xff]  }
  0x40   : > { %2774 = vmatprep.mubr.bf16.mxu1 %v8679_v57  ;;  %v8744_v53 = vld [vmem:[%s9573_s23 + $0x2a8] sm:$0xff]   ;;  %v609_v57 = vld [vmem:[%s11433_s4 + $0x270] sm:$0x11] }
  0x41   : > { %7938 = vmatpush3.bf16.msra.mxu0 %v8674_v54  ;;  %v608_v54 = vld [vmem:[%s11433_s4 + $0x268] sm:$0x11] }
  0x42   : > { %7978 = vmatpush3.bf16.msra.mxu1 %v8676_v56  ;;  %7939 = vmatprep.subr.bf16.mxu0 %v8683_v60  ;;  %v7245_v55 = vcombine.high %v608_v54, %v608_v54  ;;  %v7244_v56 = vcombine.low %v608_v54, %v608_v54  ;;  %v7246_v60 = vcombine.low %v609_v57, %v609_v57  ;;  %v8811_v54 = vld [vmem:[%s11433_s4 + $0x30] ss:$100 sps:$4 sm:$0xff]  }
  0x43   : > { %7979 = vmatprep.subr.bf16.mxu1 %v8685_v62  ;;  %v8751_v62 = vld [vmem:[%s9573_s23 + $0x2f0] sm:$0xff]  }
  0x44   : > { %2711 = vmatmul.mubr.bf16.gmra.mrb[8].mxu0 %v8681_v58  ;;  %v7247_v58 = vcombine.high %v609_v57, %v609_v57  ;;  %v8816_v57 = vld [vmem:[%s11433_s4 + $0x3c] ss:$100 sps:$4 sm:$0xff]  }
  0x45   : > { %2775 = vmatmul.mubr.bf16.gmra.mrb[8].mxu1 %v8682_v59  ;;  %7940 = vmatpush3.bf16.msra.mxu0 %v8684_v61  ;;  %v8748_v59 = vld [vmem:[%s9573_s23 + $0x270] sm:$0xff]  }
  0x46   : > { %7980 = vmatpush3.bf16.msra.mxu1 %v8686_v63  ;;  %7941 = vmatprep.subr.bf16.mxu0 %v8687_v0  ;;  %v8750_v61 = vld [vmem:[%s9573_s23 + $0x230] sm:$0xff]   ;;  %v8753_v0 = vld [vmem:[%s9573_s23 + $0x278] sm:$0xff]  }
  0x47   : > { %7981 = vmatprep.subr.bf16.mxu1 %v8689_v2  ;;  %2718 = vmatprep.mubr.bf16.mxu0 %v7241_v6  ;;  %v8752_v63 = vld [vmem:[%s9573_s23 + $0x2b0] sm:$0xff]   ;;  %v8755_v2 = vld [vmem:[%s9573_s23 + $0x2f8] sm:$0xff]   ;;  %v8760_v6 = vld [vmem:[%s11433_s4 + $0x28] ss:$100 sps:$4 sm:$0xff]  }
  0x48   : > { %2782 = vmatprep.mubr.bf16.mxu1 %v7243_v7  ;;  %v8762_v7 = vld [vmem:[%s11433_s4 + $0x2c] ss:$100 sps:$4 sm:$0xff]  }
  0x49   : > { %7942 = vmatpush3.bf16.msra.mxu0 %v8688_v1  ;;  %v8754_v1 = vld [vmem:[%s9573_s23 + $0x238] sm:$0xff]  }
  0x4a   : > { %7982 = vmatpush3.bf16.msra.mxu1 %v8690_v3  ;;  %7943 = vmatprep.subr.bf16.mxu0 %v8695_v10  ;;  %v8756_v3 = vld [vmem:[%s9573_s23 + $0x2b8] sm:$0xff]   ;;  %v8765_v10 = vld [vmem:[%s9573_s23 + $0x3c0] sm:$0xff]  }
  0x4b   : > { %7983 = vmatprep.subr.bf16.mxu1 %v8697_v12  ;;  %v8767_v12 = vld [vmem:[%s9573_s23 + $0x348] sm:$0xff]  }
  0x4c   : > { %2719 = vmatmul.mubr.bf16.gmra.mrb[12].mxu0 %v7240_v8  ;;  %v8763_v8 = vld [vmem:[%s9573_s23 + $0x340] sm:$0xff]  }
  0x4d   : > { %2783 = vmatmul.mubr.bf16.gmra.mrb[12].mxu1 %v7242_v9  ;;  %7944 = vmatpush3.bf16.msra.mxu0 %v8696_v11  ;;  %v8764_v9 = vld [vmem:[%s9573_s23 + $0x300] sm:$0xff]  }
  0x4e   : > { %7984 = vmatpush3.bf16.msra.mxu1 %v8698_v13  ;;  %7945 = vmatprep.subr.bf16.mxu0 %v8699_v14  ;;  %v8766_v11 = vld [vmem:[%s9573_s23 + $0x380] sm:$0xff]   ;;  %v8768_v13 = vld [vmem:[%s9573_s23 + $0x308] sm:$0xff]  }
  0x4f   : > { %7985 = vmatprep.subr.bf16.mxu1 %v8701_v16  ;;  %2822 = vmatprep.mubr.bf16.mxu0 %v8705_v19  ;;  %v8769_v14 = vld [vmem:[%s9573_s23 + $0x3c8] sm:$0xff]   ;;  %v8776_v19 = vld [vmem:[%s9573_s23 + $0x350] sm:$0xff]  }
  0x50   : > { %2886 = vmatprep.mubr.bf16.mxu1 %v8708_v21  ;;  %v8771_v16 = vld [vmem:[%s11433_s4 + $0xec] ss:$100 sps:$4 sm:$0xff]  }
  0x51   : > { %7946 = vmatpush3.bf16.msra.mxu0 %v8700_v15  ;;  %v8770_v15 = vld [vmem:[%s9573_s23 + $0x388] sm:$0xff]   ;;  %v8778_v21 = vld [vmem:[%s9573_s23 + $0x310] sm:$0xff]  }
  0x52   : > { %7986 = vmatpush3.bf16.msra.mxu1 %v8702_v17  ;;  %8011 = vmatprep.subr.bf16.mxu0 %v8709_v22  ;;  %v8773_v17 = vld [vmem:[%s11433_s4 + $0xe8] ss:$100 sps:$4 sm:$0xff]   ;;  %v8779_v22 = vld [vmem:[%s9573_s23 + $0x3d0] sm:$0xff]  }
  0x53   : > { %8051 = vmatprep.subr.bf16.mxu1 %v8711_v24  ;;  %v8781_v24 = vld [vmem:[%s9573_s23 + $0x358] sm:$0xff]  }
  0x54   : > { %2823 = vmatmul.mubr.bf16.vlgmr.msra.gmra.mrb[16].mxu0 %v8703_v18  ;;  %v8774_v18 = vld [vmem:[%s11433_s4 + $0xf4] ss:$100 sps:$4 sm:$0xff]  }
  0x55   : > { %2887 = vmatmul.mubr.bf16.vlgmr.msra.gmra.mrb[16].mxu1 %v8706_v20  ;;  %8012 = vmatpush3.bf16.msra.mxu0 %v8710_v23  ;;  %v8777_v20 = vld [vmem:[%s11433_s4 + $0xf0] ss:$100 sps:$4 sm:$0xff]  }
  0x56   : > { %8052 = vmatpush3.bf16.msra.mxu1 %v8712_v25  ;;  %8013 = vmatprep.subr.bf16.mxu0 %v8713_v26  ;;  %v8780_v23 = vld [vmem:[%s9573_s23 + $0x390] sm:$0xff]   ;;  %v8782_v25 = vld [vmem:[%s9573_s23 + $0x318] sm:$0xff]  }
  0x57   : > { %8053 = vmatprep.subr.bf16.mxu1 %v8715_v28  ;;  %2830 = vmatprep.mubr.bf16.mxu0 %v8717_v30  ;;  %v8783_v26 = vld [vmem:[%s9573_s23 + $0x3d8] sm:$0xff]  }
  0x58   : > { %2894 = vmatprep.mubr.bf16.mxu1 %v8720_v32  ;;  %v8785_v28 = vld [vmem:[%s11433_s4 + $0x1b4] ss:$100 sps:$4 sm:$0xff]   ;;  %v8788_v30 = vld [vmem:[%s11433_s4 + $0x1bc] ss:$100 sps:$4 sm:$0xff]  }
  0x59   : > { %8014 = vmatpush3.bf16.msra.mxu0 %v8714_v27  ;;  %v8784_v27 = vld [vmem:[%s9573_s23 + $0x398] sm:$0xff]  }
  0x5a   : > { %8054 = vmatpush3.bf16.msra.mxu1 %v8716_v29  ;;  %8015 = vmatprep.subr.bf16.mxu0 %v8722_v33  ;;  %v8787_v29 = vld [vmem:[%s11433_s4 + $0x1b0] ss:$100 sps:$4 sm:$0xff]   ;;  %v8791_v32 = vld [vmem:[%s11433_s4 + $0x1b8] ss:$100 sps:$4 sm:$0xff]   ;;  %v8792_v33 = vld [vmem:[%s9573_s23 + $0x320] sm:$0xff]  }
  0x5b   : > { %8055 = vmatprep.subr.bf16.mxu1 %v8725_v36  ;;  %v8795_v36 = vld [vmem:[%s9573_s23 + $0x368] sm:$0xff]  }
  0x5c   : > { %2831 = vmatmul.mubr.bf16.gmra.mrb[20].mxu0 %v8719_v31  ;;  %v8790_v31 = vld [vmem:[%s9573_s23 + $0x360] sm:$0xff]  }
  0x5d   : > { %2895 = vmatmul.mubr.bf16.gmra.mrb[20].mxu1 %v8723_v34  ;;  %8016 = vmatpush3.bf16.msra.mxu0 %v8724_v35  ;;  %v8793_v34 = vld [vmem:[%s9573_s23 + $0x3e0] sm:$0xff]  }
  0x5e   : > { %8056 = vmatpush3.bf16.msra.mxu1 %v8726_v37  ;;  %8017 = vmatprep.subr.bf16.mxu0 %v8727_v38  ;;  %v8794_v35 = vld [vmem:[%s9573_s23 + $0x3a0] sm:$0xff]   ;;  %v8796_v37 = vld [vmem:[%s9573_s23 + $0x328] sm:$0xff]  }
  0x5f   : > { %8057 = vmatprep.subr.bf16.mxu1 %v8729_v40  ;;  %2838 = vmatprep.mubr.bf16.mxu0 %v8731_v42  ;;  %v8797_v38 = vld [vmem:[%s9573_s23 + $0x3e8] sm:$0xff]   ;;  %v610_v40 = vld [vmem:[%s11433_s4 + $0x278] sm:$0x11] }
  0x60   : > { %2902 = vmatprep.mubr.bf16.mxu1 %v8734_v44  ;;  %v7249_v42 = vcombine.high %v610_v40, %v610_v40 }
  0x61   : > { %8018 = vmatpush3.bf16.msra.mxu0 %v8728_v39  ;;  %v8798_v39 = vld [vmem:[%s9573_s23 + $0x3a8] sm:$0xff]  }
  0x62   : > { %8058 = vmatpush3.bf16.msra.mxu1 %v8730_v41  ;;  %8019 = vmatprep.subr.bf16.mxu0 %v8736_v45  ;;  %v611_v41 = vld [vmem:[%s11433_s4 + $0x280] sm:$0x11]  ;;  %v8802_v45 = vld [vmem:[%s9573_s23 + $0x370] sm:$0xff]  }
  0x63   : > { %8059 = vmatprep.subr.bf16.mxu1 %v8739_v48  ;;  %v7251_v44 = vcombine.high %v611_v41, %v611_v41  ;;  %v8805_v48 = vld [vmem:[%s9573_s23 + $0x3f0] sm:$0xff]  }
  0x64   : > { %2839 = vmatmul.mubr.bf16.gmra.mrb[24].mxu0 %v8733_v43  ;;  %v7248_v43 = vcombine.low %v610_v40, %v610_v40  ;;  %v8865_v40 = vld [vmem:[%s11433_s4 + $0x40] ss:$100 sps:$4 sm:$0xff]  }
  0x65   : > { %2903 = vmatmul.mubr.bf16.gmra.mrb[24].mxu1 %v8737_v46  ;;  %8020 = vmatpush3.bf16.msra.mxu0 %v8738_v47  ;;  %v7250_v46 = vcombine.low %v611_v41, %v611_v41  ;;  %v8804_v47 = vld [vmem:[%s9573_s23 + $0x330] sm:$0xff]   ;;  %v8867_v41 = vld [vmem:[%s11433_s4 + $0x44] ss:$100 sps:$4 sm:$0xff]  }
  0x66   : > { %8060 = vmatpush3.bf16.msra.mxu1 %v8740_v49  ;;  %8021 = vmatprep.subr.bf16.mxu0 %v8741_v50  ;;  %v8806_v49 = vld [vmem:[%s9573_s23 + $0x3b0] sm:$0xff]   ;;  %v8807_v50 = vld [vmem:[%s9573_s23 + $0x378] sm:$0xff]  }
  0x67   : > { %8061 = vmatprep.subr.bf16.mxu1 %v8743_v52  ;;  %2846 = vmatprep.mubr.bf16.mxu0 %v7245_v55  ;;  %v8809_v52 = vld [vmem:[%s9573_s23 + $0x3f8] sm:$0xff]  }
  0x68   : > { %2910 = vmatprep.mubr.bf16.mxu1 %v7247_v58  ;;  %v8813_v55 = vld [vmem:[%s11433_s4 + $0x34] ss:$100 sps:$4 sm:$0xff]   ;;  %v8817_v58 = vld [vmem:[%s9573_s23 + $0x440] sm:$0xff]  }
  0x69   : > { %8022 = vmatpush3.bf16.msra.mxu0 %v8742_v51  ;;  %v8808_v51 = vld [vmem:[%s9573_s23 + $0x338] sm:$0xff]  }
  0x6a   : > { %8062 = vmatpush3.bf16.msra.mxu1 %v8744_v53  ;;  %8023 = vmatprep.subr.bf16.mxu0 %v8748_v59  ;;  %v8810_v53 = vld [vmem:[%s9573_s23 + $0x3b8] sm:$0xff]   ;;  %v8818_v59 = vld [vmem:[%s9573_s23 + $0x400] sm:$0xff]  }
  0x6b   : > { %8063 = vmatprep.subr.bf16.mxu1 %v8751_v62  ;;  %v8821_v62 = vld [vmem:[%s9573_s23 + $0x448] sm:$0xff]  }
  0x6c   : > { %2847 = vmatmul.mubr.bf16.gmra.mrb[28].mxu0 %v7244_v56  ;;  %v8814_v56 = vld [vmem:[%s11433_s4 + $0x38] ss:$100 sps:$4 sm:$0xff]  }
  0x6d   : > { %2911 = vmatmul.mubr.bf16.gmra.mrb[28].mxu1 %v7246_v60  ;;  %8024 = vmatpush3.bf16.msra.mxu0 %v8750_v61  ;;  %v8819_v60 = vld [vmem:[%s9573_s23 + $0x4c0] sm:$0xff]  }
  0x6e   : > { %8064 = vmatpush3.bf16.msra.mxu1 %v8752_v63  ;;  %8025 = vmatprep.subr.bf16.mxu0 %v8753_v0  ;;  %v8820_v61 = vld [vmem:[%s9573_s23 + $0x480] sm:$0xff]   ;;  %v8822_v63 = vld [vmem:[%s9573_s23 + $0x408] sm:$0xff]  }
  0x6f   : > { %8065 = vmatprep.subr.bf16.mxu1 %v8755_v2  ;;  %2950 = vmatprep.mubr.bf16.mxu0 %v8759_v5  ;;  %v8823_v0 = vld [vmem:[%s9573_s23 + $0x4c8] sm:$0xff]   ;;  %v8825_v2 = vld [vmem:[%s11433_s4 + $0xfc] ss:$100 sps:$4 sm:$0xff]   ;;  %v8830_v5 = vld [vmem:[%s9573_s23 + $0x450] sm:$0xff]  }
  0x70   : > { %3014 = vmatprep.mubr.bf16.mxu1 %v8762_v7  ;;  %v8832_v7 = vld [vmem:[%s9573_s23 + $0x410] sm:$0xff]  }
  0x71   : > { %8026 = vmatpush3.bf16.msra.mxu0 %v8754_v1  ;;  %v8824_v1 = vld [vmem:[%s9573_s23 + $0x488] sm:$0xff]  }
  0x72   : > { %8066 = vmatpush3.bf16.msra.mxu1 %v8756_v3  ;;  %8091 = vmatprep.subr.bf16.mxu0 %v8763_v8  ;;  %v8827_v3 = vld [vmem:[%s11433_s4 + $0xf8] ss:$100 sps:$4 sm:$0xff]   ;;  %v8833_v8 = vld [vmem:[%s9573_s23 + $0x4d0] sm:$0xff]  }
  0x73   : > { %8131 = vmatprep.subr.bf16.mxu1 %v8765_v10  ;;  %v8835_v10 = vld [vmem:[%s9573_s23 + $0x458] sm:$0xff]  }
  0x74   : > { %2951 = vmatmul.mubr.bf16.vlgmr.msra.gmra.mrb[32].mxu0 %v8757_v4  ;;  %v8828_v4 = vld [vmem:[%s11433_s4 + $0x104] ss:$100 sps:$4 sm:$0xff]  }
  0x75   : > { %3015 = vmatmul.mubr.bf16.vlgmr.msra.gmra.mrb[32].mxu1 %v8760_v6  ;;  %8092 = vmatpush3.bf16.msra.mxu0 %v8764_v9  ;;  %v8831_v6 = vld [vmem:[%s11433_s4 + $0x100] ss:$100 sps:$4 sm:$0xff]   ;;  %v8834_v9 = vld [vmem:[%s9573_s23 + $0x490] sm:$0xff]  }
  0x76   : > { %8132 = vmatpush3.bf16.msra.mxu1 %v8766_v11  ;;  %8093 = vmatprep.subr.bf16.mxu0 %v8767_v12  ;;  %v8836_v11 = vld [vmem:[%s9573_s23 + $0x418] sm:$0xff]  }
  0x77   : > { %8133 = vmatprep.subr.bf16.mxu1 %v8769_v14  ;;  %2958 = vmatprep.mubr.bf16.mxu0 %v8771_v16  ;;  %v8837_v12 = vld [vmem:[%s9573_s23 + $0x4d8] sm:$0xff]   ;;  %v8839_v14 = vld [vmem:[%s11433_s4 + $0x1c4] ss:$100 sps:$4 sm:$0xff]   ;;  %v8842_v16 = vld [vmem:[%s11433_s4 + $0x1cc] ss:$100 sps:$4 sm:$0xff]  }
  0x78   : > { %3022 = vmatprep.mubr.bf16.mxu1 %v8774_v18  ;;  %v8845_v18 = vld [vmem:[%s11433_s4 + $0x1c8] ss:$100 sps:$4 sm:$0xff]  }
  0x79   : > { %8094 = vmatpush3.bf16.msra.mxu0 %v8768_v13  ;;  %v8838_v13 = vld [vmem:[%s9573_s23 + $0x498] sm:$0xff]  }
  0x7a   : > { %8134 = vmatpush3.bf16.msra.mxu1 %v8770_v15  ;;  %8095 = vmatprep.subr.bf16.mxu0 %v8776_v19  ;;  %v8841_v15 = vld [vmem:[%s11433_s4 + $0x1c0] ss:$100 sps:$4 sm:$0xff]  }
  0x7b   : > { %8135 = vmatprep.subr.bf16.mxu1 %v8779_v22  ;;  %v8846_v19 = vld [vmem:[%s9573_s23 + $0x420] sm:$0xff]   ;;  %v8849_v22 = vld [vmem:[%s9573_s23 + $0x468] sm:$0xff]  }
  0x7c   : > { %2959 = vmatmul.mubr.bf16.gmra.mrb[36].mxu0 %v8773_v17  ;;  %v8844_v17 = vld [vmem:[%s9573_s23 + $0x460] sm:$0xff]  }
  0x7d   : > { %3023 = vmatmul.mubr.bf16.gmra.mrb[36].mxu1 %v8777_v20  ;;  %8096 = vmatpush3.bf16.msra.mxu0 %v8778_v21  ;;  %v8847_v20 = vld [vmem:[%s9573_s23 + $0x4e0] sm:$0xff]  }
  0x7e   : > { %8136 = vmatpush3.bf16.msra.mxu1 %v8780_v23  ;;  %8097 = vmatprep.subr.bf16.mxu0 %v8781_v24  ;;  %v8848_v21 = vld [vmem:[%s9573_s23 + $0x4a0] sm:$0xff]   ;;  %v8850_v23 = vld [vmem:[%s9573_s23 + $0x428] sm:$0xff]  }
  0x7f   : > { %8137 = vmatprep.subr.bf16.mxu1 %v8783_v26  ;;  %2966 = vmatprep.mubr.bf16.mxu0 %v8785_v28  ;;  %v8851_v24 = vld [vmem:[%s9573_s23 + $0x4e8] sm:$0xff]  }
  0x80   : > { %3030 = vmatprep.mubr.bf16.mxu1 %v8788_v30  ;;  %v612_v26 = vld [vmem:[%s11433_s4 + $0x288] sm:$0x11] }
  0x81   : > { %8098 = vmatpush3.bf16.msra.mxu0 %v8782_v25  ;;  %v8852_v25 = vld [vmem:[%s9573_s23 + $0x4a8] sm:$0xff]   ;;  %v7253_v28 = vcombine.high %v612_v26, %v612_v26 }
  0x82   : > { %8138 = vmatpush3.bf16.msra.mxu1 %v8784_v27  ;;  %8099 = vmatprep.subr.bf16.mxu0 %v8790_v31  ;;  %v613_v27 = vld [vmem:[%s11433_s4 + $0x290] sm:$0x11] }
  0x83   : > { %8139 = vmatprep.subr.bf16.mxu1 %v8793_v34  ;;  %v7255_v30 = vcombine.high %v613_v27, %v613_v27  ;;  %v8856_v31 = vld [vmem:[%s9573_s23 + $0x470] sm:$0xff]  }
  0x84   : > { %2967 = vmatmul.mubr.bf16.gmra.mrb[40].mxu0 %v8787_v29  ;;  %v7252_v29 = vcombine.low %v612_v26, %v612_v26  ;;  %v8859_v34 = vld [vmem:[%s9573_s23 + $0x4f0] sm:$0xff]  }
  0x85   : > { %3031 = vmatmul.mubr.bf16.gmra.mrb[40].mxu1 %v8791_v32  ;;  %8100 = vmatpush3.bf16.msra.mxu0 %v8792_v33  ;;  %v7254_v32 = vcombine.low %v613_v27, %v613_v27  ;;  %v8858_v33 = vld [vmem:[%s9573_s23 + $0x430] sm:$0xff]  }
  0x86   : > { %8140 = vmatpush3.bf16.msra.mxu1 %v8794_v35  ;;  %8101 = vmatprep.subr.bf16.mxu0 %v8795_v36  ;;  %v8860_v35 = vld [vmem:[%s9573_s23 + $0x4b0] sm:$0xff]   ;;  %v8861_v36 = vld [vmem:[%s9573_s23 + $0x478] sm:$0xff]  }
  0x87   : > { %8141 = vmatprep.subr.bf16.mxu1 %v8797_v38  ;;  %2974 = vmatprep.mubr.bf16.mxu0 %v7249_v42  ;;  %v8863_v38 = vld [vmem:[%s9573_s23 + $0x4f8] sm:$0xff]   ;;  %v8868_v42 = vld [vmem:[%s11433_s4 + $0x48] ss:$100 sps:$4 sm:$0xff]   ;;  %v8919_v26 = vld [vmem:[%s11433_s4 + $0x50] ss:$100 sps:$4 sm:$0xff]  }
  0x88   : > { %3038 = vmatprep.mubr.bf16.mxu1 %v7251_v44  ;;  %v8871_v44 = vld [vmem:[%s9573_s23 + $0x540] sm:$0xff]   ;;  %v8921_v27 = vld [vmem:[%s11433_s4 + $0x54] ss:$100 sps:$4 sm:$0xff]  }
  0x89   : > { %8102 = vmatpush3.bf16.msra.mxu0 %v8796_v37  ;;  %v8862_v37 = vld [vmem:[%s9573_s23 + $0x438] sm:$0xff]  }
  0x8a   : > { %8142 = vmatpush3.bf16.msra.mxu1 %v8798_v39  ;;  %8103 = vmatprep.subr.bf16.mxu0 %v8802_v45  ;;  %v8864_v39 = vld [vmem:[%s9573_s23 + $0x4b8] sm:$0xff]   ;;  %v8872_v45 = vld [vmem:[%s9573_s23 + $0x500] sm:$0xff]  }
  0x8b   : > { %8143 = vmatprep.subr.bf16.mxu1 %v8805_v48  ;;  %v8875_v48 = vld [vmem:[%s9573_s23 + $0x548] sm:$0xff]  }
  0x8c   : > { %2975 = vmatmul.mubr.bf16.gmra.mrb[44].mxu0 %v7248_v43  ;;  %v8870_v43 = vld [vmem:[%s11433_s4 + $0x4c] ss:$100 sps:$4 sm:$0xff]  }
  0x8d   : > { %3039 = vmatmul.mubr.bf16.gmra.mrb[44].mxu1 %v7250_v46  ;;  %8104 = vmatpush3.bf16.msra.mxu0 %v8804_v47  ;;  %v8873_v46 = vld [vmem:[%s9573_s23 + $0x5c0] sm:$0xff]  }
  0x8e   : > { %8144 = vmatpush3.bf16.msra.mxu1 %v8806_v49  ;;  %8105 = vmatprep.subr.bf16.mxu0 %v8807_v50  ;;  %v8874_v47 = vld [vmem:[%s9573_s23 + $0x580] sm:$0xff]   ;;  %v8876_v49 = vld [vmem:[%s9573_s23 + $0x508] sm:$0xff]  }
  0x8f   : > { %8145 = vmatprep.subr.bf16.mxu1 %v8809_v52  ;;  %3078 = vmatprep.mubr.bf16.mxu0 %v8813_v55  ;;  %v8877_v50 = vld [vmem:[%s9573_s23 + $0x5c8] sm:$0xff]   ;;  %v8884_v55 = vld [vmem:[%s9573_s23 + $0x550] sm:$0xff]  }
  0x90   : > { %3142 = vmatprep.mubr.bf16.mxu1 %v8816_v57  ;;  %v8879_v52 = vld [vmem:[%s11433_s4 + $0x10c] ss:$100 sps:$4 sm:$0xff]  }
  0x91   : > { %8106 = vmatpush3.bf16.msra.mxu0 %v8808_v51  ;;  %v8878_v51 = vld [vmem:[%s9573_s23 + $0x588] sm:$0xff]   ;;  %v8886_v57 = vld [vmem:[%s9573_s23 + $0x510] sm:$0xff]  }
  0x92   : > { %8146 = vmatpush3.bf16.msra.mxu1 %v8810_v53  ;;  %8171 = vmatprep.subr.bf16.mxu0 %v8817_v58  ;;  %v8881_v53 = vld [vmem:[%s11433_s4 + $0x108] ss:$100 sps:$4 sm:$0xff]   ;;  %v8887_v58 = vld [vmem:[%s9573_s23 + $0x5d0] sm:$0xff]  }
  0x93   : > { %8211 = vmatprep.subr.bf16.mxu1 %v8819_v60  ;;  %v8889_v60 = vld [vmem:[%s9573_s23 + $0x558] sm:$0xff]  }
  0x94   : > { %3079 = vmatmul.mubr.bf16.vlgmr.msra.gmra.mrb[48].mxu0 %v8811_v54  ;;  %v8882_v54 = vld [vmem:[%s11433_s4 + $0x114] ss:$100 sps:$4 sm:$0xff]  }
  0x95   : > { %3143 = vmatmul.mubr.bf16.vlgmr.msra.gmra.mrb[48].mxu1 %v8814_v56  ;;  %8172 = vmatpush3.bf16.msra.mxu0 %v8818_v59  ;;  %v8885_v56 = vld [vmem:[%s11433_s4 + $0x110] ss:$100 sps:$4 sm:$0xff]  }
  0x96   : > { %8212 = vmatpush3.bf16.msra.mxu1 %v8820_v61  ;;  %8173 = vmatprep.subr.bf16.mxu0 %v8821_v62  ;;  %v8888_v59 = vld [vmem:[%s9573_s23 + $0x590] sm:$0xff]   ;;  %v8890_v61 = vld [vmem:[%s9573_s23 + $0x518] sm:$0xff]  }
  0x97   : > { %8213 = vmatprep.subr.bf16.mxu1 %v8823_v0  ;;  %3086 = vmatprep.mubr.bf16.mxu0 %v8825_v2  ;;  %v8891_v62 = vld [vmem:[%s9573_s23 + $0x5d8] sm:$0xff]  }
  0x98   : > { %3150 = vmatprep.mubr.bf16.mxu1 %v8828_v4  ;;  %v8893_v0 = vld [vmem:[%s11433_s4 + $0x1d4] ss:$100 sps:$4 sm:$0xff]   ;;  %v8896_v2 = vld [vmem:[%s11433_s4 + $0x1dc] ss:$100 sps:$4 sm:$0xff]  }
  0x99   : > { %8174 = vmatpush3.bf16.msra.mxu0 %v8822_v63  ;;  %v8892_v63 = vld [vmem:[%s9573_s23 + $0x598] sm:$0xff]  }
  0x9a   : > { %8214 = vmatpush3.bf16.msra.mxu1 %v8824_v1  ;;  %8175 = vmatprep.subr.bf16.mxu0 %v8830_v5  ;;  %v8895_v1 = vld [vmem:[%s11433_s4 + $0x1d0] ss:$100 sps:$4 sm:$0xff]   ;;  %v8899_v4 = vld [vmem:[%s11433_s4 + $0x1d8] ss:$100 sps:$4 sm:$0xff]   ;;  %v8900_v5 = vld [vmem:[%s9573_s23 + $0x520] sm:$0xff]  }
  0x9b   : > { %8215 = vmatprep.subr.bf16.mxu1 %v8833_v8  ;;  %v8903_v8 = vld [vmem:[%s9573_s23 + $0x568] sm:$0xff]  }
  0x9c   : > { %3087 = vmatmul.mubr.bf16.gmra.mrb[52].mxu0 %v8827_v3  ;;  %v8898_v3 = vld [vmem:[%s9573_s23 + $0x560] sm:$0xff]  }
  0x9d   : > { %3151 = vmatmul.mubr.bf16.gmra.mrb[52].mxu1 %v8831_v6  ;;  %8176 = vmatpush3.bf16.msra.mxu0 %v8832_v7  ;;  %v8901_v6 = vld [vmem:[%s9573_s23 + $0x5e0] sm:$0xff]  }
  0x9e   : > { %8216 = vmatpush3.bf16.msra.mxu1 %v8834_v9  ;;  %8177 = vmatprep.subr.bf16.mxu0 %v8835_v10  ;;  %v8902_v7 = vld [vmem:[%s9573_s23 + $0x5a0] sm:$0xff]   ;;  %v8904_v9 = vld [vmem:[%s9573_s23 + $0x528] sm:$0xff]  }
  0x9f   : > { %8217 = vmatprep.subr.bf16.mxu1 %v8837_v12  ;;  %3094 = vmatprep.mubr.bf16.mxu0 %v8839_v14  ;;  %v8905_v10 = vld [vmem:[%s9573_s23 + $0x5e8] sm:$0xff]   ;;  %v614_v12 = vld [vmem:[%s11433_s4 + $0x298] sm:$0x11] }
  0xa0   : > { %3158 = vmatprep.mubr.bf16.mxu1 %v8842_v16  ;;  %v7256_v14 = vcombine.low %v614_v12, %v614_v12 }
  0xa1   : > { %8178 = vmatpush3.bf16.msra.mxu0 %v8836_v11  ;;  %v8906_v11 = vld [vmem:[%s9573_s23 + $0x5a8] sm:$0xff]  }
  0xa2   : > { %8218 = vmatpush3.bf16.msra.mxu1 %v8838_v13  ;;  %8179 = vmatprep.subr.bf16.mxu0 %v8844_v17  ;;  %v7257_v13 = vcombine.high %v614_v12, %v614_v12  ;;  %v8910_v17 = vld [vmem:[%s9573_s23 + $0x570] sm:$0xff]   ;;  %v8959_v12 = vld [vmem:[%s9981_s27 + $0x78] sm:$0xff]  }
  0xa3   : > { %8219 = vmatprep.subr.bf16.mxu1 %v8847_v20  ;;  %v8913_v20 = vld [vmem:[%s9573_s23 + $0x5f0] sm:$0xff]  }
  0xa4   : > { %3095 = vmatmul.mubr.bf16.gmra.mrb[56].mxu0 %v8841_v15  ;;  %v615_v15 = vld [vmem:[%s11433_s4 + $0x2a0] sm:$0x11] }
  0xa5   : > { %3159 = vmatmul.mubr.bf16.gmra.mrb[56].mxu1 %v8845_v18  ;;  %8180 = vmatpush3.bf16.msra.mxu0 %v8846_v19  ;;  %v7259_v16 = vcombine.high %v615_v15, %v615_v15  ;;  %v7258_v18 = vcombine.low %v615_v15, %v615_v15  ;;  %v8912_v19 = vld [vmem:[%s9573_s23 + $0x530] sm:$0xff]   ;;  %v8961_v15 = vld [vmem:[%s11433_s4 + $0x60] ss:$100 sps:$4 sm:$0xff]  }
  0xa6   : > { %8220 = vmatpush3.bf16.msra.mxu1 %v8848_v21  ;;  %8181 = vmatprep.subr.bf16.mxu0 %v8849_v22  ;;  %v8914_v21 = vld [vmem:[%s9573_s23 + $0x5b0] sm:$0xff]   ;;  %v8915_v22 = vld [vmem:[%s9573_s23 + $0x578] sm:$0xff]  }
  0xa7   : > { %8221 = vmatprep.subr.bf16.mxu1 %v8851_v24  ;;  %3102 = vmatprep.mubr.bf16.mxu0 %v7253_v28  ;;  %v8917_v24 = vld [vmem:[%s9573_s23 + $0x5f8] sm:$0xff]  }
  0xa8   : > { %3166 = vmatprep.mubr.bf16.mxu1 %v7255_v30  ;;  %v8922_v28 = vld [vmem:[%s11433_s4 + $0x58] ss:$100 sps:$4 sm:$0xff]   ;;  %v8925_v30 = vld [vmem:[%s9573_s23 + $0x600] sm:$0xff]  }
  0xa9   : > { %8182 = vmatpush3.bf16.msra.mxu0 %v8850_v23  ;;  %v8916_v23 = vld [vmem:[%s9573_s23 + $0x538] sm:$0xff]  }
  0xaa   : > { %8222 = vmatpush3.bf16.msra.mxu1 %v8852_v25  ;;  %8183 = vmatprep.subr.bf16.mxu0 %v8856_v31  ;;  %v8918_v25 = vld [vmem:[%s9573_s23 + $0x5b8] sm:$0xff]   ;;  %v8926_v31 = vld [vmem:[%s9981_s27 + $0x40] sm:$0xff]  }
  0xab   : > { %8223 = vmatprep.subr.bf16.mxu1 %v8859_v34  ;;  %v8929_v34 = vld [vmem:[%s9981_s27 + $0x8] sm:$0xff]  }
  0xac   : > { %3103 = vmatmul.mubr.bf16.gmra.mrb[60].mxu0 %v7252_v29  ;;  %v8924_v29 = vld [vmem:[%s11433_s4 + $0x5c] ss:$100 sps:$4 sm:$0xff]  }
  0xad   : > { %3167 = vmatmul.mubr.bf16.gmra.mrb[60].mxu1 %v7254_v32  ;;  %8184 = vmatpush3.bf16.msra.mxu0 %v8858_v33  ;;  %v8927_v32 = vld [vmem:[%s9981_s27] sm:$0xff]   ;;  %v8928_v33 = vld [vmem:[%s9981_s27 + $0x48] sm:$0xff]  }
  0xae   : > { %8224 = vmatpush3.bf16.msra.mxu1 %v8860_v35  ;;  %8185 = vmatprep.subr.bf16.mxu0 %v8861_v36  ;;  %v8930_v35 = vld [vmem:[%s11433_s4 + $0x11c] ss:$100 sps:$4 sm:$0xff]  }
  0xaf   : > { %8225 = vmatprep.subr.bf16.mxu1 %v8863_v38  ;;  %3206 = vmatprep.mubr.bf16.mxu0 %v8867_v41  ;;  %v8932_v36 = vld [vmem:[%s11433_s4 + $0x118] ss:$100 sps:$4 sm:$0xff]   ;;  %v8935_v38 = vld [vmem:[%s9573_s23 + $0x608] sm:$0xff]   ;;  %v8938_v41 = vld [vmem:[%s9981_s27 + $0x10] sm:$0xff]  }
  0xb0   : > { %3270 = vmatprep.mubr.bf16.mxu1 %v8870_v43  ;;  %v8940_v43 = vld [vmem:[%s9981_s27 + $0x18] sm:$0xff]  }
  0xb1   : > { %8186 = vmatpush3.bf16.msra.mxu0 %v8862_v37  ;;  %v8933_v37 = vld [vmem:[%s11433_s4 + $0x124] ss:$100 sps:$4 sm:$0xff]  }
  0xb2   : > { %8226 = vmatpush3.bf16.msra.mxu1 %v8864_v39  ;;  %8251 = vmatprep.subr.bf16.mxu0 %v8871_v44  ;;  %v8936_v39 = vld [vmem:[%s11433_s4 + $0x120] ss:$100 sps:$4 sm:$0xff]  }
  0xb3   : > { %8291 = vmatprep.subr.bf16.mxu1 %v8873_v46  ;;  %v8941_v44 = vld [vmem:[%s11433_s4 + $0x1e4] ss:$100 sps:$4 sm:$0xff]   ;;  %v8944_v46 = vld [vmem:[%s11433_s4 + $0x1ec] ss:$100 sps:$4 sm:$0xff]  }
  0xb4   : > { %3207 = vmatmul.mubr.bf16.vlgmr.msra.gmra.mrb[64].mxu0 %v8865_v40  ;;  %v8937_v40 = vld [vmem:[%s9981_s27 + $0x50] sm:$0xff]  }
  0xb5   : > { %3271 = vmatmul.mubr.bf16.vlgmr.msra.gmra.mrb[64].mxu1 %v8868_v42  ;;  %8252 = vmatpush3.bf16.msra.mxu0 %v8872_v45  ;;  %v8939_v42 = vld [vmem:[%s9981_s27 + $0x58] sm:$0xff]   ;;  %v8943_v45 = vld [vmem:[%s11433_s4 + $0x1e0] ss:$100 sps:$4 sm:$0xff]  }
  0xb6   : > { %8292 = vmatpush3.bf16.msra.mxu1 %v8874_v47  ;;  %8253 = vmatprep.subr.bf16.mxu0 %v8875_v48  ;;  %v8946_v47 = vld [vmem:[%s9573_s23 + $0x610] sm:$0xff]  }
  0xb7   : > { %8293 = vmatprep.subr.bf16.mxu1 %v8877_v50  ;;  %3214 = vmatprep.mubr.bf16.mxu0 %v8879_v52  ;;  %v8948_v50 = vld [vmem:[%s9981_s27 + $0x60] sm:$0xff]  }
  0xb8   : > { %3278 = vmatprep.mubr.bf16.mxu1 %v8882_v54  ;;  %v8949_v52 = vld [vmem:[%s9981_s27 + $0x20] sm:$0xff]   ;;  %v8950_v54 = vld [vmem:[%s9981_s27 + $0x68] sm:$0xff]  }
  0xb9   : > { %8254 = vmatpush3.bf16.msra.mxu0 %v8876_v49  ;;  %v8947_v49 = vld [vmem:[%s11433_s4 + $0x1e8] ss:$100 sps:$4 sm:$0xff]  }
  0xba   : > { %8294 = vmatpush3.bf16.msra.mxu1 %v8878_v51  ;;  %8255 = vmatprep.subr.bf16.mxu0 %v8884_v55 }
  0xbb   : > { %8295 = vmatprep.subr.bf16.mxu1 %v8887_v58  ;;  %v616_v58 = vld [vmem:[%s11433_s4 + $0x2a8] sm:$0x11] }
  0xbc   : > { %3215 = vmatmul.mubr.bf16.gmra.mrb[68].mxu0 %v8881_v53 }
  0xbd   : > { %3279 = vmatmul.mubr.bf16.gmra.mrb[68].mxu1 %v8885_v56  ;;  %8256 = vmatpush3.bf16.msra.mxu0 %v8886_v57  ;;  %v8951_v57 = vld [vmem:[%s9981_s27 + $0x28] sm:$0xff]  }
  0xbe   : > { %8296 = vmatpush3.bf16.msra.mxu1 %v8888_v59  ;;  %8257 = vmatprep.subr.bf16.mxu0 %v8889_v60  ;;  %v617_v59 = vld [vmem:[%s11433_s4 + $0x2b0] sm:$0x11] }
  0xbf   : > { %8297 = vmatprep.subr.bf16.mxu1 %v8891_v62  ;;  %3222 = vmatprep.mubr.bf16.mxu0 %v8893_v0  ;;  %v7261_v62 = vcombine.high %v616_v58, %v616_v58  ;;  %v7263_v0 = vcombine.high %v617_v59, %v617_v59 }
  0xc0   : > { %3286 = vmatprep.mubr.bf16.mxu1 %v8896_v2 }
  0xc1   : > { %8258 = vmatpush3.bf16.msra.mxu0 %v8890_v61 }
  0xc2   : > { %8298 = vmatpush3.bf16.msra.mxu1 %v8892_v63  ;;  %8259 = vmatprep.subr.bf16.mxu0 %v8898_v3  ;;  %v7260_v63 = vcombine.low %v616_v58, %v616_v58  ;;  %v7262_v3 = vcombine.low %v617_v59, %v617_v59  ;;  %v8982_v59 = vld [vmem:[%s9981_s27 + $0x110] sm:$0xff]  }
  0xc3   : > { %8299 = vmatprep.subr.bf16.mxu1 %v8901_v6 }
  0xc4   : > { %3223 = vmatmul.mubr.bf16.gmra.mrb[72].mxu0 %v8895_v1  ;;  %v8955_v1 = vld [vmem:[%s9573_s23 + $0x618] sm:$0xff]   ;;  %s10530_s23 = scalar_lea.vmem %s11432_s3, %s8605_s19 }
  0xc5   : > { %3287 = vmatmul.mubr.bf16.gmra.mrb[72].mxu1 %v8899_v4  ;;  %8260 = vmatpush3.bf16.msra.mxu0 %v8900_v5  ;;  %v8957_v4 = vld [vmem:[%s9981_s27 + $0x70] sm:$0xff]  }
  0xc6   : > { %8300 = vmatpush3.bf16.msra.mxu1 %v8902_v7  ;;  %8261 = vmatprep.subr.bf16.mxu0 %v8903_v8 }
  0xc7   : > { %8301 = vmatprep.subr.bf16.mxu1 %v8905_v10  ;;  %3230 = vmatprep.mubr.bf16.mxu0 %v7257_v13 }
  0xc8   : > { %3294 = vmatprep.mubr.bf16.mxu1 %v7259_v16 }
  0xc9   : > { %8262 = vmatpush3.bf16.msra.mxu0 %v8904_v9  ;;  %v8958_v9 = vld [vmem:[%s9981_s27 + $0x30] sm:$0xff]  }
  0xca   : > { %8302 = vmatpush3.bf16.msra.mxu1 %v8906_v11  ;;  %8263 = vmatprep.subr.bf16.mxu0 %v8910_v17  ;;  %v8962_v17 = vld [vmem:[%s9981_s27 + $0xc0] sm:$0xff]  }
  0xcb   : > { %8303 = vmatprep.subr.bf16.mxu1 %v8913_v20 }
  0xcc   : > { %3231 = vmatmul.mubr.bf16.gmra.mrb[76].mxu0 %v7256_v14  ;;  %v8960_v14 = vld [vmem:[%s9981_s27 + $0x38] sm:$0xff]  }
  0xcd   : > { %3295 = vmatmul.mubr.bf16.gmra.mrb[76].mxu1 %v7258_v18  ;;  %8264 = vmatpush3.bf16.msra.mxu0 %v8912_v19  ;;  %v8963_v19 = vld [vmem:[%s11433_s4 + $0x128] ss:$100 sps:$4 sm:$0xff]  }
  0xce   : > { %8304 = vmatpush3.bf16.msra.mxu1 %v8914_v21  ;;  %8265 = vmatprep.subr.bf16.mxu0 %v8915_v22  ;;  %v8964_v21 = vld [vmem:[%s11434_s5] ss:$28 sps:$4 sm:$0xff]  }
  0xcf   : > { %8305 = vmatprep.subr.bf16.mxu1 %v8917_v24  ;;  %3334 = vmatprep.mubr.bf16.mxu0 %v8921_v27  ;;  %v8966_v24 = vld [vmem:[%s11434_s5 + $0x4] ss:$28 sps:$4 sm:$0xff]  }
  0xd0   : > { %3398 = vmatprep.mubr.bf16.mxu1 %v8924_v29 }
  0xd1   : > { %8266 = vmatpush3.bf16.msra.mxu0 %v8916_v23 }
  0xd2   : > { %8306 = vmatpush3.bf16.msra.mxu1 %v8918_v25  ;;  %8464 = vmatprep.subr.bf16.mxu0 %v8925_v30 }
  0xd3   : > { %8339 = vmatprep.subr.bf16.mxu1 %v8926_v31  ;;  %v8969_v31 = vld [vmem:[%s9981_s27 + $0x100] sm:$0xff]  }
  0xd4   : > { %3335 = vmatmul.mubr.bf16.vlgmr.msra.gmra.mrb[80].mxu0 %v8919_v26  ;;  %v8967_v26 = vld [vmem:[%s9981_s27 + $0x80] sm:$0xff]  }
  0xd5   : > { %3399 = vmatmul.mubr.bf16.vlgmr.msra.gmra.mrb[80].mxu1 %v8922_v28  ;;  %8465 = vmatpush3.bf16.msra.mxu0 %v8925_v30  ;;  %v8968_v28 = vld [vmem:[%s9981_s27 + $0x140] sm:$0xff]  }
  0xd6   : > { %8340 = vmatpush3.bf16.msra.mxu1 %v8927_v32  ;;  %3342 = vmatprep.mubr.bf16.mxu0 %v8930_v35 }
  0xd7   : > { %8341 = vmatprep.subr.bf16.mxu1 %v8928_v33  ;;  %3406 = vmatprep.mubr.bf16.mxu1 %v8933_v37  ;;  %v8971_v37 = vld [vmem:[%s9981_s27 + $0x88] sm:$0xff]  }
  0xd8   : > { %8466 = vmatprep.subr.bf16.mxu0 %v8935_v38 }
  0xd9   : > { %8467 = vmatpush3.bf16.msra.mxu0 %v8935_v38 }
  0xda   : > { %8342 = vmatpush3.bf16.msra.mxu1 %v8929_v34  ;;  %8468 = vmatprep.subr.bf16.mxu0 %v8946_v47  ;;  %v8970_v34 = vld [vmem:[%s9981_s27 + $0xc8] sm:$0xff]  }
  0xdb   : > { %8343 = vmatprep.subr.bf16.mxu1 %v8937_v40 }
  0xdc   : > { %3343 = vmatmul.mubr.bf16.gmra.mrb[84].mxu0 %v8932_v36 }
  0xdd   : > { %3407 = vmatmul.mubr.bf16.gmra.mrb[84].mxu1 %v8936_v39  ;;  %3350 = vmatprep.mubr.bf16.mxu0 %v8941_v44  ;;  %v8972_v39 = vld [vmem:[%s9981_s27 + $0x148] sm:$0xff]  }
  0xde   : > { %8344 = vmatpush3.bf16.msra.mxu1 %v8938_v41  ;;  %3414 = vmatprep.mubr.bf16.mxu1 %v8944_v46 }
  0xdf   : > { %8345 = vmatprep.subr.bf16.mxu1 %v8939_v42  ;;  %8469 = vmatpush3.bf16.msra.mxu0 %v8946_v47  ;;  %v8973_v42 = vld [vmem:[%s9981_s27 + $0x108] sm:$0xff]   ;;  %v8975_v47 = vld [vmem:[%s9981_s27 + $0xd0] sm:$0xff]  }
  0xe0   : > { %8470 = vmatprep.subr.bf16.mxu0 %v8955_v1 }
  0xe2   : > { %8346 = vmatpush3.bf16.msra.mxu1 %v8940_v43 }
  0xe3   : > { %8347 = vmatprep.subr.bf16.mxu1 %v8948_v50  ;;  %8471 = vmatpush3.bf16.msra.mxu0 %v8955_v1 }
  0xe4   : > { %3351 = vmatmul.mubr.bf16.gmra.mrb[88].mxu0 %v8943_v45  ;;  %8379 = vmatprep.subr.bf16.mxu0 %v8962_v17  ;;  %v8974_v45 = vld [vmem:[%s11433_s4 + $0x1f0] ss:$100 sps:$4 sm:$0xff]  }
  0xe5   : > { %3415 = vmatmul.mubr.bf16.gmra.mrb[88].mxu1 %v8947_v49  ;;  %3358 = vmatprep.mubr.bf16.mxu0 %v7261_v62  ;;  %v8977_v49 = vld [vmem:[%s11434_s5 + $0x3c] ss:$28 sps:$4 sm:$0xff]   ;;  %v8991_v17 = vld [vmem:[%s11434_s5 + $0x70] ss:$28 sps:$4 sm:$0xff]  }
  0xe6   : > { %8348 = vmatpush3.bf16.msra.mxu1 %v8949_v52  ;;  %3422 = vmatprep.mubr.bf16.mxu1 %v7263_v0  ;;  %v8983_v62 = vld [vmem:[%s9981_s27 + $0xd8] sm:$0xff]  }
  0xe7   : > { %8349 = vmatprep.subr.bf16.mxu1 %v8950_v54  ;;  %v8984_v0 = vld [vmem:[%s9981_s27 + $0x98] sm:$0xff]  }
  0xea   : > { %8350 = vmatpush3.bf16.msra.mxu1 %v8951_v57  ;;  %v8981_v57 = vld [vmem:[%s9981_s27 + $0x150] sm:$0xff]  }
  0xeb   : > { %8351 = vmatprep.subr.bf16.mxu1 %v8957_v4 }
  0xec   : > { %3359 = vmatmul.mubr.bf16.gmra.mrb[92].mxu0 %v7260_v63 }
  0xed   : > { %3423 = vmatmul.mubr.bf16.gmra.mrb[92].mxu1 %v7262_v3  ;;  %8472 = vmatprep.mubr.msk.bf16.mxu0 %vm2649_vm0, %v8961_v15  ;;  %v8985_v3 = vld [vmem:[%s9981_s27 + $0x158] sm:$0xff]   ;;  %v8990_v15 = vld [vmem:[%s9981_s27 + $0xa0] sm:$0xff]  }
  0xee   : > { %8352 = vmatpush3.bf16.msra.mxu1 %v8958_v9  ;;  %4088 = vmatprep.mubr.bf16.mxu1 %v8966_v24 }
  0xef   : > { %8353 = vmatprep.subr.bf16.mxu1 %v8959_v12 }
  0xf2   : > { %8354 = vmatpush3.bf16.msra.mxu1 %v8960_v14 }
  0xf3   : > { %8419 = vmatprep.subr.bf16.mxu1 %v8968_v28  ;;  %v8996_v28 = vld [vmem:[%s9981_s27 + $0x168] sm:$0xff]  }
  0xf4   : > { %8473 = vmatmul.mubr.msk.bf16.vlgmr.msra.gmra.mrb[96].mxu0 %vm2649_vm0, %v8963_v19  ;;  %v8992_v19 = vld [vmem:[%s9981_s27 + $0x160] sm:$0xff]  }
  0xf5   : > { %8380 = vmatpush3.bf16.msra.mxu0 %v8967_v26  ;;  %4089 = vmatmul.mubr.bf16.vlgmr.msra.gmra.mrb[96].mxu1 %v8964_v21  ;;  %v8993_v21 = vld [vmem:[%s9981_s27 + $0x120] sm:$0xff]   ;;  %v8995_v26 = vld [vmem:[%s9981_s27 + $0xa8] sm:$0xff]  }
  0xf6   : > { %8420 = vmatpush3.bf16.msra.mxu1 %v8969_v31  ;;  %8381 = vmatprep.subr.bf16.mxu0 %v8970_v34 }
  0xf7   : > { %8421 = vmatprep.subr.bf16.mxu1 %v8972_v39  ;;  %8476 = vmatprep.mubr.msk.bf16.mxu0 %vm2649_vm0, %v8974_v45 }
  0xf8   : > { %4096 = vmatprep.mubr.bf16.mxu1 %v8977_v49 }
  0xf9   : > { %8382 = vmatpush3.bf16.msra.mxu0 %v8971_v37 }
  0xfa   : > { %8422 = vmatpush3.bf16.msra.mxu1 %v8973_v42  ;;  %8383 = vmatprep.subr.bf16.mxu0 %v8975_v47 }
  0xfb   : > { %8423 = vmatprep.subr.bf16.mxu1 %v8981_v57 }
  0xfe   : > { %8424 = vmatpush3.bf16.msra.mxu1 %v8982_v59  ;;  %v9007_v59 = vld [vmem:[%s11434_s5 + $0x8] ss:$28 sps:$4 sm:$0xff]  }
  0xff   : > { %8425 = vmatprep.subr.bf16.mxu1 %v8985_v3 }
 0x107   : > { %v7867_v48 = vpop.f32.mrb[0].mxu0 }
 0x108   : > { %v7907_v51 = vpop.f32.mrb[0].mxu1  ;;  %v7868_v53 = vpop.f32.mrb[1].mxu0 }
 0x109   : > { %v7869_v55 = vadd.f32 %v7868_v53, %v7867_v48  ;;  %v7908_v56 = vpop.f32.mrb[1].mxu1  ;;  %v7870_v61 = vpop.f32.mrb[2].mxu0  ;;  %v8976_v48 = vld [vmem:[%s11433_s4 + $0x2b8] ss:$0 sps:$4 sm:$0x11]   ;;  %v8979_v53 = vld [vmem:[%s9981_s27 + $0x90] sm:$0xff]  }
 0x10a   : > { %v7909_v60 = vadd.f32 %v7908_v56, %v7907_v51  ;;  %v7910_v2 = vpop.f32.mrb[2].mxu1  ;;  %v7871_v6 = vpop.f32.mrb[3].mxu0  ;;  %8477 = vmatmul.mubr.msk.bf16.gmra.mrb[100].mxu0 %vm2649_vm0, %v8976_v48  ;;  %v9003_v48 = vld [vmem:[%s9981_s27 + $0x130] sm:$0xff]  }
 0x10b   : > { %v7872_v7 = vadd.f32 %v7871_v6, %v7870_v61  ;;  %v7911_v8 = vpop.f32.mrb[3].mxu1  ;;  %8384 = vmatpush3.bf16.msra.mxu0 %v8979_v53 }
 0x10c   : > { %v10036_v5 = vadd.f32 %v7909_v60, %v7869_v55  ;;  %v7912_v10 = vadd.f32 %v7911_v8, %v7910_v2  ;;  %v8980_v55 = vld [vmem:[%s11434_s5 + $0x38] ss:$28 sps:$4 sm:$0xff]   ;;  %8385 = vmatprep.subr.bf16.mxu0 %v8983_v62  ;;  %v9009_v62 = vld [vmem:[%s11434_s5 + $0xc] ss:$28 sps:$4 sm:$0xff]  }
 0x10d   : > { %4097 = vmatmul.mubr.bf16.gmra.mrb[100].mxu1 %v8980_v55  ;;  %4152 = vmatprep.mubr.bf16.mxu0 %v9009_v62 }
 0x10e   : > { %v10044_v16 = vadd.f32 %v7912_v10, %v7872_v7  ;;  %v8986_v7 = vld [vmem:[%s9981_s27 + $0x118] sm:$0xff]   ;;  %v8987_v10 = vld [vmem:[%s9981_s27 + $0xe0] sm:$0xff]  }
 0x10f   : > { %v7873_v11 = vpop.f32.mrb[4].mxu0  ;;  %8386 = vmatpush3.bf16.msra.mxu0 %v8984_v0  ;;  %8426 = vmatpush3.bf16.msra.mxu1 %v8986_v7  ;;  %v9010_v0 = vld [vmem:[%s9981_s27 + $0x138] sm:$0xff]   ;;  %v9012_v7 = vld [vmem:[%s11434_s5 + $0x10] ss:$28 sps:$4 sm:$0xff]  }
 0x110   : > { %v7913_v13 = vpop.f32.mrb[4].mxu1  ;;  %v7874_v18 = vpop.f32.mrb[5].mxu0  ;;  %8387 = vmatprep.subr.bf16.mxu0 %v8987_v10  ;;  %8427 = vmatprep.subr.bf16.mxu1 %v8992_v19  ;;  %v9017_v19 = vld [vmem:[%s11434_s5 + $0x40] ss:$28 sps:$4 sm:$0xff]  }
 0x111   : > { %v7875_v20 = vadd.f32 %v7874_v18, %v7873_v11  ;;  %v7914_v22 = vpop.f32.mrb[5].mxu1  ;;  %v7876_v23 = vpop.f32.mrb[6].mxu0 }
 0x112   : > { %v7915_v25 = vadd.f32 %v7914_v22, %v7913_v13  ;;  %v7916_v27 = vpop.f32.mrb[6].mxu1  ;;  %v7877_v30 = vpop.f32.mrb[7].mxu0  ;;  %v8988_v13 = vld [vmem:[%s11434_s5 + $0x74] ss:$28 sps:$4 sm:$0xff]  }
 0x113   : > { %v7878_v32 = vadd.f32 %v7877_v30, %v7876_v23  ;;  %v7917_v33 = vpop.f32.mrb[7].mxu1  ;;  %4104 = vmatprep.mubr.bf16.mxu1 %v8988_v13  ;;  %8388 = vmatpush3.bf16.msra.mxu0 %v8990_v15  ;;  %v8994_v23 = vld [vmem:[%s9981_s27 + $0xe8] sm:$0xff]  }
 0x114   : > { %v10059_v29 = vadd.f32 %v7915_v25, %v7875_v20  ;;  %v7918_v35 = vadd.f32 %v7917_v33, %v7916_v27  ;;  %8428 = vmatpush3.bf16.msra.mxu1 %v8993_v21  ;;  %8389 = vmatprep.subr.bf16.mxu0 %v8994_v23  ;;  %v9021_v21 = vld [vmem:[%s11434_s5 + $0x7c] ss:$28 sps:$4 sm:$0xff]  }
 0x115   : > { %4105 = vmatmul.mubr.bf16.gmra.mrb[104].mxu1 %v8991_v17  ;;  %8429 = vmatprep.subr.bf16.mxu1 %v8996_v28 }
 0x116   : > { %v10066_v40 = vadd.f32 %v7918_v35, %v7878_v32  ;;  %v8997_v32 = vld [vmem:[%s9981_s27 + $0x128] sm:$0xff]   ;;  %v8998_v35 = vld [vmem:[%s9981_s27 + $0xf0] sm:$0xff]  }
 0x117   : > { %v7879_v36 = vpop.f32.mrb[8].mxu0  ;;  %8390 = vmatpush3.bf16.msra.mxu0 %v8995_v26  ;;  %v9020_v26 = vld [vmem:[%s11434_s5 + $0x48] ss:$28 sps:$4 sm:$0xff]  }
 0x118   : > { %v7919_v38 = vpop.f32.mrb[8].mxu1  ;;  %v7880_v41 = vpop.f32.mrb[9].mxu0  ;;  %8430 = vmatpush3.bf16.msra.mxu1 %v8997_v32  ;;  %8391 = vmatprep.subr.bf16.mxu0 %v8998_v35  ;;  %v9037_v35 = vld [vmem:[%s10173_s26 + $0x4] ss:$8 sps:$4 sm:$0xff]  }
 0x119   : > { %v7881_v43 = vadd.f32 %v7880_v41, %v7879_v36  ;;  %v7920_v44 = vpop.f32.mrb[9].mxu1  ;;  %v7882_v51 = vpop.f32.mrb[10].mxu0  ;;  %v3518_v36 = vld [vmem:[%s11434_s5 + $0xa8] sm:$0x11]  ;;  %v9000_v41 = vld [vmem:[%s9981_s27 + $0xb0] sm:$0xff]  }
 0x11a   : > { %v7921_v46 = vadd.f32 %v7920_v44, %v7919_v38  ;;  %v7922_v52 = vpop.f32.mrb[10].mxu1  ;;  %v7883_v54 = vpop.f32.mrb[11].mxu0  ;;  %v7487_v39 = vcombine.high %v3518_v36, %v3518_v36  ;;  %v9002_v44 = vld [vmem:[%s9981_s27 + $0x170] sm:$0xff]  }
 0x11b   : > { %v7884_v56 = vadd.f32 %v7883_v54, %v7882_v51  ;;  %v7923_v58 = vpop.f32.mrb[11].mxu1  ;;  %8392 = vmatpush3.bf16.msra.mxu0 %v9000_v41  ;;  %8431 = vmatprep.subr.bf16.mxu1 %v9002_v44  ;;  %v9004_v51 = vld [vmem:[%s9981_s27 + $0xf8] sm:$0xff]  }
 0x11c   : > { %v10080_v50 = vadd.f32 %v7921_v46, %v7881_v43  ;;  %v7924_v60 = vadd.f32 %v7923_v58, %v7922_v52  ;;  %4112 = vmatprep.mubr.bf16.mxu1 %v7487_v39  ;;  %8432 = vmatpush3.bf16.msra.mxu1 %v9003_v48  ;;  %v9005_v54 = vld [vmem:[%s9981_s27 + $0xb8] sm:$0xff]  }
 0x11d   : > { %8393 = vmatprep.subr.bf16.mxu0 %v9004_v51  ;;  %v9038_v48 = vld [vmem:[%s10173_s26 + $0x10] ss:$8 sps:$4 sm:$0xff]  }
 0x11e   : > { %v10091_v1 = vadd.f32 %v7924_v60, %v7884_v56  ;;  %v9006_v56 = vld [vmem:[%s9981_s27 + $0x178] sm:$0xff]  }
 0x11f   : > { %v7885_v61 = vpop.f32.mrb[12].mxu0  ;;  %8394 = vmatpush3.bf16.msra.mxu0 %v9005_v54  ;;  %8433 = vmatprep.subr.bf16.mxu1 %v9006_v56 }
 0x120   : > { %v7925_v63 = vpop.f32.mrb[12].mxu1  ;;  %v7886_v2 = vpop.f32.mrb[13].mxu0  ;;  %8434 = vmatpush3.bf16.msra.mxu1 %v9010_v0  ;;  %v9044_v0 = vld [vmem:[%s10173_s26 + $0x30] ss:$8 sps:$4 sm:$0xff]  }
 0x121   : > { %v7887_v4 = vadd.f32 %v7886_v2, %v7885_v61  ;;  %v7926_v6 = vpop.f32.mrb[13].mxu1  ;;  %v7888_v9 = vpop.f32.mrb[14].mxu0  ;;  %4522 = vmatprep.subr.bf16.mxu1 %v9037_v35 }
 0x122   : > { %v7927_v8 = vadd.f32 %v7926_v6, %v7925_v63  ;;  %v7889_v11 = vpop.f32.mrb[15].mxu0  ;;  %v7928_v12 = vpop.f32.mrb[14].mxu1  ;;  %4153 = vmatmul.mubr.bf16.vlgmr.msra.gmra.mrb[104].mxu0 %v9007_v59  ;;  %v9046_v59 = vld [vmem:[%s10173_s26 + $0x34] ss:$8 sps:$4 sm:$0xff]  }
 0x123   : > { %v7929_v20 = vpop.f32.mrb[15].mxu1  ;;  %v9018_v11 = vld [vmem:[%s11434_s5 + $0x4c] ss:$28 sps:$4 sm:$0xff]  }
 0x124   : > { %v10099_v14 = vadd.f32 %v7927_v8, %v7887_v4  ;;  %v9014_v8 = vld [vmem:[%s11434_s5 + $0x14] ss:$28 sps:$4 sm:$0xff]  }
 0x127   : > { %v7947_v18 = vpop.f32.mrb[16].mxu0 }
 0x128   : > { %v7948_v22 = vpop.f32.mrb[17].mxu0  ;;  %v7987_v27 = vpop.f32.mrb[16].mxu1 }
 0x129   : > { %v7949_v24 = vadd.f32 %v7948_v22, %v7947_v18  ;;  %v7950_v25 = vpop.f32.mrb[18].mxu0  ;;  %v7988_v34 = vpop.f32.mrb[17].mxu1 }
 0x12a   : > { %v7951_v31 = vpop.f32.mrb[19].mxu0  ;;  %v7989_v37 = vadd.f32 %v7988_v34, %v7987_v27  ;;  %v7990_v38 = vpop.f32.mrb[18].mxu1  ;;  %v9024_v27 = vld [vmem:[%s11434_s5 + $0x84] ss:$28 sps:$4 sm:$0xff]  }
 0x12b   : > { %v2825_v30 = vadd.f32 %v7949_v24, %v10036_v5  ;;  %v7952_v33 = vadd.f32 %v7951_v31, %v7950_v25  ;;  %v7486_v5 = vcombine.low %v3518_v36, %v3518_v36  ;;  %v7991_v43 = vpop.f32.mrb[19].mxu1  ;;  %v9023_v31 = vld [vmem:[%s11434_s5 + $0x78] ss:$28 sps:$4 sm:$0xff]   ;;  %v9035_v34 = vld [vmem:[%s10173_s26] ss:$8 sps:$4 sm:$0xff]  }
 0x12c   : > { %v7992_v46 = vadd.f32 %v7991_v43, %v7990_v38  ;;  %v3520_v36 = vld [vmem:[%s11434_s5 + $0xb8] sm:$0x11] }
 0x12d   : > { %v2828_v42 = vadd.f32 %v7952_v33, %v10044_v16  ;;  %v10119_v45 = vadd.f32 %v7989_v37, %v2825_v30  ;;  %4113 = vmatmul.mubr.bf16.gmra.mrb[108].mxu1 %v7486_v5  ;;  %v9026_v43 = vld [vmem:[%s11434_s5 + $0x80] ss:$28 sps:$4 sm:$0xff]   ;;  %v7491_v54 = vcombine.high %v3520_v36, %v3520_v36 }
 0x12e   : > { %4216 = vmatprep.mubr.bf16.mxu1 %v9014_v8 }
 0x12f   : > { %v7953_v47 = vpop.f32.mrb[20].mxu0  ;;  %v10123_v52 = vadd.f32 %v7992_v46, %v2828_v42  ;;  %v9040_v42 = vld [vmem:[%s10173_s26 + $0x14] ss:$8 sps:$4 sm:$0xff]  }
 0x130   : > { %v7954_v49 = vpop.f32.mrb[21].mxu0  ;;  %v7993_v55 = vpop.f32.mrb[20].mxu1 }
 0x131   : > { %v7955_v53 = vadd.f32 %v7954_v49, %v7953_v47  ;;  %v7956_v16 = vpop.f32.mrb[22].mxu0  ;;  %v7994_v61 = vpop.f32.mrb[21].mxu1 }
 0x132   : > { %v7957_v58 = vpop.f32.mrb[23].mxu0  ;;  %v7995_v63 = vadd.f32 %v7994_v61, %v7993_v55  ;;  %v7996_v3 = vpop.f32.mrb[22].mxu1  ;;  %v9031_v61 = vld [vmem:[%s11434_s5 + $0x18] ss:$28 sps:$4 sm:$0xff]  }
 0x133   : > { %v2833_v57 = vadd.f32 %v7955_v53, %v10059_v29  ;;  %v7958_v60 = vadd.f32 %v7957_v58, %v7956_v16  ;;  %v9011_v29 = vld [vmem:[%s9981_s27 + $0x180] sm:$0xff]   ;;  %v7997_v6 = vpop.f32.mrb[23].mxu1  ;;  %s7062_s27 = sld [smem:[#allocation2]] }
 0x134   : > { %v7998_v9 = vadd.f32 %v7997_v6, %v7996_v3  ;;  %8480 = vmatprep.subr.bf16.mxu0 %v9011_v29  ;;  %v9043_v16 = vld [vmem:[%s10173_s26 + $0x24] ss:$8 sps:$4 sm:$0xff]   ;;  %v9041_v58 = vld [vmem:[%s10173_s26 + $0x20] ss:$8 sps:$4 sm:$0xff]  }
 0x135   : > { %v2836_v2 = vadd.f32 %v7958_v60, %v10066_v40  ;;  %v10137_v4 = vadd.f32 %v7995_v63, %v2833_v57  ;;  %v9015_v40 = vld [vmem:[%s11434_s5 + $0x44] ss:$28 sps:$4 sm:$0xff]   ;;  %8481 = vmatpush3.bf16.msra.mxu0 %v9011_v29  ;;  %4217 = vmatmul.mubr.bf16.vlgmr.msra.gmra.mrb[112].mxu1 %v9012_v7 }
 0x136   : > { %4160 = vmatprep.mubr.bf16.mxu0 %v9015_v40  ;;  %4224 = vmatprep.mubr.bf16.mxu1 %v9018_v11  ;;  %v9049_v7 = vld [vmem:[%s10173_s26 + $0x44] ss:$8 sps:$4 sm:$0xff]  }
 0x137   : > { %v7959_v10 = vpop.f32.mrb[24].mxu0  ;;  %v10151_v12 = vadd.f32 %v7998_v9, %v2836_v2  ;;  %4161 = vmatmul.mubr.bf16.gmra.mrb[108].mxu0 %v9017_v19  ;;  %4523 = vmatpush1.bf16.msra.mxu1 %v9035_v34  ;;  %v7490_v2 = vcombine.low %v3520_v36, %v3520_v36 }
 0x138   : > { %v7960_v13 = vpop.f32.mrb[25].mxu0  ;;  %v7999_v18 = vpop.f32.mrb[24].mxu1  ;;  %4168 = vmatprep.mubr.bf16.mxu0 %v9021_v21  ;;  %4524 = vmatprep.subr.bf16.mxu1 %v9040_v42  ;;  %v9075_v21 = vld [vmem:[%s11435_s6 + $0x4] ss:$8 sps:$4 sm:$0xff]  }
 0x139   : > { %v7961_v15 = vadd.f32 %v7960_v13, %v7959_v10  ;;  %v7962_v17 = vpop.f32.mrb[26].mxu0  ;;  %v8000_v24 = vpop.f32.mrb[25].mxu1 }
 0x13a   : > { %v7963_v20 = vpop.f32.mrb[27].mxu0  ;;  %v8001_v25 = vadd.f32 %v8000_v24, %v7999_v18 }
 0x13b   : > { %v2841_v22 = vadd.f32 %v7961_v15, %v10080_v50  ;;  %v7964_v23 = vadd.f32 %v7963_v20, %v7962_v17  ;;  %v8002_v50 = vpop.f32.mrb[26].mxu1  ;;  %4525 = vmatpush1.bf16.msra.mxu1 %v9038_v48  ;;  %v9047_v17 = vld [vmem:[%s10173_s26 + $0x40] ss:$8 sps:$4 sm:$0xff]   ;;  %v9052_v20 = vld [vmem:[%s10173_s26 + $0x54] ss:$8 sps:$4 sm:$0xff]  }
 0x13c   : > { %v8003_v32 = vpop.f32.mrb[27].mxu1  ;;  %4526 = vmatprep.subr.bf16.mxu1 %v9043_v16  ;;  %v9064_v48 = vld [vmem:[%s10173_s26 + $0x94] ss:$8 sps:$4 sm:$0xff]  }
 0x13d   : > { %v2844_v28 = vadd.f32 %v7964_v23, %v10091_v1  ;;  %v10168_v30 = vadd.f32 %v8001_v25, %v2841_v22  ;;  %v3519_v1 = vld [vmem:[%s11434_s5 + $0xb0] sm:$0x11]  ;;  %4225 = vmatmul.mubr.bf16.gmra.mrb[116].mxu1 %v9020_v26  ;;  %v8004_v33 = vadd.f32 %v8003_v32, %v8002_v50  ;;  %v9033_v22 = vld [vmem:[%s11434_s5 + $0x88] ss:$28 sps:$4 sm:$0xff]  }
 0x13e   : > { %4232 = vmatprep.mubr.bf16.mxu1 %v9024_v27  ;;  %v7489_v38 = vcombine.high %v3519_v1, %v3519_v1  ;;  %v7488_v60 = vcombine.low %v3519_v1, %v3519_v1  ;;  %v9050_v23 = vld [vmem:[%s10173_s26 + $0x50] ss:$8 sps:$4 sm:$0xff]   ;;  %v9055_v25 = vld [vmem:[%s10173_s26 + $0x64] ss:$8 sps:$4 sm:$0xff]   ;;  %v9053_v27 = vld [vmem:[%s10173_s26 + $0x60] ss:$8 sps:$4 sm:$0xff]  }
 0x13f   : > { %v7965_v37 = vpop.f32.mrb[28].mxu0  ;;  %v10186_v39 = vadd.f32 %v8004_v33, %v2844_v28  ;;  %4169 = vmatmul.mubr.bf16.gmra.mrb[112].mxu0 %v9023_v31  ;;  %4527 = vmatpush1.bf16.msra.mxu1 %v9041_v58  ;;  %v9058_v1 = vld [vmem:[%s10173_s26 + $0x74] ss:$8 sps:$4 sm:$0xff]   ;;  %v9034_v32 = vld [vmem:[%s11434_s5 + $0xc0] ss:$0 sps:$4 sm:$0x11]  }
 0x140   : > { %v7966_v41 = vpop.f32.mrb[29].mxu0  ;;  %v8005_v5 = vpop.f32.mrb[28].mxu1  ;;  %4176 = vmatprep.mubr.bf16.mxu0 %v7489_v38  ;;  %4528 = vmatprep.subr.bf16.mxu1 %v9046_v59  ;;  %v9067_v58 = vld [vmem:[%s10173_s26 + $0xa4] ss:$8 sps:$4 sm:$0xff]  }
 0x141   : > { %v7967_v44 = vadd.f32 %v7966_v41, %v7965_v37  ;;  %v7968_v46 = vpop.f32.mrb[30].mxu0  ;;  %v8006_v47 = vpop.f32.mrb[29].mxu1 }
 0x142   : > { %v7969_v49 = vpop.f32.mrb[31].mxu0  ;;  %v8007_v51 = vadd.f32 %v8006_v47, %v8005_v5  ;;  %v8008_v53 = vpop.f32.mrb[30].mxu1  ;;  %v9056_v5 = vld [vmem:[%s10173_s26 + $0x70] ss:$8 sps:$4 sm:$0xff]   ;;  %v9061_v46 = vld [vmem:[%s10173_s26 + $0x84] ss:$8 sps:$4 sm:$0xff]  }
 0x143   : > { %v2849_v55 = vadd.f32 %v7967_v44, %v10099_v14  ;;  %v8009_v56 = vpop.f32.mrb[31].mxu1  ;;  %4529 = vmatpush1.bf16.msra.mxu1 %v9044_v0 }
 0x144   : > { %4530 = vmatprep.subr.bf16.mxu1 %v9049_v7  ;;  %v4343_v7 = vld [vmem:[%s10173_s26 + $0xc0] sm:$0x33] }
 0x145   : > { %v10195_v57 = vadd.f32 %v8007_v51, %v2849_v55  ;;  %4233 = vmatmul.mubr.bf16.gmra.mrb[120].mxu1 %v9026_v43 }
 0x146   : > { %4240 = vmatprep.mubr.bf16.mxu1 %v7491_v54  ;;  %v9062_v54 = vld [vmem:[%s10173_s26 + $0x90] ss:$8 sps:$4 sm:$0xff]  }
 0x147   : > { %v8027_v62 = vpop.f32.mrb[32].mxu0  ;;  %4177 = vmatmul.mubr.bf16.gmra.mrb[116].mxu0 %v7488_v60  ;;  %4531 = vmatpush1.bf16.msra.mxu1 %v9047_v17 }
 0x148   : > { %v8028_v14 = vpop.f32.mrb[33].mxu0  ;;  %v8067_v63 = vpop.f32.mrb[32].mxu1  ;;  %8482 = vmatprep.mubr.msk.bf16.mxu0 %vm4043_vm1, %v9031_v61  ;;  %4532 = vmatprep.subr.bf16.mxu1 %v9052_v20 }
 0x149   : > { %v8029_v3 = vadd.f32 %v8028_v14, %v8027_v62  ;;  %v8030_v29 = vpop.f32.mrb[34].mxu0  ;;  %v8068_v6 = vpop.f32.mrb[33].mxu1 }
 0x14a   : > { %v8031_v8 = vpop.f32.mrb[35].mxu0  ;;  %v8069_v9 = vadd.f32 %v8068_v6, %v8067_v63  ;;  %v8070_v40 = vpop.f32.mrb[34].mxu1 }
 0x14b   : > { %v2953_v10 = vadd.f32 %v8029_v3, %v10119_v45  ;;  %v8032_v11 = vadd.f32 %v8031_v8, %v8030_v29  ;;  %v8071_v13 = vpop.f32.mrb[35].mxu1  ;;  %v9032_v45 = vld [vmem:[%s11434_s5 + $0x50] ss:$28 sps:$4 sm:$0xff]   ;;  %4533 = vmatpush1.bf16.msra.mxu1 %v9050_v23  ;;  %v9065_v3 = vld [vmem:[%s10173_s26 + $0xa0] ss:$8 sps:$4 sm:$0xff]  }
 0x14c   : > { %v8072_v15 = vadd.f32 %v8071_v13, %v8070_v40  ;;  %4534 = vmatprep.subr.bf16.mxu1 %v9055_v25  ;;  %v9070_v29 = vld [vmem:[%s10173_s26 + $0xb4] ss:$8 sps:$4 sm:$0xff]  }
 0x14d   : > { %4241 = vmatmul.mubr.bf16.gmra.mrb[124].mxu1 %v7490_v2  ;;  %v2956_v18 = vadd.f32 %v8032_v11, %v10123_v52  ;;  %v10208_v19 = vadd.f32 %v8069_v9, %v2953_v10  ;;  %v9076_v25 = vld [vmem:[%s11435_s6 + $0x14] ss:$8 sps:$4 sm:$0xff]  }
 0x14e   : > { %7581 = vmatprep.mubr.msk.bf16.mxu1 %vm4502_vm2, %v9075_v21 }
 0x14f   : > { %v10220_v52 = vadd.f32 %v8072_v15, %v2956_v18  ;;  %v8033_v24 = vpop.f32.mrb[36].mxu0  ;;  %8483 = vmatmul.mubr.msk.bf16.vlgmr.msra.gmra.mrb[120].mxu0 %vm4043_vm1, %v9032_v45  ;;  %4535 = vmatpush1.bf16.msra.mxu1 %v9053_v27  ;;  %v7578_v15 = vcombine.low %v4343_v7, %v4343_v7 }
 0x150   : > { %v8034_v26 = vpop.f32.mrb[37].mxu0  ;;  %8486 = vmatprep.mubr.msk.bf16.mxu0 %vm4043_vm1, %v9033_v22  ;;  %v8073_v31 = vpop.f32.mrb[36].mxu1  ;;  %4536 = vmatprep.subr.bf16.mxu1 %v9058_v1 }
 0x151   : > { %v8035_v28 = vadd.f32 %v8034_v26, %v8033_v24  ;;  %v8036_v50 = vpop.f32.mrb[38].mxu0  ;;  %v8074_v34 = vpop.f32.mrb[37].mxu1  ;;  %v4517_v23 = vsel %vm4515_vm3, %v7578_v15, 0  ;;  %v9073_v24 = vld [vmem:[%s11435_s6] ss:$8 sps:$4 sm:$0xff]  }
 0x152   : > { %v8037_v33 = vpop.f32.mrb[39].mxu0  ;;  %v8075_v37 = vadd.f32 %v8074_v34, %v8073_v31  ;;  %v8076_v38 = vpop.f32.mrb[38].mxu1 }
 0x153   : > { %v2961_v35 = vadd.f32 %v8035_v28, %v10137_v4  ;;  %v8038_v36 = vadd.f32 %v8037_v33, %v8036_v50  ;;  %v8077_v41 = vpop.f32.mrb[39].mxu1  ;;  %v9059_v4 = vld [vmem:[%s10173_s26 + $0x80] ss:$8 sps:$4 sm:$0xff]   ;;  %4537 = vmatpush1.bf16.msra.mxu1 %v9056_v5 }
 0x154   : > { %v8078_v44 = vadd.f32 %v8077_v41, %v8076_v38  ;;  %4538 = vmatprep.subr.bf16.mxu1 %v9061_v46  ;;  %v9078_v38 = vld [vmem:[%s11435_s6 + $0x10] ss:$8 sps:$4 sm:$0xff]  }
 0x155   : > { %v2964_v42 = vadd.f32 %v8038_v36, %v10151_v12  ;;  %v10235_v43 = vadd.f32 %v8075_v37, %v2961_v35 }
 0x157   : > { %v10238_v47 = vadd.f32 %v8078_v44, %v2964_v42  ;;  %8487 = vmatmul.mubr.msk.bf16.gmra.mrb[124].mxu0 %vm4043_vm1, %v9034_v32  ;;  %v8039_v49 = vpop.f32.mrb[40].mxu0  ;;  %4539 = vmatpush1.bf16.msra.mxu1 %v9059_v4  ;;  %v9079_v42 = vld [vmem:[%s11435_s6 + $0x24] ss:$8 sps:$4 sm:$0xff]   ;;  %v4318_v4 = vld [vmem:[%s11435_s6 + $0x30] sm:$0x11] }
 0x158   : > { %v8040_v51 = vpop.f32.mrb[41].mxu0  ;;  %v8079_v16 = vpop.f32.mrb[40].mxu1  ;;  %4540 = vmatprep.subr.bf16.mxu1 %v9064_v48 }
 0x159   : > { %v8041_v53 = vadd.f32 %v8040_v51, %v8039_v49  ;;  %v8042_v12 = vpop.f32.mrb[42].mxu0  ;;  %v8080_v56 = vpop.f32.mrb[41].mxu1 }
 0x15a   : > { %v8043_v55 = vpop.f32.mrb[43].mxu0  ;;  %v8081_v61 = vadd.f32 %v8080_v56, %v8079_v16  ;;  %v8082_v62 = vpop.f32.mrb[42].mxu1 }
 0x15b   : > { %v2969_v59 = vadd.f32 %v8041_v53, %v10168_v30  ;;  %v8044_v60 = vadd.f32 %v8043_v55, %v8042_v12  ;;  %v8083_v14 = vpop.f32.mrb[43].mxu1  ;;  %4541 = vmatpush1.bf16.msra.mxu1 %v9062_v54  ;;  %v9068_v30 = vld [vmem:[%s10173_s26 + $0xb0] ss:$8 sps:$4 sm:$0xff]   ;;  %v9081_v12 = vld [vmem:[%s11435_s6 + $0x20] ss:$8 sps:$4 sm:$0xff]  }
 0x15c   : > { %v8084_v2 = vadd.f32 %v8083_v14, %v8082_v62  ;;  %4542 = vmatprep.subr.bf16.mxu1 %v9067_v58  ;;  %v7553_v62 = vcombine.high %v4318_v4, %v4318_v4 }
 0x15d   : > { %v2972_v63 = vadd.f32 %v8044_v60, %v10186_v39  ;;  %v10247_v0 = vadd.f32 %v8081_v61, %v2969_v59  ;;  %v7579_v39 = vcombine.high %v4343_v7, %v4343_v7 }
 0x15f   : > { %v10251_v6 = vadd.f32 %v8084_v2, %v2972_v63  ;;  %v8045_v8 = vpop.f32.mrb[44].mxu0  ;;  %4543 = vmatpush1.bf16.msra.mxu1 %v9065_v3 }
 0x160   : > { %v8046_v9 = vpop.f32.mrb[45].mxu0  ;;  %v8085_v40 = vpop.f32.mrb[44].mxu1  ;;  %4544 = vmatprep.subr.bf16.mxu1 %v9070_v29 }
 0x161   : > { %v8047_v10 = vadd.f32 %v8046_v9, %v8045_v8  ;;  %v8048_v11 = vpop.f32.mrb[46].mxu0  ;;  %v8086_v13 = vpop.f32.mrb[45].mxu1 }
 0x162   : > { %v8049_v17 = vpop.f32.mrb[47].mxu0  ;;  %v8087_v18 = vadd.f32 %v8086_v13, %v8085_v40  ;;  %v8088_v20 = vpop.f32.mrb[46].mxu1 }
 0x163   : > { %v2977_v45 = vadd.f32 %v8047_v10, %v10195_v57  ;;  %v8089_v21 = vpop.f32.mrb[47].mxu1  ;;  %4545 = vmatpush1.bf16.msra.mxu1 %v9068_v30  ;;  %v7552_v30 = vcombine.low %v4318_v4, %v4318_v4  ;;  %v9086_v17 = vld [vmem:[%s11437_s8 + $0x4] ss:$16 sps:$4 sm:$0xff]  }
 0x164   : > { %7580 = vmatprep.subr.msk.bf16.mxu1 %vm4515_vm3, %v7579_v39  ;;  %4809 = vmatprep.subr.bf16.mxu0 %v9086_v17 }
 0x165   : > { %v10256_v22 = vadd.f32 %v8087_v18, %v2977_v45  ;;  %v9084_v18 = vld [vmem:[%s11437_s8] ss:$16 sps:$4 sm:$0xff]  }
 0x166   : > { %4810 = vmatpush1.bf16.msra.mxu0 %v9084_v18  ;;  %v9087_v45 = vld [vmem:[%s11437_s8 + $0x20] ss:$16 sps:$4 sm:$0xff]  }
 0x167   : > { %v8107_v26 = vpop.f32.mrb[48].mxu0  ;;  %4547 = vmatpush1.bf16.msra.mxu1 %v4517_v23 }
 0x168   : > { %v8108_v27 = vpop.f32.mrb[49].mxu0  ;;  %v8147_v28 = vpop.f32.mrb[48].mxu1 }
 0x169   : > { %v8109_v50 = vadd.f32 %v8108_v27, %v8107_v26  ;;  %v8110_v57 = vpop.f32.mrb[50].mxu0  ;;  %v8148_v31 = vpop.f32.mrb[49].mxu1 }
 0x16a   : > { %v8111_v1 = vpop.f32.mrb[51].mxu0  ;;  %v8149_v32 = vadd.f32 %v8148_v31, %v8147_v28  ;;  %v8150_v33 = vpop.f32.mrb[50].mxu1  ;;  %4555 = vmatmul.mubr.bf16.vlgmr.msra.gmra.mrb[128].mxu1 %v9073_v24  ;;  %v10315_v31 = vld [vmem:[%s11437_s8 + $0xc] ss:$16 sps:$4 sm:$0xff]  }
 0x16b   : > { %v3081_v34 = vadd.f32 %v8109_v50, %v10208_v19  ;;  %v8112_v35 = vadd.f32 %v8111_v1, %v8110_v57  ;;  %v8151_v36 = vpop.f32.mrb[51].mxu1  ;;  %7582 = vmatprep.mubr.msk.bf16.mxu1 %vm4502_vm2, %v9076_v25  ;;  %v9092_v57 = vld [vmem:[%s11437_s8 + $0x44] ss:$16 sps:$4 sm:$0xff]   ;;  %8490 = vmatprep.subr.bf16.mxu1 %v10315_v31 }
 0x16c   : > { %v8152_v37 = vadd.f32 %v8151_v36, %v8150_v33  ;;  %v9090_v33 = vld [vmem:[%s11437_s8 + $0x40] ss:$16 sps:$4 sm:$0xff]   ;;  %v10336_v36 = vld [vmem:[%s11437_s8 + $0x2c] ss:$16 sps:$4 sm:$0xff]  }
 0x16d   : > { %v3084_v41 = vadd.f32 %v8112_v35, %v10220_v52  ;;  %v10270_v5 = vadd.f32 %v8149_v32, %v3081_v34  ;;  %v10324_v34 = vld [vmem:[%s11437_s8 + $0x8] ss:$16 sps:$4 sm:$0xff]  }
 0x16e   : > { %8498 = vmatpush1.bf16.msra.mxu1 %v10324_v34 }
 0x16f   : > { %v10275_v44 = vadd.f32 %v8152_v37, %v3084_v41  ;;  %v8113_v19 = vpop.f32.mrb[52].mxu0  ;;  %v10344_v41 = vld [vmem:[%s11437_s8 + $0x28] ss:$16 sps:$4 sm:$0xff]   ;;  %8491 = vmatprep.subr.bf16.mxu1 %v10336_v36 }
 0x170   : > { %v8114_v46 = vpop.f32.mrb[53].mxu0  ;;  %v8153_v51 = vpop.f32.mrb[52].mxu1 }
 0x171   : > { %v8115_v48 = vadd.f32 %v8114_v46, %v8113_v19  ;;  %v8116_v49 = vpop.f32.mrb[54].mxu0  ;;  %v8154_v53 = vpop.f32.mrb[53].mxu1 }
 0x172   : > { %4565 = vmatmul.mubr.bf16.gmra.mrb[132].mxu1 %v9078_v38  ;;  %v8117_v52 = vpop.f32.mrb[55].mxu0  ;;  %v8155_v55 = vadd.f32 %v8154_v53, %v8153_v51  ;;  %v8156_v56 = vpop.f32.mrb[54].mxu1  ;;  %v9096_v38 = vld [vmem:[%s11437_s8 + $0x60] ss:$16 sps:$4 sm:$0xff]   ;;  %v9104_v51 = vld [vmem:[%s11437_s8 + $0x84] ss:$16 sps:$4 sm:$0xff]  }
 0x173   : > { %7583 = vmatprep.mubr.msk.bf16.mxu1 %vm4502_vm2, %v9079_v42  ;;  %v3089_v16 = vadd.f32 %v8115_v48, %v10235_v43  ;;  %v8118_v54 = vadd.f32 %v8117_v52, %v8116_v49  ;;  %v8157_v58 = vpop.f32.mrb[55].mxu1  ;;  %8499 = vmatpush1.bf16.msra.mxu1 %v10344_v41  ;;  %v10354_v52 = vld [vmem:[%s11437_s8 + $0x4c] ss:$16 sps:$4 sm:$0xff]  }
 0x174   : > { %v8158_v61 = vadd.f32 %v8157_v58, %v8156_v56  ;;  %v10363_v56 = vld [vmem:[%s11437_s8 + $0x48] ss:$16 sps:$4 sm:$0xff]   ;;  %8492 = vmatprep.subr.bf16.mxu1 %v10354_v52 }
 0x175   : > { %v3092_v59 = vadd.f32 %v8118_v54, %v10238_v47  ;;  %v10286_v60 = vadd.f32 %v8155_v55, %v3089_v16  ;;  %v9102_v55 = vld [vmem:[%s11437_s8 + $0x80] ss:$16 sps:$4 sm:$0xff]  }
 0x177   : > { %v10288_v14 = vadd.f32 %v8158_v61, %v3092_v59  ;;  %v8119_v63 = vpop.f32.mrb[56].mxu0  ;;  %8500 = vmatpush1.bf16.msra.mxu1 %v10363_v56 }
 0x178   : > { %v8120_v2 = vpop.f32.mrb[57].mxu0  ;;  %v8159_v3 = vpop.f32.mrb[56].mxu1 }
 0x179   : > { %v8121_v29 = vadd.f32 %v8120_v2, %v8119_v63  ;;  %v8122_v43 = vpop.f32.mrb[58].mxu0  ;;  %v8160_v7 = vpop.f32.mrb[57].mxu1  ;;  %v10376_v63 = vld [vmem:[%s11437_s8 + $0x6c] ss:$16 sps:$4 sm:$0xff]  }
 0x17a   : > { %4575 = vmatmul.mubr.bf16.gmra.mrb[136].mxu1 %v9081_v12  ;;  %v8123_v8 = vpop.f32.mrb[59].mxu0  ;;  %v8161_v9 = vadd.f32 %v8160_v7, %v8159_v3  ;;  %v8162_v40 = vpop.f32.mrb[58].mxu1  ;;  %v10386_v3 = vld [vmem:[%s11437_s8 + $0x68] ss:$16 sps:$4 sm:$0xff]   ;;  %8493 = vmatprep.subr.bf16.mxu1 %v10376_v63 }
 0x17b   : > { %7584 = vmatprep.mubr.msk.bf16.mxu1 %vm4502_vm2, %v7553_v62  ;;  %v3097_v47 = vadd.f32 %v8121_v29, %v10247_v0  ;;  %v8124_v10 = vadd.f32 %v8123_v8, %v8122_v43  ;;  %v8163_v11 = vpop.f32.mrb[59].mxu1  ;;  %v9089_v0 = vld [vmem:[%s11437_s8 + $0x24] ss:$16 sps:$4 sm:$0xff]   ;;  %8501 = vmatpush1.bf16.msra.mxu1 %v10386_v3  ;;  %v9114_v29 = vld [vmem:[%s11437_s8 + $0xc0] ss:$16 sps:$4 sm:$0xff]  }
 0x17c   : > { %v8164_v13 = vadd.f32 %v8163_v11, %v8162_v40  ;;  %4811 = vmatprep.subr.bf16.mxu0 %v9089_v0  ;;  %v9110_v62 = vld [vmem:[%s11437_s8 + $0xa4] ss:$16 sps:$4 sm:$0xff]   ;;  %v10399_v7 = vld [vmem:[%s11437_s8 + $0x88] ss:$16 sps:$4 sm:$0xff]   ;;  %v10404_v8 = vld [vmem:[%s11437_s8 + $0x8c] ss:$16 sps:$4 sm:$0xff]  }
 0x17d   : > { %v3100_v39 = vadd.f32 %v8124_v10, %v10251_v6  ;;  %v10293_v15 = vadd.f32 %v8161_v9, %v3097_v47  ;;  %4812 = vmatpush1.bf16.msra.mxu0 %v9087_v45  ;;  %v9116_v43 = vld [vmem:[%s11437_s8 + $0xc4] ss:$16 sps:$4 sm:$0xff]   ;;  %8494 = vmatprep.subr.bf16.mxu1 %v10404_v8 }
 0x17e   : > { %4813 = vmatprep.subr.bf16.mxu0 %v9092_v57  ;;  %v9122_v45 = vld [vmem:[%s11437_s8 + $0xe4] ss:$16 sps:$4 sm:$0xff]  }
 0x17f   : > { %v10301_v20 = vadd.f32 %v8164_v13, %v3100_v39  ;;  %v8125_v6 = vpop.f32.mrb[60].mxu0  ;;  %8502 = vmatpush1.bf16.msra.mxu1 %v10399_v7 }
 0x180   : > { %v8126_v21 = vpop.f32.mrb[61].mxu0  ;;  %v8165_v23 = vpop.f32.mrb[60].mxu1 }
 0x181   : > { %v8127_v24 = vadd.f32 %v8126_v21, %v8125_v6  ;;  %v8128_v25 = vpop.f32.mrb[62].mxu0  ;;  %v8166_v26 = vpop.f32.mrb[61].mxu1  ;;  %4814 = vmatpush1.bf16.msra.mxu0 %v9090_v33  ;;  %v10415_v21 = vld [vmem:[%s11437_s8 + $0xac] ss:$16 sps:$4 sm:$0xff]  }
 0x182   : > { %4585 = vmatmul.mubr.bf16.gmra.mrb[140].mxu1 %v7552_v30  ;;  %v8129_v27 = vpop.f32.mrb[63].mxu0  ;;  %v8167_v28 = vadd.f32 %v8166_v26, %v8165_v23  ;;  %v8168_v50 = vpop.f32.mrb[62].mxu1  ;;  %8495 = vmatprep.subr.bf16.mxu1 %v10415_v21 }
 0x183   : > { %v3105_v1 = vadd.f32 %v8127_v24, %v10256_v22  ;;  %v8169_v32 = vpop.f32.mrb[63].mxu1  ;;  %v9098_v22 = vld [vmem:[%s11437_s8 + $0x64] ss:$16 sps:$4 sm:$0xff]   ;;  %v9120_v24 = vld [vmem:[%s11437_s8 + $0xe0] ss:$16 sps:$4 sm:$0xff]   ;;  %v9474_v50 = vmov 0  }
 0x184   : > { %4815 = vmatprep.subr.bf16.mxu0 %v9098_v22  ;;  %4841 = vmatprep.mubr.bf16.mxu0 %v9474_v50  ;;  %v10450_v22 = vld [vmem:[%s11437_s8 + $0xec] ss:$16 sps:$4 sm:$0xff]  }
 0x185   : > { %v10327_v35 = vadd.f32 %v8167_v28, %v3105_v1  ;;  %4816 = vmatpush1.bf16.msra.mxu0 %v9096_v38  ;;  %v10436_v28 = vld [vmem:[%s11437_s8 + $0xc8] ss:$16 sps:$4 sm:$0xff]   ;;  %4932 = vmatprep.mubr.bf16.mxu1 %v9474_v50 }
 0x186   : > { %4817 = vmatprep.subr.bf16.mxu0 %v9104_v51 }
 0x187   : > { %v8187_v37 = vpop.f32.mrb[64].mxu0 }
 0x188   : > { %v8188_v42 = vpop.f32.mrb[65].mxu0  ;;  %v8227_v4 = vpop.f32.mrb[64].mxu1 }
 0x189   : > { %v8189_v19 = vadd.f32 %v8188_v42, %v8187_v37  ;;  %v8190_v46 = vpop.f32.mrb[66].mxu0  ;;  %v8228_v49 = vpop.f32.mrb[65].mxu1  ;;  %4818 = vmatpush1.bf16.msra.mxu0 %v9102_v55  ;;  %v10455_v42 = vld [vmem:[%s11437_s8 + $0xe8] ss:$16 sps:$4 sm:$0xff]  }
 0x18a   : > { %v8191_v48 = vpop.f32.mrb[67].mxu0  ;;  %v8229_v16 = vadd.f32 %v8228_v49, %v8227_v4  ;;  %v8230_v54 = vpop.f32.mrb[66].mxu1  ;;  %4819 = vmatprep.subr.bf16.mxu0 %v9110_v62 }
 0x18b   : > { %v3209_v53 = vadd.f32 %v8189_v19, %v10270_v5  ;;  %v8192_v12 = vadd.f32 %v8191_v48, %v8190_v46  ;;  %v8231_v58 = vpop.f32.mrb[67].mxu1 }
 0x18c   : > { %v8232_v5 = vadd.f32 %v8231_v58, %v8230_v54 }
 0x18d   : > { %v3212_v59 = vadd.f32 %v8192_v12, %v10275_v44  ;;  %v10367_v61 = vadd.f32 %v8229_v16, %v3209_v53  ;;  %v9108_v44 = vld [vmem:[%s11437_s8 + $0xa0] ss:$16 sps:$4 sm:$0xff]   ;;  %v9134_v16 = vld [vmem:[%s11436_s7 + $0xc] ss:$16 sps:$4 sm:$0xff]  }
 0x18e   : > { %4820 = vmatpush1.bf16.msra.mxu0 %v9108_v44 }
 0x18f   : > { %v10378_v2 = vadd.f32 %v8232_v5, %v3212_v59  ;;  %v8193_v30 = vpop.f32.mrb[68].mxu0  ;;  %4821 = vmatprep.subr.bf16.mxu0 %v9116_v43 }
 0x190   : > { %v8194_v9 = vpop.f32.mrb[69].mxu0  ;;  %v8233_v40 = vpop.f32.mrb[68].mxu1 }
 0x191   : > { %v8195_v47 = vadd.f32 %v8194_v9, %v8193_v30  ;;  %v8196_v10 = vpop.f32.mrb[70].mxu0  ;;  %v8234_v11 = vpop.f32.mrb[69].mxu1 }
 0x192   : > { %v8197_v13 = vpop.f32.mrb[71].mxu0  ;;  %v8235_v39 = vadd.f32 %v8234_v11, %v8233_v40  ;;  %v8236_v17 = vpop.f32.mrb[70].mxu1  ;;  %4822 = vmatpush1.bf16.msra.mxu0 %v9114_v29 }
 0x193   : > { %v3217_v18 = vadd.f32 %v8195_v47, %v10286_v60  ;;  %v8198_v0 = vadd.f32 %v8197_v13, %v8196_v10  ;;  %v8237_v6 = vpop.f32.mrb[71].mxu1  ;;  %v10423_v60 = vld [vmem:[%s11437_s8 + $0xa8] ss:$16 sps:$4 sm:$0xff]   ;;  %4823 = vmatprep.subr.bf16.mxu0 %v9122_v45 }
 0x194   : > { %v8238_v23 = vadd.f32 %v8237_v6, %v8236_v17  ;;  %8503 = vmatpush1.bf16.msra.mxu1 %v10423_v60 }
 0x195   : > { %v3220_v25 = vadd.f32 %v8198_v0, %v10288_v14  ;;  %v10426_v26 = vadd.f32 %v8235_v39, %v3217_v18  ;;  %v10441_v14 = vld [vmem:[%s11437_s8 + $0xcc] ss:$16 sps:$4 sm:$0xff]  }
 0x196   : > { %4824 = vmatpush1.bf16.msra.mxu0 %v9120_v24  ;;  %8496 = vmatprep.subr.bf16.mxu1 %v10441_v14 }
 0x197   : > { %v10430_v27 = vadd.f32 %v8238_v23, %v3220_v25  ;;  %4880 = vmatprep.subr.bf16.mxu0 %v10315_v31  ;;  %v8199_v57 = vpop.f32.mrb[72].mxu0 }
 0x198   : > { %v8200_v1 = vpop.f32.mrb[73].mxu0  ;;  %8504 = vmatpush1.bf16.msra.mxu1 %v10436_v28  ;;  %v8239_v33 = vpop.f32.mrb[72].mxu1 }
 0x199   : > { %v8201_v31 = vadd.f32 %v8200_v1, %v8199_v57  ;;  %v8202_v32 = vpop.f32.mrb[74].mxu0  ;;  %v8240_v38 = vpop.f32.mrb[73].mxu1  ;;  %8497 = vmatprep.subr.bf16.mxu1 %v10450_v22 }
 0x19a   : > { %v8203_v37 = vpop.f32.mrb[75].mxu0  ;;  %v8241_v4 = vadd.f32 %v8240_v38, %v8239_v33  ;;  %v8242_v48 = vpop.f32.mrb[74].mxu1 }
 0x19b   : > { %v3225_v19 = vadd.f32 %v8201_v31, %v10293_v15  ;;  %v8204_v46 = vadd.f32 %v8203_v37, %v8202_v32  ;;  %v8243_v49 = vpop.f32.mrb[75].mxu1 }
 0x19c   : > { %8505 = vmatpush1.bf16.msra.mxu1 %v10455_v42  ;;  %v8244_v12 = vadd.f32 %v8243_v49, %v8242_v48 }
 0x19d   : > { %v3228_v51 = vadd.f32 %v8204_v46, %v10301_v20  ;;  %v3289_v53 = vadd.f32 %v8241_v4, %v3225_v19  ;;  %5114 = vmatprep.subr.bf16.mxu1 %v9134_v16 }
 0x19f   : > { %v3292_v54 = vadd.f32 %v8244_v12, %v3228_v51  ;;  %v8205_v55 = vpop.f32.mrb[76].mxu0 }
 0x1a0   : > { %v8206_v15 = vpop.f32.mrb[77].mxu0  ;;  %v8245_v58 = vpop.f32.mrb[76].mxu1 }
 0x1a1   : > { %v8207_v59 = vadd.f32 %v8206_v15, %v8205_v55  ;;  %v8208_v5 = vpop.f32.mrb[78].mxu0  ;;  %v8246_v62 = vpop.f32.mrb[77].mxu1 }
 0x1a2   : > { %v8209_v44 = vpop.f32.mrb[79].mxu0  ;;  %v8247_v29 = vadd.f32 %v8246_v62, %v8245_v58  ;;  %v8248_v43 = vpop.f32.mrb[78].mxu1 }
 0x1a3   : > { %v3233_v30 = vadd.f32 %v8207_v59, %v10327_v35  ;;  %v8249_v20 = vpop.f32.mrb[79].mxu1 }
 0x1a5   : > { %v3297_v9 = vadd.f32 %v8247_v29, %v3233_v30 }
 0x1a7   : > { %v8267_v40 = vpop.f32.mrb[80].mxu0 }
 0x1a8   : > { %v8268_v47 = vpop.f32.mrb[81].mxu0  ;;  %v8307_v10 = vpop.f32.mrb[80].mxu1 }
 0x1a9   : > { %v8269_v11 = vadd.f32 %v8268_v47, %v8267_v40  ;;  %v8270_v13 = vpop.f32.mrb[82].mxu0  ;;  %v8308_v39 = vpop.f32.mrb[81].mxu1 }
 0x1aa   : > { %v8271_v17 = vpop.f32.mrb[83].mxu0  ;;  %v8309_v18 = vadd.f32 %v8308_v39, %v8307_v10  ;;  %v8310_v0 = vpop.f32.mrb[82].mxu1 }
 0x1ab   : > { %v3337_v6 = vadd.f32 %v8269_v11, %v10367_v61  ;;  %v8272_v45 = vadd.f32 %v8271_v17, %v8270_v13  ;;  %v8311_v23 = vpop.f32.mrb[83].mxu1 }
 0x1ac   : > { %v8312_v24 = vadd.f32 %v8311_v23, %v8310_v0 }
 0x1ad   : > { %v3340_v25 = vadd.f32 %v8272_v45, %v10378_v2  ;;  %v3401_v57 = vadd.f32 %v8309_v18, %v3337_v6 }
 0x1af   : > { %v8273_v35 = vpop.f32.mrb[84].mxu0  ;;  %v3404_v1 = vadd.f32 %v8312_v24, %v3340_v25 }
 0x1b0   : > { %v8274_v31 = vpop.f32.mrb[85].mxu0  ;;  %v8313_v32 = vpop.f32.mrb[84].mxu1 }
 0x1b1   : > { %v8275_v33 = vadd.f32 %v8274_v31, %v8273_v35  ;;  %v8276_v37 = vpop.f32.mrb[86].mxu0  ;;  %v8314_v38 = vpop.f32.mrb[85].mxu1 }
 0x1b2   : > { %v8277_v19 = vpop.f32.mrb[87].mxu0  ;;  %v8315_v46 = vadd.f32 %v8314_v38, %v8313_v32  ;;  %v8316_v4 = vpop.f32.mrb[86].mxu1 }
 0x1b3   : > { %v3345_v48 = vadd.f32 %v8275_v33, %v10426_v26  ;;  %v8278_v49 = vadd.f32 %v8277_v19, %v8276_v37  ;;  %v8317_v61 = vpop.f32.mrb[87].mxu1 }
 0x1b4   : > { %v8318_v51 = vadd.f32 %v8317_v61, %v8316_v4 }
 0x1b5   : > { %v3348_v12 = vadd.f32 %v8278_v49, %v10430_v27  ;;  %v3409_v16 = vadd.f32 %v8315_v46, %v3345_v48 }
 0x1b7   : > { %v8279_v2 = vpop.f32.mrb[88].mxu0  ;;  %v3412_v55 = vadd.f32 %v8318_v51, %v3348_v12 }
 0x1b8   : > { %v8280_v15 = vpop.f32.mrb[89].mxu0  ;;  %v8319_v58 = vpop.f32.mrb[88].mxu1 }
 0x1b9   : > { %v8281_v59 = vadd.f32 %v8280_v15, %v8279_v2  ;;  %v8282_v5 = vpop.f32.mrb[90].mxu0  ;;  %v8320_v62 = vpop.f32.mrb[89].mxu1 }
 0x1ba   : > { %v8283_v44 = vpop.f32.mrb[91].mxu0  ;;  %v8321_v29 = vadd.f32 %v8320_v62, %v8319_v58  ;;  %v8322_v43 = vpop.f32.mrb[90].mxu1 }
 0x1bb   : > { %v3353_v30 = vadd.f32 %v8281_v59, %v3289_v53  ;;  %v8284_v20 = vadd.f32 %v8283_v44, %v8282_v5  ;;  %v8323_v40 = vpop.f32.mrb[91].mxu1 }
 0x1bc   : > { %v8324_v26 = vadd.f32 %v8323_v40, %v8322_v43 }
 0x1bd   : > { %v3356_v47 = vadd.f32 %v8284_v20, %v3292_v54  ;;  %v3417_v10 = vadd.f32 %v8321_v29, %v3353_v30 }
 0x1bf   : > { %v8285_v11 = vpop.f32.mrb[92].mxu0  ;;  %v3420_v13 = vadd.f32 %v8324_v26, %v3356_v47 }
 0x1c0   : > { %v8286_v27 = vpop.f32.mrb[93].mxu0  ;;  %v8325_v39 = vpop.f32.mrb[92].mxu1 }
 0x1c1   : > { %v8287_v17 = vadd.f32 %v8286_v27, %v8285_v11  ;;  %v8288_v18 = vpop.f32.mrb[94].mxu0  ;;  %v8326_v0 = vpop.f32.mrb[93].mxu1 }
 0x1c2   : > { %v8289_v6 = vpop.f32.mrb[95].mxu0  ;;  %v8327_v45 = vadd.f32 %v8326_v0, %v8325_v39  ;;  %v8328_v23 = vpop.f32.mrb[94].mxu1 }
 0x1c3   : > { %v3361_v24 = vadd.f32 %v8287_v17, %v3297_v9  ;;  %v8329_v25 = vpop.f32.mrb[95].mxu1 }
 0x1c5   : > { %v3425_v35 = vadd.f32 %v8327_v45, %v3361_v24 }
 0x1c7   : > { %v8474_v31 = vpop.f32.mrb[96].mxu0 }
 0x1c8   : > { %v3473_v53 = vadd.f32 %v8474_v31, %v3409_v16  ;;  %v3464_v32 = vpop.f32.mrb[97].mxu0  ;;  %v8355_v54 = vpop.f32.mrb[96].mxu1 }
 0x1c9   : > { %v3465_v33 = vadd.f32 %v3464_v32, %v3401_v57  ;;  %v8475_v37 = vpop.f32.mrb[98].mxu0  ;;  %v8356_v46 = vpop.f32.mrb[97].mxu1 }
 0x1ca   : > { %v3476_v38 = vadd.f32 %v8475_v37, %v3412_v55  ;;  %v3467_v19 = vpop.f32.mrb[99].mxu0  ;;  %v8357_v48 = vadd.f32 %v8356_v46, %v8355_v54  ;;  %v8358_v49 = vpop.f32.mrb[98].mxu1 }
 0x1cb   : > { %v3468_v4 = vadd.f32 %v3467_v19, %v3404_v1  ;;  %v8359_v51 = vpop.f32.mrb[99].mxu1 }
 0x1cc   : > { %v10469_v61 = vpack.c.bf16 %v3476_v38, %v3473_v53  ;;  %v8360_v9 = vadd.f32 %v8359_v51, %v8358_v49 }
 0x1cd   : > { %v10471_v12 = vpack.c.bf16 %v3468_v4, %v3465_v33 }
 0x1dd   : > { %v8478_v2 = vpop.f32.mrb[100].mxu0 }
 0x1de   : > { %v10473_v15 = vadd.f32 %v8478_v2, %v3425_v35  ;;  %v3480_v16 = vpop.f32.mrb[101].mxu0 }
 0x1df   : > { %v3481_v58 = vadd.f32 %v3480_v16, %v3417_v10  ;;  %v8479_v57 = vpop.f32.mrb[102].mxu0 }
 0x1e0   : > { %v3483_v59 = vpop.f32.mrb[103].mxu0  ;;  %v8361_v5 = vpop.f32.mrb[100].mxu1 }
 0x1e1   : > { %v3484_v55 = vadd.f32 %v3483_v59, %v3420_v13  ;;  %v8362_v62 = vpop.f32.mrb[101].mxu1 }
 0x1e2   : > { %v8363_v44 = vadd.f32 %v8362_v62, %v8361_v5  ;;  %v8364_v1 = vpop.f32.mrb[102].mxu1 }
 0x1e3   : > { %v10475_v29 = vpack.c.bf16 %v3484_v55, %v3481_v58  ;;  %v8365_v43 = vpop.f32.mrb[103].mxu1 }
 0x1e4   : > { %v8366_v30 = vadd.f32 %v8365_v43, %v8364_v1 }
 0x1e8   : > { %v8367_v20 = vpop.f32.mrb[104].mxu1 }
 0x1e9   : > { %v8368_v40 = vpop.f32.mrb[105].mxu1 }
 0x1ea   : > { %v8369_v26 = vadd.f32 %v8368_v40, %v8367_v20  ;;  %v8370_v47 = vpop.f32.mrb[106].mxu1 }
 0x1eb   : > { %v8371_v11 = vpop.f32.mrb[107].mxu1 }
 0x1ec   : > { %v8372_v27 = vadd.f32 %v8371_v11, %v8370_v47 }
 0x1f5   : > { %v8395_v6 = vpop.f32.mrb[104].mxu0 }
 0x1f6   : > { %v8396_v13 = vpop.f32.mrb[105].mxu0 }
 0x1f7   : > { %v8397_v45 = vadd.f32 %v8396_v13, %v8395_v6  ;;  %v8398_v23 = vpop.f32.mrb[106].mxu0 }
 0x1f8   : > { %v8399_v25 = vpop.f32.mrb[107].mxu0 }
 0x1f9   : > { %v4155_v35 = vadd.f32 %v8397_v45, %v8357_v48  ;;  %v8400_v31 = vadd.f32 %v8399_v25, %v8398_v23 }
 0x1fb   : > { %v4158_v37 = vadd.f32 %v8400_v31, %v8360_v9 }
 0x200   : > { %v8373_v39 = vpop.f32.mrb[108].mxu1 }
 0x201   : > { %v8374_v17 = vpop.f32.mrb[109].mxu1 }
 0x202   : > { %v8375_v10 = vadd.f32 %v8374_v17, %v8373_v39  ;;  %v8376_v18 = vpop.f32.mrb[110].mxu1 }
 0x203   : > { %v8377_v0 = vpop.f32.mrb[111].mxu1 }
 0x208   : > { %v8435_v24 = vpop.f32.mrb[112].mxu1 }
 0x209   : > { %v8436_v53 = vpop.f32.mrb[113].mxu1 }
 0x20a   : > { %v8437_v32 = vadd.f32 %v8436_v53, %v8435_v24  ;;  %v8438_v33 = vpop.f32.mrb[114].mxu1  ;;  %v8401_v46 = vpop.f32.mrb[108].mxu0 }
 0x20b   : > { %v8439_v54 = vpop.f32.mrb[115].mxu1  ;;  %v8402_v4 = vpop.f32.mrb[109].mxu0 }
 0x20c   : > { %v8440_v38 = vadd.f32 %v8439_v54, %v8438_v33  ;;  %v4219_v19 = vadd.f32 %v8437_v32, %v4155_v35  ;;  %v8403_v51 = vadd.f32 %v8402_v4, %v8401_v46  ;;  %v8404_v2 = vpop.f32.mrb[110].mxu0 }
 0x20d   : > { %v8405_v58 = vpop.f32.mrb[111].mxu0 }
 0x20e   : > { %v4222_v49 = vadd.f32 %v8440_v38, %v4158_v37  ;;  %v4163_v57 = vadd.f32 %v8403_v51, %v8363_v44  ;;  %v8406_v59 = vadd.f32 %v8405_v58, %v8404_v2 }
 0x210   : > { %v8441_v16 = vpop.f32.mrb[116].mxu1  ;;  %v4166_v62 = vadd.f32 %v8406_v59, %v8366_v30 }
 0x211   : > { %v8442_v5 = vpop.f32.mrb[117].mxu1 }
 0x212   : > { %v8443_v55 = vadd.f32 %v8442_v5, %v8441_v16  ;;  %v8444_v48 = vpop.f32.mrb[118].mxu1  ;;  %v8407_v9 = vpop.f32.mrb[112].mxu0 }
 0x213   : > { %v8445_v1 = vpop.f32.mrb[119].mxu1  ;;  %v8408_v40 = vpop.f32.mrb[113].mxu0 }
 0x214   : > { %v8446_v43 = vadd.f32 %v8445_v1, %v8444_v48  ;;  %v4227_v20 = vadd.f32 %v8443_v55, %v4163_v57  ;;  %v8409_v11 = vadd.f32 %v8408_v40, %v8407_v9  ;;  %v8410_v39 = vpop.f32.mrb[114].mxu0 }
 0x215   : > { %v8411_v18 = vpop.f32.mrb[115].mxu0 }
 0x216   : > { %v4230_v47 = vadd.f32 %v8446_v43, %v4166_v62  ;;  %v4171_v0 = vadd.f32 %v8409_v11, %v8369_v26  ;;  %v8412_v6 = vadd.f32 %v8411_v18, %v8410_v39 }
 0x218   : > { %v8447_v17 = vpop.f32.mrb[120].mxu1  ;;  %v4174_v23 = vadd.f32 %v8412_v6, %v8372_v27 }
 0x219   : > { %v8448_v13 = vpop.f32.mrb[121].mxu1 }
 0x21a   : > { %v8449_v45 = vadd.f32 %v8448_v13, %v8447_v17  ;;  %v8450_v44 = vpop.f32.mrb[122].mxu1  ;;  %v8413_v30 = vpop.f32.mrb[116].mxu0  ;;  %v9155_v17 = vld [vmem:[%s11438_s9 + $0x4c] ss:$16 sps:$4 sm:$0xff]   ;;  %v9153_v13 = vld [vmem:[%s11438_s9 + $0x48] ss:$16 sps:$4 sm:$0xff]  }
 0x21b   : > { %v8451_v24 = vpop.f32.mrb[123].mxu1  ;;  %v8414_v31 = vpop.f32.mrb[117].mxu0 }
 0x21c   : > { %v8452_v25 = vadd.f32 %v8451_v24, %v8450_v44  ;;  %v4235_v35 = vadd.f32 %v8449_v45, %v4171_v0  ;;  %v8415_v32 = vadd.f32 %v8414_v31, %v8413_v30  ;;  %v8416_v33 = vpop.f32.mrb[118].mxu0  ;;  %v9158_v44 = vld [vmem:[%s11436_s7 + $0x24] ss:$16 sps:$4 sm:$0xff]   ;;  %v9159_v24 = vld [vmem:[%s11438_s9 + $0x68] ss:$16 sps:$4 sm:$0xff]  }
 0x21d   : > { %v8417_v54 = vpop.f32.mrb[119].mxu0  ;;  %v9167_v30 = vld [vmem:[%s11438_s9 + $0x8c] ss:$16 sps:$4 sm:$0xff]  }
 0x21e   : > { %v4238_v53 = vadd.f32 %v8452_v25, %v4174_v23  ;;  %v4179_v38 = vadd.f32 %v8415_v32, %v8375_v10  ;;  %v9156_v23 = vld [vmem:[%s11436_s7 + $0x20] ss:$16 sps:$4 sm:$0xff]   ;;  %v9165_v54 = vld [vmem:[%s11438_s9 + $0x88] ss:$16 sps:$4 sm:$0xff]  }
 0x220   : > { %v8453_v37 = vpop.f32.mrb[124].mxu1 }
 0x221   : > { %v8454_v46 = vpop.f32.mrb[125].mxu1 }
 0x222   : > { %v8455_v4 = vadd.f32 %v8454_v46, %v8453_v37  ;;  %v8456_v51 = vpop.f32.mrb[126].mxu1  ;;  %v8484_v16 = vpop.f32.mrb[120].mxu0  ;;  %v9162_v37 = vld [vmem:[%s11436_s7 + $0x40] ss:$16 sps:$4 sm:$0xff]   ;;  %v9170_v46 = vld [vmem:[%s11436_s7 + $0x64] ss:$16 sps:$4 sm:$0xff]  }
 0x223   : > { %v8457_v26 = vpop.f32.mrb[127].mxu1  ;;  %v4291_v58 = vadd.f32 %v8484_v16, %v4227_v20  ;;  %v4282_v57 = vpop.f32.mrb[121].mxu0  ;;  %v9168_v51 = vld [vmem:[%s11436_s7 + $0x60] ss:$16 sps:$4 sm:$0xff]   ;;  %v9176_v16 = vld [vmem:[%s11438_s9 + $0x4] ss:$16 sps:$4 sm:$0xff]  }
 0x224   : > { %v4243_v2 = vadd.f32 %v8455_v4, %v4179_v38  ;;  %v4283_v27 = vadd.f32 %v4282_v57, %v4219_v19  ;;  %v8485_v59 = vpop.f32.mrb[122].mxu0  ;;  %v9173_v4 = vld [vmem:[%s11438_s9 + $0xac] ss:$16 sps:$4 sm:$0xff]   ;;  %v9171_v26 = vld [vmem:[%s11438_s9 + $0xa8] ss:$16 sps:$4 sm:$0xff]  }
 0x225   : > { %v4294_v5 = vadd.f32 %v8485_v59, %v4230_v47  ;;  %v4285_v55 = vpop.f32.mrb[123].mxu0 }
 0x226   : > { %v4286_v48 = vadd.f32 %v4285_v55, %v4222_v49  ;;  %v9132_v49 = vld [vmem:[%s11436_s7 + $0x8] ss:$16 sps:$4 sm:$0xff]   ;;  %v9174_v55 = vld [vmem:[%s11438_s9] ss:$16 sps:$4 sm:$0xff]  }
 0x227   : > { %v10477_v62 = vpack.c.bf16 %v4294_v5, %v4291_v58  ;;  %v9179_v58 = vld [vmem:[%s11438_s9 + $0xcc] ss:$16 sps:$4 sm:$0xff]  }
 0x228   : > { %v10479_v1 = vpack.c.bf16 %v4286_v48, %v4283_v27  ;;  %v9177_v48 = vld [vmem:[%s11438_s9 + $0xc8] ss:$16 sps:$4 sm:$0xff]  }
 0x22a   : > { %v8488_v43 = vpop.f32.mrb[124].mxu0  ;;  %4842 = vmatmul.mubr.bf16.vlgmr.msra.gmra.mrb[128].mxu0 %v10479_v1 }
 0x22b   : > { %v4307_v10 = vadd.f32 %v8488_v43, %v4243_v2  ;;  %4881 = vmatpush1.bf16.msra.mxu0 %v10324_v34  ;;  %v4298_v9 = vpop.f32.mrb[125].mxu0  ;;  %4851 = vmatprep.mubr.bf16.mxu0 %v9474_v50  ;;  %v9137_v34 = vld [vmem:[%s11436_s7 + $0x2c] ss:$16 sps:$4 sm:$0xff]   ;;  %v9182_v43 = vld [vmem:[%s11438_s9 + $0x24] ss:$16 sps:$4 sm:$0xff]  }
 0x22c   : > { %v4299_v20 = vadd.f32 %v4298_v9, %v4235_v35  ;;  %v8489_v40 = vpop.f32.mrb[126].mxu0  ;;  %4882 = vmatprep.subr.bf16.mxu0 %v10336_v36  ;;  %v9135_v36 = vld [vmem:[%s11436_s7 + $0x28] ss:$16 sps:$4 sm:$0xff]   ;;  %v9164_v35 = vld [vmem:[%s11436_s7 + $0x44] ss:$16 sps:$4 sm:$0xff]  }
 0x22d   : > { %v4301_v19 = vpop.f32.mrb[127].mxu0  ;;  %v9183_v9 = vld [vmem:[%s11438_s9 + $0xe8] ss:$16 sps:$4 sm:$0xff]   ;;  %v9191_v40 = vld [vmem:[%s11438_s9 + $0x10c] ss:$16 sps:$4 sm:$0xff]  }
 0x22e   : > { %v4302_v47 = vadd.f32 %v4301_v19, %v4238_v53 }
 0x22f   : > { %4883 = vmatpush1.bf16.msra.mxu0 %v10344_v41  ;;  %v9140_v41 = vld [vmem:[%s11436_s7 + $0x4c] ss:$16 sps:$4 sm:$0xff]  }
 0x230   : > { %v4615_v11 = vpack.c.bf16 %v4302_v47, %v4299_v20  ;;  %4884 = vmatprep.subr.bf16.mxu0 %v10354_v52  ;;  %v9138_v52 = vld [vmem:[%s11436_s7 + $0x48] ss:$16 sps:$4 sm:$0xff]  }
 0x232   : > { %4852 = vmatmul.mubr.bf16.gmra.mrb[132].mxu0 %v10477_v62  ;;  %4933 = vmatmul.mubr.bf16.vlgmr.msra.gmra.mrb[144].mxu1 %v4615_v11 }
 0x233   : > { %4885 = vmatpush1.bf16.msra.mxu0 %v10363_v56  ;;  %5115 = vmatpush1.bf16.msra.mxu1 %v9132_v49  ;;  %v4616_v56 = vpack.c.bf16 %v4307_v10, %v4307_v10  ;;  %v9185_v10 = vld [vmem:[%s11438_s9 + $0xec] ss:$16 sps:$4 sm:$0xff]  }
 0x234   : > { %4886 = vmatprep.subr.bf16.mxu0 %v10376_v63  ;;  %5116 = vmatprep.subr.bf16.mxu1 %v9137_v34  ;;  %v9143_v63 = vld [vmem:[%s11436_s7 + $0x6c] ss:$16 sps:$4 sm:$0xff]   ;;  %v9189_v34 = vld [vmem:[%s11438_s9 + $0x108] ss:$16 sps:$4 sm:$0xff]  }
 0x235   : > { %4861 = vmatprep.mubr.bf16.mxu0 %v9474_v50  ;;  %4942 = vmatprep.mubr.bf16.mxu1 %v9474_v50 }
 0x237   : > { %4887 = vmatpush1.bf16.msra.mxu0 %v10386_v3  ;;  %5117 = vmatpush1.bf16.msra.mxu1 %v9135_v36  ;;  %v9141_v3 = vld [vmem:[%s11436_s7 + $0x68] ss:$16 sps:$4 sm:$0xff]   ;;  %v9194_v36 = vld [vmem:[%s11438_s9 + $0x64] ss:$16 sps:$4 sm:$0xff]  }
 0x238   : > { %4888 = vmatprep.subr.bf16.mxu0 %v10404_v8  ;;  %5118 = vmatprep.subr.bf16.mxu1 %v9140_v41  ;;  %v9146_v8 = vld [vmem:[%s11438_s9 + $0xc] ss:$16 sps:$4 sm:$0xff]  }
 0x239   : > { %v9197_v41 = vld [vmem:[%s11438_s9 + $0x12c] ss:$16 sps:$4 sm:$0xff]  }
 0x23a   : > { %4862 = vmatmul.mubr.bf16.gmra.mrb[136].mxu0 %v4615_v11  ;;  %4943 = vmatmul.mubr.bf16.gmra.mrb[148].mxu1 %v4616_v56  ;;  %v9186_v11 = vld [vmem:[%s11438_s9 + $0x40] ss:$16 sps:$4 sm:$0xff]  }
 0x23b   : > { %4889 = vmatpush1.bf16.msra.mxu0 %v10399_v7  ;;  %5119 = vmatpush1.bf16.msra.mxu1 %v9138_v52  ;;  %v9144_v7 = vld [vmem:[%s11438_s9 + $0x8] ss:$16 sps:$4 sm:$0xff]   ;;  %v9192_v52 = vld [vmem:[%s11438_s9 + $0x60] ss:$16 sps:$4 sm:$0xff]  }
 0x23c   : > { %4890 = vmatprep.subr.bf16.mxu0 %v10415_v21  ;;  %5120 = vmatprep.subr.bf16.mxu1 %v9143_v63  ;;  %v9149_v21 = vld [vmem:[%s11438_s9 + $0x2c] ss:$16 sps:$4 sm:$0xff]   ;;  %v9200_v63 = vld [vmem:[%s11438_s9 + $0x84] ss:$16 sps:$4 sm:$0xff]  }
 0x23d   : > { %4871 = vmatprep.mubr.bf16.mxu0 %v9474_v50  ;;  %5146 = vmatprep.mubr.bf16.mxu1 %v9474_v50  ;;  %v4556_v39 = vpop.f32.mrb[128].mxu1 }
 0x23e   : > { %v4558_v18 = vpop.f32.mrb[129].mxu1 }
 0x23f   : > { %4891 = vmatpush1.bf16.msra.mxu0 %v10423_v60  ;;  %5121 = vmatpush1.bf16.msra.mxu1 %v9141_v3  ;;  %v9147_v60 = vld [vmem:[%s11438_s9 + $0x28] ss:$16 sps:$4 sm:$0xff]   ;;  %v9198_v3 = vld [vmem:[%s11438_s9 + $0x80] ss:$16 sps:$4 sm:$0xff]  }
 0x240   : > { %4892 = vmatprep.subr.bf16.mxu0 %v10441_v14  ;;  %5648 = vmatprep.subr.bf16.mxu1 %v9146_v8  ;;  %v9152_v14 = vld [vmem:[%s11436_s7 + $0x4] ss:$16 sps:$4 sm:$0xff]   ;;  %v9201_v8 = vld [vmem:[%s11438_s9 + $0x148] ss:$16 sps:$4 sm:$0xff]  }
 0x242   : > { %4872 = vmatmul.mubr.bf16.gmra.mrb[140].mxu0 %v4616_v56  ;;  %7637 = vmatmul.mubr.msk.bf16.vlgmr.msra.gmra.mrb[152].mxu1 %vm2649_vm0, %v10471_v12  ;;  %v9195_v56 = vld [vmem:[%s11438_s9 + $0x128] ss:$16 sps:$4 sm:$0xff]  }
 0x243   : > { %4893 = vmatpush1.bf16.msra.mxu0 %v10436_v28  ;;  %5649 = vmatpush1.bf16.msra.mxu1 %v9144_v7  ;;  %v4560_v28 = vpop.f32.mrb[130].mxu1  ;;  %v9206_v7 = vld [vmem:[%s11438_s9 + $0xa4] ss:$16 sps:$4 sm:$0xff]  }
 0x244   : > { %4894 = vmatprep.subr.bf16.mxu0 %v10450_v22  ;;  %5650 = vmatprep.subr.bf16.mxu1 %v9149_v21  ;;  %v10551_v0 = vpack.c.bf16 %v4560_v28, %v4556_v39  ;;  %v4562_v6 = vpop.f32.mrb[131].mxu1  ;;  %v9150_v22 = vld [vmem:[%s11436_s7] ss:$16 sps:$4 sm:$0xff]   ;;  %v9209_v21 = vld [vmem:[%s11438_s9 + $0x16c] ss:$16 sps:$4 sm:$0xff]  }
 0x245   : > { %4912 = vmatprep.mubr.bf16.mxu0 %v9474_v50  ;;  %5156 = vmatprep.mubr.bf16.mxu1 %v9474_v50  ;;  %v10560_v45 = vpack.c.bf16 %v4562_v6, %v4558_v18  ;;  %v4566_v25 = vpop.f32.mrb[132].mxu1  ;;  %v9207_v39 = vld [vmem:[%s11438_s9 + $0x168] ss:$16 sps:$4 sm:$0xff]   ;;  %v9218_v28 = vld [vmem:[%s11438_s9 + $0xe4] ss:$16 sps:$4 sm:$0xff]  }
 0x246   : > { %v4568_v31 = vpop.f32.mrb[133].mxu1  ;;  %v9213_v18 = vld [vmem:[%s11438_s9 + $0x188] ss:$16 sps:$4 sm:$0xff]   ;;  %v9216_v6 = vld [vmem:[%s11438_s9 + $0xe0] ss:$16 sps:$4 sm:$0xff]  }
 0x247   : > { %4895 = vmatpush1.bf16.msra.mxu0 %v10455_v42  ;;  %5651 = vmatpush1.bf16.msra.mxu1 %v9147_v60  ;;  %v9161_v42 = vld [vmem:[%s11438_s9 + $0x6c] ss:$16 sps:$4 sm:$0xff]   ;;  %v4570_v53 = vpop.f32.mrb[134].mxu1  ;;  %v9204_v60 = vld [vmem:[%s11438_s9 + $0xa0] ss:$16 sps:$4 sm:$0xff]  }
 0x248   : > { %5043 = vmatprep.subr.bf16.mxu0 %v9152_v14  ;;  %5652 = vmatprep.subr.bf16.mxu1 %v9155_v17  ;;  %v10585_v32 = vpack.c.bf16 %v4570_v53, %v4566_v25  ;;  %v4572_v33 = vpop.f32.mrb[135].mxu1  ;;  %v9212_v14 = vld [vmem:[%s11438_s9 + $0xc4] ss:$16 sps:$4 sm:$0xff]   ;;  %v9210_v17 = vld [vmem:[%s11438_s9 + $0xc0] ss:$16 sps:$4 sm:$0xff]  }
 0x249   : > { %v10593_v38 = vpack.c.bf16 %v4572_v33, %v4568_v31  ;;  %v9228_v25 = vld [vmem:[%s11438_s9 + $0x120] ss:$16 sps:$4 sm:$0xff]   ;;  %v9239_v31 = vld [vmem:[%s11439_s10 + $0xc] ss:$16 sps:$4 sm:$0xff]   ;;  %v9237_v33 = vld [vmem:[%s11439_s10 + $0x8] ss:$16 sps:$4 sm:$0xff]  }
 0x24a   : > { %4913 = vmatmul.mubr.bf16.vlgmr.msra.gmra.mrb[144].mxu0 %v10479_v1  ;;  %7638 = vmatmul.mubr.msk.bf16.gmra.mrb[156].mxu1 %vm2649_vm0, %v10469_v61  ;;  %v10630_v1 = vpack.c.bf16 %v10473_v15, %v10473_v15  ;;  %v9180_v15 = vld [vmem:[%s11438_s9 + $0x20] ss:$16 sps:$4 sm:$0xff]  }
 0x24b   : > { %5044 = vmatpush1.bf16.msra.mxu0 %v9150_v22  ;;  %5653 = vmatpush1.bf16.msra.mxu1 %v9153_v13  ;;  %v9219_v22 = vld [vmem:[%s11438_s9 + $0x1a8] ss:$16 sps:$4 sm:$0xff]   ;;  %v9224_v13 = vld [vmem:[%s11438_s9 + $0x104] ss:$16 sps:$4 sm:$0xff]   ;;  %v9234_v53 = vld [vmem:[%s11438_s9 + $0x140] ss:$16 sps:$4 sm:$0xff]  }
 0x24c   : > { %5045 = vmatprep.subr.bf16.mxu0 %v9158_v44  ;;  %5654 = vmatprep.subr.bf16.mxu1 %v9161_v42  ;;  %v9227_v44 = vld [vmem:[%s11438_s9 + $0x1cc] ss:$16 sps:$4 sm:$0xff]   ;;  %v9222_v42 = vld [vmem:[%s11438_s9 + $0x100] ss:$16 sps:$4 sm:$0xff]  }
 0x24d   : > { %4922 = vmatprep.mubr.bf16.mxu0 %v9474_v50  ;;  %5166 = vmatprep.mubr.bf16.mxu1 %v9474_v50  ;;  %v4576_v2 = vpop.f32.mrb[136].mxu1 }
 0x24e   : > { %v4578_v57 = vpop.f32.mrb[137].mxu1 }
 0x24f   : > { %5046 = vmatpush1.bf16.msra.mxu0 %v9156_v23  ;;  %5655 = vmatpush1.bf16.msra.mxu1 %v9159_v24  ;;  %v4580_v27 = vpop.f32.mrb[138].mxu1  ;;  %v9225_v23 = vld [vmem:[%s11438_s9 + $0x1c8] ss:$16 sps:$4 sm:$0xff]   ;;  %v9230_v24 = vld [vmem:[%s11438_s9 + $0x124] ss:$16 sps:$4 sm:$0xff]  }
 0x250   : > { %5047 = vmatprep.subr.bf16.mxu0 %v9164_v35  ;;  %5656 = vmatprep.subr.bf16.mxu1 %v9167_v30  ;;  %v10618_v59 = vpack.c.bf16 %v4580_v27, %v4576_v2  ;;  %v4582_v5 = vpop.f32.mrb[139].mxu1  ;;  %v9231_v35 = vld [vmem:[%s11438_s9 + $0x1e8] ss:$16 sps:$4 sm:$0xff]   ;;  %v9236_v30 = vld [vmem:[%s11438_s9 + $0x144] ss:$16 sps:$4 sm:$0xff]  }
 0x251   : > { %v9246_v2 = vld [vmem:[%s11438_s9 + $0x180] ss:$16 sps:$4 sm:$0xff]  }
 0x252   : > { %4923 = vmatmul.mubr.bf16.gmra.mrb[148].mxu0 %v10477_v62  ;;  %7639 = vmatmul.mubr.msk.bf16.gmra.mrb[144].mxu1 %vm2649_vm0, %v10475_v29  ;;  %v10626_v62 = vpack.c.bf16 %v4582_v5, %v4578_v57  ;;  %v9257_v57 = vld [vmem:[%s11439_s10 + $0x6c] ss:$16 sps:$4 sm:$0xff]   ;;  %v9252_v27 = vld [vmem:[%s11438_s9 + $0x1a0] ss:$16 sps:$4 sm:$0xff]   ;;  %v9255_v5 = vld [vmem:[%s11439_s10 + $0x68] ss:$16 sps:$4 sm:$0xff]  }
 0x253   : > { %5048 = vmatpush1.bf16.msra.mxu0 %v9162_v37  ;;  %5657 = vmatpush1.bf16.msra.mxu1 %v9165_v54  ;;  %v9242_v37 = vld [vmem:[%s11438_s9 + $0x164] ss:$16 sps:$4 sm:$0xff]   ;;  %v9245_v54 = vld [vmem:[%s11439_s10 + $0x2c] ss:$16 sps:$4 sm:$0xff]  }
 0x254   : > { %5049 = vmatprep.subr.bf16.mxu0 %v9170_v46  ;;  %5658 = vmatprep.subr.bf16.mxu1 %v9173_v4  ;;  %v9240_v46 = vld [vmem:[%s11438_s9 + $0x160] ss:$16 sps:$4 sm:$0xff]   ;;  %v9243_v4 = vld [vmem:[%s11439_s10 + $0x28] ss:$16 sps:$4 sm:$0xff]  }
 0x255   : > { %5075 = vmatprep.mubr.bf16.mxu0 %v9474_v50  ;;  %5176 = vmatprep.mubr.bf16.mxu1 %v9474_v50  ;;  %v10648_v20 = vpop.f32.mrb[140].mxu1 }
 0x256   : > { %v10656_v19 = vpop.f32.mrb[141].mxu1 }
 0x257   : > { %5050 = vmatpush1.bf16.msra.mxu0 %v9168_v51  ;;  %5659 = vmatpush1.bf16.msra.mxu1 %v9171_v26  ;;  %v4590_v47 = vpop.f32.mrb[142].mxu1  ;;  %v9248_v51 = vld [vmem:[%s11438_s9 + $0x184] ss:$16 sps:$4 sm:$0xff]   ;;  %v9251_v26 = vld [vmem:[%s11439_s10 + $0x4c] ss:$16 sps:$4 sm:$0xff]  }
 0x258   : > { %5577 = vmatprep.subr.bf16.mxu0 %v9176_v16  ;;  %5660 = vmatprep.subr.bf16.mxu1 %v9179_v58  ;;  %v4591_v49 = vpop.f32.mrb[143].mxu1  ;;  %v9249_v16 = vld [vmem:[%s11439_s10 + $0x48] ss:$16 sps:$4 sm:$0xff]   ;;  %v9254_v58 = vld [vmem:[%s11438_s9 + $0x1a4] ss:$16 sps:$4 sm:$0xff]  }
 0x259   : > { %v9275_v47 = vld [vmem:[%s11439_s10 + $0xcc] ss:$16 sps:$4 sm:$0xff]   ;;  %v10849_v49 = vpack.c.bf16 %v10648_v20, %v10648_v20 }
 0x25a   : > { %7633 = vmatmul.mubr.msk.bf16.vlgmr.msra.gmra.mrb[128].mxu0 %vm2649_vm0, %v10471_v12  ;;  %7640 = vmatmul.mubr.msk.bf16.gmra.mrb[160].mxu1 %vm2649_vm0, %v10630_v1  ;;  %v9188_v12 = vld [vmem:[%s11438_s9 + $0x44] ss:$16 sps:$4 sm:$0xff]   ;;  %v9281_v20 = vld [vmem:[%s11439_s10 + $0xec] ss:$16 sps:$4 sm:$0xff]  }
 0x25b   : > { %5578 = vmatpush1.bf16.msra.mxu0 %v9174_v55  ;;  %5661 = vmatpush1.bf16.msra.mxu1 %v9177_v48  ;;  %v9260_v55 = vld [vmem:[%s11438_s9 + $0x1c4] ss:$16 sps:$4 sm:$0xff]   ;;  %v9263_v48 = vld [vmem:[%s11439_s10 + $0x8c] ss:$16 sps:$4 sm:$0xff]  }
 0x25c   : > { %5579 = vmatprep.subr.bf16.mxu0 %v9182_v43  ;;  %5662 = vmatprep.subr.bf16.mxu1 %v9185_v10  ;;  %v9261_v43 = vld [vmem:[%s11439_s10 + $0x88] ss:$16 sps:$4 sm:$0xff]   ;;  %v9266_v10 = vld [vmem:[%s11438_s9 + $0x1e4] ss:$16 sps:$4 sm:$0xff]  }
 0x25d   : > { %5085 = vmatprep.mubr.bf16.mxu0 %v9474_v50  ;;  %5680 = vmatprep.mubr.bf16.mxu1 %v10560_v45 }
 0x25f   : > { %5580 = vmatpush1.bf16.msra.mxu0 %v9180_v15  ;;  %5663 = vmatpush1.bf16.msra.mxu1 %v9183_v9  ;;  %v9269_v15 = vld [vmem:[%s11439_s10 + $0xac] ss:$16 sps:$4 sm:$0xff]   ;;  %v10831_v9 = vpack.c.bf16 %v10656_v19, %v10656_v19  ;;  %v9272_v19 = vld [vmem:[%s11439_s10 + $0x4] ss:$16 sps:$4 sm:$0xff]  }
 0x260   : > { %5581 = vmatprep.subr.bf16.mxu0 %v9188_v12  ;;  %5664 = vmatprep.subr.bf16.mxu1 %v9191_v40  ;;  %v9264_v12 = vld [vmem:[%s11438_s9 + $0x1e0] ss:$16 sps:$4 sm:$0xff]   ;;  %v9267_v40 = vld [vmem:[%s11439_s10 + $0xa8] ss:$16 sps:$4 sm:$0xff]  }
 0x262   : > { %7634 = vmatmul.mubr.msk.bf16.gmra.mrb[132].mxu0 %vm2649_vm0, %v10469_v61  ;;  %v9203_v61 = vld [vmem:[%s11438_s9 + $0x14c] ss:$16 sps:$4 sm:$0xff]  }
 0x263   : > { %5582 = vmatpush1.bf16.msra.mxu0 %v9186_v11  ;;  %5665 = vmatpush1.bf16.msra.mxu1 %v9189_v34  ;;  %v9270_v11 = vld [vmem:[%s11439_s10] ss:$16 sps:$4 sm:$0xff]   ;;  %v9273_v34 = vld [vmem:[%s11439_s10 + $0xc8] ss:$16 sps:$4 sm:$0xff]  }
 0x264   : > { %5583 = vmatprep.subr.bf16.mxu0 %v9194_v36  ;;  %5666 = vmatprep.subr.bf16.mxu1 %v9197_v41  ;;  %v9278_v36 = vld [vmem:[%s11439_s10 + $0x24] ss:$16 sps:$4 sm:$0xff]  }
 0x265   : > { %5095 = vmatprep.mubr.bf16.mxu0 %v9474_v50  ;;  %v10864_v41 = vld [vmem:[%s10530_s23 + $0x4] ss:$16 sps:$4 sm:$0xff]  }
 0x267   : > { %5584 = vmatpush1.bf16.msra.mxu0 %v9192_v52  ;;  %5667 = vmatpush1.bf16.msra.mxu1 %v9195_v56  ;;  %v9276_v52 = vld [vmem:[%s11439_s10 + $0x20] ss:$16 sps:$4 sm:$0xff]   ;;  %v9279_v56 = vld [vmem:[%s11439_s10 + $0xe8] ss:$16 sps:$4 sm:$0xff]  }
 0x268   : > { %5585 = vmatprep.subr.bf16.mxu0 %v9200_v63  ;;  %5668 = vmatprep.subr.bf16.mxu1 %v9203_v61  ;;  %v9284_v63 = vld [vmem:[%s11439_s10 + $0x44] ss:$16 sps:$4 sm:$0xff]   ;;  %v9282_v61 = vld [vmem:[%s11439_s10 + $0x40] ss:$16 sps:$4 sm:$0xff]  }
 0x26a   : > { %7635 = vmatmul.mubr.msk.bf16.gmra.mrb[136].mxu0 %vm2649_vm0, %v10475_v29  ;;  %v9215_v29 = vld [vmem:[%s11438_s9 + $0x18c] ss:$16 sps:$4 sm:$0xff]  }
 0x26b   : > { %5586 = vmatpush1.bf16.msra.mxu0 %v9198_v3  ;;  %5669 = vmatpush1.bf16.msra.mxu1 %v9201_v8  ;;  %v9285_v3 = vld [vmem:[%s11439_s10 + $0x108] ss:$16 sps:$4 sm:$0xff]   ;;  %v9290_v8 = vld [vmem:[%s11439_s10 + $0x64] ss:$16 sps:$4 sm:$0xff]  }
 0x26c   : > { %5587 = vmatprep.subr.bf16.mxu0 %v9206_v7  ;;  %5670 = vmatprep.subr.bf16.mxu1 %v9209_v21  ;;  %v9288_v7 = vld [vmem:[%s11439_s10 + $0x60] ss:$16 sps:$4 sm:$0xff]   ;;  %v9291_v21 = vld [vmem:[%s11439_s10 + $0x128] ss:$16 sps:$4 sm:$0xff]  }
 0x26d   : > { %5105 = vmatprep.mubr.bf16.mxu0 %v9474_v50  ;;  %v9221_v50 = vld [vmem:[%s11438_s9 + $0x1ac] ss:$16 sps:$4 sm:$0xff]  }
 0x26f   : > { %5588 = vmatpush1.bf16.msra.mxu0 %v9204_v60  ;;  %5671 = vmatpush1.bf16.msra.mxu1 %v9207_v39  ;;  %v9296_v60 = vld [vmem:[%s11439_s10 + $0x84] ss:$16 sps:$4 sm:$0xff]   ;;  %v9294_v39 = vld [vmem:[%s11439_s10 + $0x80] ss:$16 sps:$4 sm:$0xff]  }
 0x270   : > { %5589 = vmatprep.subr.bf16.mxu0 %v9212_v14  ;;  %5672 = vmatprep.subr.bf16.mxu1 %v9215_v29  ;;  %v9297_v14 = vld [vmem:[%s11439_s10 + $0x148] ss:$16 sps:$4 sm:$0xff]   ;;  %v9302_v29 = vld [vmem:[%s11439_s10 + $0xa4] ss:$16 sps:$4 sm:$0xff]  }
 0x272   : > { %7636 = vmatmul.mubr.msk.bf16.gmra.mrb[152].mxu0 %vm2649_vm0, %v10630_v1  ;;  %v9258_v1 = vld [vmem:[%s11438_s9 + $0x1c0] ss:$16 sps:$4 sm:$0xff]  }
 0x273   : > { %5590 = vmatpush1.bf16.msra.mxu0 %v9210_v17  ;;  %5673 = vmatpush1.bf16.msra.mxu1 %v9213_v18  ;;  %v9300_v17 = vld [vmem:[%s11439_s10 + $0xa0] ss:$16 sps:$4 sm:$0xff]   ;;  %v9303_v18 = vld [vmem:[%s11439_s10 + $0x168] ss:$16 sps:$4 sm:$0xff]  }
 0x274   : > { %5591 = vmatprep.subr.bf16.mxu0 %v9218_v28  ;;  %5674 = vmatprep.subr.bf16.mxu1 %v9221_v50  ;;  %v9308_v28 = vld [vmem:[%s11439_s10 + $0xc4] ss:$16 sps:$4 sm:$0xff]   ;;  %v9306_v50 = vld [vmem:[%s11439_s10 + $0xc0] ss:$16 sps:$4 sm:$0xff]  }
 0x275   : > { %5609 = vmatprep.mubr.bf16.mxu0 %v10560_v45  ;;  %v9233_v45 = vld [vmem:[%s11438_s9 + $0x1ec] ss:$16 sps:$4 sm:$0xff]  }
 0x277   : > { %5592 = vmatpush1.bf16.msra.mxu0 %v9216_v6  ;;  %5675 = vmatpush1.bf16.msra.mxu1 %v9219_v22  ;;  %v9309_v6 = vld [vmem:[%s11439_s10 + $0x188] ss:$16 sps:$4 sm:$0xff]   ;;  %v9314_v22 = vld [vmem:[%s11439_s10 + $0xe4] ss:$16 sps:$4 sm:$0xff]  }
 0x278   : > { %5593 = vmatprep.subr.bf16.mxu0 %v9224_v13  ;;  %5676 = vmatprep.subr.bf16.mxu1 %v9227_v44  ;;  %v9317_v13 = vld [vmem:[%s11439_s10 + $0x1ac] ss:$16 sps:$4 sm:$0xff]   ;;  %v9312_v44 = vld [vmem:[%s11439_s10 + $0xe0] ss:$16 sps:$4 sm:$0xff]  }
 0x27b   : > { %5594 = vmatpush1.bf16.msra.mxu0 %v9222_v42  ;;  %5677 = vmatpush1.bf16.msra.mxu1 %v9225_v23  ;;  %v9315_v42 = vld [vmem:[%s11439_s10 + $0x1a8] ss:$16 sps:$4 sm:$0xff]   ;;  %v9320_v23 = vld [vmem:[%s11439_s10 + $0x104] ss:$16 sps:$4 sm:$0xff]  }
 0x27c   : > { %5595 = vmatprep.subr.bf16.mxu0 %v9230_v24  ;;  %5678 = vmatprep.subr.bf16.mxu1 %v9233_v45  ;;  %v9323_v24 = vld [vmem:[%s11439_s10 + $0x1cc] ss:$16 sps:$4 sm:$0xff]   ;;  %v9318_v45 = vld [vmem:[%s11439_s10 + $0x100] ss:$16 sps:$4 sm:$0xff]  }
 0x27f   : > { %5596 = vmatpush1.bf16.msra.mxu0 %v9228_v25  ;;  %5679 = vmatpush1.bf16.msra.mxu1 %v9231_v35  ;;  %v9321_v25 = vld [vmem:[%s11439_s10 + $0x1c8] ss:$16 sps:$4 sm:$0xff]   ;;  %v9326_v35 = vld [vmem:[%s11439_s10 + $0x124] ss:$16 sps:$4 sm:$0xff]  }
 0x280   : > { %5597 = vmatprep.subr.bf16.mxu0 %v9236_v30  ;;  %6745 = vmatprep.subr.bf16.mxu1 %v9239_v31  ;;  %v9329_v30 = vld [vmem:[%s11439_s10 + $0x1ec] ss:$16 sps:$4 sm:$0xff]   ;;  %v9324_v31 = vld [vmem:[%s11439_s10 + $0x120] ss:$16 sps:$4 sm:$0xff]  }
 0x282   : > { %5681 = vmatmul.mubr.bf16.vlgmr.msra.gmra.mrb[152].mxu1 %v10551_v0 }
 0x283   : > { %5598 = vmatpush1.bf16.msra.mxu0 %v9234_v53  ;;  %6746 = vmatpush1.bf16.msra.mxu1 %v9237_v33  ;;  %v9327_v53 = vld [vmem:[%s11439_s10 + $0x1e8] ss:$16 sps:$4 sm:$0xff]   ;;  %v9332_v33 = vld [vmem:[%s11439_s10 + $0x144] ss:$16 sps:$4 sm:$0xff]  }
 0x284   : > { %5599 = vmatprep.subr.bf16.mxu0 %v9242_v37  ;;  %6747 = vmatprep.subr.bf16.mxu1 %v9245_v54  ;;  %v9338_v37 = vld [vmem:[%s11439_s10 + $0x20c] ss:$16 sps:$4 sm:$0xff]   ;;  %v10985_v54 = vld [vmem:[%s10530_s23] ss:$16 sps:$4 sm:$0xff]  }
 0x285   : > { %5690 = vmatprep.mubr.bf16.mxu1 %v10593_v38 }
 0x287   : > { %5600 = vmatpush1.bf16.msra.mxu0 %v9240_v46  ;;  %6748 = vmatpush1.bf16.msra.mxu1 %v9243_v4  ;;  %v9330_v46 = vld [vmem:[%s11439_s10 + $0x140] ss:$16 sps:$4 sm:$0xff]   ;;  %v9336_v4 = vld [vmem:[%s11439_s10 + $0x208] ss:$16 sps:$4 sm:$0xff]  }
 0x288   : > { %5601 = vmatprep.subr.bf16.mxu0 %v9248_v51  ;;  %6749 = vmatprep.subr.bf16.mxu1 %v9251_v26  ;;  %v9341_v51 = vld [vmem:[%s11439_s10 + $0x164] ss:$16 sps:$4 sm:$0xff]   ;;  %v9344_v26 = vld [vmem:[%s11439_s10 + $0x22c] ss:$16 sps:$4 sm:$0xff]  }
 0x28a   : > { %5691 = vmatmul.mubr.bf16.gmra.mrb[156].mxu1 %v10585_v32 }
 0x28b   : > { %5602 = vmatpush1.bf16.msra.mxu0 %v9246_v2  ;;  %6750 = vmatpush1.bf16.msra.mxu1 %v9249_v16  ;;  %v11000_v2 = vld [vmem:[%s10530_s23 + $0x24] ss:$16 sps:$4 sm:$0xff]   ;;  %v9339_v16 = vld [vmem:[%s11439_s10 + $0x160] ss:$16 sps:$4 sm:$0xff]  }
 0x28c   : > { %5603 = vmatprep.subr.bf16.mxu0 %v9254_v58  ;;  %6751 = vmatprep.subr.bf16.mxu1 %v9257_v57  ;;  %v9342_v58 = vld [vmem:[%s11439_s10 + $0x228] ss:$16 sps:$4 sm:$0xff]   ;;  %v9347_v57 = vld [vmem:[%s11439_s10 + $0x184] ss:$16 sps:$4 sm:$0xff]  }
 0x28d   : > { %5700 = vmatprep.mubr.bf16.mxu1 %v10626_v62 }
 0x28f   : > { %5604 = vmatpush1.bf16.msra.mxu0 %v9252_v27  ;;  %6752 = vmatpush1.bf16.msra.mxu1 %v9255_v5  ;;  %v9350_v27 = vld [vmem:[%s11439_s10 + $0x24c] ss:$16 sps:$4 sm:$0xff]   ;;  %v11017_v5 = vld [vmem:[%s10530_s23 + $0x20] ss:$16 sps:$4 sm:$0xff]  }
 0x290   : > { %5605 = vmatprep.subr.bf16.mxu0 %v9260_v55  ;;  %6753 = vmatprep.subr.bf16.mxu1 %v9263_v48  ;;  %v9345_v55 = vld [vmem:[%s11439_s10 + $0x180] ss:$16 sps:$4 sm:$0xff]   ;;  %v9348_v48 = vld [vmem:[%s11439_s10 + $0x248] ss:$16 sps:$4 sm:$0xff]  }
 0x292   : > { %5701 = vmatmul.mubr.bf16.gmra.mrb[144].mxu1 %v10618_v59 }
 0x293   : > { %5606 = vmatpush1.bf16.msra.mxu0 %v9258_v1  ;;  %6754 = vmatpush1.bf16.msra.mxu1 %v9261_v43  ;;  %v9353_v1 = vld [vmem:[%s11439_s10 + $0x1a4] ss:$16 sps:$4 sm:$0xff]   ;;  %v9356_v43 = vld [vmem:[%s11439_s10 + $0x26c] ss:$16 sps:$4 sm:$0xff]  }
 0x294   : > { %5607 = vmatprep.subr.bf16.mxu0 %v9266_v10  ;;  %6755 = vmatprep.subr.bf16.mxu1 %v9269_v15  ;;  %v11032_v10 = vld [vmem:[%s10530_s23 + $0x44] ss:$16 sps:$4 sm:$0xff]   ;;  %v9351_v15 = vld [vmem:[%s11439_s10 + $0x1a0] ss:$16 sps:$4 sm:$0xff]  }
 0x295   : > { %5710 = vmatprep.mubr.bf16.mxu1 %v10831_v9 }
 0x297   : > { %5608 = vmatpush1.bf16.msra.mxu0 %v9264_v12  ;;  %6756 = vmatpush1.bf16.msra.mxu1 %v9267_v40  ;;  %v9359_v12 = vld [vmem:[%s11439_s10 + $0x1c4] ss:$16 sps:$4 sm:$0xff]   ;;  %v9362_v40 = vld [vmem:[%s11439_s10 + $0x28c] ss:$16 sps:$4 sm:$0xff]  }
 0x298   : > { %6603 = vmatprep.subr.bf16.mxu0 %v9272_v19  ;;  %6757 = vmatprep.subr.bf16.mxu1 %v9275_v47  ;;  %v11049_v19 = vld [vmem:[%s10530_s23 + $0x40] ss:$16 sps:$4 sm:$0xff]  }
 0x299   : > { %v5759_v47 = vld [vmem:[%s10530_s23 + $0x60] sm:$0x11] }
 0x29a   : > { %5610 = vmatmul.mubr.bf16.vlgmr.msra.gmra.mrb[128].mxu0 %v10551_v0  ;;  %5711 = vmatmul.mubr.bf16.gmra.mrb[164].mxu1 %v10849_v49  ;;  %v9287_v0 = vld [vmem:[%s11439_s10 + $0x10c] ss:$16 sps:$4 sm:$0xff]  }
 0x29b   : > { %6604 = vmatpush1.bf16.msra.mxu0 %v9270_v11  ;;  %6758 = vmatpush1.bf16.msra.mxu1 %v9273_v34  ;;  %v9360_v11 = vld [vmem:[%s11439_s10 + $0x288] ss:$16 sps:$4 sm:$0xff]   ;;  %v9365_v34 = vld [vmem:[%s11439_s10 + $0x1e4] ss:$16 sps:$4 sm:$0xff]  }
 0x29c   : > { %6605 = vmatprep.subr.bf16.mxu0 %v9278_v36  ;;  %6759 = vmatprep.subr.bf16.mxu1 %v9281_v20  ;;  %v9368_v36 = vld [vmem:[%s11439_s10 + $0x2ac] ss:$16 sps:$4 sm:$0xff]   ;;  %v11064_v20 = vcombine.high %v5759_v47, %v5759_v47 }
 0x29d   : > { %5619 = vmatprep.mubr.bf16.mxu0 %v10593_v38  ;;  %6777 = vmatprep.mubr.bf16.mxu1 %v10864_v41  ;;  %v9293_v38 = vld [vmem:[%s11439_s10 + $0x12c] ss:$16 sps:$4 sm:$0xff]  }
 0x29f   : > { %6606 = vmatpush1.bf16.msra.mxu0 %v9276_v52  ;;  %6760 = vmatpush1.bf16.msra.mxu1 %v9279_v56  ;;  %v9366_v52 = vld [vmem:[%s11439_s10 + $0x2a8] ss:$16 sps:$4 sm:$0xff]   ;;  %v9371_v56 = vld [vmem:[%s11439_s10 + $0x204] ss:$16 sps:$4 sm:$0xff]  }
 0x2a0   : > { %6607 = vmatprep.subr.bf16.mxu0 %v9284_v63  ;;  %6761 = vmatprep.subr.bf16.mxu1 %v9287_v0  ;;  %v9374_v63 = vld [vmem:[%s11439_s10 + $0x2cc] ss:$16 sps:$4 sm:$0xff]   ;;  %v11080_v0 = vcombine.low %v5759_v47, %v5759_v47 }
 0x2a2   : > { %5620 = vmatmul.mubr.bf16.gmra.mrb[132].mxu0 %v10585_v32  ;;  %v9299_v32 = vld [vmem:[%s11439_s10 + $0x14c] ss:$16 sps:$4 sm:$0xff]  }
 0x2a3   : > { %6608 = vmatpush1.bf16.msra.mxu0 %v9282_v61  ;;  %6762 = vmatpush1.bf16.msra.mxu1 %v9285_v3  ;;  %v9369_v61 = vld [vmem:[%s11439_s10 + $0x200] ss:$16 sps:$4 sm:$0xff]   ;;  %v9372_v3 = vld [vmem:[%s11439_s10 + $0x2c8] ss:$16 sps:$4 sm:$0xff]  }
 0x2a4   : > { %6609 = vmatprep.subr.bf16.mxu0 %v9290_v8  ;;  %6763 = vmatprep.subr.bf16.mxu1 %v9293_v38  ;;  %v9377_v8 = vld [vmem:[%s11439_s10 + $0x224] ss:$16 sps:$4 sm:$0xff]   ;;  %v9380_v38 = vld [vmem:[%s11439_s10 + $0x2ec] ss:$16 sps:$4 sm:$0xff]  }
 0x2a5   : > { %5629 = vmatprep.mubr.bf16.mxu0 %v10626_v62  ;;  %v9305_v62 = vld [vmem:[%s11439_s10 + $0x16c] ss:$16 sps:$4 sm:$0xff]  }
 0x2a7   : > { %6610 = vmatpush1.bf16.msra.mxu0 %v9288_v7  ;;  %6764 = vmatpush1.bf16.msra.mxu1 %v9291_v21  ;;  %v11095_v7 = vld [vmem:[%s10530_s23 + $0xc] ss:$16 sps:$4 sm:$0xff]   ;;  %v9375_v21 = vld [vmem:[%s11439_s10 + $0x220] ss:$16 sps:$4 sm:$0xff]  }
 0x2a8   : > { %6611 = vmatprep.subr.bf16.mxu0 %v9296_v60  ;;  %6765 = vmatprep.subr.bf16.mxu1 %v9299_v32  ;;  %v9378_v60 = vld [vmem:[%s11439_s10 + $0x2e8] ss:$16 sps:$4 sm:$0xff]   ;;  %v9383_v32 = vld [vmem:[%s11439_s10 + $0x244] ss:$16 sps:$4 sm:$0xff]  }
 0x2aa   : > { %5630 = vmatmul.mubr.bf16.gmra.mrb[136].mxu0 %v10618_v59  ;;  %v9311_v59 = vld [vmem:[%s11439_s10 + $0x18c] ss:$16 sps:$4 sm:$0xff]  }
 0x2ab   : > { %6612 = vmatpush1.bf16.msra.mxu0 %v9294_v39  ;;  %6766 = vmatpush1.bf16.msra.mxu1 %v9297_v14  ;;  %v9386_v39 = vld [vmem:[%s11439_s10 + $0x30c] ss:$16 sps:$4 sm:$0xff]   ;;  %v9381_v14 = vld [vmem:[%s11439_s10 + $0x240] ss:$16 sps:$4 sm:$0xff]  }
 0x2ac   : > { %6613 = vmatprep.subr.bf16.mxu0 %v9302_v29  ;;  %6767 = vmatprep.subr.bf16.mxu1 %v9305_v62  ;;  %v9384_v29 = vld [vmem:[%s11439_s10 + $0x308] ss:$16 sps:$4 sm:$0xff]   ;;  %v9389_v62 = vld [vmem:[%s11439_s10 + $0x264] ss:$16 sps:$4 sm:$0xff]  }
 0x2ad   : > { %5639 = vmatprep.mubr.bf16.mxu0 %v10831_v9  ;;  %v9354_v9 = vld [vmem:[%s11439_s10 + $0x268] ss:$16 sps:$4 sm:$0xff]  }
 0x2af   : > { %6614 = vmatpush1.bf16.msra.mxu0 %v9300_v17  ;;  %6768 = vmatpush1.bf16.msra.mxu1 %v9303_v18  ;;  %v9392_v17 = vld [vmem:[%s11439_s10 + $0x32c] ss:$16 sps:$4 sm:$0xff]   ;;  %v9387_v18 = vld [vmem:[%s11439_s10 + $0x260] ss:$16 sps:$4 sm:$0xff]  }
 0x2b0   : > { %6615 = vmatprep.subr.bf16.mxu0 %v9308_v28  ;;  %6769 = vmatprep.subr.bf16.mxu1 %v9311_v59  ;;  %v9390_v28 = vld [vmem:[%s11439_s10 + $0x328] ss:$16 sps:$4 sm:$0xff]   ;;  %v9397_v59 = vld [vmem:[%s11439_s10 + $0x284] ss:$16 sps:$4 sm:$0xff]  }
 0x2b2   : > { %5640 = vmatmul.mubr.bf16.gmra.mrb[156].mxu0 %v10849_v49  ;;  %v9357_v49 = vld [vmem:[%s11439_s10 + $0x1c0] ss:$16 sps:$4 sm:$0xff]  }
 0x2b3   : > { %6616 = vmatpush1.bf16.msra.mxu0 %v9306_v50  ;;  %6770 = vmatpush1.bf16.msra.mxu1 %v9309_v6  ;;  %v9401_v50 = vld [vmem:[%s11439_s10 + $0x34c] ss:$16 sps:$4 sm:$0xff]   ;;  %v9395_v6 = vld [vmem:[%s11439_s10 + $0x280] ss:$16 sps:$4 sm:$0xff]  }
 0x2b4   : > { %6617 = vmatprep.subr.bf16.mxu0 %v9314_v22  ;;  %6771 = vmatprep.subr.bf16.mxu1 %v9317_v13  ;;  %v9399_v22 = vld [vmem:[%s11439_s10 + $0x348] ss:$16 sps:$4 sm:$0xff]   ;;  %v9404_v13 = vld [vmem:[%s11439_s10 + $0x2a4] ss:$16 sps:$4 sm:$0xff]  }
 0x2b5   : > { %6635 = vmatprep.mubr.bf16.mxu0 %v10864_v41  ;;  %v9363_v41 = vld [vmem:[%s11439_s10 + $0x1e0] ss:$16 sps:$4 sm:$0xff]  }
 0x2b7   : > { %6618 = vmatpush1.bf16.msra.mxu0 %v9312_v44  ;;  %6772 = vmatpush1.bf16.msra.mxu1 %v9315_v42  ;;  %v9407_v44 = vld [vmem:[%s11439_s10 + $0x36c] ss:$16 sps:$4 sm:$0xff]   ;;  %v9402_v42 = vld [vmem:[%s11439_s10 + $0x2a0] ss:$16 sps:$4 sm:$0xff]  }
 0x2b8   : > { %6619 = vmatprep.subr.bf16.mxu0 %v9320_v23  ;;  %6773 = vmatprep.subr.bf16.mxu1 %v9323_v24  ;;  %v9405_v23 = vld [vmem:[%s11439_s10 + $0x368] ss:$16 sps:$4 sm:$0xff]   ;;  %v9412_v24 = vld [vmem:[%s11439_s10 + $0x2c4] ss:$16 sps:$4 sm:$0xff]  }
 0x2bb   : > { %6620 = vmatpush1.bf16.msra.mxu0 %v9318_v45  ;;  %6774 = vmatpush1.bf16.msra.mxu1 %v9321_v25  ;;  %v9416_v45 = vld [vmem:[%s11439_s10 + $0x38c] ss:$16 sps:$4 sm:$0xff]   ;;  %v9410_v25 = vld [vmem:[%s11439_s10 + $0x2c0] ss:$16 sps:$4 sm:$0xff]  }
 0x2bc   : > { %6621 = vmatprep.subr.bf16.mxu0 %v9326_v35  ;;  %6775 = vmatprep.subr.bf16.mxu1 %v9329_v30  ;;  %v9414_v35 = vld [vmem:[%s11439_s10 + $0x388] ss:$16 sps:$4 sm:$0xff]   ;;  %v9419_v30 = vld [vmem:[%s11439_s10 + $0x2e4] ss:$16 sps:$4 sm:$0xff]  }
 0x2bf   : > { %6622 = vmatpush1.bf16.msra.mxu0 %v9324_v31  ;;  %6776 = vmatpush1.bf16.msra.mxu1 %v9327_v53  ;;  %v9422_v31 = vld [vmem:[%s11439_s10 + $0x3ac] ss:$16 sps:$4 sm:$0xff]   ;;  %v9417_v53 = vld [vmem:[%s11439_s10 + $0x2e0] ss:$16 sps:$4 sm:$0xff]  }
 0x2c0   : > { %6623 = vmatprep.subr.bf16.mxu0 %v9332_v33  ;;  %6816 = vmatprep.subr.bf16.mxu1 %v9338_v37  ;;  %v9420_v33 = vld [vmem:[%s11439_s10 + $0x3a8] ss:$16 sps:$4 sm:$0xff]   ;;  %v9426_v37 = vld [vmem:[%s11439_s10 + $0x304] ss:$16 sps:$4 sm:$0xff]  }
 0x2c2   : > { %6778 = vmatmul.mubr.bf16.vlgmr.msra.gmra.mrb[152].mxu1 %v10985_v54 }
 0x2c3   : > { %6624 = vmatpush1.bf16.msra.mxu0 %v9330_v46  ;;  %6817 = vmatpush1.bf16.msra.mxu1 %v9336_v4  ;;  %v9424_v46 = vld [vmem:[%s11439_s10 + $0x300] ss:$16 sps:$4 sm:$0xff]   ;;  %v9428_v4 = vld [vmem:[%s11439_s10 + $0x3c8] ss:$16 sps:$4 sm:$0xff]  }
 0x2c4   : > { %6625 = vmatprep.subr.bf16.mxu0 %v9341_v51  ;;  %6818 = vmatprep.subr.bf16.mxu1 %v9344_v26  ;;  %v9433_v51 = vld [vmem:[%s11439_s10 + $0x324] ss:$16 sps:$4 sm:$0xff]   ;;  %v9436_v26 = vld [vmem:[%s11439_s10 + $0x3ec] ss:$16 sps:$4 sm:$0xff]  }
 0x2c5   : > { %6787 = vmatprep.mubr.bf16.mxu1 %v11000_v2 }
 0x2c7   : > { %6626 = vmatpush1.bf16.msra.mxu0 %v9339_v16  ;;  %6819 = vmatpush1.bf16.msra.mxu1 %v9342_v58  ;;  %v9434_v16 = vld [vmem:[%s11439_s10 + $0x3e8] ss:$16 sps:$4 sm:$0xff]   ;;  %v9442_v58 = vld [vmem:[%s11439_s10 + $0x344] ss:$16 sps:$4 sm:$0xff]  }
 0x2c8   : > { %6627 = vmatprep.subr.bf16.mxu0 %v9347_v57  ;;  %6820 = vmatprep.subr.bf16.mxu1 %v9350_v27  ;;  %v9437_v57 = vld [vmem:[%s10530_s23 + $0x8] ss:$16 sps:$4 sm:$0xff]   ;;  %v9440_v27 = vld [vmem:[%s11439_s10 + $0x340] ss:$16 sps:$4 sm:$0xff]  }
 0x2ca   : > { %6788 = vmatmul.mubr.bf16.gmra.mrb[156].mxu1 %v11017_v5 }
 0x2cb   : > { %6628 = vmatpush1.bf16.msra.mxu0 %v9345_v55  ;;  %6821 = vmatpush1.bf16.msra.mxu1 %v9348_v48  ;;  %v9445_v55 = vld [vmem:[%s11439_s10 + $0x364] ss:$16 sps:$4 sm:$0xff]   ;;  %v9443_v48 = vld [vmem:[%s11439_s10 + $0x360] ss:$16 sps:$4 sm:$0xff]  }
 0x2cc   : > { %6629 = vmatprep.subr.bf16.mxu0 %v9353_v1  ;;  %6822 = vmatprep.subr.bf16.mxu1 %v9356_v43  ;;  %v9450_v1 = vld [vmem:[%s11439_s10 + $0x384] ss:$16 sps:$4 sm:$0xff]   ;;  %v9451_v43 = vld [vmem:[%s10530_s23 + $0x28] ss:$16 sps:$4 sm:$0xff]  }
 0x2cd   : > { %6797 = vmatprep.mubr.bf16.mxu1 %v11032_v10 }
 0x2cf   : > { %6630 = vmatpush1.bf16.msra.mxu0 %v9351_v15  ;;  %6823 = vmatpush1.bf16.msra.mxu1 %v9354_v9  ;;  %v9455_v15 = vld [vmem:[%s10530_s23 + $0x4c] ss:$16 sps:$4 sm:$0xff]   ;;  %v9454_v9 = vld [vmem:[%s11439_s10 + $0x3a4] ss:$16 sps:$4 sm:$0xff]  }
 0x2d0   : > { %6631 = vmatprep.subr.bf16.mxu0 %v9359_v12  ;;  %6824 = vmatprep.subr.bf16.mxu1 %v9362_v40  ;;  %v9452_v12 = vld [vmem:[%s11439_s10 + $0x3a0] ss:$16 sps:$4 sm:$0xff]   ;;  %v9459_v40 = vld [vmem:[%s11439_s10 + $0x3c4] ss:$16 sps:$4 sm:$0xff]  }
 0x2d2   : > { %6798 = vmatmul.mubr.bf16.gmra.mrb[144].mxu1 %v11049_v19 }
 0x2d3   : > { %6632 = vmatpush1.bf16.msra.mxu0 %v9357_v49  ;;  %6825 = vmatpush1.bf16.msra.mxu1 %v9360_v11  ;;  %v9460_v11 = vld [vmem:[%s10530_s23 + $0x48] ss:$16 sps:$4 sm:$0xff]  }
 0x2d4   : > { %6633 = vmatprep.subr.bf16.mxu0 %v9365_v34  ;;  %6826 = vmatprep.subr.bf16.mxu1 %v9368_v36  ;;  %v9457_v36 = vld [vmem:[%s11439_s10 + $0x3c0] ss:$16 sps:$4 sm:$0xff]  }
 0x2d5   : > { %6807 = vmatprep.mubr.bf16.mxu1 %v11064_v20 }
 0x2d7   : > { %6634 = vmatpush1.bf16.msra.mxu0 %v9363_v41  ;;  %6827 = vmatpush1.bf16.msra.mxu1 %v9366_v52  ;;  %v9463_v52 = vld [vmem:[%s11439_s10 + $0x3e4] ss:$16 sps:$4 sm:$0xff]  }
 0x2d8   : > { %6674 = vmatprep.subr.bf16.mxu0 %v9371_v56  ;;  %6828 = vmatprep.subr.bf16.mxu1 %v9374_v63  ;;  %v9461_v56 = vld [vmem:[%s11439_s10 + $0x3e0] ss:$16 sps:$4 sm:$0xff]  }
 0x2da   : > { %6636 = vmatmul.mubr.bf16.vlgmr.msra.gmra.mrb[128].mxu0 %v10985_v54  ;;  %6808 = vmatmul.mubr.bf16.gmra.mrb[168].mxu1 %v11080_v0  ;;  %v9430_v54 = vld [vmem:[%s11439_s10 + $0x3cc] ss:$16 sps:$4 sm:$0xff]  }
 0x2db   : > { %6675 = vmatpush1.bf16.msra.mxu0 %v9369_v61  ;;  %6829 = vmatpush1.bf16.msra.mxu1 %v9372_v3 }
 0x2dc   : > { %6676 = vmatprep.subr.bf16.mxu0 %v9377_v8  ;;  %6830 = vmatprep.subr.bf16.mxu1 %v9380_v38 }
 0x2dd   : > { %6645 = vmatprep.mubr.bf16.mxu0 %v11000_v2  ;;  %6848 = vmatprep.mubr.bf16.mxu1 %v11095_v7  ;;  %v9431_v2 = vld [vmem:[%s11439_s10 + $0x320] ss:$16 sps:$4 sm:$0xff]  }
 0x2df   : > { %6677 = vmatpush1.bf16.msra.mxu0 %v9375_v21  ;;  %6831 = vmatpush1.bf16.msra.mxu1 %v9378_v60 }
 0x2e0   : > { %6678 = vmatprep.subr.bf16.mxu0 %v9383_v32  ;;  %6832 = vmatprep.subr.bf16.mxu1 %v9386_v39 }
 0x2e2   : > { %6646 = vmatmul.mubr.bf16.gmra.mrb[132].mxu0 %v11017_v5  ;;  %v9446_v5 = vld [vmem:[%s10530_s23 + $0x2c] ss:$16 sps:$4 sm:$0xff]  }
 0x2e3   : > { %6679 = vmatpush1.bf16.msra.mxu0 %v9381_v14  ;;  %6833 = vmatpush1.bf16.msra.mxu1 %v9384_v29 }
 0x2e4   : > { %6680 = vmatprep.subr.bf16.mxu0 %v9389_v62  ;;  %6834 = vmatprep.subr.bf16.mxu1 %v9392_v17 }
 0x2e5   : > { %6655 = vmatprep.mubr.bf16.mxu0 %v11032_v10  ;;  %v9448_v10 = vld [vmem:[%s11439_s10 + $0x380] ss:$16 sps:$4 sm:$0xff]  }
 0x2e7   : > { %6681 = vmatpush1.bf16.msra.mxu0 %v9387_v18  ;;  %6835 = vmatpush1.bf16.msra.mxu1 %v9390_v28 }
 0x2e8   : > { %6682 = vmatprep.subr.bf16.mxu0 %v9397_v59  ;;  %6836 = vmatprep.subr.bf16.mxu1 %v9401_v50 }
 0x2ea   : > { %6656 = vmatmul.mubr.bf16.gmra.mrb[136].mxu0 %v11049_v19  ;;  %v5760_v19 = vld [vmem:[%s10530_s23 + $0x68] sm:$0x11] }
 0x2eb   : > { %6683 = vmatpush1.bf16.msra.mxu0 %v9395_v6  ;;  %6837 = vmatpush1.bf16.msra.mxu1 %v9399_v22  ;;  %v7719_v61 = vcombine.low %v5760_v19, %v5760_v19 }
 0x2ec   : > { %6684 = vmatprep.subr.bf16.mxu0 %v9404_v13  ;;  %6838 = vmatprep.subr.bf16.mxu1 %v9407_v44 }
 0x2ed   : > { %6665 = vmatprep.mubr.bf16.mxu0 %v11064_v20  ;;  %v7720_v20 = vcombine.high %v5760_v19, %v5760_v19 }
 0x2ef   : > { %6685 = vmatpush1.bf16.msra.mxu0 %v9402_v42  ;;  %6839 = vmatpush1.bf16.msra.mxu1 %v9405_v23 }
 0x2f0   : > { %6686 = vmatprep.subr.bf16.mxu0 %v9412_v24  ;;  %6840 = vmatprep.subr.bf16.mxu1 %v9416_v45 }
 0x2f2   : > { %6666 = vmatmul.mubr.bf16.gmra.mrb[160].mxu0 %v11080_v0 }
 0x2f3   : > { %6687 = vmatpush1.bf16.msra.mxu0 %v9410_v25  ;;  %6841 = vmatpush1.bf16.msra.mxu1 %v9414_v35 }
 0x2f4   : > { %6688 = vmatprep.subr.bf16.mxu0 %v9419_v30  ;;  %6842 = vmatprep.subr.bf16.mxu1 %v9422_v31 }
 0x2f5   : > { %6706 = vmatprep.mubr.bf16.mxu0 %v11095_v7 }
 0x2f7   : > { %6689 = vmatpush1.bf16.msra.mxu0 %v9417_v53  ;;  %6843 = vmatpush1.bf16.msra.mxu1 %v9420_v33 }
 0x2f8   : > { %6690 = vmatprep.subr.bf16.mxu0 %v9426_v37  ;;  %6844 = vmatprep.subr.bf16.mxu1 %v9430_v54 }
 0x2fb   : > { %6691 = vmatpush1.bf16.msra.mxu0 %v9424_v46  ;;  %6845 = vmatpush1.bf16.msra.mxu1 %v9428_v4 }
 0x2fc   : > { %6692 = vmatprep.subr.bf16.mxu0 %v9433_v51  ;;  %6846 = vmatprep.subr.bf16.mxu1 %v9436_v26 }
 0x2ff   : > { %6693 = vmatpush1.bf16.msra.mxu0 %v9431_v2  ;;  %6847 = vmatpush1.bf16.msra.mxu1 %v9434_v16 }
 0x300   : > { %6694 = vmatprep.subr.bf16.mxu0 %v9442_v58 }
 0x302   : > { %6849 = vmatmul.mubr.bf16.vlgmr.msra.gmra.mrb[152].mxu1 %v9437_v57 }
 0x303   : > { %6695 = vmatpush1.bf16.msra.mxu0 %v9440_v27  ;;  %6858 = vmatprep.mubr.bf16.mxu1 %v9446_v5 }
 0x304   : > { %6696 = vmatprep.subr.bf16.mxu0 %v9445_v55 }
 0x307   : > { %6697 = vmatpush1.bf16.msra.mxu0 %v9443_v48 }
 0x308   : > { %6698 = vmatprep.subr.bf16.mxu0 %v9450_v1 }
 0x30a   : > { %6859 = vmatmul.mubr.bf16.gmra.mrb[156].mxu1 %v9451_v43 }
 0x30b   : > { %6699 = vmatpush1.bf16.msra.mxu0 %v9448_v10  ;;  %6868 = vmatprep.mubr.bf16.mxu1 %v9455_v15 }
 0x30c   : > { %6700 = vmatprep.subr.bf16.mxu0 %v9454_v9 }
 0x30d   : > { %v4944_v47 = vpop.f32.mrb[148].mxu1 }
 0x30e   : > { %v4946_v49 = vpop.f32.mrb[149].mxu1 }
 0x30f   : > { %6701 = vmatpush1.bf16.msra.mxu0 %v9452_v12  ;;  %v4948_v34 = vpop.f32.mrb[150].mxu1 }
 0x310   : > { %v4949_v41 = vpop.f32.mrb[151].mxu1  ;;  %6702 = vmatprep.subr.bf16.mxu0 %v9459_v40 }
 0x312   : > { %6869 = vmatmul.mubr.bf16.gmra.mrb[144].mxu1 %v9460_v11 }
 0x313   : > { %6703 = vmatpush1.bf16.msra.mxu0 %v9457_v36  ;;  %6878 = vmatprep.mubr.bf16.mxu1 %v7720_v20 }
 0x314   : > { %6704 = vmatprep.subr.bf16.mxu0 %v9463_v52 }
 0x315   : > { %v4873_v63 = vpop.f32.mrb[140].mxu0 }
 0x316   : > { %v4875_v0 = vpop.f32.mrb[141].mxu0 }
 0x317   : > { %6705 = vmatpush1.bf16.msra.mxu0 %v9461_v56  ;;  %v4877_v3 = vpop.f32.mrb[142].mxu0 }
 0x318   : > { %v4878_v8 = vpop.f32.mrb[143].mxu0 }
 0x31a   : > { %6707 = vmatmul.mubr.bf16.vlgmr.msra.gmra.mrb[128].mxu0 %v9437_v57  ;;  %6879 = vmatmul.mubr.bf16.gmra.mrb[172].mxu1 %v7719_v61 }
 0x31b   : > { %6716 = vmatprep.mubr.bf16.mxu0 %v9446_v5 }
 0x31d   : > { %v4914_v38 = vpop.f32.mrb[144].mxu0 }
 0x31e   : > { %v4916_v7 = vpop.f32.mrb[145].mxu0 }
 0x31f   : > { %v4918_v21 = vpop.f32.mrb[146].mxu0 }
 0x320   : > { %v4920_v60 = vpop.f32.mrb[147].mxu0 }
 0x322   : > { %6717 = vmatmul.mubr.bf16.gmra.mrb[132].mxu0 %v9451_v43 }
 0x323   : > { %6726 = vmatprep.mubr.bf16.mxu0 %v9455_v15 }
 0x325   : > { %v4924_v32 = vpop.f32.mrb[148].mxu0 }
 0x326   : > { %v4926_v39 = vpop.f32.mrb[149].mxu0 }
 0x327   : > { %v4928_v14 = vpop.f32.mrb[150].mxu0 }
 0x328   : > { %v4930_v29 = vpop.f32.mrb[151].mxu0 }
 0x32a   : > { %6727 = vmatmul.mubr.bf16.gmra.mrb[136].mxu0 %v9460_v11 }
 0x32b   : > { %6736 = vmatprep.mubr.bf16.mxu0 %v7720_v20 }
 0x32d   : > { %v5178_v62 = vpop.f32.mrb[160].mxu1 }
 0x32e   : > { %v5179_v17 = vadd.f32 %v5178_v62, %v4944_v47  ;;  %v5180_v18 = vpop.f32.mrb[161].mxu1  ;;  %v6965_v62 = vld [vmem:[%s11441_s12] sm:$0xff] }
 0x32f   : > { %v5181_v28 = vadd.f32 %v5180_v18, %v4946_v49  ;;  %v5182_v59 = vpop.f32.mrb[162].mxu1  ;;  %v6917_v49 = vlaneseq }
 0x330   : > { %v5183_v50 = vpop.f32.mrb[163].mxu1 }
 0x331   : > { %v6918_v52 = vshrl.u32 %v6917_v49, 7  ;;  %v6966_v50 = vld [vmem:[%s11441_s12 + $0x8] sm:$0xff] }
 0x332   : > { %6737 = vmatmul.mubr.bf16.gmra.mrb[164].mxu0 %v7719_v61 }
 0x333   : > { %v6927_v61 = vsub.s32 2, %v6918_v52  ;;  %v6923_v8 = vsub.s32 1, %v6918_v52 }
 0x345   : > { %v5107_v6 = vpop.f32.mrb[152].mxu0 }
 0x346   : > { %v5108_v22 = vadd.f32 %v5107_v6, %v4873_v63  ;;  %v5109_v13 = vpop.f32.mrb[153].mxu0 }
 0x347   : > { %v5110_v44 = vadd.f32 %v5109_v13, %v4875_v0  ;;  %v5111_v42 = vpop.f32.mrb[154].mxu0  ;;  %v6919_v0 = vsub.s32 0, %v6918_v52 }
 0x348   : > { %v5112_v23 = vpop.f32.mrb[155].mxu0 }
 0x36d   : > { %v5712_v24 = vpop.f32.mrb[164].mxu1 }
 0x36e   : > { %v11251_v45 = vadd.f32 %v5712_v24, %v5179_v17  ;;  %v5714_v25 = vpop.f32.mrb[165].mxu1  ;;  %v6967_v24 = vld [vmem:[%s11441_s12 + $0x10] sm:$0xff] }
 0x36f   : > { %v11253_v35 = vadd.f32 %v5714_v25, %v5181_v28  ;;  %v5716_v30 = vpop.f32.mrb[166].mxu1 }
 0x370   : > { %v5717_v31 = vpop.f32.mrb[167].mxu1 }
 0x385   : > { %v5641_v53 = vpop.f32.mrb[156].mxu0 }
 0x386   : > { %v11255_v33 = vadd.f32 %v5641_v53, %v5108_v22  ;;  %v5643_v37 = vpop.f32.mrb[157].mxu0 }
 0x387   : > { %v11257_v54 = vadd.f32 %v5643_v37, %v5110_v44  ;;  %v5645_v46 = vpop.f32.mrb[158].mxu0 }
 0x388   : > { %v5646_v4 = vpop.f32.mrb[159].mxu0 }
 0x3ad   : > { %v6809_v51 = vpop.f32.mrb[168].mxu1 }
 0x3ae   : > { %v6811_v26 = vpop.f32.mrb[169].mxu1 }
 0x3af   : > { %v6813_v2 = vpop.f32.mrb[170].mxu1 }
 0x3b0   : > { %v6814_v16 = vpop.f32.mrb[171].mxu1 }
 0x3c5   : > { %v11259_v58 = vpop.f32.mrb[160].mxu0 }
 0x3c6   : > { %v11261_v57 = vpop.f32.mrb[161].mxu0 }
 0x3c7   : > { %v6671_v27 = vpop.f32.mrb[162].mxu0 }
 0x3c8   : > { %v6672_v5 = vpop.f32.mrb[163].mxu0 }
 0x3d5   : > { %v6850_v55 = vpop.f32.mrb[152].mxu1 }
 0x3d6   : > { %v8506_v48 = vadd.f32 %v6850_v55, %v4914_v38  ;;  %v6852_v1 = vpop.f32.mrb[153].mxu1  ;;  %v6915_v38 = vld [vmem:[%s11440_s11] sm:$0xf] }
 0x3d7   : > { %v8507_v43 = vadd.f32 %v6852_v1, %v4916_v7  ;;  %v6854_v10 = vpop.f32.mrb[154].mxu1 }
 0x3d8   : > { %v8508_v15 = vadd.f32 %v6854_v10, %v4918_v21  ;;  %v6856_v9 = vpop.f32.mrb[155].mxu1  ;;  %v6931_v21 = vsub.s32 3, %v6918_v52 }
 0x3d9   : > { %v8509_v12 = vadd.f32 %v6856_v9, %v4920_v60  ;;  %v11282_v60 = vrot.slane %v6915_v38, %v6919_v0  ;;  %v6972_v0 = vld [vmem:[%s11441_s12 + $0x38] sm:$0xff] }
 0x3dd   : > { %v6860_v40 = vpop.f32.mrb[156].mxu1 }
 0x3de   : > { %v11263_v19 = vadd.f32 %v6860_v40, %v4924_v32  ;;  %v6862_v47 = vpop.f32.mrb[157].mxu1  ;;  %v11284_v32 = vrot.slane %v6915_v38, %v6927_v61 }
 0x3df   : > { %v11265_v11 = vadd.f32 %v6862_v47, %v4926_v39  ;;  %v6864_v34 = vpop.f32.mrb[158].mxu1  ;;  %v11286_v39 = vrot.slane %v6915_v38, %v6923_v8  ;;  %v6971_v47 = vld [vmem:[%s11441_s12 + $0x30] sm:$0xff] }
 0x3e0   : > { %v11267_v36 = vadd.f32 %v6864_v34, %v4928_v14  ;;  %v6866_v20 = vpop.f32.mrb[159].mxu1  ;;  %v11288_v14 = vrot.slane %v6915_v38, %v6931_v21  ;;  %v6939_v22 = vadd.f32 %v8506_v48, %v11284_v32  ;;  %v6973_v38 = vld [vmem:[%s11441_s12 + $0x40] sm:$0xff] }
 0x3e1   : > { %v11269_v41 = vadd.f32 %v6866_v20, %v4930_v29 }
 0x3e2   : > { %v6940_v37 = vadd.f32 %v8507_v43, %v11288_v14  ;;  %v6943_v43 = vadd.f32 %v8508_v15, %v11284_v32  ;;  %v6944_v34 = vadd.f32 %v8509_v12, %v11288_v14  ;;  %v6974_v12 = vld [vmem:[%s11441_s12 + $0x48] sm:$0xff] }
 0x3e4   : > { %v6999_v61 = vmul.f32 %v6971_v47, %v6943_v43  ;;  %v7000_v21 = vmul.f32 %v6972_v0, %v6944_v34 }
 0x3e5   : > { %v11271_v56 = vpop.f32.mrb[144].mxu1 }
 0x3e6   : > { %v11273_v63 = vpop.f32.mrb[145].mxu1 }
 0x3e7   : > { %v11275_v3 = vpop.f32.mrb[146].mxu1 }
 0x3e8   : > { %v11280_v7 = vpop.f32.mrb[147].mxu1 }
 0x3ed   : > { %v6708_v29 = vpop.f32.mrb[128].mxu0  ;;  %v6880_v17 = vpop.f32.mrb[172].mxu1 }
 0x3ee   : > { %v6937_v18 = vadd.f32 %v11282_v60, %v6708_v29  ;;  %v6881_v28 = vadd.f32 %v6880_v17, %v6809_v51  ;;  %v6710_v59 = vpop.f32.mrb[129].mxu0  ;;  %v6882_v6 = vpop.f32.mrb[173].mxu1  ;;  %v6968_v51 = vld [vmem:[%s11441_s12 + $0x18] sm:$0xff] }
 0x3ef   : > { %v6938_v13 = vadd.f32 %v11286_v39, %v6710_v59  ;;  %v6883_v44 = vadd.f32 %v6882_v6, %v6811_v26  ;;  %v6712_v42 = vpop.f32.mrb[130].mxu0  ;;  %v6884_v23 = vpop.f32.mrb[174].mxu1  ;;  %v6995_v26 = vmul.f32 %v6967_v24, %v6939_v22  ;;  %v6996_v27 = vmul.f32 %v6968_v51, %v6940_v37  ;;  %v6975_v22 = vld [vmem:[%s11441_s12 + $0x50] sm:$0xff]  ;;  %v6976_v24 = vld [vmem:[%s11441_s12 + $0x58] sm:$0xff] }
 0x3f0   : > { %v6993_v25 = vmul.f32 %v6965_v62, %v6937_v18  ;;  %v11303_v30 = vadd.f32 %v6881_v28, %v11251_v45  ;;  %v6714_v31 = vpop.f32.mrb[131].mxu0  ;;  %v6885_v53 = vpop.f32.mrb[175].mxu1  ;;  %v6941_v16 = vadd.f32 %v11282_v60, %v6712_v42  ;;  %v6969_v45 = vld [vmem:[%s11441_s12 + $0x20] sm:$0xff]  ;;  %v6947_v28 = vadd.f32 %v11263_v19, %v11284_v32 }
 0x3f1   : > { %v6994_v46 = vmul.f32 %v6966_v50, %v6938_v13  ;;  %v11307_v4 = vadd.f32 %v6883_v44, %v11253_v35  ;;  %v6942_v55 = vadd.f32 %v11286_v39, %v6714_v31  ;;  %v6970_v35 = vld [vmem:[%s11441_s12 + $0x28] sm:$0xff]  ;;  %v6948_v44 = vadd.f32 %v11265_v11, %v11288_v14  ;;  %v6977_v53 = vld [vmem:[%s11441_s12 + $0x60] sm:$0xff] }
 0x3f2   : > { %v6997_v10 = vmul.f32 %v6969_v45, %v6941_v16  ;;  %v6978_v11 = vld [vmem:[%s11441_s12 + $0x68] sm:$0xff]  ;;  %v6951_v45 = vadd.f32 %v11267_v36, %v11284_v32  ;;  %v6980_v36 = vld [vmem:[%s11441_s12 + $0x78] sm:$0xff] }
 0x3f3   : > { %v7021_v2 = vadd.f32 %v6994_v46, %v6993_v25  ;;  %v6998_v52 = vmul.f32 %v6970_v35, %v6942_v55  ;;  %v7003_v25 = vmul.f32 %v6975_v22, %v6947_v28  ;;  %v7004_v37 = vmul.f32 %v6976_v24, %v6948_v44  ;;  %v6979_v35 = vld [vmem:[%s11441_s12 + $0x70] sm:$0xff] }
 0x3f5   : > { %v7022_v5 = vadd.f32 %v7021_v2, %v6995_v26  ;;  %v6718_v48 = vpop.f32.mrb[132].mxu0 }
 0x3f6   : > { %v6720_v1 = vpop.f32.mrb[133].mxu0  ;;  %v6945_v15 = vadd.f32 %v11282_v60, %v6718_v48 }
 0x3f7   : > { %v7023_v9 = vadd.f32 %v7022_v5, %v6996_v27  ;;  %v6722_v40 = vpop.f32.mrb[134].mxu0  ;;  %v6946_v62 = vadd.f32 %v11286_v39, %v6720_v1 }
 0x3f8   : > { %v6724_v49 = vpop.f32.mrb[135].mxu0  ;;  %v7001_v59 = vmul.f32 %v6973_v38, %v6945_v15  ;;  %v6949_v19 = vadd.f32 %v11282_v60, %v6722_v40  ;;  %v6956_v15 = vadd.f32 %v11288_v14, %v11273_v63  ;;  %v6986_v63 = vld [vmem:[%s11441_s12 + $0xa8] sm:$0xff] }
 0x3f9   : > { %v7024_v20 = vadd.f32 %v7023_v9, %v6997_v10  ;;  %v7002_v23 = vmul.f32 %v6974_v12, %v6946_v62  ;;  %v6950_v51 = vadd.f32 %v11286_v39, %v6724_v49  ;;  %v6952_v10 = vadd.f32 %v11269_v41, %v11288_v14 }
 0x3fa   : > { %v7005_v27 = vmul.f32 %v6977_v53, %v6949_v19 }
 0x3fb   : > { %v7025_v8 = vadd.f32 %v7024_v20, %v6998_v52  ;;  %v7006_v9 = vmul.f32 %v6978_v11, %v6950_v51  ;;  %v7008_v34 = vmul.f32 %v6980_v36, %v6952_v10  ;;  %v6955_v52 = vadd.f32 %v11284_v32, %v11271_v56  ;;  %v6985_v56 = vld [vmem:[%s11441_s12 + $0xa0] sm:$0xff] }
 0x3fc   : > { %v6964_v11 = vadd.f32 %v11288_v14, %v11307_v4 }
 0x3fd   : > { %v7026_v29 = vadd.f32 %v7025_v8, %v6999_v61  ;;  %v6728_v17 = vpop.f32.mrb[136].mxu0  ;;  %v6983_v8 = vld [vmem:[%s11441_s12 + $0x90] sm:$0xff] }
 0x3fe   : > { %v6730_v18 = vpop.f32.mrb[137].mxu0  ;;  %v6953_v49 = vadd.f32 %v11282_v60, %v6728_v17  ;;  %v7011_v62 = vmul.f32 %v6983_v8, %v6955_v52 }
 0x3ff   : > { %v7027_v50 = vadd.f32 %v7026_v29, %v7000_v21  ;;  %v6732_v6 = vpop.f32.mrb[138].mxu0  ;;  %v6954_v41 = vadd.f32 %v11286_v39, %v6730_v18  ;;  %v6984_v29 = vld [vmem:[%s11441_s12 + $0x98] sm:$0xff] }
 0x400   : > { %v6734_v13 = vpop.f32.mrb[139].mxu0  ;;  %v6957_v12 = vadd.f32 %v11282_v60, %v6732_v6  ;;  %v7012_v18 = vmul.f32 %v6984_v29, %v6956_v15  ;;  %v6987_v6 = vld [vmem:[%s11441_s12 + $0xb0] sm:$0xff] }
 0x401   : > { %v7028_v42 = vadd.f32 %v7027_v50, %v7001_v59  ;;  %v6958_v59 = vadd.f32 %v11286_v39, %v6734_v13  ;;  %v6959_v50 = vadd.f32 %v11284_v32, %v11275_v3  ;;  %v6988_v3 = vld [vmem:[%s11441_s12 + $0xb8] sm:$0xff] }
 0x402   : > { %v7013_v22 = vmul.f32 %v6985_v56, %v6957_v12 }
 0x403   : > { %v7029_v31 = vadd.f32 %v7028_v42, %v7002_v23  ;;  %v6960_v23 = vadd.f32 %v11288_v14, %v11280_v7  ;;  %v7014_v13 = vmul.f32 %v6986_v63, %v6958_v59  ;;  %v7015_v19 = vmul.f32 %v6987_v6, %v6959_v50 }
 0x404   : > { %v6963_v7 = vadd.f32 %v11284_v32, %v11303_v30 }
 0x405   : > { %v7030_v46 = vadd.f32 %v7029_v31, %v7003_v25  ;;  %v6738_v26 = vpop.f32.mrb[164].mxu0  ;;  %v6989_v25 = vld [vmem:[%s11441_s12 + $0xc0] sm:$0x1] }
 0x406   : > { %v6739_v2 = vadd.f32 %v6738_v26, %v11259_v58  ;;  %v6740_v16 = vpop.f32.mrb[165].mxu0  ;;  %v6991_v26 = vld [vmem:[%s11441_s12 + $0xd0] sm:$0x1] }
 0x407   : > { %v7031_v5 = vadd.f32 %v7030_v46, %v7004_v37  ;;  %v6741_v55 = vadd.f32 %v6740_v16, %v11261_v57  ;;  %v6742_v48 = vpop.f32.mrb[166].mxu0  ;;  %v7007_v57 = vmul.f32 %v6979_v35, %v6951_v45  ;;  %v7016_v46 = vmul.f32 %v6988_v3, %v6960_v23 }
 0x408   : > { %v6911_v1 = vadd.f32 %v6739_v2, %v11255_v33  ;;  %v6743_v43 = vpop.f32.mrb[167].mxu0  ;;  %v6981_v33 = vld [vmem:[%s11441_s12 + $0x80] sm:$0xff]  ;;  %v6992_v2 = vld [vmem:[%s11441_s12 + $0xd8] sm:$0x1]  ;;  %v7019_v45 = vmul.f32 %v6991_v26, %v6963_v7 }
 0x409   : > { %v7032_v58 = vadd.f32 %v7031_v5, %v7005_v27  ;;  %v6912_v40 = vadd.f32 %v6741_v55, %v11257_v54  ;;  %v6982_v54 = vld [vmem:[%s11441_s12 + $0x88] sm:$0xff]  ;;  %v7009_v0 = vmul.f32 %v6981_v33, %v6953_v49  ;;  %v7020_v30 = vmul.f32 %v6992_v2, %v6964_v11 }
 0x40a   : > { %v7010_v21 = vmul.f32 %v6982_v54, %v6954_v41  ;;  %v6961_v42 = vadd.f32 %v11282_v60, %v6911_v1  ;;  %v6990_v60 = vld [vmem:[%s11441_s12 + $0xc8] sm:$0x1]  ;;  %v7049_v48 = vsel %vm7044_vm4, %v7019_v45, 0.0 }
 0x40b   : > { %v7033_v47 = vadd.f32 %v7032_v58, %v7006_v9  ;;  %v6962_v31 = vadd.f32 %v11286_v39, %v6912_v40  ;;  %v7051_v1 = vsel %vm7044_vm4, %v7020_v30, 0.0 }
 0x40c   : > { %v7017_v37 = vmul.f32 %v6989_v25, %v6961_v42 }
 0x40d   : > { %v7034_v20 = vadd.f32 %v7033_v47, %v7007_v57  ;;  %v7018_v39 = vmul.f32 %v6990_v60, %v6962_v31 }
 0x40e   : > { %v7045_v27 = vsel %vm7044_vm4, %v7017_v37, 0.0 }
 0x40f   : > { %v7035_v61 = vadd.f32 %v7034_v20, %v7008_v34  ;;  %v7047_v5 = vsel %vm7044_vm4, %v7018_v39, 0.0 }
 0x411   : > { %v7036_v38 = vadd.f32 %v7035_v61, %v7009_v0 }
 0x413   : > { %v7037_v17 = vadd.f32 %v7036_v38, %v7010_v21 }
 0x415   : > { %v7038_v28 = vadd.f32 %v7037_v17, %v7011_v62 }
 0x417   : > { %v7039_v44 = vadd.f32 %v7038_v28, %v7012_v18 }
 0x419   : > { %v7040_v24 = vadd.f32 %v7039_v44, %v7013_v22 }
 0x41b   : > { %v7041_v53 = vadd.f32 %v7040_v24, %v7014_v13 }
 0x41d   : > { %v7042_v51 = vadd.f32 %v7041_v53, %v7015_v19 }
 0x41f   : > { %v7043_v16 = vadd.f32 %v7042_v51, %v7016_v46 }
 0x421   : > { %v7046_v32 = vadd.f32 %v7045_v27, %v7043_v16 }
 0x423   : > { %v7048_v55 = vadd.f32 %v7047_v5, %v7046_v32 }
 0x425   : > { %v7050_v35 = vadd.f32 %v7049_v48, %v7048_v55 }
 0x427   : > { %v7052_v43 = vadd.f32 %v7051_v1, %v7050_v35 }
 0x429   : > { %7053 = vadd.xlane.f32.xlu0 %v7052_v43 }
 0x4b6   : > { %v7054_v14 = vpop.xlane.xlu0 %7053 }
 0x4b7   : > { %v7055_v4 = vrot.slane %v7054_v14, 4 }
 0x4b9   : > { %v7056_v10 = vadd.f32 %v7055_v4, %v7054_v14 }
 0x4bb   : > { %v7057_v58 = vrot.slane %v7056_v10, 2 }
 0x4bd   : > { %v7058_v9 = vadd.f32 %v7057_v58, %v7056_v10 }
 0x4bf   : > { %v7059_v40 = vrot.slane %v7058_v9, 1 }
 0x4c1   : > { %v7060_v36 = vadd.f32 %v7059_v40, %v7058_v9 }
 0x4c3   : > { %8606 = vpush %v7060_v36 }
 0x4f4   : > { %s8607_s23 = spop %8606 }
 0x4f5   : > { %s7063_s18 = sadd.f32 %s8607_s23, %s7062_s27 }
 0x4f7   : > { %v7064_v57 = vstv %s7063_s18 }
 0x4f8   : > { %7065 = vst [vmem:[%s526_s17] sm:$0xff] %v7064_v57 }
 0x4f9 PF: > { %s25_s15 = sadd.s32 1, %s9472_s15  }
 0x4fa   : > { %p22_p4 = scmp.ge.s32.totalorder %s25_s15, 4  }
 0x4fc   :  { %24 = sbr.rel (!%p22_p4) target bundleno = 2 (0x2), region = 115 }

</bundles_post_ra>
